<compile_context>
chip_gen: v7x
topology: tpu7x:2x2x1
jax: 0.10.0
libtpu: 0.0.40
codegen_flags: <defaults>
</compile_context>

<pallas_src>
import math

import jax
import jax.numpy as jnp
import numpy as np
from jax.experimental import pallas as pl
from jax.experimental.pallas import tpu as pltpu


def _make_residual_kernel(BN, H, W, C, K, approximate_gelu):
    pad = K // 2
    Hp = H + 2 * pad
    Wp = W + 2 * pad

    def kernel(x_ref, w_ref, scale_ref, shift_ref, o_ref, xpad_ref):
        # x_ref    : (BN, H, W, C)               input block (also the residual)
        # w_ref    : (K, K, C)                   depthwise conv weights
        # scale_ref: (1, C)                      folded BN scale = gamma/sqrt(var+eps)
        # shift_ref: (1, C)                      folded BN shift = beta - mean*scale
        # o_ref    : (BN, H, W, C)
        # xpad_ref : (BN, Hp, Wp, C) f32         VMEM scratch ("same"-padded copy)

        x = x_ref[...].astype(jnp.float32)

        # "same" padding built entirely in VMEM (never touches HBM).  Zero only
        # the halo strips; the interior is fully overwritten just below.
        if pad > 0:
            xpad_ref[:, :pad, :, :] = jnp.zeros((BN, pad, Wp, C), jnp.float32)
            xpad_ref[:, pad + H:, :, :] = jnp.zeros((BN, pad, Wp, C), jnp.float32)
            xpad_ref[:, pad:pad + H, :pad, :] = jnp.zeros((BN, H, pad, C), jnp.float32)
            xpad_ref[:, pad:pad + H, pad + W:, :] = jnp.zeros((BN, H, pad, C), jnp.float32)
        xpad_ref[:, pad:pad + H, pad:pad + W, :] = x

        xpad = xpad_ref[...]

        # Depthwise "same" conv.  The kw shift is a pltpu.roll along the
        # sublane (W) axis (XLU slot); remaining slices start at 0 (aligned)
        # or index the outer H axis, so no misaligned window reads remain.
        # roll follows np.roll semantics: result[j] = x[(j - shift) mod Wp],
        # so shift = Wp - kw gives result[j] = x[j + kw] for j < W (no wrap).
        # TODO(synk): bf16 taps (half VALU work / scratch bytes) when the
        # surrounding model is bf16 on v6e/v7x; keep f32 on v5e (no bf16 VALU).
        acc = jnp.zeros((BN, H, W, C), jnp.float32)
        for kw in range(K):
            shifted = xpad if kw == 0 else pltpu.roll(xpad, shift=Wp - kw, axis=2)
            cols = shifted[:, :, :W, :]                     # (BN, Hp, W, C)
            for kh in range(K):
                acc = acc + cols[:, kh:kh + H, :, :] * w_ref[kh, kw, :].astype(jnp.float32)

        if approximate_gelu:
            # tanh form -> EUP slot (default: this kernel is VALU-bound).
            c0 = math.sqrt(2.0 / math.pi)
            y = 0.5 * acc * (1.0 + jnp.tanh(c0 * (acc + 0.044715 * acc * acc * acc)))
        else:
            # Exact erf GELU (matches torch.nn.GELU() numerics), opt-in.
            y = 0.5 * acc * (1.0 + jax.lax.erf(acc * (1.0 / math.sqrt(2.0))))

        # Folded BatchNorm (inference) + residual add (reuses the VMEM block).
        y = y * scale_ref[0].astype(jnp.float32) + shift_ref[0].astype(jnp.float32)
        o_ref[...] = (y + x).astype(o_ref.dtype)

    return kernel


def _choose_block_batch(N, H, W, C, pad, itemsize):
    """Pick images-per-step from a per-step VMEM budget (instead of a fixed rule)."""
    img_in = H * W * C * itemsize
    img_pad = (H + 2 * pad) * (W + 2 * pad) * C * 4      # f32 padded scratch
    per_img = 4 * img_in + img_pad                       # 2x in + 2x out double buffers + scratch
    budget = 12 << 20                                    # headroom under the 16 MiB v5e scoped limit
    target_in = 4 << 20                                  # ~4 MiB of input per step
    bn = 1
    for cand in range(1, N + 1):
        if N % cand:
            continue
        if cand * per_img > budget:
            break
        if N >= 2 and N // cand < 2:
            break                                        # keep >= 2 steps so v7x's 2 TCs both get work
        bn = cand
        if cand * img_in >= target_in:
            break
    return bn, per_img


def residual_convmixer_block_nhwc(x_nhwc, w_hwc, scale, shift, *,
                                  approximate_gelu=True):
    """Fused BN(GELU(dwconv(x))) + x on NHWC activations (recommended path).

    x_nhwc: (N, H, W, C);  w_hwc: (K, K, C);  scale/shift: (1, C) folded BN.
    """
    N, H, W, C = x_nhwc.shape
    K = w_hwc.shape[0]
    pad = K // 2

    # TODO(synk): add an H-tile (K//2 halo) grid axis for very large H*W*C
    # images so per-step blocks stay a few MiB against v7x's 64 MiB VMEM.
    # TODO(synk): for models with C < 128, fold W into the lane axis in this
    # wrapper so vector ops and stores stay lane-dense (unmasked vst).
    bn, per_img = _choose_block_batch(N, H, W, C, pad, x_nhwc.dtype.itemsize)
    grid = (N // bn,)

    params_bytes = 2 * (K * K * C * 4 + 2 * C * 4)       # double-buffered weights + folded BN
    vmem_needed = bn * per_img + params_bytes
    vmem_limit = int(min(max(int(vmem_needed * 1.25), 16 << 20), 40 << 20))

    kernel = _make_residual_kernel(bn, H, W, C, K, approximate_gelu)

    return pl.pallas_call(
        kernel,
        out_shape=jax.ShapeDtypeStruct((N, H, W, C), x_nhwc.dtype),
        grid_spec=pltpu.PrefetchScalarGridSpec(
            num_scalar_prefetch=0,
            grid=grid,
            in_specs=[
                pl.BlockSpec((bn, H, W, C), lambda n: (n, 0, 0, 0)),
                pl.BlockSpec((K, K, C), lambda n: (0, 0, 0)),
                pl.BlockSpec((1, C), lambda n: (0, 0)),
                pl.BlockSpec((1, C), lambda n: (0, 0)),
            ],
            out_specs=pl.BlockSpec((bn, H, W, C), lambda n: (n, 0, 0, 0)),
            scratch_shapes=[
                pltpu.VMEM((bn, H + 2 * pad, W + 2 * pad, C), jnp.float32),
            ],
        ),
        compiler_params=pltpu.CompilerParams(
            dimension_semantics=("parallel",),
            vmem_limit_bytes=vmem_limit),
    )(x_nhwc, w_hwc, scale, shift)


def residual_convmixer_block(x_nchw, dw_weight, gamma, beta, run_mean, run_var,
                             eps=1e-5, approximate_gelu=True):
    """PyTorch-layout wrapper: x_nchw (N, C, H, W), dw_weight (C, 1, K, K).

    The two transposes are layout glue for the NCHW interface only; an NHWC
    end-to-end model should call `residual_convmixer_block_nhwc` directly.
    """
    N, C, H, W = x_nchw.shape
    x = jnp.transpose(x_nchw, (0, 2, 3, 1))                    # NHWC
    w_hwc = jnp.transpose(dw_weight[:, 0, :, :], (1, 2, 0))    # (K, K, C)
    inv_std = gamma / jnp.sqrt(run_var + eps)
    scale = inv_std.reshape(1, C)
    shift = (beta - run_mean * inv_std).reshape(1, C)
    out = residual_convmixer_block_nhwc(x, w_hwc, scale, shift,
                                        approximate_gelu=approximate_gelu)
    return jnp.transpose(out, (0, 3, 1, 2))                    # back to NCHW


def _reference(x_nchw, dw_weight, gamma, beta, run_mean, run_var, eps=1e-5,
               approximate_gelu=True):
    """Pure-JAX reference of fn(x) + x for verification."""
    N, C, H, W = x_nchw.shape
    y = jax.lax.conv_general_dilated(
        x_nchw, dw_weight, window_strides=(1, 1), padding="SAME",
        dimension_numbers=("NCHW", "OIHW", "NCHW"), feature_group_count=C)
    if approximate_gelu:
        c0 = math.sqrt(2.0 / math.pi)
        y = 0.5 * y * (1.0 + jnp.tanh(c0 * (y + 0.044715 * y * y * y)))
    else:
        y = 0.5 * y * (1.0 + jax.lax.erf(y / math.sqrt(2.0)))
    inv_std = gamma / jnp.sqrt(run_var + eps)
    scale = inv_std.reshape(1, C, 1, 1)
    shift = (beta - run_mean * inv_std).reshape(1, C, 1, 1)
    return y * scale + shift + x_nchw


if __name__ == "__main__":
    key = jax.random.PRNGKey(0)
    k_x, k_w, k_g, k_b, k_m, k_v = jax.random.split(key, 6)

    # C=128 keeps the channel (lane) axis dense; K=5 matches ConvMixer-cifar.
    N, C, H, W, K = 2, 128, 16, 16, 5
    x = jax.random.normal(k_x, (N, C, H, W), jnp.float32)
    dw_weight = jax.random.normal(k_w, (C, 1, K, K), jnp.float32) * 0.1
    gamma = 1.0 + 0.1 * jax.random.normal(k_g, (C,), jnp.float32)
    beta = 0.1 * jax.random.normal(k_b, (C,), jnp.float32)
    run_mean = 0.1 * jax.random.normal(k_m, (C,), jnp.float32)
    run_var = jnp.abs(jax.random.normal(k_v, (C,), jnp.float32)) + 0.5

    # Default perf path: tanh (EUP) GELU.
    out = jax.block_until_ready(
        residual_convmixer_block(x, dw_weight, gamma, beta, run_mean, run_var))
    ref = _reference(x, dw_weight, gamma, beta, run_mean, run_var,
                     approximate_gelu=True)
    np.testing.assert_allclose(np.asarray(out), np.asarray(ref),
                               rtol=1e-4, atol=1e-4)

    # Opt-in exact-erf path (matches torch.nn.GELU() numerics).
    out_exact = jax.block_until_ready(
        residual_convmixer_block(x, dw_weight, gamma, beta, run_mean, run_var,
                                 approximate_gelu=False))
    ref_exact = _reference(x, dw_weight, gamma, beta, run_mean, run_var,
                           approximate_gelu=False)
    np.testing.assert_allclose(np.asarray(out_exact), np.asarray(ref_exact),
                               rtol=1e-4, atol=1e-4)

    print("KERNEL_OK")
</pallas_src>

<mosaic_0001>
module attributes {stable_mosaic.version = 11 : i64} {
  func.func @kernel(%arg0: i32, %arg1: memref<1x16x16x128xf32, #tpu.memory_space<vmem>>, %arg2: memref<5x5x128xf32, #tpu.memory_space<vmem>>, %arg3: memref<1x128xf32, #tpu.memory_space<vmem>>, %arg4: memref<1x128xf32, #tpu.memory_space<vmem>>, %arg5: memref<1x16x16x128xf32, #tpu.memory_space<vmem>>, %arg6: memref<1x20x20x128xf32, #tpu.memory_space<vmem>>) attributes {dimension_semantics = [#tpu.dimension_semantics<parallel>], iteration_bounds = array<i64: 2>, scalar_prefetch = 0 : i64, scratch_operands = 1 : i64, tpu.core_type = #tpu.core_type<tc>, window_params = [{transform_indices = @transform_0, window_bounds = array<i64: 1, 16, 16, 128>}, {pipeline_mode = #tpu.pipeline_mode<synchronous>, transform_indices = @transform_1, window_bounds = array<i64: 5, 5, 128>}, {pipeline_mode = #tpu.pipeline_mode<synchronous>, transform_indices = @transform_2, window_bounds = array<i64: 1, 128>}, {pipeline_mode = #tpu.pipeline_mode<synchronous>, transform_indices = @transform_3, window_bounds = array<i64: 1, 128>}, {transform_indices = @transform_4, window_bounds = array<i64: 1, 16, 16, 128>}]} {
    %c0 = arith.constant 0 : index
    %c0_0 = arith.constant 0 : index
    %c0_1 = arith.constant 0 : index
    %c0_2 = arith.constant 0 : index
    %0 = vector.load %arg1[%c0, %c0_0, %c0_1, %c0_2] : memref<1x16x16x128xf32, #tpu.memory_space<vmem>>, vector<1x16x16x128xf32>
    %cst = arith.constant 0.000000e+00 : f32
    %1 = vector.broadcast %cst : f32 to vector<1x2x20x128xf32>
    %c0_3 = arith.constant 0 : index
    %c0_4 = arith.constant 0 : index
    %c0_5 = arith.constant 0 : index
    %c0_6 = arith.constant 0 : index
    %2 = vector.load %arg6[%c0_3, %c0_4, %c0_5, %c0_6] : memref<1x20x20x128xf32, #tpu.memory_space<vmem>>, vector<1x2x20x128xf32>
    tpu.vector_store %arg6[%c0_3, %c0_4, %c0_5, %c0_6], %1 {strides = array<i32>} : memref<1x20x20x128xf32, #tpu.memory_space<vmem>>, vector<1x2x20x128xf32>,
    %cst_7 = arith.constant 0.000000e+00 : f32
    %3 = vector.broadcast %cst_7 : f32 to vector<1x2x20x128xf32>
    %c0_8 = arith.constant 0 : index
    %c18 = arith.constant 18 : index
    %c0_9 = arith.constant 0 : index
    %c0_10 = arith.constant 0 : index
    %4 = vector.load %arg6[%c0_8, %c18, %c0_9, %c0_10] : memref<1x20x20x128xf32, #tpu.memory_space<vmem>>, vector<1x2x20x128xf32>
    tpu.vector_store %arg6[%c0_8, %c18, %c0_9, %c0_10], %3 {strides = array<i32>} : memref<1x20x20x128xf32, #tpu.memory_space<vmem>>, vector<1x2x20x128xf32>,
    %cst_11 = arith.constant 0.000000e+00 : f32
    %5 = vector.broadcast %cst_11 : f32 to vector<1x16x2x128xf32>
    %c0_12 = arith.constant 0 : index
    %c2 = arith.constant 2 : index
    %c0_13 = arith.constant 0 : index
    %c0_14 = arith.constant 0 : index
    %6 = vector.load %arg6[%c0_12, %c2, %c0_13, %c0_14] : memref<1x20x20x128xf32, #tpu.memory_space<vmem>>, vector<1x16x2x128xf32>
    tpu.vector_store %arg6[%c0_12, %c2, %c0_13, %c0_14], %5 {strides = array<i32>} : memref<1x20x20x128xf32, #tpu.memory_space<vmem>>, vector<1x16x2x128xf32>,
    %cst_15 = arith.constant 0.000000e+00 : f32
    %7 = vector.broadcast %cst_15 : f32 to vector<1x16x2x128xf32>
    %c0_16 = arith.constant 0 : index
    %c2_17 = arith.constant 2 : index
    %c18_18 = arith.constant 18 : index
    %c0_19 = arith.constant 0 : index
    %8 = vector.load %arg6[%c0_16, %c2_17, %c18_18, %c0_19] : memref<1x20x20x128xf32, #tpu.memory_space<vmem>>, vector<1x16x2x128xf32>
    tpu.vector_store %arg6[%c0_16, %c2_17, %c18_18, %c0_19], %7 {strides = array<i32>} : memref<1x20x20x128xf32, #tpu.memory_space<vmem>>, vector<1x16x2x128xf32>,
    %c0_20 = arith.constant 0 : index
    %c2_21 = arith.constant 2 : index
    %c2_22 = arith.constant 2 : index
    %c0_23 = arith.constant 0 : index
    %9 = vector.load %arg6[%c0_20, %c2_21, %c2_22, %c0_23] : memref<1x20x20x128xf32, #tpu.memory_space<vmem>>, vector<1x16x16x128xf32>
    tpu.vector_store %arg6[%c0_20, %c2_21, %c2_22, %c0_23], %0 {strides = array<i32>} : memref<1x20x20x128xf32, #tpu.memory_space<vmem>>, vector<1x16x16x128xf32>,
    %c0_24 = arith.constant 0 : index
    %c0_25 = arith.constant 0 : index
    %c0_26 = arith.constant 0 : index
    %c0_27 = arith.constant 0 : index
    %10 = vector.load %arg6[%c0_24, %c0_25, %c0_26, %c0_27] : memref<1x20x20x128xf32, #tpu.memory_space<vmem>>, vector<1x20x20x128xf32>
    %cst_28 = arith.constant 0.000000e+00 : f32
    %11 = vector.broadcast %cst_28 : f32 to vector<1x16x16x128xf32>
    %12 = vector.extract_strided_slice %10 {offsets = [0, 0, 0, 0], sizes = [1, 20, 16, 128], strides = [1, 1, 1, 1]} : vector<1x20x20x128xf32> to vector<1x20x16x128xf32>
    %13 = vector.extract_strided_slice %12 {offsets = [0, 0, 0, 0], sizes = [1, 16, 16, 128], strides = [1, 1, 1, 1]} : vector<1x20x16x128xf32> to vector<1x16x16x128xf32>
    %c0_29 = arith.constant 0 : index
    %c0_30 = arith.constant 0 : index
    %c0_31 = arith.constant 0 : index
    %14 = vector.load %arg2[%c0_29, %c0_30, %c0_31] : memref<5x5x128xf32, #tpu.memory_space<vmem>>, vector<1x1x128xf32>
    %15 = vector.shape_cast %14 : vector<1x1x128xf32> to vector<128xf32>
    %16 = vector.shape_cast %15 : vector<128xf32> to vector<1x1x1x128xf32>
    %17 = vector.broadcast %16 : vector<1x1x1x128xf32> to vector<1x16x16x128xf32>
    %18 = arith.mulf %13, %17 : vector<1x16x16x128xf32>
    %19 = arith.addf %11, %18 : vector<1x16x16x128xf32>
    %20 = vector.extract_strided_slice %12 {offsets = [0, 1, 0, 0], sizes = [1, 16, 16, 128], strides = [1, 1, 1, 1]} : vector<1x20x16x128xf32> to vector<1x16x16x128xf32>
    %c1 = arith.constant 1 : index
    %c0_32 = arith.constant 0 : index
    %c0_33 = arith.constant 0 : index
    %21 = vector.load %arg2[%c1, %c0_32, %c0_33] : memref<5x5x128xf32, #tpu.memory_space<vmem>>, vector<1x1x128xf32>
    %22 = vector.shape_cast %21 : vector<1x1x128xf32> to vector<128xf32>
    %23 = vector.shape_cast %22 : vector<128xf32> to vector<1x1x1x128xf32>
    %24 = vector.broadcast %23 : vector<1x1x1x128xf32> to vector<1x16x16x128xf32>
    %25 = arith.mulf %20, %24 : vector<1x16x16x128xf32>
    %26 = arith.addf %19, %25 : vector<1x16x16x128xf32>
    %27 = vector.extract_strided_slice %12 {offsets = [0, 2, 0, 0], sizes = [1, 16, 16, 128], strides = [1, 1, 1, 1]} : vector<1x20x16x128xf32> to vector<1x16x16x128xf32>
    %c2_34 = arith.constant 2 : index
    %c0_35 = arith.constant 0 : index
    %c0_36 = arith.constant 0 : index
    %28 = vector.load %arg2[%c2_34, %c0_35, %c0_36] : memref<5x5x128xf32, #tpu.memory_space<vmem>>, vector<1x1x128xf32>
    %29 = vector.shape_cast %28 : vector<1x1x128xf32> to vector<128xf32>
    %30 = vector.shape_cast %29 : vector<128xf32> to vector<1x1x1x128xf32>
    %31 = vector.broadcast %30 : vector<1x1x1x128xf32> to vector<1x16x16x128xf32>
    %32 = arith.mulf %27, %31 : vector<1x16x16x128xf32>
    %33 = arith.addf %26, %32 : vector<1x16x16x128xf32>
    %34 = vector.extract_strided_slice %12 {offsets = [0, 3, 0, 0], sizes = [1, 16, 16, 128], strides = [1, 1, 1, 1]} : vector<1x20x16x128xf32> to vector<1x16x16x128xf32>
    %c3 = arith.constant 3 : index
    %c0_37 = arith.constant 0 : index
    %c0_38 = arith.constant 0 : index
    %35 = vector.load %arg2[%c3, %c0_37, %c0_38] : memref<5x5x128xf32, #tpu.memory_space<vmem>>, vector<1x1x128xf32>
    %36 = vector.shape_cast %35 : vector<1x1x128xf32> to vector<128xf32>
    %37 = vector.shape_cast %36 : vector<128xf32> to vector<1x1x1x128xf32>
    %38 = vector.broadcast %37 : vector<1x1x1x128xf32> to vector<1x16x16x128xf32>
    %39 = arith.mulf %34, %38 : vector<1x16x16x128xf32>
    %40 = arith.addf %33, %39 : vector<1x16x16x128xf32>
    %41 = vector.extract_strided_slice %12 {offsets = [0, 4, 0, 0], sizes = [1, 16, 16, 128], strides = [1, 1, 1, 1]} : vector<1x20x16x128xf32> to vector<1x16x16x128xf32>
    %c4 = arith.constant 4 : index
    %c0_39 = arith.constant 0 : index
    %c0_40 = arith.constant 0 : index
    %42 = vector.load %arg2[%c4, %c0_39, %c0_40] : memref<5x5x128xf32, #tpu.memory_space<vmem>>, vector<1x1x128xf32>
    %43 = vector.shape_cast %42 : vector<1x1x128xf32> to vector<128xf32>
    %44 = vector.shape_cast %43 : vector<128xf32> to vector<1x1x1x128xf32>
    %45 = vector.broadcast %44 : vector<1x1x1x128xf32> to vector<1x16x16x128xf32>
    %46 = arith.mulf %41, %45 : vector<1x16x16x128xf32>
    %47 = arith.addf %40, %46 : vector<1x16x16x128xf32>
    %c19_i32 = arith.constant 19 : i32
    %48 = tpu.dynamic_rotate %10 by %c19_i32 dim 2 : vector<1x20x20x128xf32>, i32 -> vector<1x20x20x128xf32>
    %49 = vector.extract_strided_slice %48 {offsets = [0, 0, 0, 0], sizes = [1, 20, 16, 128], strides = [1, 1, 1, 1]} : vector<1x20x20x128xf32> to vector<1x20x16x128xf32>
    %50 = vector.extract_strided_slice %49 {offsets = [0, 0, 0, 0], sizes = [1, 16, 16, 128], strides = [1, 1, 1, 1]} : vector<1x20x16x128xf32> to vector<1x16x16x128xf32>
    %c0_41 = arith.constant 0 : index
    %c1_42 = arith.constant 1 : index
    %c0_43 = arith.constant 0 : index
    %51 = vector.load %arg2[%c0_41, %c1_42, %c0_43] : memref<5x5x128xf32, #tpu.memory_space<vmem>>, vector<1x1x128xf32>
    %52 = vector.shape_cast %51 : vector<1x1x128xf32> to vector<128xf32>
    %53 = vector.shape_cast %52 : vector<128xf32> to vector<1x1x1x128xf32>
    %54 = vector.broadcast %53 : vector<1x1x1x128xf32> to vector<1x16x16x128xf32>
    %55 = arith.mulf %50, %54 : vector<1x16x16x128xf32>
    %56 = arith.addf %47, %55 : vector<1x16x16x128xf32>
    %57 = vector.extract_strided_slice %49 {offsets = [0, 1, 0, 0], sizes = [1, 16, 16, 128], strides = [1, 1, 1, 1]} : vector<1x20x16x128xf32> to vector<1x16x16x128xf32>
    %c1_44 = arith.constant 1 : index
    %c1_45 = arith.constant 1 : index
    %c0_46 = arith.constant 0 : index
    %58 = vector.load %arg2[%c1_44, %c1_45, %c0_46] : memref<5x5x128xf32, #tpu.memory_space<vmem>>, vector<1x1x128xf32>
    %59 = vector.shape_cast %58 : vector<1x1x128xf32> to vector<128xf32>
    %60 = vector.shape_cast %59 : vector<128xf32> to vector<1x1x1x128xf32>
    %61 = vector.broadcast %60 : vector<1x1x1x128xf32> to vector<1x16x16x128xf32>
    %62 = arith.mulf %57, %61 : vector<1x16x16x128xf32>
    %63 = arith.addf %56, %62 : vector<1x16x16x128xf32>
    %64 = vector.extract_strided_slice %49 {offsets = [0, 2, 0, 0], sizes = [1, 16, 16, 128], strides = [1, 1, 1, 1]} : vector<1x20x16x128xf32> to vector<1x16x16x128xf32>
    %c2_47 = arith.constant 2 : index
    %c1_48 = arith.constant 1 : index
    %c0_49 = arith.constant 0 : index
    %65 = vector.load %arg2[%c2_47, %c1_48, %c0_49] : memref<5x5x128xf32, #tpu.memory_space<vmem>>, vector<1x1x128xf32>
    %66 = vector.shape_cast %65 : vector<1x1x128xf32> to vector<128xf32>
    %67 = vector.shape_cast %66 : vector<128xf32> to vector<1x1x1x128xf32>
    %68 = vector.broadcast %67 : vector<1x1x1x128xf32> to vector<1x16x16x128xf32>
    %69 = arith.mulf %64, %68 : vector<1x16x16x128xf32>
    %70 = arith.addf %63, %69 : vector<1x16x16x128xf32>
    %71 = vector.extract_strided_slice %49 {offsets = [0, 3, 0, 0], sizes = [1, 16, 16, 128], strides = [1, 1, 1, 1]} : vector<1x20x16x128xf32> to vector<1x16x16x128xf32>
    %c3_50 = arith.constant 3 : index
    %c1_51 = arith.constant 1 : index
    %c0_52 = arith.constant 0 : index
    %72 = vector.load %arg2[%c3_50, %c1_51, %c0_52] : memref<5x5x128xf32, #tpu.memory_space<vmem>>, vector<1x1x128xf32>
    %73 = vector.shape_cast %72 : vector<1x1x128xf32> to vector<128xf32>
    %74 = vector.shape_cast %73 : vector<128xf32> to vector<1x1x1x128xf32>
    %75 = vector.broadcast %74 : vector<1x1x1x128xf32> to vector<1x16x16x128xf32>
    %76 = arith.mulf %71, %75 : vector<1x16x16x128xf32>
    %77 = arith.addf %70, %76 : vector<1x16x16x128xf32>
    %78 = vector.extract_strided_slice %49 {offsets = [0, 4, 0, 0], sizes = [1, 16, 16, 128], strides = [1, 1, 1, 1]} : vector<1x20x16x128xf32> to vector<1x16x16x128xf32>
    %c4_53 = arith.constant 4 : index
    %c1_54 = arith.constant 1 : index
    %c0_55 = arith.constant 0 : index
    %79 = vector.load %arg2[%c4_53, %c1_54, %c0_55] : memref<5x5x128xf32, #tpu.memory_space<vmem>>, vector<1x1x128xf32>
    %80 = vector.shape_cast %79 : vector<1x1x128xf32> to vector<128xf32>
    %81 = vector.shape_cast %80 : vector<128xf32> to vector<1x1x1x128xf32>
    %82 = vector.broadcast %81 : vector<1x1x1x128xf32> to vector<1x16x16x128xf32>
    %83 = arith.mulf %78, %82 : vector<1x16x16x128xf32>
    %84 = arith.addf %77, %83 : vector<1x16x16x128xf32>
    %c18_i32 = arith.constant 18 : i32
    %85 = tpu.dynamic_rotate %10 by %c18_i32 dim 2 : vector<1x20x20x128xf32>, i32 -> vector<1x20x20x128xf32>
    %86 = vector.extract_strided_slice %85 {offsets = [0, 0, 0, 0], sizes = [1, 20, 16, 128], strides = [1, 1, 1, 1]} : vector<1x20x20x128xf32> to vector<1x20x16x128xf32>
    %87 = vector.extract_strided_slice %86 {offsets = [0, 0, 0, 0], sizes = [1, 16, 16, 128], strides = [1, 1, 1, 1]} : vector<1x20x16x128xf32> to vector<1x16x16x128xf32>
    %c0_56 = arith.constant 0 : index
    %c2_57 = arith.constant 2 : index
    %c0_58 = arith.constant 0 : index
    %88 = vector.load %arg2[%c0_56, %c2_57, %c0_58] : memref<5x5x128xf32, #tpu.memory_space<vmem>>, vector<1x1x128xf32>
    %89 = vector.shape_cast %88 : vector<1x1x128xf32> to vector<128xf32>
    %90 = vector.shape_cast %89 : vector<128xf32> to vector<1x1x1x128xf32>
    %91 = vector.broadcast %90 : vector<1x1x1x128xf32> to vector<1x16x16x128xf32>
    %92 = arith.mulf %87, %91 : vector<1x16x16x128xf32>
    %93 = arith.addf %84, %92 : vector<1x16x16x128xf32>
    %94 = vector.extract_strided_slice %86 {offsets = [0, 1, 0, 0], sizes = [1, 16, 16, 128], strides = [1, 1, 1, 1]} : vector<1x20x16x128xf32> to vector<1x16x16x128xf32>
    %c1_59 = arith.constant 1 : index
    %c2_60 = arith.constant 2 : index
    %c0_61 = arith.constant 0 : index
    %95 = vector.load %arg2[%c1_59, %c2_60, %c0_61] : memref<5x5x128xf32, #tpu.memory_space<vmem>>, vector<1x1x128xf32>
    %96 = vector.shape_cast %95 : vector<1x1x128xf32> to vector<128xf32>
    %97 = vector.shape_cast %96 : vector<128xf32> to vector<1x1x1x128xf32>
    %98 = vector.broadcast %97 : vector<1x1x1x128xf32> to vector<1x16x16x128xf32>
    %99 = arith.mulf %94, %98 : vector<1x16x16x128xf32>
    %100 = arith.addf %93, %99 : vector<1x16x16x128xf32>
    %101 = vector.extract_strided_slice %86 {offsets = [0, 2, 0, 0], sizes = [1, 16, 16, 128], strides = [1, 1, 1, 1]} : vector<1x20x16x128xf32> to vector<1x16x16x128xf32>
    %c2_62 = arith.constant 2 : index
    %c2_63 = arith.constant 2 : index
    %c0_64 = arith.constant 0 : index
    %102 = vector.load %arg2[%c2_62, %c2_63, %c0_64] : memref<5x5x128xf32, #tpu.memory_space<vmem>>, vector<1x1x128xf32>
    %103 = vector.shape_cast %102 : vector<1x1x128xf32> to vector<128xf32>
    %104 = vector.shape_cast %103 : vector<128xf32> to vector<1x1x1x128xf32>
    %105 = vector.broadcast %104 : vector<1x1x1x128xf32> to vector<1x16x16x128xf32>
    %106 = arith.mulf %101, %105 : vector<1x16x16x128xf32>
    %107 = arith.addf %100, %106 : vector<1x16x16x128xf32>
    %108 = vector.extract_strided_slice %86 {offsets = [0, 3, 0, 0], sizes = [1, 16, 16, 128], strides = [1, 1, 1, 1]} : vector<1x20x16x128xf32> to vector<1x16x16x128xf32>
    %c3_65 = arith.constant 3 : index
    %c2_66 = arith.constant 2 : index
    %c0_67 = arith.constant 0 : index
    %109 = vector.load %arg2[%c3_65, %c2_66, %c0_67] : memref<5x5x128xf32, #tpu.memory_space<vmem>>, vector<1x1x128xf32>
    %110 = vector.shape_cast %109 : vector<1x1x128xf32> to vector<128xf32>
    %111 = vector.shape_cast %110 : vector<128xf32> to vector<1x1x1x128xf32>
    %112 = vector.broadcast %111 : vector<1x1x1x128xf32> to vector<1x16x16x128xf32>
    %113 = arith.mulf %108, %112 : vector<1x16x16x128xf32>
    %114 = arith.addf %107, %113 : vector<1x16x16x128xf32>
    %115 = vector.extract_strided_slice %86 {offsets = [0, 4, 0, 0], sizes = [1, 16, 16, 128], strides = [1, 1, 1, 1]} : vector<1x20x16x128xf32> to vector<1x16x16x128xf32>
    %c4_68 = arith.constant 4 : index
    %c2_69 = arith.constant 2 : index
    %c0_70 = arith.constant 0 : index
    %116 = vector.load %arg2[%c4_68, %c2_69, %c0_70] : memref<5x5x128xf32, #tpu.memory_space<vmem>>, vector<1x1x128xf32>
    %117 = vector.shape_cast %116 : vector<1x1x128xf32> to vector<128xf32>
    %118 = vector.shape_cast %117 : vector<128xf32> to vector<1x1x1x128xf32>
    %119 = vector.broadcast %118 : vector<1x1x1x128xf32> to vector<1x16x16x128xf32>
    %120 = arith.mulf %115, %119 : vector<1x16x16x128xf32>
    %121 = arith.addf %114, %120 : vector<1x16x16x128xf32>
    %c17_i32 = arith.constant 17 : i32
    %122 = tpu.dynamic_rotate %10 by %c17_i32 dim 2 : vector<1x20x20x128xf32>, i32 -> vector<1x20x20x128xf32>
    %123 = vector.extract_strided_slice %122 {offsets = [0, 0, 0, 0], sizes = [1, 20, 16, 128], strides = [1, 1, 1, 1]} : vector<1x20x20x128xf32> to vector<1x20x16x128xf32>
    %124 = vector.extract_strided_slice %123 {offsets = [0, 0, 0, 0], sizes = [1, 16, 16, 128], strides = [1, 1, 1, 1]} : vector<1x20x16x128xf32> to vector<1x16x16x128xf32>
    %c0_71 = arith.constant 0 : index
    %c3_72 = arith.constant 3 : index
    %c0_73 = arith.constant 0 : index
    %125 = vector.load %arg2[%c0_71, %c3_72, %c0_73] : memref<5x5x128xf32, #tpu.memory_space<vmem>>, vector<1x1x128xf32>
    %126 = vector.shape_cast %125 : vector<1x1x128xf32> to vector<128xf32>
    %127 = vector.shape_cast %126 : vector<128xf32> to vector<1x1x1x128xf32>
    %128 = vector.broadcast %127 : vector<1x1x1x128xf32> to vector<1x16x16x128xf32>
    %129 = arith.mulf %124, %128 : vector<1x16x16x128xf32>
    %130 = arith.addf %121, %129 : vector<1x16x16x128xf32>
    %131 = vector.extract_strided_slice %123 {offsets = [0, 1, 0, 0], sizes = [1, 16, 16, 128], strides = [1, 1, 1, 1]} : vector<1x20x16x128xf32> to vector<1x16x16x128xf32>
    %c1_74 = arith.constant 1 : index
    %c3_75 = arith.constant 3 : index
    %c0_76 = arith.constant 0 : index
    %132 = vector.load %arg2[%c1_74, %c3_75, %c0_76] : memref<5x5x128xf32, #tpu.memory_space<vmem>>, vector<1x1x128xf32>
    %133 = vector.shape_cast %132 : vector<1x1x128xf32> to vector<128xf32>
    %134 = vector.shape_cast %133 : vector<128xf32> to vector<1x1x1x128xf32>
    %135 = vector.broadcast %134 : vector<1x1x1x128xf32> to vector<1x16x16x128xf32>
    %136 = arith.mulf %131, %135 : vector<1x16x16x128xf32>
    %137 = arith.addf %130, %136 : vector<1x16x16x128xf32>
    %138 = vector.extract_strided_slice %123 {offsets = [0, 2, 0, 0], sizes = [1, 16, 16, 128], strides = [1, 1, 1, 1]} : vector<1x20x16x128xf32> to vector<1x16x16x128xf32>
    %c2_77 = arith.constant 2 : index
    %c3_78 = arith.constant 3 : index
    %c0_79 = arith.constant 0 : index
    %139 = vector.load %arg2[%c2_77, %c3_78, %c0_79] : memref<5x5x128xf32, #tpu.memory_space<vmem>>, vector<1x1x128xf32>
    %140 = vector.shape_cast %139 : vector<1x1x128xf32> to vector<128xf32>
    %141 = vector.shape_cast %140 : vector<128xf32> to vector<1x1x1x128xf32>
    %142 = vector.broadcast %141 : vector<1x1x1x128xf32> to vector<1x16x16x128xf32>
    %143 = arith.mulf %138, %142 : vector<1x16x16x128xf32>
    %144 = arith.addf %137, %143 : vector<1x16x16x128xf32>
    %145 = vector.extract_strided_slice %123 {offsets = [0, 3, 0, 0], sizes = [1, 16, 16, 128], strides = [1, 1, 1, 1]} : vector<1x20x16x128xf32> to vector<1x16x16x128xf32>
    %c3_80 = arith.constant 3 : index
    %c3_81 = arith.constant 3 : index
    %c0_82 = arith.constant 0 : index
    %146 = vector.load %arg2[%c3_80, %c3_81, %c0_82] : memref<5x5x128xf32, #tpu.memory_space<vmem>>, vector<1x1x128xf32>
    %147 = vector.shape_cast %146 : vector<1x1x128xf32> to vector<128xf32>
    %148 = vector.shape_cast %147 : vector<128xf32> to vector<1x1x1x128xf32>
    %149 = vector.broadcast %148 : vector<1x1x1x128xf32> to vector<1x16x16x128xf32>
    %150 = arith.mulf %145, %149 : vector<1x16x16x128xf32>
    %151 = arith.addf %144, %150 : vector<1x16x16x128xf32>
    %152 = vector.extract_strided_slice %123 {offsets = [0, 4, 0, 0], sizes = [1, 16, 16, 128], strides = [1, 1, 1, 1]} : vector<1x20x16x128xf32> to vector<1x16x16x128xf32>
    %c4_83 = arith.constant 4 : index
    %c3_84 = arith.constant 3 : index
    %c0_85 = arith.constant 0 : index
    %153 = vector.load %arg2[%c4_83, %c3_84, %c0_85] : memref<5x5x128xf32, #tpu.memory_space<vmem>>, vector<1x1x128xf32>
    %154 = vector.shape_cast %153 : vector<1x1x128xf32> to vector<128xf32>
    %155 = vector.shape_cast %154 : vector<128xf32> to vector<1x1x1x128xf32>
    %156 = vector.broadcast %155 : vector<1x1x1x128xf32> to vector<1x16x16x128xf32>
    %157 = arith.mulf %152, %156 : vector<1x16x16x128xf32>
    %158 = arith.addf %151, %157 : vector<1x16x16x128xf32>
    %c16_i32 = arith.constant 16 : i32
    %159 = tpu.dynamic_rotate %10 by %c16_i32 dim 2 : vector<1x20x20x128xf32>, i32 -> vector<1x20x20x128xf32>
    %160 = vector.extract_strided_slice %159 {offsets = [0, 0, 0, 0], sizes = [1, 20, 16, 128], strides = [1, 1, 1, 1]} : vector<1x20x20x128xf32> to vector<1x20x16x128xf32>
    %161 = vector.extract_strided_slice %160 {offsets = [0, 0, 0, 0], sizes = [1, 16, 16, 128], strides = [1, 1, 1, 1]} : vector<1x20x16x128xf32> to vector<1x16x16x128xf32>
    %c0_86 = arith.constant 0 : index
    %c4_87 = arith.constant 4 : index
    %c0_88 = arith.constant 0 : index
    %162 = vector.load %arg2[%c0_86, %c4_87, %c0_88] : memref<5x5x128xf32, #tpu.memory_space<vmem>>, vector<1x1x128xf32>
    %163 = vector.shape_cast %162 : vector<1x1x128xf32> to vector<128xf32>
    %164 = vector.shape_cast %163 : vector<128xf32> to vector<1x1x1x128xf32>
    %165 = vector.broadcast %164 : vector<1x1x1x128xf32> to vector<1x16x16x128xf32>
    %166 = arith.mulf %161, %165 : vector<1x16x16x128xf32>
    %167 = arith.addf %158, %166 : vector<1x16x16x128xf32>
    %168 = vector.extract_strided_slice %160 {offsets = [0, 1, 0, 0], sizes = [1, 16, 16, 128], strides = [1, 1, 1, 1]} : vector<1x20x16x128xf32> to vector<1x16x16x128xf32>
    %c1_89 = arith.constant 1 : index
    %c4_90 = arith.constant 4 : index
    %c0_91 = arith.constant 0 : index
    %169 = vector.load %arg2[%c1_89, %c4_90, %c0_91] : memref<5x5x128xf32, #tpu.memory_space<vmem>>, vector<1x1x128xf32>
    %170 = vector.shape_cast %169 : vector<1x1x128xf32> to vector<128xf32>
    %171 = vector.shape_cast %170 : vector<128xf32> to vector<1x1x1x128xf32>
    %172 = vector.broadcast %171 : vector<1x1x1x128xf32> to vector<1x16x16x128xf32>
    %173 = arith.mulf %168, %172 : vector<1x16x16x128xf32>
    %174 = arith.addf %167, %173 : vector<1x16x16x128xf32>
    %175 = vector.extract_strided_slice %160 {offsets = [0, 2, 0, 0], sizes = [1, 16, 16, 128], strides = [1, 1, 1, 1]} : vector<1x20x16x128xf32> to vector<1x16x16x128xf32>
    %c2_92 = arith.constant 2 : index
    %c4_93 = arith.constant 4 : index
    %c0_94 = arith.constant 0 : index
    %176 = vector.load %arg2[%c2_92, %c4_93, %c0_94] : memref<5x5x128xf32, #tpu.memory_space<vmem>>, vector<1x1x128xf32>
    %177 = vector.shape_cast %176 : vector<1x1x128xf32> to vector<128xf32>
    %178 = vector.shape_cast %177 : vector<128xf32> to vector<1x1x1x128xf32>
    %179 = vector.broadcast %178 : vector<1x1x1x128xf32> to vector<1x16x16x128xf32>
    %180 = arith.mulf %175, %179 : vector<1x16x16x128xf32>
    %181 = arith.addf %174, %180 : vector<1x16x16x128xf32>
    %182 = vector.extract_strided_slice %160 {offsets = [0, 3, 0, 0], sizes = [1, 16, 16, 128], strides = [1, 1, 1, 1]} : vector<1x20x16x128xf32> to vector<1x16x16x128xf32>
    %c3_95 = arith.constant 3 : index
    %c4_96 = arith.constant 4 : index
    %c0_97 = arith.constant 0 : index
    %183 = vector.load %arg2[%c3_95, %c4_96, %c0_97] : memref<5x5x128xf32, #tpu.memory_space<vmem>>, vector<1x1x128xf32>
    %184 = vector.shape_cast %183 : vector<1x1x128xf32> to vector<128xf32>
    %185 = vector.shape_cast %184 : vector<128xf32> to vector<1x1x1x128xf32>
    %186 = vector.broadcast %185 : vector<1x1x1x128xf32> to vector<1x16x16x128xf32>
    %187 = arith.mulf %182, %186 : vector<1x16x16x128xf32>
    %188 = arith.addf %181, %187 : vector<1x16x16x128xf32>
    %189 = vector.extract_strided_slice %160 {offsets = [0, 4, 0, 0], sizes = [1, 16, 16, 128], strides = [1, 1, 1, 1]} : vector<1x20x16x128xf32> to vector<1x16x16x128xf32>
    %c4_98 = arith.constant 4 : index
    %c4_99 = arith.constant 4 : index
    %c0_100 = arith.constant 0 : index
    %190 = vector.load %arg2[%c4_98, %c4_99, %c0_100] : memref<5x5x128xf32, #tpu.memory_space<vmem>>, vector<1x1x128xf32>
    %191 = vector.shape_cast %190 : vector<1x1x128xf32> to vector<128xf32>
    %192 = vector.shape_cast %191 : vector<128xf32> to vector<1x1x1x128xf32>
    %193 = vector.broadcast %192 : vector<1x1x1x128xf32> to vector<1x16x16x128xf32>
    %194 = arith.mulf %189, %193 : vector<1x16x16x128xf32>
    %195 = arith.addf %188, %194 : vector<1x16x16x128xf32>
    %cst_101 = arith.constant 5.000000e-01 : f32
    %196 = vector.broadcast %cst_101 : f32 to vector<1x16x16x128xf32>
    %197 = arith.mulf %196, %195 : vector<1x16x16x128xf32>
    %cst_102 = arith.constant 4.471500e-02 : f32
    %198 = vector.broadcast %cst_102 : f32 to vector<1x16x16x128xf32>
    %199 = arith.mulf %198, %195 : vector<1x16x16x128xf32>
    %200 = arith.mulf %199, %195 : vector<1x16x16x128xf32>
    %201 = arith.mulf %200, %195 : vector<1x16x16x128xf32>
    %202 = arith.addf %195, %201 : vector<1x16x16x128xf32>
    %cst_103 = arith.constant 0.797884583 : f32
    %203 = vector.broadcast %cst_103 : f32 to vector<1x16x16x128xf32>
    %204 = arith.mulf %203, %202 : vector<1x16x16x128xf32>
    %205 = math.tanh %204 : vector<1x16x16x128xf32>
    %cst_104 = arith.constant 1.000000e+00 : f32
    %206 = vector.broadcast %cst_104 : f32 to vector<1x16x16x128xf32>
    %207 = arith.addf %206, %205 : vector<1x16x16x128xf32>
    %208 = arith.mulf %197, %207 : vector<1x16x16x128xf32>
    %c0_105 = arith.constant 0 : index
    %c0_106 = arith.constant 0 : index
    %209 = vector.load %arg3[%c0_105, %c0_106] : memref<1x128xf32, #tpu.memory_space<vmem>>, vector<1x128xf32>
    %210 = vector.shape_cast %209 : vector<1x128xf32> to vector<128xf32>
    %211 = vector.shape_cast %210 : vector<128xf32> to vector<1x1x1x128xf32>
    %212 = vector.broadcast %211 : vector<1x1x1x128xf32> to vector<1x16x16x128xf32>
    %213 = arith.mulf %208, %212 : vector<1x16x16x128xf32>
    %c0_107 = arith.constant 0 : index
    %c0_108 = arith.constant 0 : index
    %214 = vector.load %arg4[%c0_107, %c0_108] : memref<1x128xf32, #tpu.memory_space<vmem>>, vector<1x128xf32>
    %215 = vector.shape_cast %214 : vector<1x128xf32> to vector<128xf32>
    %216 = vector.shape_cast %215 : vector<128xf32> to vector<1x1x1x128xf32>
    %217 = vector.broadcast %216 : vector<1x1x1x128xf32> to vector<1x16x16x128xf32>
    %218 = arith.addf %213, %217 : vector<1x16x16x128xf32>
    %219 = arith.addf %218, %0 : vector<1x16x16x128xf32>
    %c0_109 = arith.constant 0 : index
    %c0_110 = arith.constant 0 : index
    %c0_111 = arith.constant 0 : index
    %c0_112 = arith.constant 0 : index
    %220 = vector.load %arg5[%c0_109, %c0_110, %c0_111, %c0_112] : memref<1x16x16x128xf32, #tpu.memory_space<vmem>>, vector<1x16x16x128xf32>
    tpu.vector_store %arg5[%c0_109, %c0_110, %c0_111, %c0_112], %219 {strides = array<i32>} : memref<1x16x16x128xf32, #tpu.memory_space<vmem>>, vector<1x16x16x128xf32>,
    return
  }
  func.func @transform_0(%arg0: i32) -> (i32, i32, i32, i32) {
    %c0_i32 = arith.constant 0 : i32
    %c0_i32_0 = arith.constant 0 : i32
    %c0_i32_1 = arith.constant 0 : i32
    %c0_i32_2 = arith.constant 0 : i32
    return %arg0, %c0_i32, %c0_i32_0, %c0_i32_1 : i32, i32, i32, i32
  }
  func.func @transform_1(%arg0: i32) -> (i32, i32, i32) {
    %c0_i32 = arith.constant 0 : i32
    %c0_i32_0 = arith.constant 0 : i32
    %c0_i32_1 = arith.constant 0 : i32
    %c0_i32_2 = arith.constant 0 : i32
    return %c0_i32, %c0_i32_0, %c0_i32_1 : i32, i32, i32
  }
  func.func @transform_2(%arg0: i32) -> (i32, i32) {
    %c0_i32 = arith.constant 0 : i32
    %c0_i32_0 = arith.constant 0 : i32
    %c0_i32_1 = arith.constant 0 : i32
    return %c0_i32, %c0_i32_0 : i32, i32
  }
  func.func @transform_3(%arg0: i32) -> (i32, i32) {
    %c0_i32 = arith.constant 0 : i32
    %c0_i32_0 = arith.constant 0 : i32
    %c0_i32_1 = arith.constant 0 : i32
    return %c0_i32, %c0_i32_0 : i32, i32
  }
  func.func @transform_4(%arg0: i32) -> (i32, i32, i32, i32) {
    %c0_i32 = arith.constant 0 : i32
    %c0_i32_0 = arith.constant 0 : i32
    %c0_i32_1 = arith.constant 0 : i32
    %c0_i32_2 = arith.constant 0 : i32
    return %arg0, %c0_i32, %c0_i32_0, %c0_i32_1 : i32, i32, i32, i32
  }
}

</mosaic_0001>

<bundles_post_ra>
// kernel: tpu_custom_call.1
= control target key start
LH: loop header
LB: loop body
LE: loop exit
PB: predicated region body
PF: predicated region fallthrough
CT: control target
= control target key end

     0   :  { %9 = vsyncpa [#allocation4], 0  ;;  %s13182_s0 = inlined_call_operand.hbm [shape: f32[2,16,16,128], index: 0, kind: input, shape index: {}]   ;;  %s13183_s1 = inlined_call_operand.hbm [shape: f32[5,5,128], index: 1, kind: input, shape index: {}]   ;;  %s13184_s2 = inlined_call_operand.vmem [shape: f32[1,128], index: 2, kind: input, shape index: {}]   ;;  %s13185_s3 = inlined_call_operand.vmem [shape: f32[1,128], index: 3, kind: input, shape index: {}]   ;;  %s13186_s4 = inlined_call_operand.hbm [shape: f32[2,16,16,128], index: 4, kind: output, shape index: {}]  }
   0x1   :  { %11 = vsyncpa [#allocation4 + $0x1], 0 }
   0x2   :  { %12 = vsyncpa [#allocation7], 0 }
   0x3   :  { %13 = vsyncpa [#allocation5], 0 }
   0x4   :  { %15 = vsyncpa [#allocation5 + $0x1], 0  ;;  %s6812_s15 = smov 0   ;;  %s6814_s16 = smov 0  }
   0x5   :  { %s6816_s17 = smov 0   ;;  %s6818_s18 = smov 0  }
   0x6 LB: > { %s6833_s19 = sadd.s32 4294967295, %s6777_s18   ;;  %s6222_s20 = sadd.s32 4294967294, %s6777_s18   ;;  %s6777_s18 = sphi %s6818_s18, %s14778_s18   ;;  %s6773_s17 = sphi %s6816_s17, %s14777_s17   ;;  %s6769_s16 = sphi %s6814_s16, %s14776_s16   ;;  %s6765_s15 = sphi %s6812_s15, %s14775_s15  }
   0x7   : > { %p41_p0 = scmp.ne.s32.totalorder %s6769_s16, %s6765_s15  ;;  %p13187_p1 = scmp.eq.s32.totalorder %s6833_s19, 0 }
   0x8   : > { %p134_p3 = scmp.eq.s32.totalorder %s6222_s20, 1  ;;  %p6223_p5 = scmp.ge.s32.totalorder %s6777_s18, 1 }
   0x9   : > { %p6842_p4 = por %p13187_p1, %p41_p0  ;;  %p141_p7 = scmp.lt.s32.totalorder %s6777_s18, 3 }
   0xa   : > { %p6847_p6 = por %p134_p3, %p41_p0  ;;  %s6779_s24 = smov [#allocation6]  }
   0xb   : > { %s13832_s21 = scalar_select %p6842_p4, 1, 0 }
   0xc   : > { %s13833_s22 = scalar_select %p6847_p6, 1, 0 }
   0xd   : > { %p6852_p8 = pnand %p6223_p5, %p141_p7  ;;  %s153_s25 = sshll.u32 %s6779_s24, 4  ;;  %s6856_s25 = int_to_ptr.vmem [resolvable:$true] %s153_s25 }
   0xe   : > { %s6868_s27 = sadd.s32 1, %s6777_s18   ;;  %s28_s28 = sadd.s32 1, %s6773_s17 }
   0xf   : > { %s13834_s23 = scalar_select %p6852_p8, 1, 0 }
  0x10   : > { %p6275_p9 = pneg %p6852_p8  ;;  %s25_s29 = ssub.s32 %s6777_s18, %s6868_s27 }
  0x11   : > { %s6649_s6 = scalar_lea.hbm %s13183_s1, 640 }
  0x12   : > { %p6863_p11 = pnand %p6275_p9, %p13187_p1  ;;  %p6650_p12 = scmp.ne.s32.totalorder %s13183_s1, %s6649_s6 }
  0x13   : > { %p6656_p5 = scmp.lt.u32.totalorder %s6649_s6, %s13183_s1 }
  0x14   : > { %p6651_p13 = pneg %p6863_p11 }
  0x16   : > { %p6652_p0 = pnand %p6651_p13, %p6650_p12 }
  0x18   : > { %p6653_p3 = pneg %p6652_p0 }
  0x1a   : > { %p6658_p7 = pnand %p6656_p5, %p6653_p3 }
  0x1c   : > { %6661 = shalt.err (!%p6658_p7)
}
  0x1d   : > { %s6662_s11 = scalar_lea.vmem %s6856_s25, 640  ;;  %p6670_p2 = scmp.lt.s32.totalorder %s6856_s25, %s6856_s25 }
  0x1e   : > { %p6663_p9 = scmp.ne.s32.totalorder %s6856_s25, %s6662_s11  ;;  %p6671_p6 = scmp.lt.s32.totalorder %s6662_s11, %s6662_s11 }
  0x20   : > { %p6665_p10 = pnand %p6663_p9, %p6651_p13  ;;  %p6672_p4 = por %p6671_p6, %p6670_p2 }
  0x22   : > { %p6666_p1 = pneg %p6665_p10 }
  0x24   : > { %p6673_p8 = pnand %p6672_p4, %p6666_p1 }
  0x26   : > { %6676 = shalt.err (!%p6673_p8)
}
  0x27   : > { %s6780_s12 = smov 128   ;;  %s6781_s13 = smov 8  }
  0x28   : > { %6278 = dma.hbm_to_vmem [thread:$0]  (!%p6863_p11), %s13183_s1, 640, %s6856_s25, [#allocation7], %s6780_s12, %s6780_s12, %s6781_s13  }
  0x29   : > { %p26_p1 = scmp.eq.s32.totalorder %s25_s29, 0  ;;  %p35_p2 = scmp.ne.s32.totalorder %s6773_s17, %s6769_s16 }
  0x2a   : > { %p36_p4 = scmp.eq.s32.totalorder %s6777_s18, 0  ;;  %p6288_p6 = scmp.lt.s32.totalorder %s6777_s18, 2 }
  0x2b   : > { %s6902_s24 = scalar_select %p26_p1, %s6773_s17, %s28_s28  }
  0x2c   : > { %p37_p8 = por %p36_p4, %p35_p2  ;;  %p13836_p10 = scmp.eq.s32.totalorder %s6833_s19, 1 }
  0x2d   : > { %s173_s26 = sand.u32 1, %s6773_s17   ;;  %s6265_s5 = sshll.u32 %s6777_s18, 12 }
  0x2e   : > { %p6906_p12 = por %p13836_p10, %p35_p2  ;;  %s6226_s6 = sshll.u32 %s173_s26, 8 }
  0x2f   : > { %s6915_s9 = scalar_lea.hbm %s13182_s0, %s6265_s5  ;;  %s177_s25 = scalar_lea.vmem [#allocation3], %s6226_s6 }
  0x30   : > { %s184_s28 = sshll.u32 %s177_s25, 4  ;;  %p6917_p11 = pnand %p6288_p6, %p37_p8  ;;  %s6921_s28 = int_to_ptr.vmem [resolvable:$true] %s184_s28 }
  0x31   : > { %s6923_s10 = scalar_lea.sflag [#allocation4], %s173_s26  ;;  %s6677_s11 = scalar_lea.hbm %s6915_s9, 4096 }
  0x32   : > { %p6678_p13 = scmp.ne.s32.totalorder %s6915_s9, %s6677_s11  ;;  %p6679_p0 = pneg %p6917_p11 }
  0x33   : > { %s6682_s5 = scalar_lea.hbm %s13182_s0, 8192  ;;  %p6683_p7 = scmp.lt.u32.totalorder %s6915_s9, %s13182_s0 }
  0x34   : > { %p6680_p3 = pnand %p6679_p0, %p6678_p13  ;;  %p6684_p9 = scmp.lt.u32.totalorder %s6682_s5, %s6677_s11 }
  0x35   : > { %p6686_p2 = scmp.lt.u32.totalorder %s6677_s11, %s6915_s9 }
  0x36   : > { %p6681_p5 = pneg %p6680_p3  ;;  %p6685_p1 = por %p6684_p9, %p6683_p7 }
  0x38   : > { %p6687_p4 = por %p6686_p2, %p6685_p1 }
  0x3a   : > { %p6688_p6 = pnand %p6687_p4, %p6681_p5 }
  0x3c   : > { %6691 = shalt.err (!%p6688_p6)
}
  0x3d   : > { %s6692_s26 = scalar_lea.vmem %s6921_s28, 4096  ;;  %s6782_s8 = smov [#allocation3]  }
  0x3e   : > { %p6693_p8 = scmp.ne.s32.totalorder %s6921_s28, %s6692_s26  ;;  %s6697_s25 = sshll.u32 %s6782_s8, 4  ;;  %s6698_s25 = int_to_ptr.vmem [resolvable:$false] %s6697_s25 }
  0x3f   : > { %s6699_s14 = scalar_lea.vmem %s6698_s25, 8192  ;;  %p6700_p3 = scmp.lt.s32.totalorder %s6921_s28, %s6698_s25 }
  0x40   : > { %p6695_p10 = pnand %p6693_p8, %p6679_p0  ;;  %p6701_p7 = scmp.lt.s32.totalorder %s6699_s14, %s6692_s26 }
  0x42   : > { %p6696_p13 = pneg %p6695_p10  ;;  %p6702_p9 = por %p6701_p7, %p6700_p3 }
  0x44   : > { %p6703_p1 = pnand %p6702_p9, %p6696_p13 }
  0x46   : > { %6706 = shalt.err (!%p6703_p1)
}
  0x47   : > { %6282 = dma.hbm_to_vmem [thread:$0]  (!%p6917_p11), %s6915_s9, 4096, %s6921_s28, %s6923_s10, %s6780_s12, %s6780_s12, %s6781_s13  }
  0x48   : > { %p13839_p0 = scmp.ne.s32.totalorder %s13834_s23, 0 }
  0x4a   : > { %196 = sbr.rel (%p13839_p0) target bundleno = 1196 (0x4ac), region = 36 }
  0x51   : > { %s6957_s11 = sand.u32 1, %s6769_s16   ;;  %p13840_p5 = scmp.ne.s32.totalorder %s13832_s21, 0 }
  0x52   : > { %s6230_s20 = sshll.u32 %s6957_s11, 8  ;;  %s199_s5 = scalar_lea.sflag [#allocation4], %s6957_s11 }
  0x53   : > { %s6963_s29 = scalar_lea.vmem [#allocation3], %s6230_s20 }
  0x54   : > { %6752 = dma.done.wait (%p13840_p5), %s199_s5, 4096  }
  0x55   : > { %6754 = vsyncadd (%p13840_p5), %s199_s5, 4294963200  ;;  %p13841_p11 = scmp.eq.s32.totalorder %s6833_s19, 0 }
  0x57   : > { %6756 = dma.done.wait (%p13841_p11), [#allocation7], 640   ;;  %p13842_p2 = pmov %p13841_p11 }
  0x58   : > { %v6783_v0 = vmov 0.0   ;;  %vm750_vm0 = vcmask 1047556   ;;  %vm892_vm1 = vcmask 1046528   ;;  %v6973_v2 = vld [vmem:[#allocation6] ss:$0 sm:$0xff]  ;;  %vm2118_vm2 = vcmask 1045504  }
  0x59   : > { %6758 = vsyncadd (%p13842_p2), [#allocation7], 4294966656  ;;  %263 = vst [vmem:[#allocation2] sm:$0xff] %v6783_v0  ;;  %v751_v1 = vrot.slane %v6783_v0, 4  ;;  %v6975_v3 = vld [vmem:[#allocation6 + $0x1] ss:$0 sm:$0xff] }
  0x5a   : > { %265 = vst [vmem:[#allocation2 + $0x10] sm:$0xf] %v6783_v0  ;;  %268 = vst [vmem:[#allocation2 + $0x28] sm:$0xf] %v6783_v0  ;;  %v6977_v4 = vld [vmem:[#allocation6 + $0x2] ss:$0 sm:$0xff] }
  0x5b   : > { %272 = vst [vmem:[#allocation2 + $0x1c0] sm:$0xf] %v6783_v0  ;;  %275 = vst [vmem:[#allocation2 + $0x1d8] sm:$0xf] %v6783_v0  ;;  %v6980_v5 = vmul.f32 0.0, %v6973_v2  ;;  %v796_v6 = vmul.f32 0.0, %v6975_v3 }
  0x5c   : > { %277 = vst [vmem:[#allocation2 + $0x30] sm:$0x3] %v6783_v0  ;;  %278 = vst [vmem:[#allocation2 + $0x48] sm:$0x3] %v6783_v0  ;;  %v2022_v7 = vmul.f32 0.0, %v6977_v4  ;;  %v231_v26 = vld [vmem:[%s6963_s29] sm:$0xff] }
  0x5d   : > { %279 = vst [vmem:[#allocation2 + $0x60] sm:$0x3] %v6783_v0  ;;  %280 = vst [vmem:[#allocation2 + $0x78] sm:$0x3] %v6783_v0  ;;  %v6984_v8 = vld [vmem:[#allocation6 + $0x3] ss:$0 sm:$0xff] }
  0x5e   : > { %281 = vst [vmem:[#allocation2 + $0x90] sm:$0x3] %v6783_v0  ;;  %282 = vst [vmem:[#allocation2 + $0xa8] sm:$0x3] %v6783_v0  ;;  %v3248_v11 = vmul.f32 0.0, %v6984_v8  ;;  %v6995_v17 = vrot.slane %v796_v6, 1 }
  0x5f   : > { %283 = vst [vmem:[#allocation2 + $0xc0] sm:$0x3] %v6783_v0  ;;  %284 = vst [vmem:[#allocation2 + $0xd8] sm:$0x3] %v6783_v0  ;;  %v6987_v14 = vld [vmem:[#allocation6 + $0x8] ss:$0 sm:$0xff] }
  0x60   : > { %285 = vst [vmem:[#allocation2 + $0xf0] sm:$0x3] %v6783_v0  ;;  %286 = vst [vmem:[#allocation2 + $0x108] sm:$0x3] %v6783_v0  ;;  %v6997_v18 = vrot.slane %v2022_v7, 2  ;;  %v476_v19 = vmul.f32 0.0, %v6987_v14 }
  0x61   : > { %287 = vst [vmem:[#allocation2 + $0x120] sm:$0x3] %v6783_v0  ;;  %288 = vst [vmem:[#allocation2 + $0x138] sm:$0x3] %v6783_v0  ;;  %v343_v9 = vld [vmem:[#allocation2 + $0x10] sm:$0xf] }
  0x62   : > { %289 = vst [vmem:[#allocation2 + $0x150] sm:$0x3] %v6783_v0  ;;  %290 = vst [vmem:[#allocation2 + $0x168] sm:$0x3] %v6783_v0  ;;  %v346_v10 = vld [vmem:[#allocation2 + $0x28] sm:$0xf]  ;;  %v6990_v15 = vsel %vm750_vm0, %v751_v1, %v343_v9  ;;  %v7016_v27 = vadd.f32 %v476_v19, %v6980_v5 }
  0x63   : > { %291 = vst [vmem:[#allocation2 + $0x180] sm:$0x3] %v6783_v0  ;;  %292 = vst [vmem:[#allocation2 + $0x198] sm:$0x3] %v6783_v0  ;;  %v397_v12 = vld [vmem:[#allocation2 + $0x1c0] sm:$0xf]  ;;  %v6993_v16 = vsel %vm750_vm0, %v751_v1, %v346_v10  ;;  %v798_v25 = vmul.f32 %v6975_v3, %v6990_v15  ;;  %v2024_v58 = vmul.f32 %v6977_v4, %v6990_v15 }
  0x64   : > { %293 = vst [vmem:[#allocation2 + $0x42] sm:$0x3] %v6783_v0  ;;  %294 = vst [vmem:[#allocation2 + $0x5a] sm:$0x3] %v6783_v0  ;;  %v400_v13 = vld [vmem:[#allocation2 + $0x1d8] sm:$0xf]  ;;  %v7001_v20 = vsel %vm750_vm0, %v751_v1, %v397_v12  ;;  %v801_v30 = vmul.f32 %v6975_v3, %v6993_v16 }
  0x65   : > { %295 = vst [vmem:[#allocation2 + $0x72] sm:$0x3] %v6783_v0  ;;  %296 = vst [vmem:[#allocation2 + $0x8a] sm:$0x3] %v6783_v0  ;;  %v7003_v21 = vrot.slane %v3248_v11, 3  ;;  %v7010_v24 = vsel %vm750_vm0, %v751_v1, %v400_v13  ;;  %v896_v33 = vrot.slane %v798_v25, 1  ;;  %v7088_v1 = vmul.f32 %v6977_v4, %v6993_v16 }
  0x66   : > { %297 = vst [vmem:[#allocation2 + $0xa2] sm:$0x3] %v6783_v0  ;;  %298 = vst [vmem:[#allocation2 + $0xba] sm:$0x3] %v6783_v0  ;;  %v7005_v22 = vld [vmem:[#allocation6 + $0x18] ss:$0 sm:$0xff] }
  0x67   : > { %299 = vst [vmem:[#allocation2 + $0xd2] sm:$0x3] %v6783_v0  ;;  %300 = vst [vmem:[#allocation2 + $0xea] sm:$0x3] %v6783_v0  ;;  %v7007_v23 = vld [vmem:[#allocation6 + $0x20] ss:$0 sm:$0xff]  ;;  %v7054_v48 = vsel %vm892_vm1, %v6995_v17, %v896_v33 }
  0x68   : > { %301 = vst [vmem:[#allocation2 + $0x102] sm:$0x3] %v6783_v0  ;;  %302 = vst [vmem:[#allocation2 + $0x11a] sm:$0x3] %v6783_v0  ;;  %v7019_v28 = vmul.f32 0.0, %v7005_v22  ;;  %v7022_v29 = vmul.f32 0.0, %v7007_v23 }
  0x69   : > { %303 = vst [vmem:[#allocation2 + $0x132] sm:$0x3] %v6783_v0  ;;  %304 = vst [vmem:[#allocation2 + $0x14a] sm:$0x3] %v6783_v0  ;;  %v7026_v31 = vld [vmem:[#allocation6 + $0x9] ss:$0 sm:$0xff] }
  0x6a   : > { %305 = vst [vmem:[#allocation2 + $0x162] sm:$0x3] %v6783_v0  ;;  %306 = vst [vmem:[#allocation2 + $0x17a] sm:$0x3] %v6783_v0  ;;  %v7028_v32 = vld [vmem:[#allocation6 + $0x19] ss:$0 sm:$0xff]  ;;  %v1044_v35 = vmul.f32 %v7026_v31, %v6993_v16 }
  0x6b   : > { %307 = vst [vmem:[#allocation2 + $0x192] sm:$0x3] %v6783_v0  ;;  %308 = vst [vmem:[#allocation2 + $0x1aa] sm:$0x3] %v6783_v0  ;;  %v7031_v34 = vmul.f32 0.0, %v7026_v31  ;;  %v7036_v36 = vmul.f32 0.0, %v7028_v32  ;;  %v1579_v40 = vmul.f32 %v7028_v32, %v7001_v20 }
  0x6c   : > { %13843 = vst [vmem:[#allocation12_spill] sm:$0xff] %v6980_v5  ;;  %13844 = vst [vmem:[#allocation13_spill] sm:$0xff] %v6987_v14  ;;  %v7038_v37 = vld [vmem:[#allocation6 + $0x21] ss:$0 sm:$0xff]  ;;  %v232_v38 = vld [vmem:[%s6963_s29 + $0x8] sm:$0xff]  ;;  %v901_v39 = vrot.slane %v801_v30, 1 }
  0x6d   : > { %13845 = vst [vmem:[#allocation14_spill] sm:$0xff] %v6993_v16  ;;  %13846 = vst [vmem:[#allocation15_spill] sm:$0xff] %v6995_v17  ;;  %v1820_v41 = vmul.f32 0.0, %v7038_v37  ;;  %v7046_v42 = vmul.f32 %v7038_v37, %v7001_v20  ;;  %vm3344_vm3 = vcmask 1044480   ;;  %v233_v43 = vld [vmem:[%s6963_s29 + $0x10] sm:$0xff]  ;;  %v13192_v44 = vrot.slane %v7031_v34, 1 }
  0x6e   : > { %13847 = vst [vmem:[#allocation16_spill] sm:$0xff] %v6997_v18  ;;  %13848 = vst [vmem:[#allocation17_spill] sm:$0xff] %v7001_v20  ;;  %v1141_v45 = vrot.slane %v1044_v35, 1  ;;  %v13191_v46 = vrot.slane %v7036_v36, 1  ;;  %v234_v47 = vld [vmem:[%s6963_s29 + $0x18] sm:$0xff]  ;;  %v7058_v49 = vsel %vm892_vm1, %v6995_v17, %v901_v39  ;;  %v1706_v50 = vrot.slane %v1579_v40, 1 }
  0x6f   : > { %13849 = vst [vmem:[#allocation18_spill] sm:$0xff] %v7003_v21  ;;  %13850 = vst [vmem:[#allocation19_spill] sm:$0xff] %v7007_v23  ;;  %v1824_v51 = vmul.f32 %v7038_v37, %v7010_v24  ;;  %v7062_v52 = vld [vmem:[#allocation6 + $0xa] ss:$0 sm:$0xff]  ;;  %v7064_v53 = vld [vmem:[#allocation6 + $0x1a] ss:$0 sm:$0xff] }
  0x70   : > { %13851 = vst [vmem:[#allocation20_spill] sm:$0xff] %v7010_v24  ;;  %13852 = vst [vmem:[#allocation21_spill] sm:$0xff] %v7016_v27  ;;  %v235_v54 = vld [vmem:[%s6963_s29 + $0x20] sm:$0xff]  ;;  %v236_v55 = vld [vmem:[%s6963_s29 + $0x28] sm:$0xff]  ;;  %v7071_v56 = vsel %vm892_vm1, %v13192_v44, %v1141_v45  ;;  %v7073_v57 = vrot.slane %v1820_v41, 1  ;;  %v7083_v62 = vsel %vm892_vm1, %v13191_v46, %v1706_v50  ;;  %v2122_v10 = vrot.slane %v2024_v58, 2 }
  0x71   : > { %13853 = vst [vmem:[#allocation22_spill] sm:$0xff] %v7026_v31  ;;  %13854 = vst [vmem:[#allocation23_spill] sm:$0xff] %v7028_v32  ;;  %v237_v59 = vld [vmem:[%s6963_s29 + $0x30] sm:$0xff]  ;;  %v238_v60 = vld [vmem:[%s6963_s29 + $0x38] sm:$0xff]  ;;  %v1951_v0 = vrot.slane %v1824_v51, 1  ;;  %v7095_v11 = vmul.f32 %v7062_v52, %v6993_v16  ;;  %v7098_v12 = vmul.f32 0.0, %v7064_v53  ;;  %v2805_v33 = vmul.f32 %v7064_v53, %v7001_v20 }
  0x72   : > { %309 = vst [vmem:[#allocation2 + $0x32] sm:$0xff] %v231_v26  ;;  %13855 = vst [vmem:[#allocation24_spill] sm:$0xff] %v7038_v37  ;;  %v239_v61 = vld [vmem:[%s6963_s29 + $0x40] sm:$0xff]  ;;  %v240_v6 = vld [vmem:[%s6963_s29 + $0x48] sm:$0xff]  ;;  %v7116_v40 = vsel %vm2118_vm2, %v6997_v18, %v2122_v10  ;;  %v3250_v58 = vmul.f32 %v6984_v8, %v6990_v15  ;;  %vm4570_vm4 = vcmask 1043456   ;;  %s7803_s9 = scalar_lea.vmem [#allocation8], %s6230_s20 }
  0x73   : > { %13856 = vst [vmem:[#allocation25_spill] sm:$0xff] %v7046_v42  ;;  %310 = vst [vmem:[#allocation2 + $0x3a] sm:$0xff] %v232_v38  ;;  %v241_v7 = vld [vmem:[%s6963_s29 + $0x50] sm:$0xff]  ;;  %v242_v9 = vld [vmem:[%s6963_s29 + $0x58] sm:$0xff]  ;;  %v7106_v26 = vsel %vm892_vm1, %v7073_v57, %v1951_v0  ;;  %v13190_v41 = vrot.slane %v7098_v12, 2  ;;  %s6266_s8 = sshll.u32 %s6833_s19, 12 }
  0x74   : > { %311 = vst [vmem:[#allocation2 + $0x4a] sm:$0xff] %v233_v43  ;;  %13857 = vst [vmem:[#allocation26_spill] sm:$0xff] %v7054_v48  ;;  %v7100_v13 = vld [vmem:[#allocation6 + $0x22] ss:$0 sm:$0xff]  ;;  %v244_v25 = vld [vmem:[%s6963_s29 + $0x68] sm:$0xff]  ;;  %s6139_s25 = sshll.u32 %s7803_s9, 4  ;;  %s13135_s5 = scalar_lea.hbm %s13186_s4, %s6266_s8  ;;  %s13137_s25 = int_to_ptr.vmem [resolvable:$true] %s6139_s25 }
  0x75   : > { %13858 = vst [vmem:[#allocation27_spill] sm:$0xff] %v7058_v49  ;;  %13859 = vst [vmem:[#allocation28_spill] sm:$0xff] %v7064_v53  ;;  %v243_v19 = vld [vmem:[%s6963_s29 + $0x60] sm:$0xff]  ;;  %v245_v35 = vld [vmem:[%s6963_s29 + $0x70] sm:$0xff]  ;;  %v7121_v43 = vmul.f32 %v7100_v13, %v7001_v20  ;;  %v7124_v45 = vmul.f32 0.0, %v7100_v13  ;;  %s6707_s21 = scalar_lea.vmem %s13137_s25, 4096 }
  0x76   : > { %312 = vst [vmem:[#allocation2 + $0x52] sm:$0xff] %v234_v47  ;;  %13860 = vst [vmem:[#allocation29_spill] sm:$0xff] %v7071_v56  ;;  %v246_v38 = vld [vmem:[%s6963_s29 + $0x78] sm:$0xff]  ;;  %v247_v39 = vld [vmem:[%s6963_s29 + $0x80] sm:$0xff]  ;;  %p6708_p4 = scmp.ne.s32.totalorder %s13137_s25, %s6707_s21  ;;  %s6784_s19 = smov [#allocation8]  }
  0x77   : > { %13861 = vst [vmem:[#allocation30_spill] sm:$0xff] %v7073_v57  ;;  %313 = vst [vmem:[#allocation2 + $0x62] sm:$0xff] %v235_v54  ;;  %v248_v47 = vld [vmem:[%s6963_s29 + $0x88] sm:$0xff]  ;;  %v7127_v50 = vld [vmem:[#allocation6 + $0x10] ss:$0 sm:$0xff]  ;;  %v2932_v54 = vrot.slane %v2805_v33, 2 }
  0x78   : > { %314 = vst [vmem:[#allocation2 + $0x6a] sm:$0xff] %v236_v55  ;;  %13862 = vst [vmem:[#allocation31_spill] sm:$0xff] %v7088_v1  ;;  %v3050_v55 = vmul.f32 %v7100_v13, %v7010_v24  ;;  %v13194_v0 = vrot.slane %v7124_v45, 2  ;;  %v251_v8 = vld [vmem:[%s6963_s29 + $0xa0] sm:$0xff]  ;;  %v3348_v33 = vrot.slane %v3250_v58, 3  ;;  %v256_v56 = vld [vmem:[%s6963_s29 + $0xc8] sm:$0xff]  ;;  %p6709_p6 = pnand %p6708_p4, %p6906_p12 }
  0x79   : > { %315 = vst [vmem:[#allocation2 + $0x7a] sm:$0xff] %v237_v59  ;;  %316 = vst [vmem:[#allocation2 + $0x82] sm:$0xff] %v238_v60  ;;  %v7134_v59 = vld [vmem:[#allocation6 + $0x23] ss:$0 sm:$0xff]  ;;  %v249_v60 = vld [vmem:[%s6963_s29 + $0x90] sm:$0xff]  ;;  %s6711_s23 = sshll.u32 %s6784_s19, 4  ;;  %s6712_s23 = int_to_ptr.vmem [resolvable:$false] %s6711_s23 }
  0x7a   : > { %317 = vst [vmem:[#allocation2 + $0x92] sm:$0xff] %v239_v61  ;;  %13863 = vst [vmem:[#allocation32_spill] sm:$0xff] %v7095_v11  ;;  %v250_v61 = vld [vmem:[%s6963_s29 + $0x98] sm:$0xff]  ;;  %v7167_v30 = vld [vmem:[#allocation6 + $0x11] ss:$0 sm:$0xff]  ;;  %p6710_p8 = pneg %p6709_p6  ;;  %s6713_s12 = scalar_lea.vmem %s6712_s23, 8192 }
  0x7b   : > { %13864 = vst [vmem:[#allocation33_spill] sm:$0xff] %v7100_v13  ;;  %318 = vst [vmem:[#allocation2 + $0x9a] sm:$0xff] %v240_v6  ;;  %v7140_v6 = vmul.f32 0.0, %v7134_v59  ;;  %v7148_v10 = vld [vmem:[#allocation2 + $0x48] sm:$0xff]  ;;  %p6714_p10 = scmp.lt.s32.totalorder %s13137_s25, %s6712_s23  ;;  %p6715_p13 = scmp.lt.s32.totalorder %s6713_s12, %s6707_s21 }
  0x7c   : > { %319 = vst [vmem:[#allocation2 + $0xaa] sm:$0xff] %v241_v7  ;;  %320 = vst [vmem:[#allocation2 + $0xb2] sm:$0xff] %v242_v9  ;;  %v7144_v7 = vmul.f32 %v7134_v59, %v7010_v24  ;;  %v7146_v9 = vld [vmem:[#allocation2 + $0x30] sm:$0xff] }
  0x7d   : > { %321 = vst [vmem:[#allocation2 + $0xc2] sm:$0xff] %v243_v19  ;;  %322 = vst [vmem:[#allocation2 + $0xca] sm:$0xff] %v244_v25  ;;  %v7154_v19 = vsel %vm2118_vm2, %v13190_v41, %v2932_v54  ;;  %v3177_v25 = vrot.slane %v3050_v55, 2  ;;  %v753_v58 = vrot.slane %v7146_v9, 4  ;;  %v7196_v42 = vld [vmem:[#allocation2 + $0x50] sm:$0xff]  ;;  %p6716_p3 = por %p6715_p13, %p6714_p10 }
  0x7e   : > { %13865 = vst [vmem:[#allocation34_spill] sm:$0xff] %v7116_v40  ;;  %13866 = vst [vmem:[#allocation35_spill] sm:$0xff] %v7121_v43 }
  0x7f   : > { %323 = vst [vmem:[#allocation2 + $0xda] sm:$0xff] %v245_v35  ;;  %324 = vst [vmem:[#allocation2 + $0xe2] sm:$0xff] %v246_v38  ;;  %v7156_v35 = vld [vmem:[#allocation6 + $0x4] ss:$0 sm:$0xff]  ;;  %v7172_v54 = vsel %vm2118_vm2, %v13194_v0, %v3177_v25  ;;  %v546_v25 = vmul.f32 %v7127_v50, %v7146_v9  ;;  %v7188_v0 = vld [vmem:[#allocation2 + $0x38] sm:$0xff]  ;;  %p6717_p7 = pnand %p6716_p3, %p6710_p8 }
  0x80   : > { %325 = vst [vmem:[#allocation2 + $0xf2] sm:$0xff] %v247_v39  ;;  %326 = vst [vmem:[#allocation2 + $0xfa] sm:$0xff] %v248_v47  ;;  %v7158_v38 = vld [vmem:[#allocation2 + $0x60] sm:$0xff]  ;;  %v7165_v63 = vld [vmem:[#allocation2 + $0x78] sm:$0xff]  ;;  %v7176_v55 = vmul.f32 %v7156_v35, %v6990_v15  ;;  %v754_v47 = vrot.slane %v7148_v10, 4  ;;  %v7186_v15 = vsel %vm3344_vm3, %v7003_v21, %v3348_v33 }
  0x81   : > { %13867 = vst [vmem:[#allocation36_spill] sm:$0xff] %v7140_v6  ;;  %13868 = vst [vmem:[#allocation37_spill] sm:$0xff] %v7144_v7  ;;  %v359_v39 = vld [vmem:[#allocation2 + $0x90] sm:$0xff]  ;;  %v755_v51 = vrot.slane %v7158_v38, 4  ;;  %v756_v41 = vrot.slane %v7165_v63, 4 }
  0x82   : > { %327 = vst [vmem:[#allocation2 + $0x10a] sm:$0xff] %v249_v60  ;;  %328 = vst [vmem:[#allocation2 + $0x112] sm:$0xff] %v250_v61  ;;  %v7163_v60 = vmul.f32 0.0, %v7156_v35  ;;  %v349_v61 = vld [vmem:[#allocation2 + $0x40] sm:$0xf]  ;;  %v757_v46 = vrot.slane %v359_v39, 4 }
  0x83   : > { %13869 = vst [vmem:[#allocation38_spill] sm:$0xff] %v7154_v19  ;;  %13870 = vst [vmem:[#allocation39_spill] sm:$0xff] %v7156_v35  ;;  %v362_v44 = vld [vmem:[#allocation2 + $0xa8] sm:$0xff]  ;;  %v7191_v7 = vsel %vm750_vm0, %v753_v58, %v349_v61  ;;  %v355_v20 = vld [vmem:[#allocation2 + $0x70] sm:$0xf]  ;;  %v616_v61 = vmul.f32 %v7005_v22, %v7148_v10 }
  0x84   : > { %329 = vst [vmem:[#allocation2 + $0x122] sm:$0xff] %v251_v8  ;;  %13871 = vst [vmem:[#allocation40_spill] sm:$0xff] %v7165_v63  ;;  %v352_v8 = vld [vmem:[#allocation2 + $0x58] sm:$0xf]  ;;  %v365_v24 = vld [vmem:[#allocation2 + $0xc0] sm:$0xff]  ;;  %v758_v39 = vrot.slane %v362_v44, 4  ;;  %v7199_v49 = vsel %vm750_vm0, %v755_v51, %v355_v20  ;;  %v578_v51 = vadd.f32 %v546_v25, %v7016_v27 }
  0x85   : > { %13872 = vst [vmem:[#allocation41_spill] sm:$0xff] %v7172_v54  ;;  %13873 = vst [vmem:[#allocation42_spill] sm:$0xff] %v7176_v55  ;;  %v7194_v6 = vsel %vm750_vm0, %v754_v47, %v352_v8  ;;  %v358_v43 = vld [vmem:[#allocation2 + $0x88] sm:$0xf]  ;;  %v361_v33 = vld [vmem:[#allocation2 + $0xa0] sm:$0xf] }
  0x86   : > { %13874 = vst [vmem:[#allocation43_spill] sm:$0xff] %v7186_v15  ;;  %13875 = vst [vmem:[#allocation44_spill] sm:$0xff] %v7191_v7  ;;  %v7202_v1 = vsel %vm750_vm0, %v756_v41, %v358_v43  ;;  %v364_v35 = vld [vmem:[#allocation2 + $0xb8] sm:$0xf]  ;;  %v759_v15 = vrot.slane %v365_v24, 4  ;;  %v7206_v47 = vld [vmem:[#allocation2 + $0x68] sm:$0xff]  ;;  %v7209_v58 = vsel %vm750_vm0, %v757_v46, %v361_v33  ;;  %v648_v5 = vadd.f32 %v616_v61, %v578_v51 }
  0x87   : > { %13876 = vst [vmem:[#allocation45_spill] sm:$0xff] %v7194_v6  ;;  %13877 = vst [vmem:[#allocation46_spill] sm:$0xff] %v7199_v49  ;;  %v368_v63 = vld [vmem:[#allocation2 + $0xd8] sm:$0xff]  ;;  %v7212_v44 = vsel %vm750_vm0, %v758_v39, %v364_v35  ;;  %v367_v20 = vld [vmem:[#allocation2 + $0xd0] sm:$0xf]  ;;  %v686_v35 = vmul.f32 %v7007_v23, %v7158_v38  ;;  %v1532_v51 = vmul.f32 %v7028_v32, %v7148_v10 }
  0x88   : > { %13878 = vst [vmem:[#allocation47_spill] sm:$0xff] %v7202_v1  ;;  %13879 = vst [vmem:[#allocation48_spill] sm:$0xff] %v7209_v58  ;;  %v760_v41 = vrot.slane %v368_v63, 4  ;;  %v371_v43 = vld [vmem:[#allocation2 + $0xf0] sm:$0xff]  ;;  %v7218_v8 = vsel %vm750_vm0, %v759_v15, %v367_v20  ;;  %v370_v1 = vld [vmem:[#allocation2 + $0xe8] sm:$0xf]  ;;  %v1287_v63 = vmul.f32 %v7167_v30, %v7146_v9  ;;  %v7228_v15 = vmul.f32 %v7167_v30, %v7188_v0 }
  0x89   : > { %13880 = vst [vmem:[#allocation49_spill] sm:$0xff] %v7212_v44  ;;  %v7215_v24 = vld [vmem:[#allocation6 + $0x12] ss:$0 sm:$0xff]  ;;  %13882 = vst [vmem:[#allocation51_spill] sm:$0xff] %v7218_v8  ;;  %v373_v40 = vld [vmem:[#allocation2 + $0x100] sm:$0xf] }
  0x8a   : > { %13881 = vst [vmem:[#allocation50_spill] sm:$0xff] %v7215_v24  ;;  %v761_v46 = vrot.slane %v371_v43, 4  ;;  %v374_v33 = vld [vmem:[#allocation2 + $0x108] sm:$0xff]  ;;  %v253_v58 = vld [vmem:[%s6963_s29 + $0xb0] sm:$0xff]  ;;  %13883 = vst [vmem:[#allocation52_spill] sm:$0xff] %v7228_v15  ;;  %v7231_v20 = vsel %vm750_vm0, %v760_v41, %v370_v1  ;;  %v1383_v61 = vrot.slane %v1287_v63, 1 }
  0x8b   : > { %v762_v39 = vrot.slane %v374_v33, 4  ;;  %v377_v25 = vld [vmem:[#allocation2 + $0x120] sm:$0xff]  ;;  %v252_v44 = vld [vmem:[%s6963_s29 + $0xa8] sm:$0xff]  ;;  %13884 = vst [vmem:[#allocation53_spill] sm:$0xff] %v7231_v20  ;;  %v376_v8 = vld [vmem:[#allocation2 + $0x118] sm:$0xf] }
  0x8c   : > { %v7234_v43 = vsel %vm750_vm0, %v761_v46, %v373_v40  ;;  %330 = vst [vmem:[#allocation2 + $0x12a] sm:$0xff] %v252_v44  ;;  %331 = vst [vmem:[#allocation2 + $0x13a] sm:$0xff] %v253_v58  ;;  %v254_v33 = vld [vmem:[%s6963_s29 + $0xb8] sm:$0xff]  ;;  %v255_v55 = vld [vmem:[%s6963_s29 + $0xc0] sm:$0xff]  ;;  %v763_v16 = vrot.slane %v377_v25, 4  ;;  %v718_v46 = vadd.f32 %v686_v35, %v648_v5  ;;  %v13215_v58 = vrot.slane %v7228_v15, 1 }
  0x8d   : > { %13885 = vst [vmem:[#allocation54_spill] sm:$0xff] %v7234_v43  ;;  %332 = vst [vmem:[#allocation2 + $0x142] sm:$0xff] %v254_v33  ;;  %v257_v1 = vld [vmem:[%s6963_s29 + $0xd0] sm:$0xff]  ;;  %v258_v40 = vld [vmem:[%s6963_s29 + $0xd8] sm:$0xff]  ;;  %v7247_v44 = vmul.f32 %v7028_v32, %v7196_v42  ;;  %v1628_v25 = vrot.slane %v1532_v51, 1  ;;  %v7259_v5 = vmul.f32 0.0, %v7062_v52  ;;  %v7262_v35 = vsel %vm750_vm0, %v762_v39, %v376_v8 }
  0x8e   : > { %333 = vst [vmem:[#allocation2 + $0x152] sm:$0xff] %v255_v55  ;;  %334 = vst [vmem:[#allocation2 + $0x15a] sm:$0xff] %v256_v56  ;;  %v259_v41 = vld [vmem:[%s6963_s29 + $0xe0] sm:$0xff]  ;;  %v260_v63 = vld [vmem:[%s6963_s29 + $0xe8] sm:$0xff]  ;;  %v1777_v56 = vmul.f32 %v7038_v37, %v7158_v38  ;;  %v7256_v55 = vmul.f32 %v7038_v37, %v7206_v47  ;;  %v1005_v33 = vadd.f32 %v6995_v17, %v718_v46  ;;  %v13890_v39 = vrot.slane %v7031_v34, 1 }
  0x8f   : > { %13886 = vst [vmem:[#allocation55_spill] sm:$0xff] %v7247_v44  ;;  %335 = vst [vmem:[#allocation2 + $0x16a] sm:$0xff] %v257_v1  ;;  %v261_v43 = vld [vmem:[%s6963_s29 + $0xf0] sm:$0xff]  ;;  %v262_v20 = vld [vmem:[%s6963_s29 + $0xf8] sm:$0xff]  ;;  %v13218_v51 = vrot.slane %v7247_v44, 1  ;;  %v2513_v1 = vmul.f32 %v7215_v24, %v7146_v9  ;;  %v7274_v8 = vmul.f32 %v7215_v24, %v7188_v0  ;;  %v7294_v34 = vmul.f32 %v7064_v53, %v7196_v42  ;;  %s6126_s29 = scalar_lea.sflag [#allocation5], %s6957_s11 }
  0x90   : > { %336 = vst [vmem:[#allocation2 + $0x172] sm:$0xff] %v258_v40  ;;  %337 = vst [vmem:[#allocation2 + $0x182] sm:$0xff] %v259_v41  ;;  %v1385_v40 = vsel %vm892_vm1, %v1383_v61, %v13215_v58  ;;  %v1873_v41 = vrot.slane %v1777_v56, 1  ;;  %v13217_v48 = vrot.slane %v7256_v55, 1  ;;  %v7311_v17 = vmul.f32 %v7100_v13, %v7206_v47 }
  0x91   : > { %13887 = vst [vmem:[#allocation56_spill] sm:$0xff] %v7256_v55  ;;  %13888 = vst [vmem:[#allocation57_spill] sm:$0xff] %v7262_v35  ;;  %v2609_v46 = vrot.slane %v2513_v1, 2  ;;  %v1630_v61 = vsel %vm892_vm1, %v1628_v25, %v13218_v51  ;;  %v13223_v58 = vrot.slane %v7274_v8, 2  ;;  %v7299_v35 = vmul.f32 %v7100_v13, %v7158_v38 }
  0x92   : > { %338 = vst [vmem:[#allocation2 + $0x18a] sm:$0xff] %v260_v63  ;;  %339 = vst [vmem:[#allocation2 + $0x19a] sm:$0xff] %v261_v43  ;;  %v7281_v63 = vmul.f32 %v7064_v53, %v7148_v10  ;;  %v7289_v56 = vsel %vm892_vm1, %v1873_v41, %v13217_v48 }
  0x93   : > { %340 = vst [vmem:[#allocation2 + $0x1a2] sm:$0xff] %v262_v20  ;;  %13889 = vst [vmem:[#allocation58_spill] sm:$0xff] %v7274_v8  ;;  %v1250_v20 = vadd.f32 %v13890_v39, %v1005_v33  ;;  %v379_v33 = vld [vmem:[#allocation2 + $0x130] sm:$0xf]  ;;  %v380_v1 = vld [vmem:[#allocation2 + $0x138] sm:$0xff]  ;;  %v7307_v51 = vsel %vm2118_vm2, %v2609_v46, %v13223_v58 }
  0x94   : > { %v7302_v25 = vsel %vm750_vm0, %v763_v16, %v379_v33  ;;  %v764_v41 = vrot.slane %v380_v1, 4 }
  0x95   : > { %v1495_v39 = vadd.f32 %v1385_v40, %v1250_v20  ;;  %13891 = vst [vmem:[#allocation59_spill] sm:$0xff] %v7302_v25  ;;  %v383_v48 = vld [vmem:[#allocation2 + $0x150] sm:$0xff]  ;;  %v382_v40 = vld [vmem:[#allocation2 + $0x148] sm:$0xf]  ;;  %v384_v43 = vld [vmem:[#allocation2 + $0x158] sm:$0xff] }
  0x96   : > { %v434_v20 = vmul.f32 %v6973_v2, %v383_v48  ;;  %v765_v55 = vrot.slane %v383_v48, 4  ;;  %v386_v44 = vld [vmem:[#allocation2 + $0x168] sm:$0xff]  ;;  %v7318_v33 = vsel %vm750_vm0, %v764_v41, %v382_v40  ;;  %v385_v1 = vld [vmem:[#allocation2 + $0x160] sm:$0xf]  ;;  %v435_v46 = vmul.f32 %v6973_v2, %v384_v43 }
  0x97   : > { %v7314_v15 = vadd.f32 %v1630_v61, %v1495_v39  ;;  %13892 = vst [vmem:[#allocation60_spill] sm:$0xff] %v7318_v33  ;;  %v7322_v58 = vmul.f32 %v6975_v3, %v384_v43  ;;  %v387_v25 = vld [vmem:[#allocation2 + $0x170] sm:$0xff]  ;;  %v504_v48 = vmul.f32 %v6987_v14, %v386_v44  ;;  %v841_v61 = vmul.f32 %v6975_v3, %v386_v44  ;;  %v389_v33 = vld [vmem:[#allocation2 + $0x180] sm:$0xff]  ;;  %v388_v11 = vld [vmem:[#allocation2 + $0x178] sm:$0xf] }
  0x98   : > { %v7326_v13 = vsel %vm750_vm0, %v765_v55, %v385_v1  ;;  %v2067_v39 = vmul.f32 %v6977_v4, %v386_v44  ;;  %v436_v40 = vmul.f32 %v6973_v2, %v386_v44  ;;  %v766_v16 = vrot.slane %v386_v44, 4 }
  0x99   : > { %13893 = vst [vmem:[#allocation61_spill] sm:$0xff] %v7322_v58  ;;  %13894 = vst [vmem:[#allocation62_spill] sm:$0xff] %v7326_v13  ;;  %v840_v41 = vmul.f32 %v6975_v3, %v7326_v13  ;;  %v437_v8 = vmul.f32 %v6973_v2, %v387_v25  ;;  %v505_v55 = vmul.f32 %v6987_v14, %v387_v25  ;;  %v968_v49 = vrot.slane %v841_v61, 1  ;;  %v390_v6 = vld [vmem:[#allocation2 + $0x188] sm:$0xff]  ;;  %v391_v27 = vld [vmem:[#allocation2 + $0x190] sm:$0xf] }
  0x9a   : > { %v536_v1 = vadd.f32 %v504_v48, %v434_v20  ;;  %v842_v53 = vmul.f32 %v6975_v3, %v387_v25  ;;  %v7339_v37 = vsel %vm750_vm0, %v766_v16, %v388_v11  ;;  %v2068_v13 = vmul.f32 %v6977_v4, %v387_v25 }
  0x9b   : > { %v966_v54 = vrot.slane %v840_v41, 1  ;;  %13895 = vst [vmem:[#allocation63_spill] sm:$0xff] %v7339_v37  ;;  %v843_v43 = vmul.f32 %v6975_v3, %v7339_v37  ;;  %v2069_v44 = vmul.f32 %v6977_v4, %v7339_v37  ;;  %v2194_v32 = vrot.slane %v2067_v39, 2 }
  0x9c   : > { %v506_v2 = vmul.f32 %v6987_v14, %v389_v33  ;;  %v13896_v20 = vrot.slane %v7322_v58, 1  ;;  %v537_v11 = vadd.f32 %v505_v55, %v435_v46  ;;  %v969_v16 = vrot.slane %v842_v53, 1 }
  0x9d   : > { %v1087_v61 = vmul.f32 %v7026_v31, %v389_v33  ;;  %v574_v25 = vmul.f32 %v7127_v50, %v389_v33  ;;  %v971_v41 = vrot.slane %v843_v43, 1  ;;  %v2195_v3 = vrot.slane %v2068_v13, 2 }
  0x9e   : > { %v7350_v48 = vsel %vm892_vm1, %v13896_v20, %v966_v54  ;;  %v2197_v23 = vrot.slane %v2069_v44, 2  ;;  %v2313_v4 = vmul.f32 %v7062_v52, %v389_v33  ;;  %v767_v39 = vrot.slane %v389_v33, 4 }
  0x9f   : > { %v507_v37 = vmul.f32 %v6987_v14, %v390_v6  ;;  %v538_v7 = vadd.f32 %v506_v2, %v436_v40  ;;  %v575_v58 = vmul.f32 %v7127_v50, %v390_v6  ;;  %v606_v54 = vadd.f32 %v574_v25, %v536_v1  ;;  %v393_v14 = vld [vmem:[#allocation2 + $0x1a0] sm:$0xff] }
  0xa0   : > { %v970_v46 = vsel %vm892_vm1, %v968_v49, %v969_v16  ;;  %v1088_v53 = vmul.f32 %v7026_v31, %v390_v6  ;;  %v7360_v55 = vsel %vm750_vm0, %v767_v39, %v391_v27  ;;  %v7363_v13 = vsel %vm892_vm1, %v969_v16, %v971_v41  ;;  %v392_v27 = vld [vmem:[#allocation2 + $0x198] sm:$0xff] }
  0xa1   : > { %13897 = vst [vmem:[#allocation64_spill] sm:$0xff] %v7360_v55  ;;  %v1213_v43 = vrot.slane %v1087_v61, 1  ;;  %v7366_v33 = vsel %vm2118_vm2, %v2194_v32, %v2195_v3  ;;  %v1089_v40 = vmul.f32 %v7026_v31, %v7360_v55  ;;  %v7371_v44 = vsel %vm2118_vm2, %v2195_v3, %v2197_v23 }
  0xa2   : > { %v2314_v49 = vmul.f32 %v7062_v52, %v390_v6  ;;  %v2315_v1 = vmul.f32 %v7062_v52, %v7360_v55  ;;  %v2439_v2 = vrot.slane %v2313_v4, 2  ;;  %v539_v20 = vadd.f32 %v507_v37, %v437_v8 }
  0xa3   : > { %v576_v16 = vmul.f32 %v7127_v50, %v392_v27  ;;  %v644_v61 = vmul.f32 %v7005_v22, %v392_v27  ;;  %v1214_v32 = vrot.slane %v1088_v53, 1  ;;  %v1216_v25 = vrot.slane %v1089_v40, 1 }
  0xa4   : > { %v1332_v41 = vmul.f32 %v7167_v30, %v392_v27  ;;  %v2440_v39 = vrot.slane %v2314_v49, 2  ;;  %v2442_v31 = vrot.slane %v2315_v1, 2  ;;  %v2558_v23 = vmul.f32 %v7215_v24, %v392_v27 }
  0xa5   : > { %v608_v3 = vadd.f32 %v576_v16, %v538_v7  ;;  %v676_v6 = vadd.f32 %v644_v61, %v606_v54  ;;  %v607_v19 = vadd.f32 %v575_v58, %v537_v11  ;;  %v1215_v55 = vsel %vm892_vm1, %v1213_v43, %v1214_v32  ;;  %v394_v7 = vld [vmem:[#allocation2 + $0x1a8] sm:$0xf] }
  0xa6   : > { %v1217_v37 = vsel %vm892_vm1, %v1214_v32, %v1216_v25  ;;  %v1458_v8 = vrot.slane %v1332_v41, 1  ;;  %v7387_v40 = vsel %vm2118_vm2, %v2439_v2, %v2440_v39  ;;  %v7390_v49 = vsel %vm2118_vm2, %v2440_v39, %v2442_v31 }
  0xa7   : > { %v678_v4 = vadd.f32 %v7019_v28, %v608_v3  ;;  %v7384_v53 = vadd.f32 %v7022_v29, %v676_v6  ;;  %v768_v54 = vrot.slane %v392_v27, 4  ;;  %v577_v58 = vmul.f32 %v7127_v50, %v393_v14 }
  0xa8   : > { %v645_v11 = vmul.f32 %v7005_v22, %v393_v14  ;;  %v1333_v43 = vmul.f32 %v7167_v30, %v393_v14  ;;  %v2684_v16 = vrot.slane %v2558_v23, 2  ;;  %v2559_v61 = vmul.f32 %v7215_v24, %v393_v14 }
  0xa9   : > { %13898 = vst [vmem:[#allocation65_spill] sm:$0xff] %v7384_v53  ;;  %v748_v1 = vadd.f32 %v7022_v29, %v678_v4  ;;  %v1985_v2 = vadd.f32 %v7289_v56, %v7314_v15  ;;  %v7400_v32 = vsel %vm750_vm0, %v768_v54, %v394_v7  ;;  %v609_v31 = vadd.f32 %v577_v58, %v539_v20  ;;  %v7415_v58 = vld [vmem:[#allocation6 + $0x13] ss:$0 sm:$0xff] }
  0xaa   : > { %13899 = vst [vmem:[#allocation66_spill] sm:$0xff] %v7400_v32  ;;  %v677_v25 = vadd.f32 %v645_v11, %v607_v19  ;;  %v1459_v27 = vrot.slane %v1333_v43, 1  ;;  %v1334_v39 = vmul.f32 %v7167_v30, %v7400_v32  ;;  %v2560_v3 = vmul.f32 %v7215_v24, %v7400_v32  ;;  %v13920_v32 = vld [vmem:[#allocation32_spill] sm:$0xff] }
  0xab   : > { %v1035_v41 = vadd.f32 %v970_v46, %v748_v1  ;;  %v2685_v6 = vrot.slane %v2559_v61, 2  ;;  %v679_v23 = vadd.f32 %v7019_v28, %v609_v31  ;;  %v2231_v15 = vadd.f32 %v6997_v18, %v1985_v2  ;;  %v7422_v2 = vld [vmem:[#allocation6 + $0xb] ss:$0 sm:$0xff] }
  0xac   : > { %v747_v14 = vadd.f32 %v7022_v29, %v677_v25  ;;  %v13900_v56 = vrot.slane %v7294_v34, 2  ;;  %v13901_v20 = vrot.slane %v7281_v63, 2  ;;  %v1460_v4 = vsel %vm892_vm1, %v1458_v8, %v1459_v27  ;;  %v7424_v63 = vld [vmem:[#allocation6 + $0x1b] ss:$0 sm:$0xff] }
  0xad   : > { %v1280_v46 = vadd.f32 %v1215_v55, %v1035_v41  ;;  %v1461_v7 = vrot.slane %v1334_v39, 1  ;;  %v2687_v54 = vrot.slane %v2560_v3, 2  ;;  %v749_v11 = vadd.f32 %v7022_v29, %v679_v23 }
  0xae   : > { %v2856_v19 = vsel %vm2118_vm2, %v13901_v20, %v13900_v56  ;;  %v2686_v28 = vsel %vm2118_vm2, %v2684_v16, %v2685_v6  ;;  %v13902_v43 = vrot.slane %v7259_v5, 2  ;;  %v13258_v61 = vrot.slane %v7311_v17, 2 }
  0xaf   : > { %v7427_v55 = vadd.f32 %v7350_v48, %v747_v14  ;;  %v1462_v8 = vsel %vm892_vm1, %v1459_v27, %v1461_v7  ;;  %v1525_v31 = vadd.f32 %v1460_v4, %v1280_v46  ;;  %v7431_v25 = vmul.f32 0.0, %v7422_v2 }
  0xb0   : > { %v2476_v1 = vadd.f32 %v13902_v43, %v2231_v15  ;;  %v1036_v29 = vadd.f32 %v7363_v13, %v749_v11  ;;  %v2688_v16 = vsel %vm2118_vm2, %v2685_v6, %v2687_v54  ;;  %v3739_v39 = vmul.f32 %v7415_v58, %v7146_v9 }
  0xb1   : > { %13903 = vst [vmem:[#allocation67_spill] sm:$0xff] %v7427_v55  ;;  %v13904_v3 = vrot.slane %v7036_v36, 1  ;;  %v13905_v48 = vrot.slane %v7299_v35, 2  ;;  %v7447_v14 = vmul.f32 %v7415_v58, %v7188_v0  ;;  %v3984_v13 = vmul.f32 %v7424_v63, %v7148_v10 }
  0xb2   : > { %v2721_v41 = vadd.f32 %v7307_v51, %v2476_v1  ;;  %v1281_v51 = vadd.f32 %v1217_v37, %v1036_v29  ;;  %v3835_v15 = vrot.slane %v3739_v39, 3  ;;  %v7453_v36 = vmul.f32 %v7424_v63, %v7196_v42  ;;  %v7469_v1 = vld [vmem:[#allocation6 + $0x14] ss:$0 sm:$0xff]  ;;  %v7476_v39 = vld [vmem:[#allocation6 + $0xc] ss:$0 sm:$0xff] }
  0xb3   : > { %v1770_v23 = vadd.f32 %v13904_v3, %v1525_v31  ;;  %v3101_v27 = vsel %vm2118_vm2, %v13905_v48, %v13258_v61  ;;  %v13257_v35 = vrot.slane %v7431_v25, 3  ;;  %v13256_v20 = vrot.slane %v7447_v14, 3 }
  0xb4   : > { %v2966_v6 = vadd.f32 %v2856_v19, %v2721_v41  ;;  %v4080_v46 = vrot.slane %v3984_v13, 3  ;;  %v1526_v4 = vadd.f32 %v1462_v8, %v1281_v51  ;;  %v13255_v54 = vrot.slane %v7453_v36, 3  ;;  %v7495_v13 = vld [vmem:[#allocation6 + $0x1c] ss:$0 sm:$0xff] }
  0xb5   : > { %v2015_v56 = vadd.f32 %v7073_v57, %v1770_v23  ;;  %v4229_v37 = vmul.f32 %v7134_v59, %v7158_v38  ;;  %v3837_v11 = vsel %vm3344_vm3, %v3835_v15, %v13256_v20  ;;  %v7467_v43 = vmul.f32 %v7134_v59, %v7206_v47  ;;  %v13915_v20 = vld [vmem:[#allocation46_spill] sm:$0xff] }
  0xb6   : > { %v3211_v7 = vadd.f32 %v3101_v27, %v2966_v6  ;;  %v1771_v8 = vadd.f32 %v7083_v62, %v1526_v4  ;;  %v7474_v41 = vrot.slane %v7163_v60, 4  ;;  %v4082_v3 = vsel %vm3344_vm3, %v4080_v46, %v13255_v54 }
  0xb7   : > { %v2261_v19 = vadd.f32 %v7366_v33, %v2015_v56  ;;  %v4325_v29 = vrot.slane %v4229_v37, 3  ;;  %v13253_v23 = vrot.slane %v7467_v43, 3  ;;  %v7484_v48 = vmul.f32 0.0, %v7476_v39 }
  0xb8   : > { %v3457_v31 = vadd.f32 %v7003_v21, %v3211_v7  ;;  %v2016_v62 = vadd.f32 %v7106_v26, %v1771_v8  ;;  %v4965_v60 = vmul.f32 %v7469_v1, %v7146_v9  ;;  %v7501_v26 = vld [vmem:[#allocation6 + $0x24] ss:$0 sm:$0xff]  ;;  %v13906_v37 = vrot.slane %v7098_v12, 2 }
  0xb9   : > { %v2506_v33 = vadd.f32 %v7387_v40, %v2261_v19  ;;  %v7493_v40 = vmul.f32 %v7469_v1, %v7188_v0  ;;  %v4327_v6 = vsel %vm3344_vm3, %v4325_v29, %v13253_v23  ;;  %v13266_v15 = vrot.slane %v7484_v48, 4 }
  0xba   : > { %v3702_v27 = vadd.f32 %v13257_v35, %v3457_v31  ;;  %v2262_v56 = vadd.f32 %v7371_v44, %v2016_v62  ;;  %v5061_v4 = vrot.slane %v4965_v60, 4  ;;  %v5210_v8 = vmul.f32 %v7495_v13, %v7148_v10  ;;  %v13916_v35 = vld [vmem:[#allocation24_spill] sm:$0xff] }
  0xbb   : > { %v2751_v51 = vadd.f32 %v2686_v28, %v2506_v33  ;;  %v13252_v7 = vrot.slane %v7493_v40, 4  ;;  %v4573_v28 = vsel %vm4570_vm4, %v7474_v41, %v7474_v41  ;;  %v7514_v31 = vmul.f32 %v7495_v13, %v7196_v42 }
  0xbc   : > { %v3947_v46 = vadd.f32 %v3837_v11, %v3702_v27  ;;  %v2507_v44 = vadd.f32 %v7390_v49, %v2262_v56  ;;  %v5455_v29 = vmul.f32 %v7501_v26, %v7158_v38  ;;  %v5306_v33 = vrot.slane %v5210_v8, 4 }
  0xbd   : > { %v2996_v19 = vadd.f32 %v13906_v37, %v2751_v51  ;;  %v5063_v12 = vsel %vm4570_vm4, %v5061_v4, %v13252_v7  ;;  %v13254_v62 = vrot.slane %v7514_v31, 4  ;;  %v7525_v27 = vmul.f32 %v7501_v26, %v7206_v47  ;;  %v13909_v7 = vld [vmem:[#allocation38_spill] sm:$0xff] }
  0xbe   : > { %v4192_v11 = vadd.f32 %v4082_v3, %v3947_v46  ;;  %v2752_v60 = vadd.f32 %v2688_v16, %v2507_v44  ;;  %v5551_v37 = vrot.slane %v5455_v29, 4  ;;  %v547_v49 = vmul.f32 %v7127_v50, %v7188_v0  ;;  %v13910_v44 = vld [vmem:[#allocation21_spill] sm:$0xff]  ;;  %v13911_v29 = vld [vmem:[#allocation44_spill] sm:$0xff] }
  0xbf   : > { %v13907_v3 = vrot.slane %v7124_v45, 2  ;;  %v5308_v46 = vsel %vm4570_vm4, %v5306_v33, %v13254_v62  ;;  %v13259_v4 = vrot.slane %v7525_v27, 4  ;;  %v617_v8 = vmul.f32 %v7005_v22, %v7196_v42  ;;  %v13914_v62 = vld [vmem:[#allocation23_spill] sm:$0xff] }
  0xc0   : > { %v4437_v51 = vadd.f32 %v4327_v6, %v4192_v11  ;;  %v2997_v16 = vadd.f32 %v13909_v7, %v2752_v60  ;;  %v579_v11 = vadd.f32 %v547_v49, %v13910_v44  ;;  %v1289_v23 = vmul.f32 %v7167_v30, %v13911_v29  ;;  %v13917_v7 = vld [vmem:[#allocation41_spill] sm:$0xff] }
  0xc1   : > { %v7531_v56 = vadd.f32 %v13907_v3, %v2996_v19  ;;  %v5553_v45 = vsel %vm4570_vm4, %v5551_v37, %v13259_v4  ;;  %v13912_v19 = vld [vmem:[#allocation19_spill] sm:$0xff]  ;;  %v13913_v3 = vld [vmem:[#allocation45_spill] sm:$0xff]  ;;  %v1779_v61 = vmul.f32 %v13916_v35, %v13915_v20  ;;  %v2515_v37 = vmul.f32 %v7215_v24, %v13911_v29  ;;  %v13919_v4 = vld [vmem:[#allocation28_spill] sm:$0xff] }
  0xc2   : > { %v4683_v6 = vadd.f32 %v4573_v28, %v4437_v51  ;;  %v687_v33 = vmul.f32 %v13912_v19, %v7206_v47  ;;  %v1534_v54 = vmul.f32 %v13914_v62, %v13913_v3  ;;  %v7553_v28 = vadd.f32 %v13917_v7, %v2997_v16 }
  0xc3   : > { %13908 = vst [vmem:[#allocation68_spill] sm:$0xff] %v7531_v56  ;;  %v649_v51 = vadd.f32 %v617_v8, %v579_v11  ;;  %v1386_v49 = vrot.slane %v1289_v23, 1  ;;  %v1876_v56 = vrot.slane %v1779_v61, 1  ;;  %v2760_v55 = vmul.f32 %v13919_v4, %v13913_v3  ;;  %v13924_v23 = vld [vmem:[#allocation52_spill] sm:$0xff]  ;;  %v13926_v11 = vld [vmem:[#allocation55_spill] sm:$0xff] }
  0xc4   : > { %13918 = vst [vmem:[#allocation38_spill] sm:$0xff] %v7553_v28  ;;  %v4928_v60 = vadd.f32 %v13266_v15, %v4683_v6  ;;  %v1631_v44 = vrot.slane %v1534_v54, 1  ;;  %v13921_v21 = vrot.slane %v13920_v32, 2  ;;  %v13922_v16 = vrot.slane %v7259_v5, 2  ;;  %v13923_v6 = vld [vmem:[#allocation33_spill] sm:$0xff]  ;;  %v13929_v5 = vld [vmem:[#allocation14_spill] sm:$0xff] }
  0xc5   : > { %v719_v53 = vadd.f32 %v687_v33, %v649_v51  ;;  %v3005_v8 = vmul.f32 %v13923_v6, %v13915_v20  ;;  %v13925_v54 = vrot.slane %v13924_v23, 1  ;;  %v13927_v15 = vrot.slane %v13926_v11, 1  ;;  %v13932_v23 = vld [vmem:[#allocation58_spill] sm:$0xff] }
  0xc6   : > { %v5173_v57 = vadd.f32 %v5063_v12, %v4928_v60  ;;  %v2368_v7 = vsel %vm2118_vm2, %v13922_v16, %v13921_v21  ;;  %v2612_v4 = vrot.slane %v2515_v37, 2  ;;  %v2857_v12 = vrot.slane %v2760_v55, 2  ;;  %v13928_v60 = vld [vmem:[#allocation26_spill] sm:$0xff]  ;;  %v13930_v16 = vld [vmem:[#allocation56_spill] sm:$0xff] }
  0xc7   : > { %v1387_v61 = vsel %vm892_vm1, %v13925_v54, %v1386_v49  ;;  %v1632_v28 = vsel %vm892_vm1, %v13927_v15, %v1631_v44  ;;  %v1006_v32 = vadd.f32 %v13928_v60, %v719_v53  ;;  %v3102_v51 = vrot.slane %v3005_v8, 2  ;;  %v13934_v53 = vld [vmem:[#allocation29_spill] sm:$0xff] }
  0xc8   : > { %v5418_v33 = vadd.f32 %v5308_v46, %v5173_v57  ;;  %v3496_v21 = vmul.f32 %v7422_v2, %v13929_v5  ;;  %v13931_v18 = vrot.slane %v13930_v16, 1  ;;  %v13933_v24 = vrot.slane %v13932_v23, 2 }
  0xc9   : > { %v3741_v15 = vmul.f32 %v7415_v58, %v13911_v29  ;;  %v3986_v57 = vmul.f32 %v7424_v63, %v13913_v3  ;;  %v1251_v46 = vadd.f32 %v13934_v53, %v1006_v32  ;;  %v13935_v44 = vrot.slane %v7294_v34, 2 }
  0xca   : > { %v1877_v6 = vsel %vm892_vm1, %v13931_v18, %v1876_v56  ;;  %v2613_v49 = vsel %vm2118_vm2, %v13933_v24, %v2612_v4  ;;  %v5663_v55 = vadd.f32 %v5553_v45, %v5418_v33  ;;  %v3593_v8 = vrot.slane %v3496_v21, 3  ;;  %v13936_v24 = vld [vmem:[#allocation42_spill] sm:$0xff] }
  0xcb   : > { %v2858_v37 = vsel %vm2118_vm2, %v13935_v44, %v2857_v12  ;;  %v3838_v54 = vrot.slane %v3741_v15, 3  ;;  %v4083_v18 = vrot.slane %v3986_v57, 3  ;;  %v4231_v56 = vmul.f32 %v7134_v59, %v13915_v20 }
  0xcc   : > { %v4574_v4 = vrot.slane %v13936_v24, 4  ;;  %v7594_v11 = vmul.f32 0.5, %v5663_v55  ;;  %v5727_v60 = vmul.f32 0.044715, %v5663_v55  ;;  %v1496_v16 = vadd.f32 %v1387_v61, %v1251_v46  ;;  %v13941_v46 = vld [vmem:[#allocation13_spill] sm:$0xff] }
  0xcd   : > { %v13937_v45 = vrot.slane %v7311_v17, 2  ;;  %v13938_v34 = vrot.slane %v7431_v25, 3  ;;  %v13939_v32 = vrot.slane %v7447_v14, 3  ;;  %v13940_v23 = vrot.slane %v7453_v36, 3 }
  0xce   : > { %v4328_v61 = vrot.slane %v4231_v56, 3  ;;  %v5759_v57 = vmul.f32 %v5727_v60, %v5663_v55  ;;  %v1741_v17 = vadd.f32 %v1632_v28, %v1496_v16  ;;  %v4967_v25 = vmul.f32 %v7469_v1, %v13911_v29 }
  0xcf   : > { %v3103_v33 = vsel %vm2118_vm2, %v13937_v45, %v3102_v51  ;;  %v7602_v12 = vsel %vm3344_vm3, %v13938_v34, %v3593_v8  ;;  %v7607_v21 = vsel %vm3344_vm3, %v13939_v32, %v3838_v54  ;;  %v7612_v15 = vsel %vm3344_vm3, %v13940_v23, %v4083_v18  ;;  %v13944_v34 = vld [vmem:[#allocation34_spill] sm:$0xff] }
  0xd0   : > { %v4722_v51 = vmul.f32 %v7476_v39, %v13929_v5  ;;  %v7620_v14 = vsel %vm4570_vm4, %v7474_v41, %v4574_v4  ;;  %v5212_v53 = vmul.f32 %v7495_v13, %v13913_v3  ;;  %v5457_v36 = vmul.f32 %v7501_v26, %v13915_v20  ;;  %v13943_v4 = vld [vmem:[#allocation12_spill] sm:$0xff] }
  0xd1   : > { %v478_v44 = vmul.f32 %v13941_v46, %v7146_v9  ;;  %v5791_v28 = vmul.f32 %v5759_v57, %v5663_v55  ;;  %v1986_v8 = vadd.f32 %v1877_v6, %v1741_v17  ;;  %v5064_v18 = vrot.slane %v4967_v25, 4 }
  0xd2   : > { %v4819_v54 = vrot.slane %v4722_v51, 4  ;;  %v13942_v56 = vrot.slane %v7467_v43, 3  ;;  %v5309_v41 = vrot.slane %v5212_v53, 4  ;;  %v548_v16 = vmul.f32 %v7127_v50, %v7148_v10  ;;  %v13948_v53 = vld [vmem:[#allocation40_spill] sm:$0xff] }
  0xd3   : > { %v510_v60 = vadd.f32 %v478_v44, %v13943_v4  ;;  %v5823_v45 = vadd.f32 %v5791_v28, %v5663_v55  ;;  %v2232_v32 = vadd.f32 %v13944_v34, %v1986_v8  ;;  %v13945_v23 = vrot.slane %v7484_v48, 4 }
  0xd4   : > { %v7631_v24 = vsel %vm3344_vm3, %v13942_v56, %v4328_v61  ;;  %v5554_v57 = vrot.slane %v5457_v36, 4  ;;  %v13946_v43 = vrot.slane %v7493_v40, 4  ;;  %v13947_v17 = vrot.slane %v7514_v31, 4  ;;  %v13949_v36 = vld [vmem:[#allocation22_spill] sm:$0xff] }
  0xd5   : > { %v7640_v6 = vsel %vm4570_vm4, %v13945_v23, %v4819_v54  ;;  %v580_v50 = vadd.f32 %v548_v16, %v510_v60  ;;  %v618_v55 = vmul.f32 %v7005_v22, %v7158_v38  ;;  %v5855_v25 = vmul.f32 0.7978846, %v5823_v45  ;;  %v7668_v22 = vld [vmem:[#allocation2 + $0x80] sm:$0xff] }
  0xd6   : > { %v7645_v61 = vsel %vm4570_vm4, %v13946_v43, %v5064_v18  ;;  %v7650_v51 = vsel %vm4570_vm4, %v13947_v17, %v5309_v41  ;;  %v2477_v48 = vadd.f32 %v2368_v7, %v2232_v32  ;;  %v688_v46 = vmul.f32 %v13912_v19, %v13948_v53  ;;  %13950 = vst [vmem:[#allocation21_spill] sm:$0xff] %v7668_v22  ;;  %v13952_v43 = vld [vmem:[#allocation15_spill] sm:$0xff] }
  0xd7   : > { %v1045_v40 = vmul.f32 %v13949_v36, %v7146_v9  ;;  %v650_v44 = vadd.f32 %v618_v55, %v580_v50  ;;  %v7660_v28 = vmul.f32 %v13949_v36, %v7188_v0  ;;  %v1290_v31 = vmul.f32 %v7167_v30, %v7148_v10  ;;  %v13953_v36 = vld [vmem:[#allocation43_spill] sm:$0xff] }
  0xd8   : > { %v7666_v8 = vmul.f32 %v7167_v30, %v7196_v42  ;;  %6329 = vtanh.f32 %v5855_v25  ;;  %v2722_v7 = vadd.f32 %v2613_v49, %v2477_v48  ;;  %v1535_v54 = vmul.f32 %v13914_v62, %v7158_v38 }
  0xd9   : > { %v1143_v19 = vrot.slane %v1045_v40, 1  ;;  %v720_v18 = vadd.f32 %v688_v46, %v650_v44  ;;  %v13285_v56 = vrot.slane %v7660_v28, 1  ;;  %v1388_v41 = vrot.slane %v1290_v31, 1  ;;  %v13954_v44 = vld [vmem:[#allocation50_spill] sm:$0xff] }
  0xda   : > { %v13282_v60 = vrot.slane %v7666_v8, 1  ;;  %v2967_v16 = vadd.f32 %v2858_v37, %v2722_v7  ;;  %v7676_v45 = vmul.f32 %v13914_v62, %v7206_v47  ;;  %v1633_v34 = vrot.slane %v1535_v54, 1 }
  0xdb   : > { %v1780_v32 = vmul.f32 %v13916_v35, %v13948_v53  ;;  %v13951_v49 = vrot.slane %v7525_v27, 4  ;;  %v1007_v17 = vadd.f32 %v13952_v43, %v720_v18  ;;  %v1145_v50 = vsel %vm892_vm1, %v1143_v19, %v13285_v56  ;;  %v13955_v19 = vld [vmem:[#allocation16_spill] sm:$0xff]  ;;  %v7888_v56 = vld [vmem:[#allocation6 + $0x21] ss:$0 sm:$0xff] }
  0xdc   : > { %v7691_v37 = vmul.f32 %v13916_v35, %v7668_v22  ;;  %v3212_v62 = vadd.f32 %v3103_v33, %v2967_v16  ;;  %v13281_v55 = vrot.slane %v7676_v45, 1  ;;  %v7699_v46 = vmul.f32 %v7062_v52, %v7188_v0  ;;  %13965 = vst [vmem:[#allocation32_spill] sm:$0xff] %v7888_v56 }
  0xdd   : > { %v7683_v23 = vsel %vm4570_vm4, %v13951_v49, %v5554_v57  ;;  %v1878_v25 = vrot.slane %v1780_v32, 1  ;;  %v1252_v48 = vadd.f32 %v1145_v50, %v1007_v17  ;;  %v2271_v57 = vmul.f32 %v7062_v52, %v7146_v9 }
  0xde   : > { %v13271_v27 = vrot.slane %v7691_v37, 1  ;;  %v3458_v40 = vadd.f32 %v13953_v36, %v3212_v62  ;;  %v1390_v35 = vsel %vm892_vm1, %v1388_v41, %v13282_v60  ;;  %v1635_v33 = vsel %vm892_vm1, %v1633_v34, %v13281_v55  ;;  %v13956_v34 = vld [vmem:[#allocation28_spill] sm:$0xff]  ;;  %v13957_v62 = vld [vmem:[#allocation33_spill] sm:$0xff]  ;;  %v7865_v60 = vld [vmem:[#allocation6 + $0x18] ss:$0 sm:$0xff] }
  0xdf   : > { %v2516_v31 = vmul.f32 %v13954_v44, %v7148_v10  ;;  %v1497_v7 = vadd.f32 %v1390_v35, %v1252_v48  ;;  %v2126_v54 = vsel %vm2118_vm2, %v13955_v19, %v13955_v19  ;;  %v2369_v52 = vrot.slane %v2271_v57, 2  ;;  %13961 = vst [vmem:[#allocation19_spill] sm:$0xff] %v7865_v60 }
  0xe0   : > { %v13275_v18 = vrot.slane %v7699_v46, 2  ;;  %v3703_v16 = vadd.f32 %v7602_v12, %v3458_v40  ;;  %v7717_v41 = vmul.f32 %v13954_v44, %v7196_v42  ;;  %v2761_v49 = vmul.f32 %v13956_v34, %v7158_v38 }
  0xe1   : > { %v2614_v32 = vrot.slane %v2516_v31, 2  ;;  %v1742_v43 = vadd.f32 %v1635_v33, %v1497_v7  ;;  %v1880_v17 = vsel %vm892_vm1, %v1878_v25, %v13271_v27  ;;  %v7726_v50 = vmul.f32 %v13956_v34, %v7206_v47  ;;  %v7740_v34 = vld [vmem:[%s13184_s2] ss:$0 sm:$0xff] }
  0xe2   : > { %v3006_v12 = vmul.f32 %v13957_v62, %v13948_v53  ;;  %v6330_v48 = vpop.eup %6329  ;;  %v3948_v57 = vadd.f32 %v7607_v21, %v3703_v16  ;;  %v13274_v36 = vrot.slane %v7717_v41, 2  ;;  %v2859_v40 = vrot.slane %v2761_v49, 2 }
  0xe3   : > { %v7734_v35 = vmul.f32 %v13957_v62, %v7668_v22  ;;  %v5919_v33 = vadd.f32 1.0, %v6330_v48  ;;  %v1987_v31 = vadd.f32 %v1880_v17, %v1742_v43  ;;  %v13273_v25 = vrot.slane %v7726_v50, 2 }
  0xe4   : > { %v3104_v7 = vrot.slane %v3006_v12, 2  ;;  %v4193_v27 = vadd.f32 %v7612_v15, %v3948_v57  ;;  %v2371_v21 = vsel %vm2118_vm2, %v2369_v52, %v13275_v18  ;;  %v2616_v16 = vsel %vm2118_vm2, %v2614_v32, %v13274_v36  ;;  %v7756_v15 = vld [vmem:[%s13185_s3] ss:$0 sm:$0xff] }
  0xe5   : > { %v13272_v49 = vrot.slane %v7734_v35, 2  ;;  %v5951_v43 = vmul.f32 %v5919_v33, %v7594_v11  ;;  %v2233_v17 = vadd.f32 %v2126_v54, %v1987_v31  ;;  %v3497_v62 = vmul.f32 %v7422_v2, %v7146_v9 }
  0xe6   : > { %v4438_v12 = vadd.f32 %v7631_v24, %v4193_v27  ;;  %v2861_v52 = vsel %vm2118_vm2, %v2859_v40, %v13273_v25  ;;  %v7767_v11 = vmul.f32 %v7422_v2, %v7188_v0  ;;  %v3742_v33 = vmul.f32 %v7415_v58, %v7148_v10 }
  0xe7   : > { %v3106_v32 = vsel %vm2118_vm2, %v3104_v7, %v13272_v49  ;;  %v5990_v54 = vmul.f32 %v7740_v34, %v5951_v43  ;;  %v2478_v48 = vadd.f32 %v2371_v21, %v2233_v17  ;;  %v3595_v57 = vrot.slane %v3497_v62, 3 }
  0xe8   : > { %v4684_v24 = vadd.f32 %v7620_v14, %v4438_v12  ;;  %v13280_v27 = vrot.slane %v7767_v11, 3  ;;  %v7776_v40 = vmul.f32 %v7415_v58, %v7196_v42  ;;  %v3987_v31 = vmul.f32 %v7424_v63, %v7158_v38  ;;  %v6393_v12 = vld [vmem:[#allocation2 + $0x32] sm:$0xff] }
  0xe9   : > { %v6029_v7 = vadd.f32 %v7756_v15, %v5990_v54  ;;  %v2723_v49 = vadd.f32 %v2616_v16, %v2478_v48  ;;  %v3840_v21 = vrot.slane %v3742_v33, 3  ;;  %v7783_v43 = vmul.f32 %v7424_v63, %v7206_v47  ;;  %v6394_v33 = vld [vmem:[#allocation2] sm:$0xff] }
  0xea   : > { %v4929_v14 = vadd.f32 %v7640_v6, %v4684_v24  ;;  %v13278_v17 = vrot.slane %v7776_v40, 3  ;;  %v4085_v62 = vrot.slane %v3987_v31, 3  ;;  %v4232_v54 = vmul.f32 %v7134_v59, %v13948_v53  ;;  %v13958_v24 = vld [vmem:[#allocation39_spill] sm:$0xff] }
  0xeb   : > { %v6061_v25 = vadd.f32 %v6393_v12, %v6029_v7  ;;  %v2968_v36 = vadd.f32 %v2861_v52, %v2723_v49  ;;  %v13276_v18 = vrot.slane %v7783_v43, 3  ;;  %v3597_v48 = vsel %vm3344_vm3, %v3595_v57, %v13280_v27 }
  0xec   : > { %v5174_v16 = vadd.f32 %v7645_v61, %v4929_v14  ;;  %v7796_v6 = vmul.f32 %v7134_v59, %v7668_v22  ;;  %v7799_v31 = vmul.f32 %v6394_v33, %v13958_v24  ;;  %v3842_v61 = vsel %vm3344_vm3, %v3840_v21, %v13278_v17  ;;  %v7852_v17 = vld [vmem:[#allocation6 + $0x8] ss:$0 sm:$0xff] }
  0xed   : > { %6093 = vst [vmem:[%s7803_s9] sm:$0xff] %v6061_v25  ;;  %v3213_v49 = vadd.f32 %v3106_v32, %v2968_v36  ;;  %v4330_v52 = vrot.slane %v4232_v54, 3  ;;  %v4723_v57 = vmul.f32 %v7476_v39, %v7146_v9  ;;  %v4087_v7 = vsel %vm3344_vm3, %v4085_v62, %v13276_v18  ;;  %v13959_v36 = vld [vmem:[#allocation18_spill] sm:$0xff] }
  0xee   : > { %v5419_v59 = vadd.f32 %v7650_v51, %v5174_v16  ;;  %v13277_v14 = vrot.slane %v7796_v6, 3  ;;  %v7818_v25 = vmul.f32 %v7476_v39, %v7188_v0  ;;  %v4968_v21 = vmul.f32 %v7469_v1, %v7148_v10 }
  0xef   : > { %v3459_v32 = vadd.f32 %v13959_v36, %v3213_v49  ;;  %v4821_v12 = vrot.slane %v4723_v57, 4  ;;  %v7825_v9 = vmul.f32 %v7469_v1, %v7196_v42  ;;  %v13294_v54 = vrot.slane %v7799_v31, 4 }
  0xf0   : > { %v5664_v51 = vadd.f32 %v7683_v23, %v5419_v59  ;;  %v4332_v62 = vsel %vm3344_vm3, %v4330_v52, %v13277_v14  ;;  %v13279_v16 = vrot.slane %v7818_v25, 4  ;;  %v5066_v24 = vrot.slane %v4968_v21, 4 }
  0xf1   : > { %v3704_v33 = vadd.f32 %v3597_v48, %v3459_v32  ;;  %v13284_v49 = vrot.slane %v7825_v9, 4  ;;  %v5213_v10 = vmul.f32 %v7495_v13, %v7158_v38  ;;  %v7840_v23 = vmul.f32 %v7495_v13, %v7206_v47 }
  0xf2   : > { %v7836_v57 = vmul.f32 0.5, %v5664_v51  ;;  %v5728_v18 = vmul.f32 0.044715, %v5664_v51  ;;  %v4823_v52 = vsel %vm4570_vm4, %v4821_v12, %v13279_v16  ;;  %v5458_v48 = vmul.f32 %v7501_v26, %v13948_v53  ;;  %v7859_v16 = vld [vmem:[#allocation6 + $0x10] ss:$0 sm:$0xff] }
  0xf3   : > { %v3949_v59 = vadd.f32 %v3842_v61, %v3704_v33  ;;  %v5311_v14 = vrot.slane %v5213_v10, 4  ;;  %v13283_v21 = vrot.slane %v7840_v23, 4  ;;  %v7850_v38 = vmul.f32 %v7501_v26, %v7668_v22 }
  0xf4   : > { %v5760_v32 = vmul.f32 %v5728_v18, %v5664_v51  ;;  %v479_v61 = vmul.f32 %v7852_v17, %v7188_v0  ;;  %v5068_v12 = vsel %vm4570_vm4, %v5066_v24, %v13284_v49  ;;  %v5556_v10 = vrot.slane %v5458_v48, 4 }
  0xf5   : > { %13960 = vst [vmem:[#allocation44_spill] sm:$0xff] %v7850_v38  ;;  %v4194_v33 = vadd.f32 %v4087_v7, %v3949_v59  ;;  %v549_v53 = vmul.f32 %v7859_v16, %v7196_v42  ;;  %v5557_v27 = vrot.slane %v7850_v38, 4  ;;  %v619_v0 = vmul.f32 %v7865_v60, %v7206_v47  ;;  %v7872_v59 = vld [vmem:[#allocation6 + $0x9] ss:$0 sm:$0xff] }
  0xf6   : > { %v5792_v18 = vmul.f32 %v5760_v32, %v5664_v51  ;;  %v511_v55 = vadd.f32 %v479_v61, %v13943_v4  ;;  %v5313_v24 = vsel %vm4570_vm4, %v5311_v14, %v13283_v21  ;;  %13962 = vst [vmem:[#allocation23_spill] sm:$0xff] %v7872_v59  ;;  %v1047_v42 = vmul.f32 %v7872_v59, %v13911_v29  ;;  %v7878_v61 = vld [vmem:[#allocation6 + $0x20] ss:$0 sm:$0xff] }
  0xf7   : > { %v4439_v7 = vadd.f32 %v4332_v62, %v4194_v33  ;;  %v1292_v48 = vmul.f32 %v7167_v30, %v13913_v3  ;;  %13963 = vst [vmem:[#allocation24_spill] sm:$0xff] %v7878_v61  ;;  %v689_v47 = vmul.f32 %v7878_v61, %v7668_v22  ;;  %v7882_v62 = vld [vmem:[#allocation6 + $0x19] ss:$0 sm:$0xff]  ;;  %v13966_v30 = vld [vmem:[#allocation47_spill] sm:$0xff] }
  0xf8   : > { %v5824_v32 = vadd.f32 %v5792_v18, %v5664_v51  ;;  %v581_v4 = vadd.f32 %v549_v53, %v511_v55  ;;  %13964 = vst [vmem:[#allocation41_spill] sm:$0xff] %v7882_v62  ;;  %v1537_v14 = vmul.f32 %v7882_v62, %v13915_v20  ;;  %v1146_v21 = vrot.slane %v1047_v42, 1 }
  0xf9   : > { %v4685_v33 = vadd.f32 %v13294_v54, %v4439_v7  ;;  %v1391_v49 = vrot.slane %v1292_v48, 1  ;;  %v1782_v55 = vmul.f32 %v7888_v56, %v13966_v30  ;;  %v5558_v53 = vsel %vm4570_vm4, %v5556_v10, %v5557_v27  ;;  %v13969_v48 = vld [vmem:[#allocation31_spill] sm:$0xff]  ;;  %v7905_v10 = vld [vmem:[#allocation6 + $0xa] ss:$0 sm:$0xff] }
  0xfa   : > { %v5856_v51 = vmul.f32 0.7978846, %v5824_v32  ;;  %v651_v18 = vadd.f32 %v619_v0, %v581_v4  ;;  %v1636_v22 = vrot.slane %v1537_v14, 1  ;;  %v13967_v62 = vrot.slane %v7660_v28, 1  ;;  %v7914_v0 = vld [vmem:[#allocation6 + $0x1a] ss:$0 sm:$0xff] }
  0xfb   : > { %v4930_v59 = vadd.f32 %v4823_v52, %v4685_v33  ;;  %v13968_v7 = vrot.slane %v7666_v8, 1  ;;  %v13970_v54 = vrot.slane %v13969_v48, 2  ;;  %v1881_v38 = vrot.slane %v1782_v55, 1 }
  0xfc   : > { %v1147_v61 = vsel %vm892_vm1, %v13967_v62, %v1146_v21  ;;  %6331 = vtanh.f32 %v5856_v51  ;;  %v721_v56 = vadd.f32 %v689_v47, %v651_v18  ;;  %v2273_v52 = vmul.f32 %v7905_v10, %v13911_v29  ;;  %v7919_v62 = vld [vmem:[#allocation6 + $0x22] ss:$0 sm:$0xff] }
  0xfd   : > { %v1392_v42 = vsel %vm892_vm1, %v13968_v7, %v1391_v49  ;;  %v2128_v32 = vsel %vm2118_vm2, %v13955_v19, %v13970_v54  ;;  %v5175_v28 = vadd.f32 %v5068_v12, %v4930_v59  ;;  %v13971_v21 = vrot.slane %v7676_v45, 1  ;;  %v13972_v54 = vld [vmem:[#allocation27_spill] sm:$0xff] }
  0xfe   : > { %v2518_v49 = vmul.f32 %v13954_v44, %v13913_v3  ;;  %v2763_v19 = vmul.f32 %v7914_v0, %v13915_v20  ;;  %v1008_v4 = vadd.f32 %v13972_v54, %v721_v56  ;;  %v2372_v47 = vrot.slane %v2273_v52, 2  ;;  %v7923_v59 = vld [vmem:[#allocation6 + $0x3] ss:$0 sm:$0xff] }
  0xff   : > { %v1637_v8 = vsel %vm892_vm1, %v13971_v21, %v1636_v22  ;;  %v3008_v12 = vmul.f32 %v7919_v62, %v13966_v30  ;;  %v3253_v22 = vmul.f32 %v7923_v59, %v13929_v5  ;;  %v5420_v45 = vadd.f32 %v5313_v24, %v5175_v28 }
 0x100   : > { %v2617_v44 = vrot.slane %v2518_v49, 2  ;;  %v2862_v14 = vrot.slane %v2763_v19, 2  ;;  %v3499_v33 = vmul.f32 %v7422_v2, %v13911_v29  ;;  %v1253_v55 = vadd.f32 %v1147_v61, %v1008_v4 }
 0x101   : > { %v13973_v56 = vrot.slane %v7691_v37, 1  ;;  %v3107_v18 = vrot.slane %v3008_v12, 2  ;;  %v3353_v7 = vrot.slane %v3253_v22, 3  ;;  %v5665_v48 = vadd.f32 %v5558_v53, %v5420_v45  ;;  %v7960_v22 = vld [vmem:[#allocation6 + $0x4] ss:$0 sm:$0xff] }
 0x102   : > { %v13974_v52 = vrot.slane %v7699_v46, 2  ;;  %v13975_v54 = vrot.slane %v7717_v41, 2  ;;  %v13976_v28 = vrot.slane %v7726_v50, 2  ;;  %v1498_v61 = vadd.f32 %v1392_v42, %v1253_v55 }
 0x103   : > { %v1882_v51 = vsel %vm892_vm1, %v13973_v56, %v1881_v38  ;;  %v13977_v37 = vrot.slane %v7734_v35, 2  ;;  %v3598_v19 = vrot.slane %v3499_v33, 3  ;;  %v3744_v46 = vmul.f32 %v7415_v58, %v13913_v3  ;;  %v7956_v35 = vld [vmem:[#allocation6 + $0x23] ss:$0 sm:$0xff] }
 0x104   : > { %v2373_v21 = vsel %vm2118_vm2, %v13974_v52, %v2372_v47  ;;  %v2618_v24 = vsel %vm2118_vm2, %v13975_v54, %v2617_v44  ;;  %v2863_v49 = vsel %vm2118_vm2, %v13976_v28, %v2862_v14  ;;  %v7948_v53 = vmul.f32 0.5, %v5665_v48 }
 0x105   : > { %v7944_v38 = vsel %vm2118_vm2, %v13977_v37, %v3107_v18  ;;  %v5729_v4 = vmul.f32 0.044715, %v5665_v48  ;;  %v7952_v41 = vsel %vm3344_vm3, %v13959_v36, %v3353_v7  ;;  %v3989_v50 = vmul.f32 %v7424_v63, %v13915_v20 }
 0x106   : > { %v1743_v42 = vadd.f32 %v1637_v8, %v1498_v61  ;;  %v3843_v47 = vrot.slane %v3744_v46, 3  ;;  %v4234_v12 = vmul.f32 %v7956_v35, %v13966_v30  ;;  %v4479_v45 = vmul.f32 %v7960_v22, %v13929_v5  ;;  %v6332_v8 = vpop.eup %6331 }
 0x107   : > { %v5761_v44 = vmul.f32 %v5729_v4, %v5665_v48  ;;  %v4088_v14 = vrot.slane %v3989_v50, 3  ;;  %v4725_v36 = vmul.f32 %v7476_v39, %v13911_v29  ;;  %v4970_v33 = vmul.f32 %v7469_v1, %v13913_v3 }
 0x108   : > { %v1988_v55 = vadd.f32 %v1882_v51, %v1743_v42  ;;  %v13978_v56 = vrot.slane %v7767_v11, 3  ;;  %v4333_v7 = vrot.slane %v4234_v12, 3  ;;  %v4579_v52 = vrot.slane %v4479_v45, 4 }
 0x109   : > { %v5920_v54 = vadd.f32 1.0, %v6332_v8  ;;  %v5793_v28 = vmul.f32 %v5761_v44, %v5665_v48  ;;  %v13979_v5 = vrot.slane %v7776_v40, 3  ;;  %v4824_v37 = vrot.slane %v4725_v36, 4 }
 0x10a   : > { %v7971_v18 = vsel %vm3344_vm3, %v13978_v56, %v3598_v19  ;;  %v2234_v46 = vadd.f32 %v2128_v32, %v1988_v55  ;;  %v13980_v4 = vrot.slane %v7783_v43, 3  ;;  %v13981_v11 = vrot.slane %v7796_v6, 3 }
 0x10b   : > { %v7976_v61 = vsel %vm3344_vm3, %v13979_v5, %v3843_v47  ;;  %v5069_v50 = vrot.slane %v4970_v33, 4  ;;  %v5952_v42 = vmul.f32 %v5920_v54, %v7836_v57  ;;  %v5825_v12 = vadd.f32 %v5793_v28, %v5665_v48  ;;  %v8005_v57 = vld [vmem:[#allocation2 + $0x30] sm:$0xff] }
 0x10c   : > { %v7981_v51 = vsel %vm3344_vm3, %v13980_v4, %v4088_v14  ;;  %v7986_v19 = vsel %vm3344_vm3, %v13981_v11, %v4333_v7  ;;  %v13982_v40 = vrot.slane %v7799_v31, 4  ;;  %v5215_v43 = vmul.f32 %v7495_v13, %v13915_v20  ;;  %v8003_v14 = vld [vmem:[#allocation6] ss:$0 sm:$0xff]  ;;  %v8033_v11 = vld [vmem:[#allocation2 + $0x90] sm:$0xff] }
 0x10d   : > { %v2479_v32 = vadd.f32 %v2373_v21, %v2234_v46  ;;  %v13983_v45 = vrot.slane %v7818_v25, 4  ;;  %v5460_v44 = vmul.f32 %v7501_v26, %v13966_v30  ;;  %v410_v31 = vmul.f32 %v8005_v57, %v8003_v14  ;;  %v8010_v21 = vld [vmem:[#allocation2 + $0x48] sm:$0xff]  ;;  %13989 = vst [vmem:[#allocation14_spill] sm:$0xff] %v8033_v11 }
 0x10e   : > { %v7992_v47 = vsel %vm4570_vm4, %v13982_v40, %v4579_v52  ;;  %v5991_v48 = vmul.f32 %v7740_v34, %v5952_v42  ;;  %v5857_v36 = vmul.f32 0.7978846, %v5825_v12  ;;  %v5314_v33 = vrot.slane %v5215_v43, 4  ;;  %13984 = vst [vmem:[#allocation52_spill] sm:$0xff] %v8010_v21  ;;  %v8019_v52 = vld [vmem:[#allocation2 + $0x60] sm:$0xff] }
 0x10f   : > { %v7999_v6 = vsel %vm4570_vm4, %v13983_v45, %v4824_v37  ;;  %v480_v25 = vmul.f32 %v8010_v21, %v7852_v17  ;;  %v2724_v8 = vadd.f32 %v2618_v24, %v2479_v32  ;;  %v13985_v55 = vrot.slane %v7825_v9, 4  ;;  %13986 = vst [vmem:[#allocation55_spill] sm:$0xff] %v8019_v52  ;;  %v8024_v37 = vld [vmem:[#allocation2 + $0x78] sm:$0xff]  ;;  %v8037_v12 = vld [vmem:[#allocation6 + $0x1] ss:$0 sm:$0xff] }
 0x110   : > { %v5559_v7 = vrot.slane %v5460_v44, 4  ;;  %v550_v54 = vmul.f32 %v8019_v52, %v7859_v16  ;;  %v6030_v28 = vadd.f32 %v7756_v15, %v5991_v48  ;;  %6333 = vtanh.f32 %v5857_v36  ;;  %13987 = vst [vmem:[#allocation26_spill] sm:$0xff] %v8024_v37  ;;  %13991 = vst [vmem:[#allocation56_spill] sm:$0xff] %v8037_v12  ;;  %v6415_v43 = vld [vmem:[#allocation2 + $0x3a] sm:$0xff] }
 0x111   : > { %v8017_v56 = vsel %vm4570_vm4, %v13985_v55, %v5069_v50  ;;  %v512_v5 = vadd.f32 %v480_v25, %v410_v31  ;;  %v620_v24 = vmul.f32 %v8024_v37, %v7865_v60  ;;  %v2969_v46 = vadd.f32 %v2863_v49, %v2724_v8  ;;  %v13990_v50 = vld [vmem:[#allocation24_spill] sm:$0xff]  ;;  %v8041_v49 = vld [vmem:[#allocation2 + $0x38] sm:$0xff]  ;;  %v13993_v44 = vld [vmem:[#allocation23_spill] sm:$0xff] }
 0x112   : > { %v13988_v9 = vrot.slane %v7840_v23, 4  ;;  %v690_v42 = vmul.f32 %v8033_v11, %v13990_v50  ;;  %v802_v40 = vmul.f32 %v8037_v12, %v8005_v57  ;;  %v6062_v32 = vadd.f32 %v6415_v43, %v6030_v28  ;;  %v8056_v8 = vld [vmem:[#allocation6 + $0x11] ss:$0 sm:$0xff]  ;;  %v14003_v43 = vld [vmem:[#allocation32_spill] sm:$0xff] }
 0x113   : > { %v582_v45 = vadd.f32 %v550_v54, %v512_v5  ;;  %v8045_v23 = vmul.f32 %v8041_v49, %v8037_v12  ;;  %v1048_v31 = vmul.f32 %v8010_v21, %v13993_v44  ;;  %v3214_v48 = vadd.f32 %v7944_v38, %v2969_v46  ;;  %13996 = vst [vmem:[#allocation13_spill] sm:$0xff] %v8056_v8  ;;  %v8068_v46 = vld [vmem:[#allocation2 + $0x98] sm:$0xff] }
 0x114   : > { %v8031_v4 = vsel %vm4570_vm4, %v13988_v9, %v5314_v33  ;;  %v903_v36 = vrot.slane %v802_v40, 1  ;;  %v8050_v33 = vld [vmem:[#allocation2 + $0x50] sm:$0xff]  ;;  %v1293_v55 = vmul.f32 %v8056_v8, %v8019_v52  ;;  %6094 = vst [vmem:[%s7803_s9 + $0x8] sm:$0xff] %v6062_v32  ;;  %v8062_v9 = vld [vmem:[#allocation2 + $0x68] sm:$0xff]  ;;  %13998 = vst [vmem:[#allocation34_spill] sm:$0xff] %v8068_v46  ;;  %v8074_v30 = vsel %vm4570_vm4, %v5557_v27, %v5559_v7 }
 0x115   : > { %13992 = vst [vmem:[#allocation58_spill] sm:$0xff] %v8045_v23  ;;  %13994 = vst [vmem:[#allocation29_spill] sm:$0xff] %v8050_v33  ;;  %v8054_v25 = vmul.f32 %v8050_v33, %v13993_v44  ;;  %v652_v54 = vadd.f32 %v620_v24, %v582_v45  ;;  %v1148_v5 = vrot.slane %v1048_v31, 1  ;;  %v8066_v38 = vmul.f32 %v8062_v9, %v8056_v8  ;;  %v14000_v32 = vld [vmem:[#allocation41_spill] sm:$0xff] }
 0x116   : > { %13997 = vst [vmem:[#allocation12_spill] sm:$0xff] %v8062_v9  ;;  %v3460_v40 = vadd.f32 %v7952_v41, %v3214_v48  ;;  %v1538_v45 = vmul.f32 %v8024_v37, %v14000_v32  ;;  %v1393_v28 = vrot.slane %v1293_v55, 1  ;;  %v14001_v8 = vld [vmem:[#allocation21_spill] sm:$0xff]  ;;  %v14002_v48 = vrot.slane %v8045_v23, 1  ;;  %v8099_v23 = vld [vmem:[#allocation6 + $0x2] ss:$0 sm:$0xff] }
 0x117   : > { %13995 = vst [vmem:[#allocation42_spill] sm:$0xff] %v8054_v25  ;;  %v722_v31 = vadd.f32 %v690_v42, %v652_v54  ;;  %v8082_v44 = vmul.f32 %v14000_v32, %v14001_v8  ;;  %v1783_v24 = vmul.f32 %v8033_v11, %v14003_v43  ;;  %v14004_v42 = vrot.slane %v8054_v25, 1  ;;  %14005 = vst [vmem:[#allocation40_spill] sm:$0xff] %v8099_v23 }
 0x118   : > { %v3705_v41 = vadd.f32 %v7971_v18, %v3460_v40  ;;  %v905_v27 = vsel %vm892_vm1, %v903_v36, %v14002_v48  ;;  %v1638_v7 = vrot.slane %v1538_v45, 1  ;;  %v8096_v20 = vmul.f32 %v14003_v43, %v8068_v46 }
 0x119   : > { %v1009_v3 = vadd.f32 %v905_v27, %v722_v31  ;;  %v1150_v55 = vsel %vm892_vm1, %v1148_v5, %v14004_v42  ;;  %v13311_v54 = vrot.slane %v8082_v44, 1  ;;  %v1883_v40 = vrot.slane %v1783_v24, 1 }
 0x11a   : > { %v3950_v18 = vadd.f32 %v7976_v61, %v3705_v41  ;;  %v2028_v36 = vmul.f32 %v8099_v23, %v8005_v57  ;;  %v8105_v45 = vmul.f32 %v8099_v23, %v8041_v49  ;;  %v6334_v31 = vpop.eup %6333  ;;  %v14006_v48 = vrot.slane %v8066_v38, 1 }
 0x11b   : > { %v1254_v5 = vadd.f32 %v1150_v55, %v1009_v3  ;;  %v2274_v61 = vmul.f32 %v8010_v21, %v7905_v10  ;;  %v5921_v24 = vadd.f32 1.0, %v6334_v31  ;;  %v1640_v25 = vsel %vm892_vm1, %v1638_v7, %v13311_v54 }
 0x11c   : > { %v1395_v27 = vsel %vm892_vm1, %v1393_v28, %v14006_v48  ;;  %v4195_v41 = vadd.f32 %v7981_v51, %v3950_v18  ;;  %v2129_v23 = vrot.slane %v2028_v36, 2  ;;  %v13310_v3 = vrot.slane %v8105_v45, 2  ;;  %v8127_v18 = vld [vmem:[#allocation6 + $0x12] ss:$0 sm:$0xff] }
 0x11d   : > { %v1499_v43 = vadd.f32 %v1395_v27, %v1254_v5  ;;  %v8120_v55 = vmul.f32 %v8050_v33, %v7905_v10  ;;  %v2374_v28 = vrot.slane %v2274_v61, 2  ;;  %v5953_v48 = vmul.f32 %v5921_v24, %v7948_v53 }
 0x11e   : > { %v4440_v42 = vadd.f32 %v7986_v19, %v4195_v41  ;;  %v14007_v31 = vrot.slane %v8096_v20, 1  ;;  %v2519_v7 = vmul.f32 %v8127_v18, %v8019_v52  ;;  %v8134_v27 = vmul.f32 %v8127_v18, %v8062_v9 }
 0x11f   : > { %v1744_v36 = vadd.f32 %v1640_v25, %v1499_v43  ;;  %v13309_v5 = vrot.slane %v8120_v55, 2  ;;  %v2764_v53 = vmul.f32 %v8024_v37, %v7914_v0  ;;  %v5992_v19 = vmul.f32 %v7740_v34, %v5953_v48 }
 0x120   : > { %v1885_v51 = vsel %vm892_vm1, %v1883_v40, %v14007_v31  ;;  %v4686_v61 = vadd.f32 %v7992_v47, %v4440_v42  ;;  %v2619_v40 = vrot.slane %v2519_v7, 2  ;;  %v8142_v24 = vmul.f32 %v7914_v0, %v14001_v8 }
 0x121   : > { %v1989_v41 = vadd.f32 %v1885_v51, %v1744_v36  ;;  %v2131_v25 = vsel %vm2118_vm2, %v2129_v23, %v13310_v3  ;;  %v2376_v43 = vsel %vm2118_vm2, %v2374_v28, %v13309_v5  ;;  %v13315_v31 = vrot.slane %v8134_v27, 2  ;;  %v6422_v5 = vld [vmem:[#allocation2 + $0x4a] sm:$0xff] }
 0x122   : > { %v6031_v48 = vadd.f32 %v7756_v15, %v5992_v19  ;;  %v4931_v47 = vadd.f32 %v7999_v6, %v4686_v61  ;;  %v2864_v42 = vrot.slane %v2764_v53, 2  ;;  %v3009_v7 = vmul.f32 %v8033_v11, %v7919_v62 }
 0x123   : > { %v2235_v51 = vadd.f32 %v2131_v25, %v1989_v41  ;;  %v8158_v23 = vmul.f32 %v7919_v62, %v8068_v46  ;;  %v3254_v28 = vmul.f32 %v8005_v57, %v7923_v59  ;;  %v2621_v6 = vsel %vm2118_vm2, %v2619_v40, %v13315_v31 }
 0x124   : > { %v6063_v3 = vadd.f32 %v6422_v5, %v6031_v48  ;;  %v5176_v19 = vadd.f32 %v8017_v56, %v4931_v47  ;;  %v3109_v53 = vrot.slane %v3009_v7, 2  ;;  %v8169_v25 = vmul.f32 %v8041_v49, %v7923_v59 }
 0x125   : > { %v2480_v61 = vadd.f32 %v2376_v43, %v2235_v51  ;;  %v13313_v41 = vrot.slane %v8158_v23, 2  ;;  %v3355_v54 = vrot.slane %v3254_v28, 3  ;;  %v3500_v5 = vmul.f32 %v8010_v21, %v7422_v2 }
 0x126   : > { %6095 = vst [vmem:[%s7803_s9 + $0x10] sm:$0xff] %v6063_v3  ;;  %v5421_v36 = vadd.f32 %v8031_v4, %v5176_v19  ;;  %v8177_v56 = vmul.f32 %v8050_v33, %v7422_v2  ;;  %v3745_v40 = vmul.f32 %v8019_v52, %v7415_v58  ;;  %v14008_v48 = vrot.slane %v8142_v24, 2 }
 0x127   : > { %v2725_v43 = vadd.f32 %v2621_v6, %v2480_v61  ;;  %v13312_v7 = vrot.slane %v8169_v25, 3  ;;  %v8187_v4 = vmul.f32 %v8062_v9, %v7415_v58  ;;  %v3111_v2 = vsel %vm2118_vm2, %v3109_v53, %v13313_v41 }
 0x128   : > { %v2866_v47 = vsel %vm2118_vm2, %v2864_v42, %v14008_v48  ;;  %v5666_v3 = vadd.f32 %v8074_v30, %v5421_v36  ;;  %v3600_v51 = vrot.slane %v3500_v5, 3  ;;  %v13314_v28 = vrot.slane %v8177_v56, 3 }
 0x129   : > { %14009 = vst [vmem:[#allocation22_spill] sm:$0xff] %v8187_v4  ;;  %v2970_v19 = vadd.f32 %v2866_v47, %v2725_v43  ;;  %v3357_v42 = vsel %vm3344_vm3, %v3355_v54, %v13312_v7  ;;  %v3845_v6 = vrot.slane %v3745_v40, 3  ;;  %v3990_v61 = vmul.f32 %v8024_v37, %v7424_v63 }
 0x12a   : > { %v8199_v58 = vmul.f32 0.5, %v5666_v3  ;;  %v5730_v48 = vmul.f32 0.044715, %v5666_v3  ;;  %v13325_v30 = vrot.slane %v8187_v4, 3  ;;  %v8204_v36 = vmul.f32 %v7424_v63, %v14001_v8 }
 0x12b   : > { %v3215_v53 = vadd.f32 %v3111_v2, %v2970_v19  ;;  %v3602_v5 = vsel %vm3344_vm3, %v3600_v51, %v13314_v28  ;;  %v4090_v43 = vrot.slane %v3990_v61, 3  ;;  %v4235_v54 = vmul.f32 %v8033_v11, %v7956_v35 }
 0x12c   : > { %v5762_v40 = vmul.f32 %v5730_v48, %v5666_v3  ;;  %v13324_v47 = vrot.slane %v8204_v36, 3  ;;  %v8214_v7 = vmul.f32 %v7956_v35, %v8068_v46  ;;  %v4480_v63 = vmul.f32 %v8005_v57, %v7960_v22 }
 0x12d   : > { %v3461_v41 = vadd.f32 %v3357_v42, %v3215_v53  ;;  %v4335_v2 = vrot.slane %v4235_v54, 3  ;;  %v8220_v19 = vmul.f32 %v8041_v49, %v7960_v22  ;;  %v4726_v51 = vmul.f32 %v8010_v21, %v7476_v39 }
 0x12e   : > { %v5794_v61 = vmul.f32 %v5762_v40, %v5666_v3  ;;  %v3847_v48 = vsel %vm3344_vm3, %v3845_v6, %v13325_v30  ;;  %v4092_v28 = vsel %vm3344_vm3, %v4090_v43, %v13324_v47  ;;  %v13322_v57 = vrot.slane %v8214_v7, 3  ;;  %v14016_v30 = vld [vmem:[#allocation47_spill] sm:$0xff] }
 0x12f   : > { %v3706_v42 = vadd.f32 %v3602_v5, %v3461_v41  ;;  %v4581_v53 = vrot.slane %v4480_v63, 4  ;;  %v13321_v54 = vrot.slane %v8220_v19, 4  ;;  %v8234_v31 = vmul.f32 %v8050_v33, %v7476_v39 }
 0x130   : > { %v5826_v21 = vadd.f32 %v5794_v61, %v5666_v3  ;;  %v4826_v40 = vrot.slane %v4726_v51, 4  ;;  %v4971_v4 = vmul.f32 %v8019_v52, %v7469_v1  ;;  %v8240_v6 = vmul.f32 %v8062_v9, %v7469_v1 }
 0x131   : > { %v3951_v43 = vadd.f32 %v3847_v48, %v3706_v42  ;;  %v4337_v41 = vsel %vm3344_vm3, %v4335_v2, %v13322_v57  ;;  %v13319_v5 = vrot.slane %v8234_v31, 4  ;;  %v5216_v39 = vmul.f32 %v8024_v37, %v7495_v13  ;;  %v14013_v57 = vld [vmem:[#allocation23_spill] sm:$0xff] }
 0x132   : > { %14010 = vst [vmem:[#allocation15_spill] sm:$0xff] %v8240_v6  ;;  %v5858_v63 = vmul.f32 0.7978846, %v5826_v21  ;;  %v5071_v3 = vrot.slane %v4971_v4, 4  ;;  %v13320_v51 = vrot.slane %v8240_v6, 4  ;;  %v8251_v61 = vmul.f32 %v7495_v13, %v14001_v8 }
 0x133   : > { %v4196_v1 = vadd.f32 %v4092_v28, %v3951_v43  ;;  %v4583_v48 = vsel %vm4570_vm4, %v4581_v53, %v13321_v54  ;;  %v5316_v42 = vrot.slane %v5216_v39, 4  ;;  %v5461_v2 = vmul.f32 %v8033_v11, %v7501_v26  ;;  %v14012_v54 = vld [vmem:[#allocation45_spill] sm:$0xff] }
 0x134   : > { %14011 = vst [vmem:[#allocation43_spill] sm:$0xff] %v8251_v61  ;;  %6335 = vtanh.f32 %v5858_v63  ;;  %v4828_v21 = vsel %vm4570_vm4, %v4826_v40, %v13319_v5  ;;  %v13323_v4 = vrot.slane %v8251_v61, 4  ;;  %v8264_v13 = vmul.f32 %v7501_v26, %v8068_v46 }
 0x135   : > { %v4441_v28 = vadd.f32 %v4337_v41, %v4196_v1  ;;  %v5073_v53 = vsel %vm4570_vm4, %v5071_v3, %v13320_v51  ;;  %v411_v43 = vmul.f32 %v8041_v49, %v8003_v14  ;;  %v481_v39 = vmul.f32 %v8050_v33, %v7852_v17 }
 0x136   : > { %v5318_v40 = vsel %vm4570_vm4, %v5316_v42, %v13323_v4  ;;  %v5561_v63 = vrot.slane %v5461_v2, 4  ;;  %v551_v26 = vmul.f32 %v8062_v9, %v7859_v16  ;;  %v621_v3 = vmul.f32 %v7865_v60, %v14001_v8  ;;  %v14014_v2 = vld [vmem:[#allocation46_spill] sm:$0xff]  ;;  %v14015_v4 = vld [vmem:[#allocation13_spill] sm:$0xff]  ;;  %v14018_v8 = vld [vmem:[#allocation32_spill] sm:$0xff] }
 0x137   : > { %v4687_v41 = vadd.f32 %v4583_v48, %v4441_v28  ;;  %v513_v1 = vadd.f32 %v481_v39, %v411_v43  ;;  %v804_v49 = vmul.f32 %v8037_v12, %v13911_v29  ;;  %v691_v51 = vmul.f32 %v13990_v50, %v8068_v46  ;;  %v14017_v39 = vld [vmem:[#allocation48_spill] sm:$0xff] }
 0x138   : > { %v1050_v42 = vmul.f32 %v14013_v57, %v14012_v54  ;;  %v1295_v47 = vmul.f32 %v14015_v4, %v14014_v2  ;;  %v1540_v5 = vmul.f32 %v14000_v32, %v14016_v30  ;;  %v1785_v9 = vmul.f32 %v14018_v8, %v14017_v39  ;;  %v14019_v46 = vld [vmem:[#allocation40_spill] sm:$0xff]  ;;  %v14021_v32 = vld [vmem:[#allocation58_spill] sm:$0xff] }
 0x139   : > { %v4932_v48 = vadd.f32 %v4828_v21, %v4687_v41  ;;  %v583_v28 = vadd.f32 %v551_v26, %v513_v1  ;;  %v906_v43 = vrot.slane %v804_v49, 1  ;;  %v2030_v50 = vmul.f32 %v14019_v46, %v13911_v29  ;;  %v14023_v41 = vld [vmem:[#allocation42_spill] sm:$0xff] }
 0x13a   : > { %v1151_v33 = vrot.slane %v1050_v42, 1  ;;  %v1396_v12 = vrot.slane %v1295_v47, 1  ;;  %v1641_v11 = vrot.slane %v1540_v5, 1  ;;  %v14020_v57 = vrot.slane %v8264_v13, 4 }
 0x13b   : > { %v5177_v60 = vadd.f32 %v5073_v53, %v4932_v48  ;;  %v653_v61 = vadd.f32 %v621_v3, %v583_v28  ;;  %v1886_v6 = vrot.slane %v1785_v9, 1  ;;  %v14022_v21 = vrot.slane %v14021_v32, 1 }
 0x13c   : > { %v5563_v4 = vsel %vm4570_vm4, %v5561_v63, %v14020_v57  ;;  %v14024_v1 = vrot.slane %v14023_v41, 1  ;;  %v14025_v47 = vrot.slane %v8066_v38, 1  ;;  %v2132_v42 = vrot.slane %v2030_v50, 2 }
 0x13d   : > { %v907_v26 = vsel %vm892_vm1, %v14022_v21, %v906_v43  ;;  %v5422_v53 = vadd.f32 %v5318_v40, %v5177_v60  ;;  %v723_v48 = vadd.f32 %v691_v51, %v653_v61  ;;  %v14026_v46 = vrot.slane %v8082_v44, 1 }
 0x13e   : > { %v1152_v49 = vsel %vm892_vm1, %v14024_v1, %v1151_v33  ;;  %v1397_v5 = vsel %vm892_vm1, %v14025_v47, %v1396_v12  ;;  %v2276_v9 = vmul.f32 %v7905_v10, %v14012_v54  ;;  %v6336_v32 = vpop.eup %6335  ;;  %v14027_v63 = vrot.slane %v8096_v20, 1 }
 0x13f   : > { %v1642_v57 = vsel %vm892_vm1, %v14026_v46, %v1641_v11  ;;  %v2521_v33 = vmul.f32 %v8127_v18, %v14014_v2  ;;  %v2766_v50 = vmul.f32 %v7914_v0, %v14016_v30  ;;  %v3011_v60 = vmul.f32 %v7919_v62, %v14017_v39 }
 0x140   : > { %v1887_v3 = vsel %vm892_vm1, %v14027_v63, %v1886_v6  ;;  %v5922_v12 = vadd.f32 1.0, %v6336_v32  ;;  %v5667_v44 = vadd.f32 %v5563_v4, %v5422_v53  ;;  %v1010_v11 = vadd.f32 %v907_v26, %v723_v48  ;;  %v8343_v32 = vld [vmem:[#allocation6 + $0x13] ss:$0 sm:$0xff]  ;;  %v8347_v63 = vld [vmem:[#allocation6 + $0x1b] ss:$0 sm:$0xff] }
 0x141   : > { %v2377_v38 = vrot.slane %v2276_v9, 2  ;;  %v14028_v46 = vrot.slane %v8105_v45, 2  ;;  %v2622_v20 = vrot.slane %v2521_v33, 2  ;;  %v2867_v61 = vrot.slane %v2766_v50, 2  ;;  %v8339_v9 = vld [vmem:[#allocation6 + $0xb] ss:$0 sm:$0xff] }
 0x142   : > { %v3256_v6 = vmul.f32 %v7923_v59, %v13911_v29  ;;  %v5954_v40 = vmul.f32 %v5922_v12, %v8199_v58  ;;  %v5731_v28 = vmul.f32 0.044715, %v5667_v44  ;;  %v1255_v43 = vadd.f32 %v1152_v49, %v1010_v11  ;;  %14032 = vst [vmem:[#allocation50_spill] sm:$0xff] %v8343_v32  ;;  %14033 = vst [vmem:[#allocation16_spill] sm:$0xff] %v8347_v63 }
 0x143   : > { %v2133_v51 = vsel %vm2118_vm2, %v14028_v46, %v2132_v42  ;;  %v3112_v21 = vrot.slane %v3011_v60, 2  ;;  %v8327_v41 = vmul.f32 0.5, %v5667_v44  ;;  %v14029_v4 = vrot.slane %v8120_v55, 2 }
 0x144   : > { %v14030_v45 = vrot.slane %v8134_v27, 2  ;;  %v14031_v47 = vrot.slane %v8142_v24, 2  ;;  %v5993_v53 = vmul.f32 %v7740_v34, %v5954_v40  ;;  %v5763_v58 = vmul.f32 %v5731_v28, %v5667_v44 }
 0x145   : > { %v2378_v26 = vsel %vm2118_vm2, %v14029_v4, %v2377_v38  ;;  %v1500_v48 = vadd.f32 %v1397_v5, %v1255_v43  ;;  %v3358_v49 = vrot.slane %v3256_v6, 3  ;;  %v3502_v55 = vmul.f32 %v8339_v9, %v14012_v54  ;;  %v6426_v6 = vld [vmem:[#allocation2 + $0x52] sm:$0xff] }
 0x146   : > { %v2623_v1 = vsel %vm2118_vm2, %v14030_v45, %v2622_v20  ;;  %v2868_v42 = vsel %vm2118_vm2, %v14031_v47, %v2867_v61  ;;  %v3747_v27 = vmul.f32 %v8343_v32, %v14014_v2  ;;  %v3992_v24 = vmul.f32 %v8347_v63, %v14016_v30 }
 0x147   : > { %v4237_v33 = vmul.f32 %v7956_v35, %v14017_v39  ;;  %v6032_v5 = vadd.f32 %v7756_v15, %v5993_v53  ;;  %v5795_v50 = vmul.f32 %v5763_v58, %v5667_v44  ;;  %v1745_v60 = vadd.f32 %v1642_v57, %v1500_v48 }
 0x148   : > { %v14034_v12 = vrot.slane %v8158_v23, 2  ;;  %v3603_v38 = vrot.slane %v3502_v55, 3  ;;  %v3848_v46 = vrot.slane %v3747_v27, 3  ;;  %v4093_v20 = vrot.slane %v3992_v24, 3  ;;  %v8376_v55 = vld [vmem:[#allocation6 + $0xc] ss:$0 sm:$0xff] }
 0x149   : > { %v4338_v61 = vrot.slane %v4237_v33, 3  ;;  %v6064_v40 = vadd.f32 %v6426_v6, %v6032_v5  ;;  %v5827_v28 = vadd.f32 %v5795_v50, %v5667_v44  ;;  %v1990_v43 = vadd.f32 %v1887_v3, %v1745_v60  ;;  %v8384_v24 = vld [vmem:[#allocation6 + $0x1c] ss:$0 sm:$0xff]  ;;  %v8388_v33 = vld [vmem:[#allocation6 + $0x24] ss:$0 sm:$0xff]  ;;  %v14040_v5 = vld [vmem:[#allocation52_spill] sm:$0xff] }
 0x14a   : > { %v3113_v11 = vsel %vm2118_vm2, %v14034_v12, %v3112_v21  ;;  %v4482_v4 = vmul.f32 %v7960_v22, %v13911_v29  ;;  %v14035_v45 = vrot.slane %v8169_v25, 3  ;;  %v14036_v57 = vrot.slane %v8177_v56, 3  ;;  %v14037_v21 = vld [vmem:[#allocation22_spill] sm:$0xff] }
 0x14b   : > { %v14038_v53 = vrot.slane %v14037_v21, 3  ;;  %v14039_v48 = vrot.slane %v8204_v36, 3  ;;  %6096 = vst [vmem:[%s7803_s9 + $0x18] sm:$0xff] %v6064_v40  ;;  %v5859_v29 = vmul.f32 0.7978846, %v5827_v28  ;;  %v2236_v44 = vadd.f32 %v2133_v51, %v1990_v43 }
 0x14c   : > { %v3359_v47 = vsel %vm3344_vm3, %v14035_v45, %v3358_v49  ;;  %v3604_v23 = vsel %vm3344_vm3, %v14036_v57, %v3603_v38  ;;  %v4584_v25 = vrot.slane %v4482_v4, 4  ;;  %v4728_v56 = vmul.f32 %v8376_v55, %v14012_v54  ;;  %v8380_v49 = vld [vmem:[#allocation6 + $0x14] ss:$0 sm:$0xff]  ;;  %v14044_v57 = vld [vmem:[#allocation15_spill] sm:$0xff] }
 0x14d   : > { %v8368_v58 = vsel %vm3344_vm3, %v14038_v53, %v3848_v46  ;;  %v8373_v3 = vsel %vm3344_vm3, %v14039_v48, %v4093_v20  ;;  %v4973_v27 = vmul.f32 %v8380_v49, %v14014_v2  ;;  %v5218_v36 = vmul.f32 %v8384_v24, %v14016_v30  ;;  %v14046_v48 = vld [vmem:[#allocation43_spill] sm:$0xff] }
 0x14e   : > { %v5463_v51 = vmul.f32 %v8388_v33, %v14017_v39  ;;  %v412_v50 = vmul.f32 %v14040_v5, %v8003_v14  ;;  %6337 = vtanh.f32 %v5859_v29  ;;  %v2481_v60 = vadd.f32 %v2378_v26, %v2236_v44  ;;  %v14048_v44 = vld [vmem:[#allocation19_spill] sm:$0xff] }
 0x14f   : > { %v14041_v12 = vrot.slane %v8214_v7, 3  ;;  %v4829_v46 = vrot.slane %v4728_v56, 4  ;;  %v5074_v20 = vrot.slane %v4973_v27, 4  ;;  %v5319_v6 = vrot.slane %v5218_v36, 4 }
 0x150   : > { %v5564_v40 = vrot.slane %v5463_v51, 4  ;;  %v482_v28 = vmul.f32 %v8019_v52, %v7852_v17  ;;  %v2726_v43 = vadd.f32 %v2623_v1, %v2481_v60  ;;  %v14042_v4 = vrot.slane %v8220_v19, 4  ;;  %v14051_v51 = vld [vmem:[#allocation56_spill] sm:$0xff] }
 0x151   : > { %v8397_v38 = vsel %vm3344_vm3, %v14041_v12, %v4338_v61  ;;  %v14043_v26 = vrot.slane %v8234_v31, 4  ;;  %v552_v61 = vmul.f32 %v8024_v37, %v7859_v16  ;;  %v14045_v21 = vrot.slane %v14044_v57, 4  ;;  %v14052_v12 = vld [vmem:[#allocation29_spill] sm:$0xff] }
 0x152   : > { %v8404_v45 = vsel %vm4570_vm4, %v14042_v4, %v4584_v25  ;;  %v14047_v1 = vrot.slane %v14046_v48, 4  ;;  %v514_v29 = vadd.f32 %v482_v28, %v412_v50  ;;  %v14049_v25 = vld [vmem:[#allocation14_spill] sm:$0xff]  ;;  %v2971_v56 = vadd.f32 %v2868_v42, %v2726_v43  ;;  %v14055_v28 = vld [vmem:[#allocation12_spill] sm:$0xff]  ;;  %v14058_v57 = vld [vmem:[#allocation21_spill] sm:$0xff] }
 0x153   : > { %v8409_v7 = vsel %vm4570_vm4, %v14043_v26, %v4829_v46  ;;  %v8416_v53 = vsel %vm4570_vm4, %v14045_v21, %v5074_v20  ;;  %v622_v31 = vmul.f32 %v14049_v25, %v14048_v44  ;;  %v14050_v27 = vrot.slane %v8264_v13, 4  ;;  %v14057_v13 = vld [vmem:[#allocation13_spill] sm:$0xff] }
 0x154   : > { %v8421_v19 = vsel %vm4570_vm4, %v14047_v1, %v5319_v6  ;;  %v805_v60 = vmul.f32 %v14051_v51, %v14040_v5  ;;  %v8434_v46 = vmul.f32 %v14052_v12, %v14051_v51  ;;  %v584_v20 = vadd.f32 %v552_v61, %v514_v29  ;;  %v14054_v6 = vld [vmem:[#allocation23_spill] sm:$0xff]  ;;  %v8449_v48 = vld [vmem:[#allocation2 + $0xb0] sm:$0xff]  ;;  %v8451_v1 = vld [vmem:[#allocation2 + $0xa8] sm:$0xff] }
 0x155   : > { %v8428_v36 = vsel %vm4570_vm4, %v14050_v27, %v5564_v40  ;;  %v1051_v50 = vmul.f32 %v8019_v52, %v14054_v6  ;;  %v8440_v4 = vmul.f32 %v14055_v28, %v14054_v6  ;;  %v1296_v42 = vmul.f32 %v14057_v13, %v8024_v37  ;;  %14059 = vst [vmem:[#allocation39_spill] sm:$0xff] %v8449_v48  ;;  %v14061_v29 = vld [vmem:[#allocation24_spill] sm:$0xff] }
 0x156   : > { %14053 = vst [vmem:[#allocation28_spill] sm:$0xff] %v8434_v46  ;;  %v3216_v40 = vadd.f32 %v3113_v11, %v2971_v56  ;;  %v908_v43 = vrot.slane %v805_v60, 1  ;;  %v13348_v26 = vrot.slane %v8434_v46, 1  ;;  %v8447_v21 = vmul.f32 %v14057_v13, %v14058_v57  ;;  %14060 = vst [vmem:[#allocation18_spill] sm:$0xff] %v8451_v1  ;;  %v14062_v60 = vld [vmem:[#allocation41_spill] sm:$0xff] }
 0x157   : > { %14056 = vst [vmem:[#allocation33_spill] sm:$0xff] %v8440_v4  ;;  %v654_v61 = vadd.f32 %v622_v31, %v584_v20  ;;  %v692_v27 = vmul.f32 %v8451_v1, %v14061_v29  ;;  %v1153_v39 = vrot.slane %v1051_v50, 1  ;;  %v1398_v56 = vrot.slane %v1296_v42, 1  ;;  %v14063_v20 = vld [vmem:[#allocation34_spill] sm:$0xff] }
 0x158   : > { %v3462_v6 = vadd.f32 %v3359_v47, %v3216_v40  ;;  %v910_v11 = vsel %vm892_vm1, %v908_v43, %v13348_v26  ;;  %v1541_v57 = vmul.f32 %v14049_v25, %v14062_v60  ;;  %v8464_v2 = vmul.f32 %v14062_v60, %v14063_v20  ;;  %v6338_v30 = vpop.eup %6337 }
 0x159   : > { %v724_v13 = vadd.f32 %v692_v27, %v654_v61  ;;  %v1786_v50 = vmul.f32 %v8451_v1, %v14018_v8  ;;  %v14064_v40 = vrot.slane %v8440_v4, 1  ;;  %v8473_v26 = vmul.f32 %v14018_v8, %v8449_v48 }
 0x15a   : > { %v3707_v47 = vadd.f32 %v3604_v23, %v3462_v6  ;;  %v1643_v42 = vrot.slane %v1541_v57, 1  ;;  %v5923_v61 = vadd.f32 1.0, %v6338_v30  ;;  %v13352_v31 = vrot.slane %v8464_v2, 1  ;;  %v14065_v23 = vld [vmem:[#allocation40_spill] sm:$0xff] }
 0x15b   : > { %v1155_v43 = vsel %vm892_vm1, %v1153_v39, %v14064_v40  ;;  %v1011_v27 = vadd.f32 %v910_v11, %v724_v13  ;;  %v1888_v46 = vrot.slane %v1786_v50, 1  ;;  %v2031_v6 = vmul.f32 %v14065_v23, %v14040_v5 }
 0x15c   : > { %v3952_v60 = vadd.f32 %v8368_v58, %v3707_v47  ;;  %v8482_v39 = vmul.f32 %v14065_v23, %v14052_v12  ;;  %v5955_v57 = vmul.f32 %v5923_v61, %v8327_v41  ;;  %v14066_v30 = vrot.slane %v8447_v21, 1 }
 0x15d   : > { %v1256_v40 = vadd.f32 %v1155_v43, %v1011_v27  ;;  %v2277_v11 = vmul.f32 %v8019_v52, %v7905_v10  ;;  %v1645_v50 = vsel %vm892_vm1, %v1643_v42, %v13352_v31  ;;  %v2134_v47 = vrot.slane %v2031_v6, 2  ;;  %v8506_v42 = vld [vmem:[#allocation2 + $0x80] sm:$0xff] }
 0x15e   : > { %v1400_v13 = vsel %vm892_vm1, %v1398_v56, %v14066_v30  ;;  %v4197_v58 = vadd.f32 %v8373_v3, %v3952_v60  ;;  %v13357_v29 = vrot.slane %v8482_v39, 2  ;;  %v5994_v4 = vmul.f32 %v7740_v34, %v5955_v57  ;;  %14068 = vst [vmem:[#allocation31_spill] sm:$0xff] %v8506_v42 }
 0x15f   : > { %v1501_v41 = vadd.f32 %v1400_v13, %v1256_v40  ;;  %v8498_v43 = vmul.f32 %v14055_v28, %v7905_v10  ;;  %v2379_v56 = vrot.slane %v2277_v11, 2  ;;  %v14067_v27 = vrot.slane %v8473_v26, 1 }
 0x160   : > { %v4442_v61 = vadd.f32 %v8397_v38, %v4197_v58  ;;  %v2522_v60 = vmul.f32 %v8127_v18, %v8024_v37  ;;  %v8510_v34 = vmul.f32 %v8506_v42, %v8127_v18  ;;  %v6033_v6 = vadd.f32 %v7756_v15, %v5994_v4  ;;  %v6433_v58 = vld [vmem:[#allocation2 + $0x62] sm:$0xff] }
 0x161   : > { %v1890_v3 = vsel %vm892_vm1, %v1888_v46, %v14067_v27  ;;  %v1746_v57 = vadd.f32 %v1645_v50, %v1501_v41  ;;  %v13353_v40 = vrot.slane %v8498_v43, 2  ;;  %v2767_v38 = vmul.f32 %v14049_v25, %v7914_v0 }
 0x162   : > { %v4688_v46 = vadd.f32 %v8404_v45, %v4442_v61  ;;  %v2624_v30 = vrot.slane %v2522_v60, 2  ;;  %v13356_v13 = vrot.slane %v8510_v34, 2  ;;  %v8520_v11 = vmul.f32 %v7914_v0, %v14063_v20 }
 0x163   : > { %v6065_v27 = vadd.f32 %v6433_v58, %v6033_v6  ;;  %v1991_v31 = vadd.f32 %v1890_v3, %v1746_v57  ;;  %v2136_v15 = vsel %vm2118_vm2, %v2134_v47, %v13357_v29  ;;  %v2381_v4 = vsel %vm2118_vm2, %v2379_v56, %v13353_v40 }
 0x164   : > { %v4933_v45 = vadd.f32 %v8409_v7, %v4688_v46  ;;  %v2869_v50 = vrot.slane %v2767_v38, 2  ;;  %v13355_v41 = vrot.slane %v8520_v11, 2  ;;  %v3012_v61 = vmul.f32 %v8451_v1, %v7919_v62 }
 0x165   : > { %6097 = vst [vmem:[%s7803_s9 + $0x20] sm:$0xff] %v6065_v27  ;;  %v2237_v60 = vadd.f32 %v2136_v15, %v1991_v31  ;;  %v8535_v3 = vmul.f32 %v7919_v62, %v8449_v48  ;;  %v3257_v47 = vmul.f32 %v14040_v5, %v7923_v59  ;;  %v8541_v56 = vmul.f32 %v14052_v12, %v7923_v59 }
 0x166   : > { %v5178_v7 = vadd.f32 %v8416_v53, %v4933_v45  ;;  %v2626_v6 = vsel %vm2118_vm2, %v2624_v30, %v13356_v13  ;;  %v3114_v57 = vrot.slane %v3012_v61, 2  ;;  %v3503_v31 = vmul.f32 %v8339_v9, %v8019_v52 }
 0x167   : > { %v2482_v38 = vadd.f32 %v2381_v4, %v2237_v60  ;;  %v13354_v46 = vrot.slane %v8535_v3, 2  ;;  %v3360_v58 = vrot.slane %v3257_v47, 3  ;;  %v13360_v27 = vrot.slane %v8541_v56, 3 }
 0x168   : > { %v5423_v15 = vadd.f32 %v8421_v19, %v5178_v7  ;;  %v8554_v40 = vmul.f32 %v8339_v9, %v14055_v28  ;;  %v3605_v53 = vrot.slane %v3503_v31, 3  ;;  %v3748_v30 = vmul.f32 %v8343_v32, %v8024_v37 }
 0x169   : > { %v2727_v45 = vadd.f32 %v2626_v6, %v2482_v38  ;;  %v2871_v4 = vsel %vm2118_vm2, %v2869_v50, %v13355_v41  ;;  %v3116_v61 = vsel %vm2118_vm2, %v3114_v57, %v13354_v46  ;;  %v8566_v19 = vmul.f32 %v8506_v42, %v8343_v32 }
 0x16a   : > { %v5668_v60 = vadd.f32 %v8428_v36, %v5423_v15  ;;  %v13361_v47 = vrot.slane %v8554_v40, 3  ;;  %v3850_v7 = vrot.slane %v3748_v30, 3  ;;  %v3993_v6 = vmul.f32 %v8347_v63, %v14049_v25 }
 0x16b   : > { %v2972_v31 = vadd.f32 %v2871_v4, %v2727_v45  ;;  %v8575_v50 = vmul.f32 %v8347_v63, %v14063_v20  ;;  %v4238_v57 = vmul.f32 %v8451_v1, %v7956_v35  ;;  %v3362_v36 = vsel %vm3344_vm3, %v3360_v58, %v13360_v27 }
 0x16c   : > { %v8579_v46 = vmul.f32 0.5, %v5668_v60  ;;  %v5732_v41 = vmul.f32 0.044715, %v5668_v60  ;;  %v3607_v15 = vsel %vm3344_vm3, %v3605_v53, %v13361_v47  ;;  %v4095_v45 = vrot.slane %v3993_v6, 3 }
 0x16d   : > { %v3217_v30 = vadd.f32 %v3116_v61, %v2972_v31  ;;  %v8590_v13 = vmul.f32 %v7956_v35, %v8449_v48  ;;  %v4340_v38 = vrot.slane %v4238_v57, 3  ;;  %v4483_v63 = vmul.f32 %v14040_v5, %v7960_v22 }
 0x16e   : > { %v5764_v29 = vmul.f32 %v5732_v41, %v5668_v60  ;;  %v8596_v58 = vmul.f32 %v14052_v12, %v7960_v22  ;;  %v14070_v53 = vrot.slane %v8566_v19, 3  ;;  %v4729_v31 = vmul.f32 %v8376_v55, %v8019_v52 }
 0x16f   : > { %v3463_v27 = vadd.f32 %v3362_v36, %v3217_v30  ;;  %v13364_v6 = vrot.slane %v8590_v13, 3  ;;  %v4586_v41 = vrot.slane %v4483_v63, 4  ;;  %v8607_v5 = vmul.f32 %v8376_v55, %v14055_v28 }
 0x170   : > { %14069 = vst [vmem:[#allocation27_spill] sm:$0xff] %v8596_v58  ;;  %v3852_v61 = vsel %vm3344_vm3, %v3850_v7, %v14070_v53  ;;  %v5796_v47 = vmul.f32 %v5764_v29, %v5668_v60  ;;  %v14072_v36 = vrot.slane %v8575_v50, 3  ;;  %v4974_v53 = vmul.f32 %v8380_v49, %v8024_v37 }
 0x171   : > { %14071 = vst [vmem:[#allocation44_spill] sm:$0xff] %v8607_v5  ;;  %v3708_v4 = vadd.f32 %v3607_v15, %v3463_v27  ;;  %v4342_v7 = vsel %vm3344_vm3, %v4340_v38, %v13364_v6  ;;  %v4831_v63 = vrot.slane %v4729_v31, 4  ;;  %v8620_v52 = vmul.f32 %v8506_v42, %v8380_v49 }
 0x172   : > { %v4097_v30 = vsel %vm3344_vm3, %v4095_v45, %v14072_v36  ;;  %v5828_v29 = vadd.f32 %v5796_v47, %v5668_v60  ;;  %v5076_v15 = vrot.slane %v4974_v53, 4  ;;  %v5219_v45 = vmul.f32 %v8384_v24, %v14049_v25 }
 0x173   : > { %14073 = vst [vmem:[#allocation45_spill] sm:$0xff] %v8620_v52  ;;  %v3953_v27 = vadd.f32 %v3852_v61, %v3708_v4  ;;  %v8626_v36 = vmul.f32 %v8384_v24, %v14063_v20  ;;  %v14075_v6 = vrot.slane %v8596_v58, 4  ;;  %v13369_v47 = vrot.slane %v8620_v52, 4  ;;  %v14082_v52 = vld [vmem:[#allocation48_spill] sm:$0xff] }
 0x174   : > { %v5860_v38 = vmul.f32 0.7978846, %v5828_v29  ;;  %v5464_v31 = vmul.f32 %v8451_v1, %v8388_v33  ;;  %v5321_v4 = vrot.slane %v5219_v45, 4  ;;  %v8637_v53 = vmul.f32 %v8388_v33, %v8449_v48  ;;  %v14081_v1 = vld [vmem:[#allocation13_spill] sm:$0xff]  ;;  %v14086_v58 = vld [vmem:[#allocation28_spill] sm:$0xff] }
 0x175   : > { %14074 = vst [vmem:[#allocation32_spill] sm:$0xff] %v8626_v36  ;;  %v4588_v60 = vsel %vm4570_vm4, %v4586_v41, %v14075_v6  ;;  %v4198_v57 = vadd.f32 %v4097_v30, %v3953_v27  ;;  %v13368_v61 = vrot.slane %v8626_v36, 4  ;;  %v14076_v29 = vrot.slane %v8607_v5, 4  ;;  %v14084_v5 = vld [vmem:[#allocation49_spill] sm:$0xff] }
 0x176   : > { %6339 = vtanh.f32 %v5860_v38  ;;  %v5078_v6 = vsel %vm4570_vm4, %v5076_v15, %v13369_v47  ;;  %v413_v41 = vmul.f32 %v14052_v12, %v8003_v14  ;;  %v5566_v45 = vrot.slane %v5464_v31, 4  ;;  %v14078_v31 = vld [vmem:[#allocation46_spill] sm:$0xff] }
 0x177   : > { %v4833_v25 = vsel %vm4570_vm4, %v4831_v63, %v14076_v29  ;;  %v4443_v30 = vadd.f32 %v4342_v7, %v4198_v57  ;;  %v5323_v27 = vsel %vm4570_vm4, %v5321_v4, %v13368_v61  ;;  %v483_v38 = vmul.f32 %v14055_v28, %v7852_v17  ;;  %v14077_v29 = vld [vmem:[#allocation24_spill] sm:$0xff]  ;;  %v14079_v61 = vld [vmem:[#allocation23_spill] sm:$0xff] }
 0x178   : > { %v553_v63 = vmul.f32 %v8506_v42, %v7859_v16  ;;  %v623_v15 = vmul.f32 %v14048_v44, %v14063_v20  ;;  %v807_v12 = vmul.f32 %v14051_v51, %v14012_v54  ;;  %v693_v4 = vmul.f32 %v14077_v29, %v8449_v48  ;;  %v14080_v28 = vld [vmem:[#allocation47_spill] sm:$0xff]  ;;  %v14083_v16 = vld [vmem:[#allocation41_spill] sm:$0xff] }
 0x179   : > { %v4689_v57 = vadd.f32 %v4588_v60, %v4443_v30  ;;  %v515_v7 = vadd.f32 %v483_v38, %v413_v41  ;;  %v1053_v47 = vmul.f32 %v14079_v61, %v14078_v31  ;;  %v1298_v36 = vmul.f32 %v14081_v1, %v14080_v28 }
 0x17a   : > { %v911_v17 = vrot.slane %v807_v12, 1  ;;  %v1543_v42 = vmul.f32 %v14083_v16, %v14082_v52  ;;  %v1788_v44 = vmul.f32 %v14018_v8, %v14084_v5  ;;  %v2033_v41 = vmul.f32 %v14065_v23, %v14012_v54  ;;  %v14088_v8 = vld [vmem:[#allocation33_spill] sm:$0xff] }
 0x17b   : > { %v4934_v20 = vadd.f32 %v4833_v25, %v4689_v57  ;;  %v585_v51 = vadd.f32 %v553_v63, %v515_v7  ;;  %v1156_v60 = vrot.slane %v1053_v47, 1  ;;  %v14085_v30 = vrot.slane %v8637_v53, 4 }
 0x17c   : > { %v1401_v38 = vrot.slane %v1298_v36, 1  ;;  %v1646_v12 = vrot.slane %v1543_v42, 1  ;;  %v1891_v29 = vrot.slane %v1788_v44, 1  ;;  %v14087_v16 = vrot.slane %v14086_v58, 1 }
 0x17d   : > { %v5568_v61 = vsel %vm4570_vm4, %v5566_v45, %v14085_v30  ;;  %v5179_v48 = vadd.f32 %v5078_v6, %v4934_v20  ;;  %v655_v1 = vadd.f32 %v623_v15, %v585_v51  ;;  %v14089_v25 = vrot.slane %v14088_v8, 1 }
 0x17e   : > { %v912_v37 = vsel %vm892_vm1, %v14087_v16, %v911_v17  ;;  %v14090_v63 = vrot.slane %v8447_v21, 1  ;;  %v14091_v7 = vrot.slane %v8464_v2, 1  ;;  %v2137_v42 = vrot.slane %v2033_v41, 2 }
 0x17f   : > { %v1157_v47 = vsel %vm892_vm1, %v14089_v25, %v1156_v60  ;;  %v2279_v51 = vmul.f32 %v7905_v10, %v14078_v31  ;;  %v5424_v20 = vadd.f32 %v5323_v27, %v5179_v48  ;;  %v725_v58 = vadd.f32 %v693_v4, %v655_v1 }
 0x180   : > { %v1402_v57 = vsel %vm892_vm1, %v14090_v63, %v1401_v38  ;;  %v1647_v36 = vsel %vm892_vm1, %v14091_v7, %v1646_v12  ;;  %v14092_v6 = vrot.slane %v8473_v26, 1  ;;  %v2524_v15 = vmul.f32 %v8127_v18, %v14080_v28  ;;  %v6340_v21 = vpop.eup %6339 }
 0x181   : > { %v2382_v17 = vrot.slane %v2279_v51, 2  ;;  %v2769_v2 = vmul.f32 %v7914_v0, %v14082_v52  ;;  %v3014_v44 = vmul.f32 %v7919_v62, %v14084_v5  ;;  %v3259_v10 = vmul.f32 %v7923_v59, %v14012_v54 }
 0x182   : > { %v1892_v45 = vsel %vm892_vm1, %v14092_v6, %v1891_v29  ;;  %v5924_v48 = vadd.f32 1.0, %v6340_v21  ;;  %v5669_v1 = vadd.f32 %v5568_v61, %v5424_v20  ;;  %v1012_v27 = vadd.f32 %v912_v37, %v725_v58  ;;  %v8738_v58 = vld [vmem:[%s13185_s3] ss:$0 sm:$0xff] }
 0x183   : > { %v2627_v26 = vrot.slane %v2524_v15, 2  ;;  %v14093_v4 = vrot.slane %v8482_v39, 2  ;;  %v14094_v41 = vrot.slane %v8498_v43, 2  ;;  %v2872_v38 = vrot.slane %v2769_v2, 2  ;;  %14100 = vst [vmem:[#allocation42_spill] sm:$0xff] %v8738_v58 }
 0x184   : > { %v3117_v0 = vrot.slane %v3014_v44, 2  ;;  %v5956_v12 = vmul.f32 %v5924_v48, %v8579_v46  ;;  %v5733_v62 = vmul.f32 0.044715, %v5669_v1  ;;  %v1257_v29 = vadd.f32 %v1157_v47, %v1012_v27  ;;  %v8722_v46 = vld [vmem:[%s13184_s2] ss:$0 sm:$0xff]  ;;  %v6436_v48 = vld [vmem:[#allocation2 + $0x6a] sm:$0xff] }
 0x185   : > { %v2138_v60 = vsel %vm2118_vm2, %v14093_v4, %v2137_v42  ;;  %v2383_v30 = vsel %vm2118_vm2, %v14094_v41, %v2382_v17  ;;  %v3363_v16 = vrot.slane %v3259_v10, 3  ;;  %v8706_v59 = vmul.f32 0.5, %v5669_v1  ;;  %14098 = vst [vmem:[#allocation58_spill] sm:$0xff] %v8722_v46 }
 0x186   : > { %v14095_v37 = vrot.slane %v8510_v34, 2  ;;  %v14096_v39 = vrot.slane %v8520_v11, 2  ;;  %v14097_v43 = vrot.slane %v8535_v3, 2  ;;  %v5995_v47 = vmul.f32 %v8722_v46, %v5956_v12  ;;  %v14099_v3 = vld [vmem:[#allocation16_spill] sm:$0xff] }
 0x187   : > { %v5765_v63 = vmul.f32 %v5733_v62, %v5669_v1  ;;  %v1502_v34 = vadd.f32 %v1402_v57, %v1257_v29  ;;  %v3505_v7 = vmul.f32 %v8339_v9, %v14078_v31  ;;  %v3750_v11 = vmul.f32 %v8343_v32, %v14080_v28 }
 0x188   : > { %v2628_v61 = vsel %vm2118_vm2, %v14095_v37, %v2627_v26  ;;  %v2873_v8 = vsel %vm2118_vm2, %v14096_v39, %v2872_v38  ;;  %v8717_v25 = vsel %vm2118_vm2, %v14097_v43, %v3117_v0  ;;  %v3995_v42 = vmul.f32 %v14099_v3, %v14082_v52  ;;  %v8775_v37 = vld [vmem:[#allocation6 + $0x8] ss:$0 sm:$0xff]  ;;  %v14107_v39 = vld [vmem:[#allocation26_spill] sm:$0xff] }
 0x189   : > { %v4240_v51 = vmul.f32 %v7956_v35, %v14084_v5  ;;  %v4485_v20 = vmul.f32 %v7960_v22, %v14012_v54  ;;  %v6034_v57 = vadd.f32 %v8738_v58, %v5995_v47  ;;  %v5797_v6 = vmul.f32 %v5765_v63, %v5669_v1 }
 0x18a   : > { %v1747_v15 = vadd.f32 %v1647_v36, %v1502_v34  ;;  %v3608_v21 = vrot.slane %v3505_v7, 3  ;;  %v14101_v17 = vrot.slane %v8541_v56, 3  ;;  %v3853_v44 = vrot.slane %v3750_v11, 3  ;;  %v14108_v34 = vld [vmem:[#allocation27_spill] sm:$0xff] }
 0x18b   : > { %v4098_v35 = vrot.slane %v3995_v42, 3  ;;  %v4343_v10 = vrot.slane %v4240_v51, 3  ;;  %v6066_v22 = vadd.f32 %v6436_v48, %v6034_v57  ;;  %v5829_v54 = vadd.f32 %v5797_v6, %v5669_v1  ;;  %v14110_v57 = vld [vmem:[#allocation14_spill] sm:$0xff]  ;;  %v14115_v48 = vld [vmem:[#allocation32_spill] sm:$0xff] }
 0x18c   : > { %v3364_v2 = vsel %vm3344_vm3, %v14101_v17, %v3363_v16  ;;  %v1992_v27 = vadd.f32 %v1892_v45, %v1747_v15  ;;  %v4589_v26 = vrot.slane %v4485_v20, 4  ;;  %v14102_v4 = vrot.slane %v8554_v40, 3  ;;  %v8784_v20 = vld [vmem:[#allocation6 + $0x10] ss:$0 sm:$0xff]  ;;  %v14111_v15 = vld [vmem:[#allocation44_spill] sm:$0xff] }
 0x18d   : > { %v14103_v36 = vrot.slane %v8566_v19, 3  ;;  %v14104_v56 = vrot.slane %v8575_v50, 3  ;;  %v14105_v12 = vrot.slane %v8590_v13, 3  ;;  %6098 = vst [vmem:[%s7803_s9 + $0x28] sm:$0xff] %v6066_v22  ;;  %v5861_v40 = vmul.f32 0.7978846, %v5829_v54 }
 0x18e   : > { %v8747_v41 = vsel %vm3344_vm3, %v14102_v4, %v3608_v21  ;;  %v2238_v1 = vadd.f32 %v2138_v60, %v1992_v27  ;;  %v4731_v62 = vmul.f32 %v8376_v55, %v14078_v31  ;;  %v4976_v19 = vmul.f32 %v8380_v49, %v14080_v28  ;;  %v14106_v13 = vld [vmem:[#allocation55_spill] sm:$0xff] }
 0x18f   : > { %v8752_v38 = vsel %vm3344_vm3, %v14103_v36, %v3853_v44  ;;  %v8757_v0 = vsel %vm3344_vm3, %v14104_v56, %v4098_v35  ;;  %v8762_v45 = vsel %vm3344_vm3, %v14105_v12, %v4343_v10  ;;  %v5221_v50 = vmul.f32 %v8384_v24, %v14082_v52  ;;  %v8807_v36 = vld [vmem:[#allocation6 + $0x20] ss:$0 sm:$0xff] }
 0x190   : > { %v5466_v29 = vmul.f32 %v8388_v33, %v14084_v5  ;;  %v414_v16 = vmul.f32 %v14106_v13, %v8003_v14  ;;  %v484_v60 = vmul.f32 %v8775_v37, %v14107_v39  ;;  %6341 = vtanh.f32 %v5861_v40  ;;  %14118 = vst [vmem:[#allocation22_spill] sm:$0xff] %v8807_v36  ;;  %v8809_v56 = vld [vmem:[#allocation2 + $0xc0] sm:$0xff] }
 0x191   : > { %v2483_v43 = vadd.f32 %v2383_v30, %v2238_v1  ;;  %v4834_v47 = vrot.slane %v4731_v62, 4  ;;  %v5079_v63 = vrot.slane %v4976_v19, 4  ;;  %v14109_v7 = vrot.slane %v14108_v34, 4  ;;  %v14113_v30 = vld [vmem:[#allocation45_spill] sm:$0xff]  ;;  %14119 = vst [vmem:[#allocation52_spill] sm:$0xff] %v8809_v56  ;;  %v14120_v1 = vld [vmem:[#allocation56_spill] sm:$0xff] }
 0x192   : > { %v5324_v42 = vrot.slane %v5221_v50, 4  ;;  %v516_v51 = vadd.f32 %v484_v60, %v414_v16  ;;  %v554_v14 = vmul.f32 %v8784_v20, %v14110_v57  ;;  %v14112_v21 = vrot.slane %v14111_v15, 4  ;;  %v14121_v19 = vld [vmem:[#allocation12_spill] sm:$0xff]  ;;  %v14125_v34 = vld [vmem:[#allocation34_spill] sm:$0xff] }
 0x193   : > { %v8782_v11 = vsel %vm4570_vm4, %v14109_v7, %v4589_v26  ;;  %v2728_v6 = vadd.f32 %v2628_v61, %v2483_v43  ;;  %v14114_v44 = vrot.slane %v14113_v30, 4  ;;  %v5569_v10 = vrot.slane %v5466_v29, 4  ;;  %v8803_v26 = vld [vmem:[#allocation6 + $0x18] ss:$0 sm:$0xff]  ;;  %v8819_v29 = vld [vmem:[#allocation6 + $0x9] ss:$0 sm:$0xff] }
 0x194   : > { %v8791_v17 = vsel %vm4570_vm4, %v14112_v21, %v4834_v47  ;;  %v14116_v22 = vrot.slane %v14115_v48, 4  ;;  %v586_v27 = vadd.f32 %v554_v14, %v516_v51  ;;  %v14117_v61 = vld [vmem:[#allocation18_spill] sm:$0xff]  ;;  %v694_v12 = vmul.f32 %v8809_v56, %v8807_v36  ;;  %14122 = vst [vmem:[#allocation15_spill] sm:$0xff] %v8819_v29  ;;  %v14123_v43 = vld [vmem:[#allocation31_spill] sm:$0xff] }
 0x195   : > { %v8796_v35 = vsel %vm4570_vm4, %v14114_v44, %v5079_v63  ;;  %v624_v4 = vmul.f32 %v8803_v26, %v14117_v61  ;;  %v2973_v40 = vadd.f32 %v2873_v8, %v2728_v6  ;;  %v808_v62 = vmul.f32 %v14120_v1, %v14106_v13  ;;  %v14124_v63 = vld [vmem:[#allocation13_spill] sm:$0xff]  ;;  %v8835_v6 = vld [vmem:[#allocation2 + $0xc8] sm:$0xff]  ;;  %v8842_v48 = vld [vmem:[#allocation6 + $0x19] ss:$0 sm:$0xff] }
 0x196   : > { %v8801_v54 = vsel %vm4570_vm4, %v14116_v22, %v5324_v42  ;;  %v8817_v50 = vmul.f32 %v14121_v19, %v14120_v1  ;;  %v1054_v16 = vmul.f32 %v8819_v29, %v14107_v39  ;;  %v8825_v47 = vmul.f32 %v8819_v29, %v14123_v43  ;;  %14126 = vst [vmem:[#allocation43_spill] sm:$0xff] %v8835_v6  ;;  %v14128_v22 = vld [vmem:[#allocation39_spill] sm:$0xff] }
 0x197   : > { %v656_v60 = vadd.f32 %v624_v4, %v586_v27  ;;  %v1299_v8 = vmul.f32 %v14124_v63, %v14110_v57  ;;  %v8831_v13 = vmul.f32 %v14124_v63, %v14125_v34  ;;  %v3218_v7 = vadd.f32 %v8717_v25, %v2973_v40  ;;  %14127 = vst [vmem:[#allocation19_spill] sm:$0xff] %v8842_v48  ;;  %v8858_v1 = vld [vmem:[#allocation6 + $0x21] ss:$0 sm:$0xff] }
 0x198   : > { %v913_v42 = vrot.slane %v808_v62, 1  ;;  %v13388_v51 = vrot.slane %v8817_v50, 1  ;;  %v1158_v14 = vrot.slane %v1054_v16, 1  ;;  %v13387_v15 = vrot.slane %v8825_v47, 1  ;;  %14130 = vst [vmem:[#allocation29_spill] sm:$0xff] %v8858_v1 }
 0x199   : > { %v726_v39 = vadd.f32 %v694_v12, %v656_v60  ;;  %v1403_v21 = vrot.slane %v1299_v8, 1  ;;  %v13385_v30 = vrot.slane %v8831_v13, 1  ;;  %v3464_v44 = vadd.f32 %v3364_v2, %v3218_v7  ;;  %v8871_v7 = vld [vmem:[#allocation2 + $0x60] sm:$0xff] }
 0x19a   : > { %v915_v57 = vsel %vm892_vm1, %v913_v42, %v13388_v51  ;;  %v1544_v25 = vmul.f32 %v8842_v48, %v14117_v61  ;;  %v8848_v27 = vmul.f32 %v8842_v48, %v14128_v22  ;;  %v14129_v4 = vrot.slane %v8637_v53, 4  ;;  %v6342_v19 = vpop.eup %6341 }
 0x19b   : > { %v1013_v40 = vadd.f32 %v915_v57, %v726_v39  ;;  %v1160_v2 = vsel %vm892_vm1, %v1158_v14, %v13387_v15  ;;  %v1789_v62 = vmul.f32 %v8858_v1, %v8809_v56  ;;  %v3709_v16 = vadd.f32 %v8747_v41, %v3464_v44  ;;  %v8877_v44 = vld [vmem:[#allocation2 + $0x68] sm:$0xff] }
 0x19c   : > { %v8853_v12 = vsel %vm4570_vm4, %v14129_v4, %v5569_v10  ;;  %v1648_v60 = vrot.slane %v1544_v25, 1  ;;  %v13383_v63 = vrot.slane %v8848_v27, 1  ;;  %v8866_v53 = vmul.f32 %v8858_v1, %v8835_v6 }
 0x19d   : > { %v5925_v10 = vadd.f32 1.0, %v6342_v19  ;;  %v1258_v8 = vadd.f32 %v1160_v2, %v1013_v40  ;;  %v1405_v34 = vsel %vm892_vm1, %v1403_v21, %v13385_v30  ;;  %v2034_v42 = vmul.f32 %v8871_v7, %v14065_v23  ;;  %v8884_v40 = vld [vmem:[#allocation6 + $0xa] ss:$0 sm:$0xff]  ;;  %v8886_v2 = vld [vmem:[#allocation2 + $0x78] sm:$0xff] }
 0x19e   : > { %v3954_v41 = vadd.f32 %v8752_v38, %v3709_v16  ;;  %v1893_v14 = vrot.slane %v1789_v62, 1  ;;  %v13384_v39 = vrot.slane %v8866_v53, 1  ;;  %v8881_v57 = vmul.f32 %v8877_v44, %v14065_v23  ;;  %14131 = vst [vmem:[#allocation21_spill] sm:$0xff] %v8886_v2 }
 0x19f   : > { %v5957_v25 = vmul.f32 %v5925_v10, %v8706_v59  ;;  %v1503_v4 = vadd.f32 %v1405_v34, %v1258_v8  ;;  %v2139_v21 = vrot.slane %v2034_v42, 2  ;;  %v2280_v38 = vmul.f32 %v8886_v2, %v8884_v40  ;;  %v8900_v34 = vld [vmem:[#allocation2 + $0x90] sm:$0xff] }
 0x1a0   : > { %v4199_v62 = vadd.f32 %v8757_v0, %v3954_v41  ;;  %v1650_v19 = vsel %vm892_vm1, %v1648_v60, %v13383_v63  ;;  %v13386_v23 = vrot.slane %v8881_v57, 2  ;;  %v8897_v59 = vmul.f32 %v8884_v40, %v14123_v43  ;;  %14132 = vst [vmem:[#allocation40_spill] sm:$0xff] %v8900_v34  ;;  %v8909_v63 = vld [vmem:[#allocation2 + $0x98] sm:$0xff] }
 0x1a1   : > { %v5996_v16 = vmul.f32 %v8722_v46, %v5957_v25  ;;  %v1748_v10 = vadd.f32 %v1650_v19, %v1503_v4  ;;  %v2384_v8 = vrot.slane %v2280_v38, 2  ;;  %v2525_v42 = vmul.f32 %v8900_v34, %v8127_v18  ;;  %14133 = vst [vmem:[#allocation24_spill] sm:$0xff] %v8909_v63  ;;  %v9005_v46 = vld [vmem:[#allocation6 + $0x4] ss:$0 sm:$0xff] }
 0x1a2   : > { %v4444_v0 = vadd.f32 %v8762_v45, %v4199_v62  ;;  %v1895_v60 = vsel %vm892_vm1, %v1893_v14, %v13384_v39  ;;  %v13389_v41 = vrot.slane %v8897_v59, 2  ;;  %v8913_v25 = vmul.f32 %v8909_v63, %v8127_v18  ;;  %v8919_v45 = vld [vmem:[#allocation6 + $0x1a] ss:$0 sm:$0xff]  ;;  %14141 = vst [vmem:[#allocation48_spill] sm:$0xff] %v9005_v46 }
 0x1a3   : > { %v6035_v4 = vadd.f32 %v8738_v58, %v5996_v16  ;;  %v1993_v38 = vadd.f32 %v1895_v60, %v1748_v10  ;;  %v2141_v19 = vsel %vm2118_vm2, %v2139_v21, %v13386_v23  ;;  %v2770_v14 = vmul.f32 %v8919_v45, %v14117_v61  ;;  %v6452_v16 = vld [vmem:[#allocation2 + $0x7a] sm:$0xff]  ;;  %v8932_v23 = vld [vmem:[#allocation6 + $0x22] ss:$0 sm:$0xff] }
 0x1a4   : > { %v4690_v62 = vadd.f32 %v8782_v11, %v4444_v0  ;;  %v2629_v39 = vrot.slane %v2525_v42, 2  ;;  %v13390_v30 = vrot.slane %v8913_v25, 2  ;;  %v8927_v18 = vmul.f32 %v8919_v45, %v14128_v22 }
 0x1a5   : > { %v6067_v10 = vadd.f32 %v6452_v16, %v6035_v4  ;;  %v2239_v60 = vadd.f32 %v2141_v19, %v1993_v38  ;;  %v2386_v21 = vsel %vm2118_vm2, %v2384_v8, %v13389_v41  ;;  %v3015_v15 = vmul.f32 %v8932_v23, %v8809_v56  ;;  %v8943_v19 = vld [vmem:[#allocation6 + $0x3] ss:$0 sm:$0xff] }
 0x1a6   : > { %v4935_v11 = vadd.f32 %v8791_v17, %v4690_v62  ;;  %v2874_v42 = vrot.slane %v2770_v14, 2  ;;  %v8940_v51 = vmul.f32 %v8932_v23, %v8835_v6  ;;  %v3260_v8 = vmul.f32 %v8943_v19, %v8871_v7 }
 0x1a7   : > { %6099 = vst [vmem:[%s7803_s9 + $0x30] sm:$0xff] %v6067_v10  ;;  %v2484_v4 = vadd.f32 %v2386_v21, %v2239_v60  ;;  %v3119_v38 = vrot.slane %v3015_v15, 2  ;;  %v8949_v16 = vmul.f32 %v8943_v19, %v8877_v44  ;;  %v2631_v14 = vsel %vm2118_vm2, %v2629_v39, %v13390_v30 }
 0x1a8   : > { %v5180_v17 = vadd.f32 %v8796_v35, %v4935_v11  ;;  %v3506_v15 = vmul.f32 %v8886_v2, %v8339_v9  ;;  %v3365_v60 = vrot.slane %v3260_v8, 3  ;;  %v8961_v41 = vmul.f32 %v14123_v43, %v8339_v9 }
 0x1a9   : > { %14134 = vst [vmem:[#allocation46_spill] sm:$0xff] %v8949_v16  ;;  %v2729_v10 = vadd.f32 %v2631_v14, %v2484_v4  ;;  %v14136_v35 = vrot.slane %v8927_v18, 2  ;;  %v3751_v30 = vmul.f32 %v8900_v34, %v8343_v32  ;;  %v14137_v4 = vrot.slane %v8940_v51, 2 }
 0x1aa   : > { %14135 = vst [vmem:[#allocation23_spill] sm:$0xff] %v8961_v41  ;;  %v5425_v0 = vadd.f32 %v8801_v54, %v5180_v17  ;;  %v3610_v39 = vrot.slane %v3506_v15, 3  ;;  %v13399_v14 = vrot.slane %v8961_v41, 3  ;;  %v8975_v21 = vmul.f32 %v8909_v63, %v8343_v32 }
 0x1ab   : > { %v2876_v11 = vsel %vm2118_vm2, %v2874_v42, %v14136_v35  ;;  %v3121_v8 = vsel %vm2118_vm2, %v3119_v38, %v14137_v4  ;;  %v3855_v17 = vrot.slane %v3751_v30, 3  ;;  %v3996_v42 = vmul.f32 %v14117_v61, %v14099_v3  ;;  %v8988_v4 = vld [vmem:[#allocation6 + $0x23] ss:$0 sm:$0xff] }
 0x1ac   : > { %v2974_v62 = vadd.f32 %v2876_v11, %v2729_v10  ;;  %14138 = vst [vmem:[#allocation47_spill] sm:$0xff] %v8975_v21  ;;  %v5670_v54 = vadd.f32 %v8853_v12, %v5425_v0  ;;  %v8982_v15 = vmul.f32 %v14099_v3, %v14128_v22  ;;  %v14139_v35 = vrot.slane %v8949_v16, 3 }
 0x1ad   : > { %v4241_v12 = vmul.f32 %v8988_v4, %v8809_v56  ;;  %v3612_v58 = vsel %vm3344_vm3, %v3610_v39, %v13399_v14  ;;  %v4100_v3 = vrot.slane %v3996_v42, 3  ;;  %v14140_v32 = vrot.slane %v8975_v21, 3 }
 0x1ae   : > { %v3219_v10 = vadd.f32 %v3121_v8, %v2974_v62  ;;  %v3367_v38 = vsel %vm3344_vm3, %v3365_v60, %v14139_v35  ;;  %v8992_v30 = vmul.f32 0.5, %v5670_v54  ;;  %v5734_v0 = vmul.f32 0.044715, %v5670_v54 }
 0x1af   : > { %v13407_v8 = vrot.slane %v8982_v15, 3  ;;  %v9000_v60 = vmul.f32 %v8988_v4, %v8835_v6  ;;  %v4345_v35 = vrot.slane %v4241_v12, 3  ;;  %v3857_v16 = vsel %vm3344_vm3, %v3855_v17, %v14140_v32 }
 0x1b0   : > { %v3465_v62 = vadd.f32 %v3367_v38, %v3219_v10  ;;  %v5766_v11 = vmul.f32 %v5734_v0, %v5670_v54  ;;  %v4486_v41 = vmul.f32 %v9005_v46, %v8871_v7  ;;  %v9011_v39 = vmul.f32 %v9005_v46, %v8877_v44 }
 0x1b1   : > { %v13406_v10 = vrot.slane %v9000_v60, 3  ;;  %v4732_v38 = vmul.f32 %v8886_v2, %v8376_v55  ;;  %v9018_v12 = vmul.f32 %v14123_v43, %v8376_v55  ;;  %v4977_v7 = vmul.f32 %v8900_v34, %v8380_v49 }
 0x1b2   : > { %v3710_v42 = vadd.f32 %v3612_v58, %v3465_v62  ;;  %v5798_v32 = vmul.f32 %v5766_v11, %v5670_v54  ;;  %v4591_v17 = vrot.slane %v4486_v41, 4  ;;  %v13405_v0 = vrot.slane %v9011_v39, 4 }
 0x1b3   : > { %v4102_v58 = vsel %vm3344_vm3, %v4100_v3, %v13407_v8  ;;  %v4347_v62 = vsel %vm3344_vm3, %v4345_v35, %v13406_v10  ;;  %v4836_v2 = vrot.slane %v4732_v38, 4  ;;  %v13413_v11 = vrot.slane %v9018_v12, 4 }
 0x1b4   : > { %v3955_v14 = vadd.f32 %v3857_v16, %v3710_v42  ;;  %v5830_v21 = vadd.f32 %v5798_v32, %v5670_v54  ;;  %v4593_v41 = vsel %vm4570_vm4, %v4591_v17, %v13405_v0  ;;  %v9035_v34 = vmul.f32 %v8909_v63, %v8380_v49 }
 0x1b5   : > { %v5081_v42 = vrot.slane %v4977_v7, 4  ;;  %v5222_v3 = vmul.f32 %v14117_v61, %v8384_v24  ;;  %v9041_v35 = vmul.f32 %v8384_v24, %v14128_v22  ;;  %v5467_v32 = vmul.f32 %v8809_v56, %v8388_v33 }
 0x1b6   : > { %14142 = vst [vmem:[#allocation41_spill] sm:$0xff] %v9035_v34  ;;  %v4200_v16 = vadd.f32 %v4102_v58, %v3955_v14  ;;  %v5862_v54 = vmul.f32 0.7978846, %v5830_v21  ;;  %v9048_v17 = vmul.f32 %v8388_v33, %v8835_v6  ;;  %v9051_v58 = vld [vmem:[#allocation6] ss:$0 sm:$0xff]  ;;  %v4838_v21 = vsel %vm4570_vm4, %v4836_v2, %v13413_v11 }
 0x1b7   : > { %14143 = vst [vmem:[#allocation49_spill] sm:$0xff] %v9041_v35  ;;  %v5326_v14 = vrot.slane %v5222_v3, 4  ;;  %v13412_v7 = vrot.slane %v9041_v35, 4  ;;  %v415_v10 = vmul.f32 %v9051_v58, %v8877_v44  ;;  %v5571_v8 = vrot.slane %v5467_v32, 4  ;;  %v14148_v11 = vld [vmem:[#allocation51_spill] sm:$0xff] }
 0x1b8   : > { %14144 = vst [vmem:[#allocation28_spill] sm:$0xff] %v9048_v17  ;;  %v4445_v0 = vadd.f32 %v4347_v62, %v4200_v16  ;;  %6343 = vtanh.f32 %v5862_v54  ;;  %v13411_v38 = vrot.slane %v9048_v17, 4  ;;  %v14145_v61 = vrot.slane %v9035_v34, 4 }
 0x1b9   : > { %v5328_v16 = vsel %vm4570_vm4, %v5326_v14, %v13412_v7  ;;  %v485_v44 = vmul.f32 %v8775_v37, %v14123_v43  ;;  %v555_v2 = vmul.f32 %v8909_v63, %v8784_v20  ;;  %v1056_v32 = vmul.f32 %v8819_v29, %v14080_v28  ;;  %v9080_v14 = vld [vmem:[#allocation6 + $0x11] ss:$0 sm:$0xff] }
 0x1ba   : > { %v4691_v56 = vadd.f32 %v4593_v41, %v4445_v0  ;;  %v5083_v62 = vsel %vm4570_vm4, %v5081_v42, %v14145_v61  ;;  %v5573_v3 = vsel %vm4570_vm4, %v5571_v8, %v13411_v38  ;;  %v625_v0 = vmul.f32 %v8803_v26, %v14128_v22  ;;  %v9074_v41 = vld [vmem:[#allocation6 + $0x1] ss:$0 sm:$0xff]  ;;  %14147 = vst [vmem:[#allocation55_spill] sm:$0xff] %v9080_v14  ;;  %v9088_v22 = vld [vmem:[#allocation6 + $0x2] ss:$0 sm:$0xff] }
 0x1bb   : > { %14146 = vst [vmem:[#allocation33_spill] sm:$0xff] %v9074_v41  ;;  %v810_v61 = vmul.f32 %v9074_v41, %v14078_v31  ;;  %v517_v54 = vadd.f32 %v485_v44, %v415_v10  ;;  %v1301_v8 = vmul.f32 %v9080_v14, %v14082_v52  ;;  %v1546_v7 = vmul.f32 %v8842_v48, %v14084_v5 }
 0x1bc   : > { %v4936_v42 = vadd.f32 %v4838_v21, %v4691_v56  ;;  %v1791_v17 = vmul.f32 %v8858_v1, %v14148_v11  ;;  %14149 = vst [vmem:[#allocation26_spill] sm:$0xff] %v9088_v22  ;;  %v2036_v56 = vmul.f32 %v9088_v22, %v14078_v31  ;;  %v1161_v44 = vrot.slane %v1056_v32, 1 }
 0x1bd   : > { %v916_v38 = vrot.slane %v810_v61, 1  ;;  %v587_v21 = vadd.f32 %v555_v2, %v517_v54  ;;  %v1406_v63 = vrot.slane %v1301_v8, 1  ;;  %v695_v29 = vmul.f32 %v8807_v36, %v8835_v6 }
 0x1be   : > { %v5181_v10 = vadd.f32 %v5083_v62, %v4936_v42  ;;  %v1651_v14 = vrot.slane %v1546_v7, 1  ;;  %v1896_v61 = vrot.slane %v1791_v17, 1  ;;  %v2142_v43 = vrot.slane %v2036_v56, 2 }
 0x1bf   : > { %v657_v48 = vadd.f32 %v625_v0, %v587_v21  ;;  %v14150_v34 = vrot.slane %v8817_v50, 1  ;;  %v14151_v41 = vrot.slane %v8825_v47, 1  ;;  %v14152_v62 = vrot.slane %v8831_v13, 1  ;;  %v9111_v47 = vld [vmem:[#allocation6 + $0x12] ss:$0 sm:$0xff] }
 0x1c0   : > { %v5426_v35 = vadd.f32 %v5328_v16, %v5181_v10  ;;  %v14153_v42 = vrot.slane %v8848_v27, 1  ;;  %v14154_v17 = vrot.slane %v8866_v53, 1  ;;  %v2282_v50 = vmul.f32 %v8884_v40, %v14080_v28 }
 0x1c1   : > { %v917_v1 = vsel %vm892_vm1, %v14150_v34, %v916_v38  ;;  %v1162_v22 = vsel %vm892_vm1, %v14151_v41, %v1161_v44  ;;  %v1407_v2 = vsel %vm892_vm1, %v14152_v62, %v1406_v63  ;;  %v727_v38 = vadd.f32 %v695_v29, %v657_v48 }
 0x1c2   : > { %v1652_v7 = vsel %vm892_vm1, %v14153_v42, %v1651_v14  ;;  %v1897_v16 = vsel %vm892_vm1, %v14154_v17, %v1896_v61  ;;  %v5671_v34 = vadd.f32 %v5573_v3, %v5426_v35  ;;  %v2527_v13 = vmul.f32 %v9111_v47, %v14082_v52  ;;  %v6344_v27 = vpop.eup %6343 }
 0x1c3   : > { %v2772_v63 = vmul.f32 %v8919_v45, %v14084_v5  ;;  %v14155_v0 = vrot.slane %v8881_v57, 2  ;;  %v2387_v41 = vrot.slane %v2282_v50, 2  ;;  %v3017_v54 = vmul.f32 %v8932_v23, %v14148_v11 }
 0x1c4   : > { %v3262_v29 = vmul.f32 %v8943_v19, %v14078_v31  ;;  %v5926_v48 = vadd.f32 1.0, %v6344_v27  ;;  %v5735_v35 = vmul.f32 0.044715, %v5671_v34  ;;  %v1014_v3 = vadd.f32 %v917_v1, %v727_v38 }
 0x1c5   : > { %v2143_v53 = vsel %vm2118_vm2, %v14155_v0, %v2142_v43  ;;  %v3508_v32 = vmul.f32 %v8339_v9, %v14080_v28  ;;  %v9126_v14 = vmul.f32 0.5, %v5671_v34  ;;  %v2632_v8 = vrot.slane %v2527_v13, 2 }
 0x1c6   : > { %v2877_v56 = vrot.slane %v2772_v63, 2  ;;  %v3122_v57 = vrot.slane %v3017_v54, 2  ;;  %v5958_v43 = vmul.f32 %v5926_v48, %v8992_v30  ;;  %v5767_v10 = vmul.f32 %v5735_v35, %v5671_v34  ;;  %v14160_v30 = vld [vmem:[#allocation58_spill] sm:$0xff] }
 0x1c7   : > { %v1259_v21 = vadd.f32 %v1162_v22, %v1014_v3  ;;  %v3368_v44 = vrot.slane %v3262_v29, 3  ;;  %v14156_v61 = vrot.slane %v8897_v59, 2  ;;  %v14157_v42 = vrot.slane %v8913_v25, 2  ;;  %v14161_v59 = vld [vmem:[#allocation46_spill] sm:$0xff] }
 0x1c8   : > { %v14158_v9 = vrot.slane %v8927_v18, 2  ;;  %v14159_v50 = vrot.slane %v8940_v51, 2  ;;  %v5997_v13 = vmul.f32 %v14160_v30, %v5958_v43  ;;  %v5799_v22 = vmul.f32 %v5767_v10, %v5671_v34  ;;  %v14163_v25 = vld [vmem:[#allocation50_spill] sm:$0xff]  ;;  %v14164_v18 = vld [vmem:[#allocation16_spill] sm:$0xff] }
 0x1c9   : > { %v2388_v62 = vsel %vm2118_vm2, %v14156_v61, %v2387_v41  ;;  %v2633_v1 = vsel %vm2118_vm2, %v14157_v42, %v2632_v8  ;;  %v1504_v63 = vadd.f32 %v1407_v2, %v1259_v21  ;;  %v3613_v27 = vrot.slane %v3508_v32, 3  ;;  %v14165_v48 = vld [vmem:[#allocation42_spill] sm:$0xff]  ;;  %v6462_v10 = vld [vmem:[#allocation2 + $0x82] sm:$0xff] }
 0x1ca   : > { %v2878_v17 = vsel %vm2118_vm2, %v14158_v9, %v2877_v56  ;;  %v3123_v38 = vsel %vm2118_vm2, %v14159_v50, %v3122_v57  ;;  %v14162_v0 = vrot.slane %v14161_v59, 3  ;;  %v3753_v54 = vmul.f32 %v14163_v25, %v14082_v52  ;;  %v14166_v9 = vld [vmem:[#allocation23_spill] sm:$0xff] }
 0x1cb   : > { %v3998_v29 = vmul.f32 %v14164_v18, %v14084_v5  ;;  %v4243_v51 = vmul.f32 %v8988_v4, %v14148_v11  ;;  %v6036_v35 = vadd.f32 %v14165_v48, %v5997_v13  ;;  %v5831_v3 = vadd.f32 %v5799_v22, %v5671_v34  ;;  %v14168_v13 = vld [vmem:[#allocation47_spill] sm:$0xff] }
 0x1cc   : > { %v9145_v41 = vsel %vm3344_vm3, %v14162_v0, %v3368_v44  ;;  %v1749_v2 = vadd.f32 %v1652_v7, %v1504_v63  ;;  %v4488_v32 = vmul.f32 %v9005_v46, %v14078_v31  ;;  %v3858_v8 = vrot.slane %v3753_v54, 3 }
 0x1cd   : > { %v4103_v56 = vrot.slane %v3998_v29, 3  ;;  %v4348_v57 = vrot.slane %v4243_v51, 3  ;;  %v4734_v43 = vmul.f32 %v8376_v55, %v14080_v28  ;;  %v6068_v21 = vadd.f32 %v6462_v10, %v6036_v35  ;;  %v14179_v10 = vld [vmem:[#allocation33_spill] sm:$0xff] }
 0x1ce   : > { %v5863_v44 = vmul.f32 0.7978846, %v5831_v3  ;;  %v1994_v61 = vadd.f32 %v1897_v16, %v1749_v2  ;;  %v4594_v42 = vrot.slane %v4488_v32, 4  ;;  %v14167_v50 = vrot.slane %v14166_v9, 3  ;;  %v14182_v9 = vld [vmem:[#allocation49_spill] sm:$0xff] }
 0x1cf   : > { %v14169_v7 = vrot.slane %v14168_v13, 3  ;;  %v14170_v31 = vrot.slane %v8982_v15, 3  ;;  %v4839_v55 = vrot.slane %v4734_v43, 4  ;;  %6100 = vst [vmem:[%s7803_s9 + $0x38] sm:$0xff] %v6068_v21  ;;  %v14171_v16 = vrot.slane %v9000_v60, 3 }
 0x1d0   : > { %v3614_v34 = vsel %vm3344_vm3, %v14167_v50, %v3613_v27  ;;  %6345 = vtanh.f32 %v5863_v44  ;;  %v2240_v59 = vadd.f32 %v2143_v53, %v1994_v61  ;;  %v4979_v27 = vmul.f32 %v8380_v49, %v14082_v52  ;;  %v14173_v53 = vld [vmem:[#allocation21_spill] sm:$0xff] }
 0x1d1   : > { %v9164_v22 = vsel %vm3344_vm3, %v14169_v7, %v3858_v8  ;;  %v9169_v63 = vsel %vm3344_vm3, %v14170_v31, %v4103_v56  ;;  %v9175_v0 = vsel %vm3344_vm3, %v14171_v16, %v4348_v57  ;;  %v14172_v25 = vrot.slane %v9011_v39, 4  ;;  %v14175_v39 = vld [vmem:[#allocation40_spill] sm:$0xff]  ;;  %v14176_v8 = vld [vmem:[#allocation18_spill] sm:$0xff]  ;;  %v14180_v44 = vld [vmem:[#allocation41_spill] sm:$0xff] }
 0x1d2   : > { %v5224_v15 = vmul.f32 %v8384_v24, %v14084_v5  ;;  %v5469_v18 = vmul.f32 %v8388_v33, %v14148_v11  ;;  %v416_v60 = vmul.f32 %v9051_v58, %v14173_v53  ;;  %v2485_v29 = vadd.f32 %v2388_v62, %v2240_v59  ;;  %v14177_v33 = vld [vmem:[#allocation52_spill] sm:$0xff]  ;;  %v9201_v62 = vld [vmem:[#allocation2 + $0xd8] sm:$0xff]  ;;  %v14185_v31 = vld [vmem:[#allocation15_spill] sm:$0xff] }
 0x1d3   : > { %v9182_v54 = vsel %vm4570_vm4, %v14172_v25, %v4594_v42  ;;  %v14174_v51 = vrot.slane %v9018_v12, 4  ;;  %v5084_v49 = vrot.slane %v4979_v27, 4  ;;  %v486_v3 = vmul.f32 %v14175_v39, %v8775_v37  ;;  %14178 = vst [vmem:[#allocation27_spill] sm:$0xff] %v9201_v62  ;;  %v14186_v25 = vld [vmem:[#allocation24_spill] sm:$0xff] }
 0x1d4   : > { %v5329_v2 = vrot.slane %v5224_v15, 4  ;;  %v5574_v32 = vrot.slane %v5469_v18, 4  ;;  %v556_v24 = vmul.f32 %v8784_v20, %v14176_v8  ;;  %v626_v56 = vmul.f32 %v14177_v33, %v8803_v26 }
 0x1d5   : > { %v9193_v35 = vsel %vm4570_vm4, %v14174_v51, %v4839_v55  ;;  %v2730_v57 = vadd.f32 %v2633_v1, %v2485_v29  ;;  %v518_v43 = vadd.f32 %v486_v3, %v416_v60  ;;  %v696_v12 = vmul.f32 %v9201_v62, %v8807_v36  ;;  %v14184_v1 = vld [vmem:[#allocation31_spill] sm:$0xff] }
 0x1d6   : > { %v811_v21 = vmul.f32 %v14179_v10, %v14173_v53  ;;  %v14181_v61 = vrot.slane %v14180_v44, 4  ;;  %v14183_v50 = vrot.slane %v14182_v9, 4  ;;  %v9219_v7 = vmul.f32 %v14179_v10, %v14184_v1  ;;  %v14187_v29 = vld [vmem:[#allocation55_spill] sm:$0xff] }
 0x1d7   : > { %v1057_v55 = vmul.f32 %v14175_v39, %v14185_v31  ;;  %v2975_v59 = vadd.f32 %v2878_v17, %v2730_v57  ;;  %v588_v16 = vadd.f32 %v556_v24, %v518_v43  ;;  %v9225_v15 = vmul.f32 %v14186_v25, %v14185_v31  ;;  %v14189_v24 = vld [vmem:[#allocation19_spill] sm:$0xff] }
 0x1d8   : > { %v9210_v42 = vsel %vm4570_vm4, %v14181_v61, %v5084_v49  ;;  %v9215_v13 = vsel %vm4570_vm4, %v14183_v50, %v5329_v2  ;;  %v918_v27 = vrot.slane %v811_v21, 1  ;;  %v13436_v18 = vrot.slane %v9219_v7, 1  ;;  %v14188_v49 = vld [vmem:[#allocation39_spill] sm:$0xff]  ;;  %v14191_v21 = vld [vmem:[#allocation28_spill] sm:$0xff] }
 0x1d9   : > { %v1163_v60 = vrot.slane %v1057_v55, 1  ;;  %v1302_v51 = vmul.f32 %v14187_v29, %v14176_v8  ;;  %v9232_v3 = vmul.f32 %v14187_v29, %v14188_v49  ;;  %v3220_v2 = vadd.f32 %v3123_v38, %v2975_v59  ;;  %v9237_v43 = vld [vmem:[#allocation2 + $0xe0] sm:$0xff] }
 0x1da   : > { %v658_v44 = vadd.f32 %v626_v56, %v588_v16  ;;  %v13435_v17 = vrot.slane %v9225_v15, 1  ;;  %v1547_v57 = vmul.f32 %v14189_v24, %v14177_v33  ;;  %14190 = vst [vmem:[#allocation14_spill] sm:$0xff] %v9237_v43  ;;  %v14192_v61 = vrot.slane %v14191_v21, 4  ;;  %v6346_v38 = vpop.eup %6345 }
 0x1db   : > { %v1408_v50 = vrot.slane %v1302_v51, 1  ;;  %v9247_v55 = vmul.f32 %v14189_v24, %v8835_v6  ;;  %v3466_v56 = vadd.f32 %v9145_v41, %v3220_v2  ;;  %v920_v16 = vsel %vm892_vm1, %v918_v27, %v13436_v18 }
 0x1dc   : > { %v9242_v9 = vsel %vm4570_vm4, %v14192_v61, %v5574_v32  ;;  %v728_v59 = vadd.f32 %v696_v12, %v658_v44  ;;  %v1165_v32 = vsel %vm892_vm1, %v1163_v60, %v13435_v17  ;;  %v5927_v49 = vadd.f32 1.0, %v6346_v38  ;;  %v14193_v61 = vld [vmem:[#allocation29_spill] sm:$0xff]  ;;  %v14194_v12 = vld [vmem:[#allocation26_spill] sm:$0xff] }
 0x1dd   : > { %v1653_v51 = vrot.slane %v1547_v57, 1  ;;  %v13439_v21 = vrot.slane %v9247_v55, 1  ;;  %v1792_v8 = vmul.f32 %v9201_v62, %v14193_v61  ;;  %v3711_v24 = vadd.f32 %v3614_v34, %v3466_v56 }
 0x1de   : > { %v1015_v11 = vadd.f32 %v920_v16, %v728_v59  ;;  %v9261_v41 = vmul.f32 %v14193_v61, %v9237_v43  ;;  %v2037_v27 = vmul.f32 %v14194_v12, %v14173_v53  ;;  %v5959_v2 = vmul.f32 %v5927_v49, %v9126_v14 }
 0x1df   : > { %v14195_v60 = vrot.slane %v9232_v3, 1  ;;  %v1898_v57 = vrot.slane %v1792_v8, 1  ;;  %v9271_v38 = vmul.f32 %v14194_v12, %v14184_v1  ;;  %v3956_v34 = vadd.f32 %v9164_v22, %v3711_v24  ;;  %v9287_v22 = vld [vmem:[#allocation2 + $0xa8] sm:$0xff] }
 0x1e0   : > { %v1260_v56 = vadd.f32 %v1165_v32, %v1015_v11  ;;  %v13438_v59 = vrot.slane %v9261_v41, 1  ;;  %v2144_v16 = vrot.slane %v2037_v27, 2  ;;  %v5998_v17 = vmul.f32 %v14160_v30, %v5959_v2  ;;  %14196 = vst [vmem:[#allocation44_spill] sm:$0xff] %v9287_v22  ;;  %v9365_v30 = vld [vmem:[#allocation6 + $0x1b] ss:$0 sm:$0xff] }
 0x1e1   : > { %v1410_v44 = vsel %vm892_vm1, %v1408_v50, %v14195_v60  ;;  %v13437_v18 = vrot.slane %v9271_v38, 2  ;;  %v2283_v14 = vmul.f32 %v14175_v39, %v8884_v40  ;;  %v9281_v50 = vmul.f32 %v14186_v25, %v8884_v40 }
 0x1e2   : > { %v4201_v1 = vadd.f32 %v9169_v63, %v3956_v34  ;;  %v1505_v8 = vadd.f32 %v1410_v44, %v1260_v56  ;;  %v1655_v11 = vsel %vm892_vm1, %v1653_v51, %v13439_v21  ;;  %v2528_v24 = vmul.f32 %v9287_v22, %v9111_v47  ;;  %v9297_v44 = vld [vmem:[#allocation2 + $0xb0] sm:$0xff] }
 0x1e3   : > { %v6037_v32 = vadd.f32 %v14165_v48, %v5998_v17  ;;  %v1900_v49 = vsel %vm892_vm1, %v1898_v57, %v13438_v59  ;;  %v2389_v27 = vrot.slane %v2283_v14, 2  ;;  %v13441_v63 = vrot.slane %v9281_v50, 2  ;;  %14197 = vst [vmem:[#allocation45_spill] sm:$0xff] %v9297_v44  ;;  %v6466_v56 = vld [vmem:[#allocation2 + $0x92] sm:$0xff] }
 0x1e4   : > { %v4446_v2 = vadd.f32 %v9175_v0, %v4201_v1  ;;  %v1750_v60 = vadd.f32 %v1655_v11, %v1505_v8  ;;  %v9301_v51 = vmul.f32 %v9297_v44, %v9111_v47  ;;  %v2634_v34 = vrot.slane %v2528_v24, 2 }
 0x1e5   : > { %v6069_v17 = vadd.f32 %v6466_v56, %v6037_v32  ;;  %v2146_v57 = vsel %vm2118_vm2, %v2144_v16, %v13437_v18  ;;  %v2773_v14 = vmul.f32 %v8919_v45, %v14177_v33  ;;  %v9310_v0 = vmul.f32 %v8919_v45, %v8835_v6 }
 0x1e6   : > { %14198 = vst [vmem:[#allocation32_spill] sm:$0xff] %v9301_v51  ;;  %v4692_v1 = vadd.f32 %v9182_v54, %v4446_v2  ;;  %v1995_v8 = vadd.f32 %v1900_v49, %v1750_v60  ;;  %v13440_v11 = vrot.slane %v9301_v51, 2  ;;  %v3018_v24 = vmul.f32 %v9201_v62, %v8932_v23 }
 0x1e7   : > { %14199 = vst [vmem:[#allocation56_spill] sm:$0xff] %v9310_v0  ;;  %6101 = vst [vmem:[%s7803_s9 + $0x40] sm:$0xff] %v6069_v17  ;;  %v2879_v32 = vrot.slane %v2773_v14, 2  ;;  %v9320_v16 = vmul.f32 %v8932_v23, %v9237_v43  ;;  %v3263_v18 = vmul.f32 %v8943_v19, %v14173_v53  ;;  %v2391_v49 = vsel %vm2118_vm2, %v2389_v27, %v13441_v63  ;;  %v9332_v14 = vld [vmem:[#allocation2 + $0x80] sm:$0xff]  ;;  %v9351_v63 = vld [vmem:[#allocation6 + $0x13] ss:$0 sm:$0xff] }
 0x1e8   : > { %v4937_v59 = vadd.f32 %v9193_v35, %v4692_v1  ;;  %v2241_v54 = vadd.f32 %v2146_v57, %v1995_v8  ;;  %v2636_v2 = vsel %vm2118_vm2, %v2634_v34, %v13440_v11  ;;  %v3124_v60 = vrot.slane %v3018_v24, 2  ;;  %v9339_v1 = vld [vmem:[#allocation6 + $0xb] ss:$0 sm:$0xff]  ;;  %14201 = vst [vmem:[#allocation12_spill] sm:$0xff] %v9351_v63 }
 0x1e9   : > { %v9336_v21 = vmul.f32 %v9332_v14, %v8943_v19  ;;  %v3370_v56 = vrot.slane %v3263_v18, 3  ;;  %v3509_v27 = vmul.f32 %v9339_v1, %v14175_v39  ;;  %v9345_v34 = vmul.f32 %v9339_v1, %v14186_v25 }
 0x1ea   : > { %v5182_v35 = vadd.f32 %v9210_v42, %v4937_v59  ;;  %v2486_v57 = vadd.f32 %v2391_v49, %v2241_v54  ;;  %v14200_v8 = vrot.slane %v9310_v0, 2  ;;  %v3754_v42 = vmul.f32 %v9351_v63, %v9287_v22 }
 0x1eb   : > { %v9357_v18 = vmul.f32 %v9351_v63, %v9297_v44  ;;  %v3615_v49 = vrot.slane %v3509_v27, 3  ;;  %v13448_v17 = vrot.slane %v9345_v34, 3  ;;  %v14203_v48 = vrot.slane %v9320_v16, 2 }
 0x1ec   : > { %v2881_v24 = vsel %vm2118_vm2, %v2879_v32, %v14200_v8  ;;  %v5427_v59 = vadd.f32 %v9215_v13, %v5182_v35  ;;  %v2731_v54 = vadd.f32 %v2636_v2, %v2486_v57  ;;  %v3860_v8 = vrot.slane %v3754_v42, 3 }
 0x1ed   : > { %14202 = vst [vmem:[#allocation13_spill] sm:$0xff] %v9357_v18  ;;  %v3126_v32 = vsel %vm2118_vm2, %v3124_v60, %v14203_v48  ;;  %v13449_v11 = vrot.slane %v9357_v18, 3  ;;  %v3999_v0 = vmul.f32 %v9365_v30, %v14177_v33  ;;  %v14204_v13 = vrot.slane %v9336_v21, 3 }
 0x1ee   : > { %v5672_v63 = vadd.f32 %v9242_v9, %v5427_v59  ;;  %v2976_v51 = vadd.f32 %v2881_v24, %v2731_v54  ;;  %v9375_v35 = vmul.f32 %v9365_v30, %v8835_v6  ;;  %v3617_v48 = vsel %vm3344_vm3, %v3615_v49, %v13448_v17 }
 0x1ef   : > { %v3372_v2 = vsel %vm3344_vm3, %v3370_v56, %v14204_v13  ;;  %v4105_v60 = vrot.slane %v3999_v0, 3  ;;  %v4244_v57 = vmul.f32 %v9201_v62, %v8988_v4  ;;  %v9384_v9 = vmul.f32 %v8988_v4, %v9237_v43 }
 0x1f0   : > { %14205 = vst [vmem:[#allocation34_spill] sm:$0xff] %v9375_v35  ;;  %v5736_v27 = vmul.f32 0.044715, %v5672_v63  ;;  %v3221_v24 = vadd.f32 %v3126_v32, %v2976_v51  ;;  %v3862_v56 = vsel %vm3344_vm3, %v3860_v8, %v13449_v11  ;;  %v13455_v42 = vrot.slane %v9375_v35, 3  ;;  %v9399_v32 = vld [vmem:[#allocation6 + $0xc] ss:$0 sm:$0xff] }
 0x1f1   : > { %14206 = vst [vmem:[#allocation46_spill] sm:$0xff] %v9384_v9  ;;  %v4350_v59 = vrot.slane %v4244_v57, 3  ;;  %v4489_v0 = vmul.f32 %v9005_v46, %v14173_v53  ;;  %v9395_v49 = vmul.f32 %v9332_v14, %v9005_v46  ;;  %v9397_v13 = vmul.f32 0.5, %v5672_v63 }
 0x1f2   : > { %v5768_v17 = vmul.f32 %v5736_v27, %v5672_v63  ;;  %v3467_v51 = vadd.f32 %v3372_v2, %v3221_v24  ;;  %v4735_v8 = vmul.f32 %v9399_v32, %v14175_v39  ;;  %v4107_v57 = vsel %vm3344_vm3, %v4105_v60, %v13455_v42  ;;  %v9414_v24 = vld [vmem:[#allocation6 + $0x14] ss:$0 sm:$0xff]  ;;  %v9423_v42 = vld [vmem:[#allocation6 + $0x1c] ss:$0 sm:$0xff] }
 0x1f3   : > { %v4596_v11 = vrot.slane %v4489_v0, 4  ;;  %v13462_v53 = vrot.slane %v9395_v49, 4  ;;  %v9409_v54 = vmul.f32 %v9399_v32, %v14186_v25  ;;  %v14207_v2 = vrot.slane %v9384_v9, 3  ;;  %14208 = vst [vmem:[#allocation50_spill] sm:$0xff] %v9414_v24  ;;  %v9435_v9 = vld [vmem:[#allocation6 + $0x24] ss:$0 sm:$0xff] }
 0x1f4   : > { %v5800_v18 = vmul.f32 %v5768_v17, %v5672_v63  ;;  %v3712_v46 = vadd.f32 %v3617_v48, %v3467_v51  ;;  %v4980_v39 = vmul.f32 %v9414_v24, %v9287_v22  ;;  %v4841_v35 = vrot.slane %v4735_v8, 4 }
 0x1f5   : > { %v4352_v27 = vsel %vm3344_vm3, %v4350_v59, %v14207_v2  ;;  %v9421_v0 = vmul.f32 %v9414_v24, %v9297_v44  ;;  %v5225_v17 = vmul.f32 %v9423_v42, %v14177_v33  ;;  %v9429_v2 = vmul.f32 %v9423_v42, %v8835_v6 }
 0x1f6   : > { %v5832_v48 = vadd.f32 %v5800_v18, %v5672_v63  ;;  %v3957_v51 = vadd.f32 %v3862_v56, %v3712_v46  ;;  %v5086_v59 = vrot.slane %v4980_v39, 4  ;;  %v4598_v8 = vsel %vm4570_vm4, %v4596_v11, %v13462_v53 }
 0x1f7   : > { %v13465_v60 = vrot.slane %v9421_v0, 4  ;;  %v5331_v22 = vrot.slane %v5225_v17, 4  ;;  %v5470_v24 = vmul.f32 %v9435_v9, %v9201_v62  ;;  %v13466_v46 = vrot.slane %v9429_v2, 4 }
 0x1f8   : > { %v5864_v33 = vmul.f32 0.7978846, %v5832_v48  ;;  %v4202_v63 = vadd.f32 %v4107_v57, %v3957_v51  ;;  %v9442_v39 = vmul.f32 %v9435_v9, %v9237_v43  ;;  %v14209_v18 = vrot.slane %v9409_v54, 4 }
 0x1f9   : > { %v5088_v56 = vsel %vm4570_vm4, %v5086_v59, %v13465_v60  ;;  %v417_v17 = vmul.f32 %v9332_v14, %v9051_v58  ;;  %v487_v57 = vmul.f32 %v14186_v25, %v8775_v37  ;;  %v5333_v51 = vsel %vm4570_vm4, %v5331_v22, %v13466_v46  ;;  %v14212_v46 = vld [vmem:[#allocation53_spill] sm:$0xff] }
 0x1fa   : > { %v4843_v11 = vsel %vm4570_vm4, %v4841_v35, %v14209_v18  ;;  %6347 = vtanh.f32 %v5864_v33  ;;  %v4447_v48 = vadd.f32 %v4352_v27, %v4202_v63  ;;  %v5576_v53 = vrot.slane %v5470_v24, 4  ;;  %v14210_v63 = vld [vmem:[#allocation51_spill] sm:$0xff] }
 0x1fb   : > { %v519_v35 = vadd.f32 %v487_v57, %v417_v17  ;;  %v557_v18 = vmul.f32 %v9297_v44, %v8784_v20  ;;  %v627_v59 = vmul.f32 %v8803_v26, %v8835_v6  ;;  %v697_v60 = vmul.f32 %v8807_v36, %v9237_v43  ;;  %v14211_v17 = vld [vmem:[#allocation19_spill] sm:$0xff] }
 0x1fc   : > { %v4693_v14 = vadd.f32 %v4598_v8, %v4447_v48  ;;  %v813_v33 = vmul.f32 %v14179_v10, %v14080_v28  ;;  %v1059_v22 = vmul.f32 %v14185_v31, %v14082_v52  ;;  %v1304_v24 = vmul.f32 %v14187_v29, %v14084_v5 }
 0x1fd   : > { %v589_v27 = vadd.f32 %v557_v18, %v519_v35  ;;  %v1549_v57 = vmul.f32 %v14211_v17, %v14210_v63  ;;  %v1794_v62 = vmul.f32 %v14193_v61, %v14212_v46  ;;  %v2039_v43 = vmul.f32 %v14194_v12, %v14080_v28 }
 0x1fe   : > { %v4938_v8 = vadd.f32 %v4843_v11, %v4693_v14  ;;  %v921_v48 = vrot.slane %v813_v33, 1  ;;  %v1166_v6 = vrot.slane %v1059_v22, 1  ;;  %v1411_v25 = vrot.slane %v1304_v24, 1 }
 0x1ff   : > { %v659_v44 = vadd.f32 %v627_v59, %v589_v27  ;;  %v1656_v10 = vrot.slane %v1549_v57, 1  ;;  %v1901_v31 = vrot.slane %v1794_v62, 1  ;;  %v14213_v18 = vrot.slane %v9442_v39, 4 }
 0x200   : > { %v5183_v35 = vadd.f32 %v5088_v56, %v4938_v8  ;;  %v14214_v17 = vrot.slane %v9219_v7, 1  ;;  %v14215_v11 = vrot.slane %v9225_v15, 1  ;;  %v14216_v22 = vrot.slane %v9232_v3, 1 }
 0x201   : > { %v5578_v29 = vsel %vm4570_vm4, %v5576_v53, %v14213_v18  ;;  %v729_v33 = vadd.f32 %v697_v60, %v659_v44  ;;  %v14217_v62 = vrot.slane %v9247_v55, 1  ;;  %v2147_v27 = vrot.slane %v2039_v43, 2 }
 0x202   : > { %v922_v36 = vsel %vm892_vm1, %v14214_v17, %v921_v48  ;;  %v1167_v14 = vsel %vm892_vm1, %v14215_v11, %v1166_v6  ;;  %v1412_v59 = vsel %vm892_vm1, %v14216_v22, %v1411_v25  ;;  %v5428_v24 = vadd.f32 %v5333_v51, %v5183_v35 }
 0x203   : > { %v1657_v56 = vsel %vm892_vm1, %v14217_v62, %v1656_v10  ;;  %v14218_v53 = vrot.slane %v9261_v41, 1  ;;  %v2285_v15 = vmul.f32 %v8884_v40, %v14082_v52  ;;  %v2530_v6 = vmul.f32 %v9111_v47, %v14084_v5  ;;  %v14221_v62 = vld [vmem:[#allocation32_spill] sm:$0xff] }
 0x204   : > { %v1016_v44 = vadd.f32 %v922_v36, %v729_v33  ;;  %v2775_v25 = vmul.f32 %v8919_v45, %v14210_v63  ;;  %v3020_v3 = vmul.f32 %v8932_v23, %v14212_v46  ;;  %v3265_v10 = vmul.f32 %v8943_v19, %v14080_v28  ;;  %v6348_v43 = vpop.eup %6347 }
 0x205   : > { %v1902_v7 = vsel %vm892_vm1, %v14218_v53, %v1901_v31  ;;  %v5673_v55 = vadd.f32 %v5578_v29, %v5428_v24  ;;  %v2392_v41 = vrot.slane %v2285_v15, 2  ;;  %v2637_v31 = vrot.slane %v2530_v6, 2  ;;  %v14223_v53 = vld [vmem:[#allocation56_spill] sm:$0xff] }
 0x206   : > { %v3511_v60 = vmul.f32 %v9339_v1, %v14082_v52  ;;  %v5928_v51 = vadd.f32 1.0, %v6348_v43  ;;  %v1261_v17 = vadd.f32 %v1167_v14, %v1016_v44  ;;  %v14219_v36 = vrot.slane %v9271_v38, 2  ;;  %v14226_v43 = vld [vmem:[#allocation58_spill] sm:$0xff] }
 0x207   : > { %v2882_v8 = vrot.slane %v2775_v25, 2  ;;  %v9509_v48 = vmul.f32 0.5, %v5673_v55  ;;  %v5737_v35 = vmul.f32 0.044715, %v5673_v55  ;;  %v14220_v18 = vrot.slane %v9281_v50, 2  ;;  %v14225_v25 = vld [vmem:[#allocation12_spill] sm:$0xff] }
 0x208   : > { %v2148_v57 = vsel %vm2118_vm2, %v14219_v36, %v2147_v27  ;;  %v3127_v29 = vrot.slane %v3020_v3, 2  ;;  %v5960_v33 = vmul.f32 %v5928_v51, %v9397_v13  ;;  %v1506_v22 = vadd.f32 %v1412_v59, %v1261_v17 }
 0x209   : > { %v2393_v11 = vsel %vm2118_vm2, %v14220_v18, %v2392_v41  ;;  %v14222_v24 = vrot.slane %v14221_v62, 2  ;;  %v14224_v38 = vrot.slane %v14223_v53, 2  ;;  %v5769_v15 = vmul.f32 %v5737_v35, %v5673_v55 }
 0x20a   : > { %v3373_v6 = vrot.slane %v3265_v10, 3  ;;  %v3618_v44 = vrot.slane %v3511_v60, 3  ;;  %v3756_v50 = vmul.f32 %v14225_v25, %v14084_v5  ;;  %v5999_v41 = vmul.f32 %v14226_v43, %v5960_v33 }
 0x20b   : > { %v2638_v14 = vsel %vm2118_vm2, %v14222_v24, %v2637_v31  ;;  %v2883_v27 = vsel %vm2118_vm2, %v14224_v38, %v2882_v8  ;;  %v1751_v3 = vadd.f32 %v1657_v56, %v1506_v22  ;;  %v4001_v13 = vmul.f32 %v9365_v30, %v14210_v63  ;;  %v14229_v8 = vld [vmem:[#allocation42_spill] sm:$0xff] }
 0x20c   : > { %v4246_v59 = vmul.f32 %v8988_v4, %v14212_v46  ;;  %v5801_v31 = vmul.f32 %v5769_v15, %v5673_v55  ;;  %v14227_v51 = vrot.slane %v9320_v16, 2  ;;  %v14228_v10 = vrot.slane %v9336_v21, 3  ;;  %v14231_v16 = vld [vmem:[#allocation48_spill] sm:$0xff] }
 0x20d   : > { %v3863_v36 = vrot.slane %v3756_v50, 3  ;;  %v6038_v35 = vadd.f32 %v14229_v8, %v5999_v41  ;;  %v1996_v18 = vadd.f32 %v1902_v7, %v1751_v3  ;;  %v14230_v56 = vrot.slane %v9345_v34, 3  ;;  %v14234_v34 = vld [vmem:[#allocation34_spill] sm:$0xff] }
 0x20e   : > { %v3128_v17 = vsel %vm2118_vm2, %v14227_v51, %v3127_v29  ;;  %v3374_v60 = vsel %vm3344_vm3, %v14228_v10, %v3373_v6  ;;  %v4108_v22 = vrot.slane %v4001_v13, 3  ;;  %v5833_v62 = vadd.f32 %v5801_v31, %v5673_v55  ;;  %v6475_v29 = vld [vmem:[#allocation2 + $0x9a] sm:$0xff]  ;;  %v14232_v6 = vld [vmem:[#allocation13_spill] sm:$0xff]  ;;  %v14237_v51 = vld [vmem:[#allocation40_spill] sm:$0xff] }
 0x20f   : > { %v3619_v33 = vsel %vm3344_vm3, %v14230_v56, %v3618_v44  ;;  %v4353_v24 = vrot.slane %v4246_v59, 3  ;;  %v4491_v53 = vmul.f32 %v14231_v16, %v14080_v28  ;;  %v4737_v21 = vmul.f32 %v9399_v32, %v14082_v52  ;;  %v14236_v28 = vld [vmem:[#allocation50_spill] sm:$0xff] }
 0x210   : > { %v6070_v38 = vadd.f32 %v6475_v29, %v6038_v35  ;;  %v2242_v15 = vadd.f32 %v2148_v57, %v1996_v18  ;;  %v14233_v50 = vrot.slane %v14232_v6, 3  ;;  %v14235_v43 = vrot.slane %v14234_v34, 3  ;;  %v14242_v29 = vld [vmem:[#allocation44_spill] sm:$0xff] }
 0x211   : > { %v5865_v55 = vmul.f32 0.7978846, %v5833_v62  ;;  %v4599_v41 = vrot.slane %v4491_v53, 4  ;;  %v4844_v3 = vrot.slane %v4737_v21, 4  ;;  %v4982_v13 = vmul.f32 %v14236_v28, %v14084_v5  ;;  %v14244_v6 = vld [vmem:[#allocation52_spill] sm:$0xff] }
 0x212   : > { %v3864_v7 = vsel %vm3344_vm3, %v14233_v50, %v3863_v36  ;;  %v9548_v44 = vsel %vm3344_vm3, %v14235_v43, %v4108_v22  ;;  %6102 = vst [vmem:[%s7803_s9 + $0x48] sm:$0xff] %v6070_v38  ;;  %v2487_v59 = vadd.f32 %v2393_v11, %v2242_v15  ;;  %v5227_v57 = vmul.f32 %v9423_v42, %v14210_v63  ;;  %v14238_v36 = vld [vmem:[#allocation46_spill] sm:$0xff] }
 0x213   : > { %v5472_v31 = vmul.f32 %v9435_v9, %v14212_v46  ;;  %v418_v10 = vmul.f32 %v9051_v58, %v14237_v51  ;;  %6349 = vtanh.f32 %v5865_v55  ;;  %v14239_v8 = vrot.slane %v14238_v36, 3 }
 0x214   : > { %v14240_v18 = vrot.slane %v9395_v49, 4  ;;  %v5089_v11 = vrot.slane %v4982_v13, 4  ;;  %v2732_v22 = vadd.f32 %v2638_v14, %v2487_v59  ;;  %v14241_v62 = vrot.slane %v9409_v54, 4  ;;  %v14245_v14 = vld [vmem:[#allocation27_spill] sm:$0xff]  ;;  %v14249_v13 = vld [vmem:[#allocation33_spill] sm:$0xff] }
 0x215   : > { %v9562_v35 = vsel %vm3344_vm3, %v14239_v8, %v4353_v24  ;;  %v5334_v21 = vrot.slane %v5227_v57, 4  ;;  %v488_v38 = vmul.f32 %v14242_v29, %v8775_v37  ;;  %v14243_v15 = vrot.slane %v9421_v0, 4  ;;  %v9590_v37 = vld [vmem:[#allocation2 + $0xf0] sm:$0xff]  ;;  %v14248_v0 = vld [vmem:[#allocation22_spill] sm:$0xff]  ;;  %v14250_v57 = vld [vmem:[#allocation24_spill] sm:$0xff] }
 0x216   : > { %v9567_v56 = vsel %vm4570_vm4, %v14240_v18, %v4599_v41  ;;  %v9572_v53 = vsel %vm4570_vm4, %v14241_v62, %v4844_v3  ;;  %v5579_v49 = vrot.slane %v5472_v31, 4  ;;  %v558_v50 = vmul.f32 %v14244_v6, %v8784_v20  ;;  %14247 = vst [vmem:[#allocation16_spill] sm:$0xff] %v9590_v37  ;;  %v14253_v8 = vld [vmem:[#allocation55_spill] sm:$0xff] }
 0x217   : > { %v9579_v24 = vsel %vm4570_vm4, %v14243_v15, %v5089_v11  ;;  %v628_v34 = vmul.f32 %v14245_v14, %v8803_v26  ;;  %v2977_v54 = vadd.f32 %v2883_v27, %v2732_v22  ;;  %v14246_v43 = vrot.slane %v9429_v2, 4  ;;  %v14251_v26 = vld [vmem:[#allocation15_spill] sm:$0xff]  ;;  %v14252_v2 = vld [vmem:[#allocation45_spill] sm:$0xff] }
 0x218   : > { %v520_v41 = vadd.f32 %v488_v38, %v418_v10  ;;  %v698_v3 = vmul.f32 %v9590_v37, %v14248_v0  ;;  %v814_v59 = vmul.f32 %v14249_v13, %v14237_v51  ;;  %v9598_v20 = vmul.f32 %v14249_v13, %v14250_v57  ;;  %v14254_v11 = vld [vmem:[#allocation43_spill] sm:$0xff] }
 0x219   : > { %v9588_v55 = vsel %vm4570_vm4, %v14246_v43, %v5334_v21  ;;  %v1060_v27 = vmul.f32 %v14242_v29, %v14251_v26  ;;  %v9604_v31 = vmul.f32 %v14252_v2, %v14251_v26  ;;  %v3222_v10 = vadd.f32 %v3128_v17, %v2977_v54  ;;  %v9614_v43 = vld [vmem:[#allocation2 + $0xf8] sm:$0xff] }
 0x21a   : > { %v590_v36 = vadd.f32 %v558_v50, %v520_v41  ;;  %v1305_v18 = vmul.f32 %v14253_v8, %v14244_v6  ;;  %v9610_v22 = vmul.f32 %v14253_v8, %v14254_v11  ;;  %v923_v62 = vrot.slane %v814_v59, 1  ;;  %14255 = vst [vmem:[#allocation23_spill] sm:$0xff] %v9614_v43  ;;  %v14257_v41 = vld [vmem:[#allocation19_spill] sm:$0xff] }
 0x21b   : > { %v13479_v21 = vrot.slane %v9598_v20, 1  ;;  %v1168_v38 = vrot.slane %v1060_v27, 1  ;;  %v13478_v15 = vrot.slane %v9604_v31, 1  ;;  %v3468_v0 = vadd.f32 %v3374_v60, %v3222_v10  ;;  %v14258_v27 = vld [vmem:[#allocation14_spill] sm:$0xff] }
 0x21c   : > { %v660_v26 = vadd.f32 %v628_v34, %v590_v36  ;;  %v1413_v46 = vrot.slane %v1305_v18, 1  ;;  %v13483_v17 = vrot.slane %v9610_v22, 1  ;;  %v14256_v50 = vrot.slane %v9442_v39, 4 }
 0x21d   : > { %v925_v54 = vsel %vm892_vm1, %v923_v62, %v13479_v21  ;;  %v1550_v59 = vmul.f32 %v14245_v14, %v14257_v41  ;;  %v9629_v11 = vmul.f32 %v14257_v41, %v14258_v27  ;;  %v3713_v60 = vadd.f32 %v3619_v33, %v3468_v0  ;;  %v6350_v10 = vpop.eup %6349 }
 0x21e   : > { %v9620_v6 = vsel %vm4570_vm4, %v14256_v50, %v5579_v49  ;;  %v730_v34 = vadd.f32 %v698_v3, %v660_v26  ;;  %v1170_v39 = vsel %vm892_vm1, %v1168_v38, %v13478_v15  ;;  %v1795_v49 = vmul.f32 %v9590_v37, %v14193_v61 }
 0x21f   : > { %v1658_v36 = vrot.slane %v1550_v59, 1  ;;  %v13482_v18 = vrot.slane %v9629_v11, 1  ;;  %v9639_v62 = vmul.f32 %v14193_v61, %v9614_v43  ;;  %v2040_v50 = vmul.f32 %v14194_v12, %v14237_v51 }
 0x220   : > { %v5929_v33 = vadd.f32 1.0, %v6350_v10  ;;  %v3958_v3 = vadd.f32 %v3864_v7, %v3713_v60  ;;  %v1017_v0 = vadd.f32 %v925_v54, %v730_v34  ;;  %v1415_v38 = vsel %vm892_vm1, %v1413_v46, %v13483_v17 }
 0x221   : > { %v1903_v26 = vrot.slane %v1795_v49, 1  ;;  %v13481_v41 = vrot.slane %v9639_v62, 1  ;;  %v9649_v59 = vmul.f32 %v14194_v12, %v14250_v57  ;;  %v2149_v15 = vrot.slane %v2040_v50, 2  ;;  %v9663_v57 = vld [vmem:[#allocation2 + $0xc0] sm:$0xff] }
 0x222   : > { %v5961_v61 = vmul.f32 %v5929_v33, %v9509_v48  ;;  %v4203_v21 = vadd.f32 %v9548_v44, %v3958_v3  ;;  %v1262_v51 = vadd.f32 %v1170_v39, %v1017_v0  ;;  %v2286_v7 = vmul.f32 %v14242_v29, %v8884_v40  ;;  %v9670_v44 = vld [vmem:[%s13184_s2] ss:$0 sm:$0xff]  ;;  %v9681_v33 = vld [vmem:[#allocation2 + $0xc8] sm:$0xff] }
 0x223   : > { %v1660_v46 = vsel %vm892_vm1, %v1658_v36, %v13482_v18  ;;  %v13480_v54 = vrot.slane %v9649_v59, 2  ;;  %v9661_v60 = vmul.f32 %v14252_v2, %v8884_v40  ;;  %v2531_v48 = vmul.f32 %v9663_v57, %v9111_v47  ;;  %14259 = vst [vmem:[#allocation47_spill] sm:$0xff] %v9670_v44  ;;  %14260 = vst [vmem:[#allocation21_spill] sm:$0xff] %v9681_v33 }
 0x224   : > { %v6000_v34 = vmul.f32 %v9670_v44, %v5961_v61  ;;  %v4448_v39 = vadd.f32 %v9562_v35, %v4203_v21  ;;  %v1507_v49 = vadd.f32 %v1415_v38, %v1262_v51  ;;  %v2394_v10 = vrot.slane %v2286_v7, 2  ;;  %v9690_v35 = vld [vmem:[%s13185_s3] ss:$0 sm:$0xff] }
 0x225   : > { %v1905_v40 = vsel %vm892_vm1, %v1903_v26, %v13481_v41  ;;  %v2151_v36 = vsel %vm2118_vm2, %v2149_v15, %v13480_v54  ;;  %v13489_v50 = vrot.slane %v9661_v60, 2  ;;  %v9685_v3 = vmul.f32 %v9681_v33, %v9111_v47  ;;  %14261 = vst [vmem:[#allocation18_spill] sm:$0xff] %v9690_v35  ;;  %v6481_v54 = vld [vmem:[#allocation2 + $0xaa] sm:$0xff] }
 0x226   : > { %v6039_v21 = vadd.f32 %v9690_v35, %v6000_v34  ;;  %v4694_v0 = vadd.f32 %v9567_v56, %v4448_v39  ;;  %v1752_v38 = vadd.f32 %v1660_v46, %v1507_v49  ;;  %v2776_v15 = vmul.f32 %v14245_v14, %v8919_v45 }
 0x227   : > { %v2639_v26 = vrot.slane %v2531_v48, 2  ;;  %v13484_v61 = vrot.slane %v9685_v3, 2  ;;  %v9699_v51 = vmul.f32 %v8919_v45, %v14258_v27  ;;  %v3021_v7 = vmul.f32 %v9590_v37, %v8932_v23 }
 0x228   : > { %v6071_v41 = vadd.f32 %v6481_v54, %v6039_v21  ;;  %v4939_v34 = vadd.f32 %v9572_v53, %v4694_v0  ;;  %v1997_v56 = vadd.f32 %v1905_v40, %v1752_v38  ;;  %v2396_v46 = vsel %vm2118_vm2, %v2394_v10, %v13489_v50  ;;  %v6482_v54 = vld [vmem:[#allocation2 + $0x90] sm:$0xff]  ;;  %v9715_v40 = vld [vmem:[#allocation2 + $0x98] sm:$0xff] }
 0x229   : > { %v2884_v39 = vrot.slane %v2776_v15, 2  ;;  %v13488_v48 = vrot.slane %v9699_v51, 2  ;;  %v9710_v49 = vmul.f32 %v8932_v23, %v9614_v43  ;;  %v3129_v45 = vrot.slane %v3021_v7, 2 }
 0x22a   : > { %6103 = vst [vmem:[%s7803_s9 + $0x50] sm:$0xff] %v6071_v41  ;;  %v5184_v18 = vadd.f32 %v9579_v24, %v4939_v34  ;;  %v2243_v17 = vadd.f32 %v2151_v36, %v1997_v56  ;;  %v3266_v53 = vmul.f32 %v6482_v54, %v8943_v19  ;;  %v9719_v10 = vmul.f32 %v9715_v40, %v8943_v19 }
 0x22b   : > { %v2641_v21 = vsel %vm2118_vm2, %v2639_v26, %v13484_v61  ;;  %v13486_v23 = vrot.slane %v9710_v49, 2  ;;  %v3512_v41 = vmul.f32 %v9339_v1, %v14242_v29  ;;  %v9729_v24 = vmul.f32 %v9339_v1, %v14252_v2 }
 0x22c   : > { %v5429_v36 = vadd.f32 %v9588_v55, %v5184_v18  ;;  %v2488_v0 = vadd.f32 %v2396_v46, %v2243_v17  ;;  %v3375_v38 = vrot.slane %v3266_v53, 3  ;;  %v13485_v19 = vrot.slane %v9719_v10, 3 }
 0x22d   : > { %v2886_v15 = vsel %vm2118_vm2, %v2884_v39, %v13488_v48  ;;  %v3620_v26 = vrot.slane %v3512_v41, 3  ;;  %v13487_v7 = vrot.slane %v9729_v24, 3  ;;  %v3757_v34 = vmul.f32 %v9663_v57, %v14225_v25 }
 0x22e   : > { %v5674_v56 = vadd.f32 %v9620_v6, %v5429_v36  ;;  %v2733_v61 = vadd.f32 %v2641_v21, %v2488_v0  ;;  %v3131_v55 = vsel %vm2118_vm2, %v3129_v45, %v13486_v23  ;;  %v9745_v17 = vmul.f32 %v9681_v33, %v14225_v25 }
 0x22f   : > { %v3377_v18 = vsel %vm3344_vm3, %v3375_v38, %v13485_v19  ;;  %v3865_v46 = vrot.slane %v3757_v34, 3  ;;  %v4002_v39 = vmul.f32 %v9365_v30, %v14245_v14  ;;  %v9754_v6 = vmul.f32 %v9365_v30, %v14258_v27 }
 0x230   : > { %v5738_v53 = vmul.f32 0.044715, %v5674_v56  ;;  %v2978_v21 = vadd.f32 %v2886_v15, %v2733_v61  ;;  %v3622_v45 = vsel %vm3344_vm3, %v3620_v26, %v13487_v7  ;;  %v13491_v41 = vrot.slane %v9745_v17, 3 }
 0x231   : > { %v4110_v36 = vrot.slane %v4002_v39, 3  ;;  %v13490_v0 = vrot.slane %v9754_v6, 3  ;;  %v4247_v38 = vmul.f32 %v9590_v37, %v8988_v4  ;;  %v9765_v34 = vmul.f32 %v8988_v4, %v9614_v43 }
 0x232   : > { %v9767_v19 = vmul.f32 0.5, %v5674_v56  ;;  %v5770_v23 = vmul.f32 %v5738_v53, %v5674_v56  ;;  %v3223_v61 = vadd.f32 %v3131_v55, %v2978_v21  ;;  %v4492_v15 = vmul.f32 %v6482_v54, %v14231_v16 }
 0x233   : > { %v3867_v26 = vsel %vm3344_vm3, %v3865_v46, %v13491_v41  ;;  %v4355_v39 = vrot.slane %v4247_v38, 3  ;;  %v13493_v7 = vrot.slane %v9765_v34, 3  ;;  %v9776_v48 = vmul.f32 %v9715_v40, %v14231_v16 }
 0x234   : > { %v5802_v50 = vmul.f32 %v5770_v23, %v5674_v56  ;;  %v3469_v4 = vadd.f32 %v3377_v18, %v3223_v61  ;;  %v4112_v53 = vsel %vm3344_vm3, %v4110_v36, %v13490_v0  ;;  %v4738_v54 = vmul.f32 %v9399_v32, %v14242_v29 }
 0x235   : > { %v4601_v55 = vrot.slane %v4492_v15, 4  ;;  %v9786_v46 = vmul.f32 %v9399_v32, %v14252_v2  ;;  %v4983_v16 = vmul.f32 %v9663_v57, %v14236_v28  ;;  %v9792_v61 = vmul.f32 %v9681_v33, %v14236_v28 }
 0x236   : > { %v5834_v38 = vadd.f32 %v5802_v50, %v5674_v56  ;;  %v3714_v23 = vadd.f32 %v3622_v45, %v3469_v4  ;;  %v4846_v18 = vrot.slane %v4738_v54, 4  ;;  %v4357_v36 = vsel %vm3344_vm3, %v4355_v39, %v13493_v7 }
 0x237   : > { %14262 = vst [vmem:[#allocation41_spill] sm:$0xff] %v9792_v61  ;;  %v13496_v15 = vrot.slane %v9786_v46, 4  ;;  %v5091_v0 = vrot.slane %v4983_v16, 4  ;;  %v5228_v41 = vmul.f32 %v9423_v42, %v14245_v14  ;;  %v9803_v56 = vmul.f32 %v9423_v42, %v14258_v27 }
 0x238   : > { %v5866_v21 = vmul.f32 0.7978846, %v5834_v38  ;;  %v3959_v29 = vadd.f32 %v3867_v26, %v3714_v23  ;;  %v14264_v45 = vrot.slane %v9776_v48, 4  ;;  %v5473_v39 = vmul.f32 %v9590_v37, %v9435_v9 }
 0x239   : > { %14263 = vst [vmem:[#allocation49_spill] sm:$0xff] %v9803_v56  ;;  %v5336_v54 = vrot.slane %v5228_v41, 4  ;;  %v9812_v16 = vmul.f32 %v9435_v9, %v9614_v43  ;;  %v4848_v38 = vsel %vm4570_vm4, %v4846_v18, %v13496_v15  ;;  %v13497_v23 = vrot.slane %v9803_v56, 4  ;;  %v9831_v18 = vld [vmem:[#allocation6 + $0x10] ss:$0 sm:$0xff] }
 0x23a   : > { %v4603_v4 = vsel %vm4570_vm4, %v4601_v55, %v14264_v45  ;;  %6351 = vtanh.f32 %v5866_v21  ;;  %v4204_v26 = vadd.f32 %v4112_v53, %v3959_v29  ;;  %v5581_v7 = vrot.slane %v5473_v39, 4  ;;  %v9821_v55 = vld [vmem:[#allocation6 + $0x8] ss:$0 sm:$0xff]  ;;  %v9838_v15 = vld [vmem:[#allocation6 + $0x18] ss:$0 sm:$0xff] }
 0x23b   : > { %14265 = vst [vmem:[#allocation31_spill] sm:$0xff] %v9812_v16  ;;  %v13499_v50 = vrot.slane %v9812_v16, 4  ;;  %v419_v41 = vmul.f32 %v9715_v40, %v9051_v58  ;;  %v489_v45 = vmul.f32 %v9821_v55, %v14252_v2  ;;  %v14266_v29 = vrot.slane %v9792_v61, 4  ;;  %14267 = vst [vmem:[#allocation39_spill] sm:$0xff] %v9838_v15  ;;  %v9850_v16 = vld [vmem:[#allocation6 + $0x19] ss:$0 sm:$0xff] }
 0x23c   : > { %v4449_v37 = vadd.f32 %v4357_v36, %v4204_v26  ;;  %v5338_v21 = vsel %vm4570_vm4, %v5336_v54, %v13497_v23  ;;  %v559_v39 = vmul.f32 %v9831_v18, %v9681_v33  ;;  %v629_v36 = vmul.f32 %v9838_v15, %v14258_v27  ;;  %v9844_v54 = vld [vmem:[#allocation6 + $0x9] ss:$0 sm:$0xff]  ;;  %14269 = vst [vmem:[#allocation29_spill] sm:$0xff] %v9850_v16  ;;  %v9854_v27 = vld [vmem:[#allocation6 + $0x21] ss:$0 sm:$0xff]  ;;  %v14272_v33 = vld [vmem:[#allocation54_spill] sm:$0xff] }
 0x23d   : > { %v5093_v53 = vsel %vm4570_vm4, %v5091_v0, %v14266_v29  ;;  %v5583_v58 = vsel %vm4570_vm4, %v5581_v7, %v13499_v50  ;;  %v521_v40 = vadd.f32 %v489_v45, %v419_v41  ;;  %v816_v0 = vmul.f32 %v14249_v13, %v14082_v52  ;;  %14268 = vst [vmem:[#allocation28_spill] sm:$0xff] %v9844_v54  ;;  %v14270_v7 = vld [vmem:[#allocation53_spill] sm:$0xff]  ;;  %v9860_v56 = vld [vmem:[#allocation6 + $0x20] ss:$0 sm:$0xff] }
 0x23e   : > { %v4695_v26 = vadd.f32 %v4603_v4, %v4449_v37  ;;  %v1062_v29 = vmul.f32 %v9844_v54, %v14084_v5  ;;  %v1307_v23 = vmul.f32 %v14253_v8, %v14210_v63  ;;  %v1552_v41 = vmul.f32 %v9850_v16, %v14270_v7  ;;  %14271 = vst [vmem:[#allocation26_spill] sm:$0xff] %v9854_v27 }
 0x23f   : > { %v591_v45 = vadd.f32 %v559_v39, %v521_v40  ;;  %v926_v50 = vrot.slane %v816_v0, 1  ;;  %v1797_v37 = vmul.f32 %v9854_v27, %v14272_v33  ;;  %v2042_v13 = vmul.f32 %v14194_v12, %v14082_v52  ;;  %14273 = vst [vmem:[#allocation32_spill] sm:$0xff] %v9860_v56 }
 0x240   : > { %v4940_v4 = vadd.f32 %v4848_v38, %v4695_v26  ;;  %v1171_v54 = vrot.slane %v1062_v29, 1  ;;  %v1416_v2 = vrot.slane %v1307_v23, 1  ;;  %v1661_v15 = vrot.slane %v1552_v41, 1 }
 0x241   : > { %v661_v8 = vadd.f32 %v629_v36, %v591_v45  ;;  %v699_v16 = vmul.f32 %v9860_v56, %v9614_v43  ;;  %v14274_v39 = vrot.slane %v9598_v20, 1  ;;  %v1906_v0 = vrot.slane %v1797_v37, 1  ;;  %v9879_v45 = vld [vmem:[#allocation6 + $0xa] ss:$0 sm:$0xff] }
 0x242   : > { %v5185_v61 = vadd.f32 %v5093_v53, %v4940_v4  ;;  %v14275_v27 = vrot.slane %v9604_v31, 1  ;;  %v14276_v38 = vrot.slane %v9610_v22, 1  ;;  %v2152_v36 = vrot.slane %v2042_v13, 2  ;;  %v9885_v22 = vld [vmem:[#allocation6 + $0x1a] ss:$0 sm:$0xff] }
 0x243   : > { %v927_v40 = vsel %vm892_vm1, %v14274_v39, %v926_v50  ;;  %v731_v26 = vadd.f32 %v699_v16, %v661_v8  ;;  %v14277_v29 = vrot.slane %v9629_v11, 1  ;;  %v14278_v20 = vrot.slane %v9639_v62, 1  ;;  %v9893_v13 = vld [vmem:[#allocation6 + $0x3] ss:$0 sm:$0xff] }
 0x244   : > { %v1172_v12 = vsel %vm892_vm1, %v14275_v27, %v1171_v54  ;;  %v1417_v23 = vsel %vm892_vm1, %v14276_v38, %v1416_v2  ;;  %v2288_v31 = vmul.f32 %v9879_v45, %v14084_v5  ;;  %v6352_v27 = vpop.eup %6351  ;;  %v5430_v53 = vadd.f32 %v5338_v21, %v5185_v61 }
 0x245   : > { %v1662_v41 = vsel %vm892_vm1, %v14277_v29, %v1661_v15  ;;  %v1907_v50 = vsel %vm892_vm1, %v14278_v20, %v1906_v0  ;;  %v2533_v2 = vmul.f32 %v9111_v47, %v14210_v63  ;;  %v2778_v11 = vmul.f32 %v9885_v22, %v14270_v7  ;;  %v9889_v15 = vld [vmem:[#allocation6 + $0x22] ss:$0 sm:$0xff] }
 0x246   : > { %v3023_v62 = vmul.f32 %v9889_v15, %v14272_v33  ;;  %v5930_v16 = vadd.f32 1.0, %v6352_v27  ;;  %v1018_v54 = vadd.f32 %v927_v40, %v731_v26  ;;  %v2397_v37 = vrot.slane %v2288_v31, 2 }
 0x247   : > { %v3268_v61 = vmul.f32 %v9893_v13, %v14082_v52  ;;  %v5675_v21 = vadd.f32 %v5583_v58, %v5430_v53  ;;  %v2642_v47 = vrot.slane %v2533_v2, 2  ;;  %v2887_v4 = vrot.slane %v2778_v11, 2 }
 0x248   : > { %v3132_v8 = vrot.slane %v3023_v62, 2  ;;  %v5962_v39 = vmul.f32 %v5930_v16, %v9767_v19  ;;  %v1263_v0 = vadd.f32 %v1172_v12, %v1018_v54  ;;  %v14279_v38 = vrot.slane %v9649_v59, 2 }
 0x249   : > { %v14280_v20 = vrot.slane %v9661_v60, 2  ;;  %v9904_v26 = vmul.f32 0.5, %v5675_v21  ;;  %v5739_v31 = vmul.f32 0.044715, %v5675_v21  ;;  %v14281_v27 = vrot.slane %v9685_v3, 2 }
 0x24a   : > { %v2153_v29 = vsel %vm2118_vm2, %v14279_v38, %v2152_v36  ;;  %v3378_v53 = vrot.slane %v3268_v61, 3  ;;  %v6001_v2 = vmul.f32 %v9670_v44, %v5962_v39  ;;  %v1508_v19 = vadd.f32 %v1417_v23, %v1263_v0  ;;  %v6497_v0 = vld [vmem:[#allocation2 + $0xb2] sm:$0xff] }
 0x24b   : > { %v2398_v40 = vsel %vm2118_vm2, %v14280_v20, %v2397_v37  ;;  %v2643_v58 = vsel %vm2118_vm2, %v14281_v27, %v2642_v47  ;;  %v14282_v12 = vrot.slane %v9699_v51, 2  ;;  %v14283_v36 = vrot.slane %v9710_v49, 2  ;;  %v9923_v51 = vld [vmem:[#allocation6 + $0x23] ss:$0 sm:$0xff]  ;;  %v9927_v37 = vld [vmem:[#allocation6 + $0x4] ss:$0 sm:$0xff] }
 0x24c   : > { %v5771_v11 = vmul.f32 %v5739_v31, %v5675_v21  ;;  %v3514_v62 = vmul.f32 %v9339_v1, %v14084_v5  ;;  %v3759_v3 = vmul.f32 %v14225_v25, %v14210_v63  ;;  %v4004_v16 = vmul.f32 %v9365_v30, %v14270_v7  ;;  %14284 = vst [vmem:[#allocation56_spill] sm:$0xff] %v9923_v51 }
 0x24d   : > { %v2888_v59 = vsel %vm2118_vm2, %v14282_v12, %v2887_v4  ;;  %v3133_v60 = vsel %vm2118_vm2, %v14283_v36, %v3132_v8  ;;  %v6040_v23 = vadd.f32 %v9690_v35, %v6001_v2  ;;  %v1753_v54 = vadd.f32 %v1662_v41, %v1508_v19 }
 0x24e   : > { %v4249_v49 = vmul.f32 %v9923_v51, %v14272_v33  ;;  %v4494_v61 = vmul.f32 %v9927_v37, %v14082_v52  ;;  %v5803_v47 = vmul.f32 %v5771_v11, %v5675_v21  ;;  %v3623_v4 = vrot.slane %v3514_v62, 3 }
 0x24f   : > { %v3868_v8 = vrot.slane %v3759_v3, 3  ;;  %v4113_v39 = vrot.slane %v4004_v16, 3  ;;  %v6072_v38 = vadd.f32 %v6497_v0, %v6040_v23  ;;  %v1998_v20 = vadd.f32 %v1907_v50, %v1753_v54  ;;  %v9961_v54 = vld [vmem:[#allocation6] ss:$0 sm:$0xff] }
 0x250   : > { %v14285_v41 = vrot.slane %v9719_v10, 3  ;;  %v4358_v27 = vrot.slane %v4249_v49, 3  ;;  %v5835_v2 = vadd.f32 %v5803_v47, %v5675_v21  ;;  %v14286_v19 = vrot.slane %v9729_v24, 3 }
 0x251   : > { %v14287_v36 = vrot.slane %v9745_v17, 3  ;;  %v4604_v11 = vrot.slane %v4494_v61, 4  ;;  %6104 = vst [vmem:[%s7803_s9 + $0x58] sm:$0xff] %v6072_v38  ;;  %v2244_v62 = vadd.f32 %v2153_v29, %v1998_v20  ;;  %v14288_v50 = vrot.slane %v9754_v6, 3 }
 0x252   : > { %v3379_v31 = vsel %vm3344_vm3, %v14285_v41, %v3378_v53  ;;  %v3624_v12 = vsel %vm3344_vm3, %v14286_v19, %v3623_v4  ;;  %v14289_v53 = vrot.slane %v9765_v34, 3  ;;  %v4740_v24 = vmul.f32 %v9399_v32, %v14084_v5  ;;  %v14290_v34 = vld [vmem:[#allocation44_spill] sm:$0xff] }
 0x253   : > { %v9940_v52 = vsel %vm3344_vm3, %v14287_v36, %v3868_v8  ;;  %v9946_v10 = vsel %vm3344_vm3, %v14288_v50, %v4113_v39  ;;  %v5867_v17 = vmul.f32 0.7978846, %v5835_v2  ;;  %v4985_v3 = vmul.f32 %v14236_v28, %v14210_v63  ;;  %v14293_v2 = vld [vmem:[#allocation41_spill] sm:$0xff]  ;;  %v14298_v50 = vld [vmem:[#allocation39_spill] sm:$0xff] }
 0x254   : > { %v9951_v21 = vsel %vm3344_vm3, %v14289_v53, %v4358_v27  ;;  %v5230_v29 = vmul.f32 %v9423_v42, %v14270_v7  ;;  %v5475_v6 = vmul.f32 %v9435_v9, %v14272_v33  ;;  %v2489_v16 = vadd.f32 %v2398_v40, %v2244_v62  ;;  %v14295_v36 = vld [vmem:[#allocation49_spill] sm:$0xff] }
 0x255   : > { %v4849_v23 = vrot.slane %v4740_v24, 4  ;;  %v420_v49 = vmul.f32 %v9961_v54, %v14290_v34  ;;  %v490_v61 = vmul.f32 %v9821_v55, %v9663_v57  ;;  %6353 = vtanh.f32 %v5867_v17  ;;  %v10024_v63 = vld [vmem:[#allocation2 + $0x110] sm:$0xff] }
 0x256   : > { %v14291_v47 = vrot.slane %v9776_v48, 4  ;;  %v5094_v8 = vrot.slane %v4985_v3, 4  ;;  %v5339_v39 = vrot.slane %v5230_v29, 4  ;;  %v2734_v0 = vadd.f32 %v2643_v58, %v2489_v16  ;;  %v14297_v58 = vld [vmem:[#allocation16_spill] sm:$0xff]  ;;  %v9995_v29 = vld [vmem:[#allocation6 + $0x1] ss:$0 sm:$0xff] }
 0x257   : > { %v5584_v38 = vrot.slane %v5475_v6, 4  ;;  %v522_v40 = vadd.f32 %v490_v61, %v420_v49  ;;  %v560_v20 = vmul.f32 %v9831_v18, %v14245_v14  ;;  %v14292_v41 = vrot.slane %v9786_v46, 4  ;;  %v9991_v3 = vld [vmem:[#allocation2 + $0x108] sm:$0xff]  ;;  %14300 = vst [vmem:[#allocation58_spill] sm:$0xff] %v9995_v29  ;;  %v14301_v16 = vld [vmem:[#allocation45_spill] sm:$0xff]  ;;  %14309 = vst [vmem:[#allocation13_spill] sm:$0xff] %v10024_v63 }
 0x258   : > { %v9970_v4 = vsel %vm4570_vm4, %v14291_v47, %v4604_v11  ;;  %v14294_v19 = vrot.slane %v14293_v2, 4  ;;  %v14296_v11 = vrot.slane %v14295_v36, 4  ;;  %v630_v53 = vmul.f32 %v14298_v50, %v14297_v58  ;;  %14299 = vst [vmem:[#allocation12_spill] sm:$0xff] %v9991_v3  ;;  %v14303_v49 = vld [vmem:[#allocation28_spill] sm:$0xff]  ;;  %v14304_v47 = vld [vmem:[#allocation21_spill] sm:$0xff] }
 0x259   : > { %v9977_v27 = vsel %vm4570_vm4, %v14292_v41, %v4849_v23  ;;  %v2979_v24 = vadd.f32 %v2888_v59, %v2734_v0  ;;  %v592_v17 = vadd.f32 %v560_v20, %v522_v40  ;;  %v700_v46 = vmul.f32 %v9991_v3, %v9860_v56  ;;  %v14306_v41 = vld [vmem:[#allocation14_spill] sm:$0xff] }
 0x25a   : > { %v9982_v48 = vsel %vm4570_vm4, %v14294_v19, %v5094_v8  ;;  %v9987_v62 = vsel %vm4570_vm4, %v14296_v11, %v5339_v39  ;;  %v817_v6 = vmul.f32 %v9995_v29, %v14290_v34  ;;  %v10001_v23 = vmul.f32 %v9995_v29, %v14301_v16  ;;  %v10009_v8 = vld [vmem:[#allocation6 + $0x11] ss:$0 sm:$0xff]  ;;  %v14307_v19 = vld [vmem:[#allocation31_spill] sm:$0xff] }
 0x25b   : > { %v1063_v61 = vmul.f32 %v14303_v49, %v9663_v57  ;;  %v10007_v59 = vmul.f32 %v14303_v49, %v14304_v47  ;;  %14305 = vst [vmem:[#allocation48_spill] sm:$0xff] %v10009_v8  ;;  %v1308_v39 = vmul.f32 %v10009_v8, %v14245_v14  ;;  %v3224_v0 = vadd.f32 %v3133_v60, %v2979_v24  ;;  %v14310_v24 = vld [vmem:[#allocation29_spill] sm:$0xff] }
 0x25c   : > { %14302 = vst [vmem:[#allocation42_spill] sm:$0xff] %v10001_v23  ;;  %v662_v40 = vadd.f32 %v630_v53, %v592_v17  ;;  %v928_v20 = vrot.slane %v817_v6, 1  ;;  %v10015_v2 = vmul.f32 %v10009_v8, %v14306_v41  ;;  %v14308_v36 = vrot.slane %v14307_v19, 4 }
 0x25d   : > { %v13518_v33 = vrot.slane %v10001_v23, 1  ;;  %v1173_v7 = vrot.slane %v1063_v61, 1  ;;  %v13520_v49 = vrot.slane %v10007_v59, 1  ;;  %v3470_v14 = vadd.f32 %v3379_v31, %v3224_v0  ;;  %v14311_v61 = vld [vmem:[#allocation26_spill] sm:$0xff] }
 0x25e   : > { %v10020_v11 = vsel %vm4570_vm4, %v14308_v36, %v5584_v38  ;;  %v732_v60 = vadd.f32 %v700_v46, %v662_v40  ;;  %v1418_v53 = vrot.slane %v1308_v39, 1  ;;  %v1553_v17 = vmul.f32 %v14310_v24, %v14297_v58  ;;  %v10046_v38 = vld [vmem:[#allocation6 + $0x2] ss:$0 sm:$0xff] }
 0x25f   : > { %v930_v6 = vsel %vm892_vm1, %v928_v20, %v13518_v33  ;;  %v10034_v41 = vmul.f32 %v14310_v24, %v9614_v43  ;;  %v1798_v19 = vmul.f32 %v9991_v3, %v14311_v61  ;;  %v3715_v36 = vadd.f32 %v3624_v12, %v3470_v14  ;;  %v6354_v0 = vpop.eup %6353 }
 0x260   : > { %v1019_v31 = vadd.f32 %v930_v6, %v732_v60  ;;  %v1175_v46 = vsel %vm892_vm1, %v1173_v7, %v13520_v49  ;;  %v1663_v39 = vrot.slane %v1553_v17, 1  ;;  %v10044_v20 = vmul.f32 %v14311_v61, %v10024_v63 }
 0x261   : > { %v13521_v40 = vrot.slane %v10034_v41, 1  ;;  %v1908_v33 = vrot.slane %v1798_v19, 1  ;;  %v2043_v23 = vmul.f32 %v10046_v38, %v14290_v34  ;;  %v5931_v12 = vadd.f32 1.0, %v6354_v0 }
 0x262   : > { %v3960_v14 = vadd.f32 %v9940_v52, %v3715_v36  ;;  %v1264_v60 = vadd.f32 %v1175_v46, %v1019_v31  ;;  %v10053_v7 = vmul.f32 %v10046_v38, %v14301_v16  ;;  %v14312_v17 = vrot.slane %v10015_v2, 1 }
 0x263   : > { %v1665_v19 = vsel %vm892_vm1, %v1663_v39, %v13521_v40  ;;  %v13522_v49 = vrot.slane %v10044_v20, 1  ;;  %v2289_v34 = vmul.f32 %v9879_v45, %v9663_v57  ;;  %v5963_v52 = vmul.f32 %v5931_v12, %v9904_v26  ;;  %v10073_v39 = vld [vmem:[#allocation6 + $0x12] ss:$0 sm:$0xff] }
 0x264   : > { %v1420_v6 = vsel %vm892_vm1, %v1418_v53, %v14312_v17  ;;  %v4205_v36 = vadd.f32 %v9946_v10, %v3960_v14  ;;  %v2154_v16 = vrot.slane %v2043_v23, 2  ;;  %v10069_v53 = vmul.f32 %v9879_v45, %v14304_v47  ;;  %v10071_v17 = vld [vmem:[#allocation2 + $0xd8] sm:$0xff] }
 0x265   : > { %v1509_v31 = vadd.f32 %v1420_v6, %v1264_v60  ;;  %v2399_v0 = vrot.slane %v2289_v34, 2  ;;  %14313 = vst [vmem:[#allocation34_spill] sm:$0xff] %v10071_v17  ;;  %v2534_v40 = vmul.f32 %v10073_v39, %v10071_v17  ;;  %v6002_v26 = vmul.f32 %v9670_v44, %v5963_v52  ;;  %v10083_v60 = vld [vmem:[#allocation2 + $0xe0] sm:$0xff] }
 0x266   : > { %v4450_v10 = vadd.f32 %v9951_v21, %v4205_v36  ;;  %v1910_v23 = vsel %vm892_vm1, %v1908_v33, %v13522_v49  ;;  %v13527_v14 = vrot.slane %v10069_v53, 2  ;;  %14314 = vst [vmem:[#allocation50_spill] sm:$0xff] %v10083_v60  ;;  %v10087_v6 = vmul.f32 %v10083_v60, %v10073_v39 }
 0x267   : > { %v1754_v12 = vadd.f32 %v1665_v19, %v1509_v31  ;;  %v2644_v34 = vrot.slane %v2534_v40, 2  ;;  %v2779_v46 = vmul.f32 %v9885_v22, %v14297_v58  ;;  %v6041_v52 = vadd.f32 %v9690_v35, %v6002_v26 }
 0x268   : > { %v4696_v21 = vadd.f32 %v9970_v4, %v4450_v10  ;;  %v10095_v33 = vmul.f32 %v9885_v22, %v9614_v43  ;;  %v14316_v36 = vrot.slane %v10053_v7, 2  ;;  %v2401_v40 = vsel %vm2118_vm2, %v2399_v0, %v13527_v14  ;;  %v6506_v4 = vld [vmem:[#allocation2 + $0xc2] sm:$0xff] }
 0x269   : > { %v1999_v19 = vadd.f32 %v1910_v23, %v1754_v12  ;;  %v13528_v49 = vrot.slane %v10087_v6, 2  ;;  %v3024_v26 = vmul.f32 %v9991_v3, %v9889_v15  ;;  %v6073_v10 = vadd.f32 %v6506_v4, %v6041_v52 }
 0x26a   : > { %14315 = vst [vmem:[#allocation40_spill] sm:$0xff] %v10095_v33  ;;  %v2156_v31 = vsel %vm2118_vm2, %v2154_v16, %v14316_v36  ;;  %v4941_v12 = vadd.f32 %v9977_v27, %v4696_v21  ;;  %v2889_v35 = vrot.slane %v2779_v46, 2  ;;  %v13532_v16 = vrot.slane %v10095_v33, 2  ;;  %v6507_v36 = vld [vmem:[#allocation2 + $0xa8] sm:$0xff]  ;;  %v10118_v21 = vld [vmem:[#allocation2 + $0xb0] sm:$0xff] }
 0x26b   : > { %v2245_v23 = vadd.f32 %v2156_v31, %v1999_v19  ;;  %v2646_v44 = vsel %vm2118_vm2, %v2644_v34, %v13528_v49  ;;  %v10113_v0 = vmul.f32 %v9889_v15, %v10024_v63  ;;  %v3269_v14 = vmul.f32 %v6507_v36, %v9893_v13  ;;  %6105 = vst [vmem:[%s7803_s9 + $0x60] sm:$0xff] %v6073_v10 }
 0x26c   : > { %v5186_v52 = vadd.f32 %v9982_v48, %v4941_v12  ;;  %v3134_v27 = vrot.slane %v3024_v26, 2  ;;  %v10122_v46 = vmul.f32 %v10118_v21, %v9893_v13  ;;  %v3515_v31 = vmul.f32 %v9663_v57, %v9339_v1 }
 0x26d   : > { %v2490_v4 = vadd.f32 %v2401_v40, %v2245_v23  ;;  %v3380_v19 = vrot.slane %v3269_v14, 3  ;;  %v10129_v49 = vmul.f32 %v14304_v47, %v9339_v1  ;;  %v3760_v10 = vmul.f32 %v10071_v17, %v14225_v25 }
 0x26e   : > { %v5431_v48 = vadd.f32 %v9987_v62, %v5186_v52  ;;  %v13530_v26 = vrot.slane %v10122_v46, 3  ;;  %v2891_v12 = vsel %vm2118_vm2, %v2889_v35, %v13532_v16  ;;  %v3625_v14 = vrot.slane %v3515_v31, 3 }
 0x26f   : > { %14317 = vst [vmem:[#allocation46_spill] sm:$0xff] %v10129_v49  ;;  %v2735_v40 = vadd.f32 %v2646_v44, %v2490_v4  ;;  %v13531_v23 = vrot.slane %v10129_v49, 3  ;;  %v10141_v34 = vmul.f32 %v10083_v60, %v14225_v25  ;;  %v14319_v44 = vrot.slane %v10113_v0, 2 }
 0x270   : > { %v5676_v1 = vadd.f32 %v10020_v11, %v5431_v48  ;;  %v3870_v4 = vrot.slane %v3760_v10, 3  ;;  %v3382_v33 = vsel %vm3344_vm3, %v3380_v19, %v13530_v26  ;;  %v4005_v31 = vmul.f32 %v14297_v58, %v9365_v30 }
 0x271   : > { %14318 = vst [vmem:[#allocation52_spill] sm:$0xff] %v10141_v34  ;;  %v2980_v62 = vadd.f32 %v2891_v12, %v2735_v40  ;;  %v3136_v52 = vsel %vm2118_vm2, %v3134_v27, %v14319_v44  ;;  %v13534_v35 = vrot.slane %v10141_v34, 3  ;;  %v10155_v25 = vmul.f32 %v9365_v30, %v9614_v43 }
 0x272   : > { %v5740_v11 = vmul.f32 0.044715, %v5676_v1  ;;  %v3627_v27 = vsel %vm3344_vm3, %v3625_v14, %v13531_v23  ;;  %v4250_v40 = vmul.f32 %v9991_v3, %v9923_v51  ;;  %v10162_v10 = vmul.f32 0.5, %v5676_v1 }
 0x273   : > { %v3225_v48 = vadd.f32 %v3136_v52, %v2980_v62  ;;  %v4115_v19 = vrot.slane %v4005_v31, 3  ;;  %v10167_v44 = vmul.f32 %v9923_v51, %v10024_v63  ;;  %v3872_v62 = vsel %vm3344_vm3, %v3870_v4, %v13534_v35 }
 0x274   : > { %v5772_v30 = vmul.f32 %v5740_v11, %v5676_v1  ;;  %v4495_v14 = vmul.f32 %v6507_v36, %v9927_v37  ;;  %v4360_v52 = vrot.slane %v4250_v40, 3  ;;  %v10176_v31 = vmul.f32 %v10118_v21, %v9927_v37 }
 0x275   : > { %v3471_v26 = vadd.f32 %v3382_v33, %v3225_v48  ;;  %v4741_v16 = vmul.f32 %v9663_v57, %v9399_v32  ;;  %v10182_v33 = vmul.f32 %v14304_v47, %v9399_v32  ;;  %v14320_v4 = vrot.slane %v10155_v25, 3 }
 0x276   : > { %v5804_v12 = vmul.f32 %v5772_v30, %v5676_v1  ;;  %v4606_v11 = vrot.slane %v4495_v14, 4  ;;  %v13539_v48 = vrot.slane %v10176_v31, 4  ;;  %v4986_v35 = vmul.f32 %v10071_v17, %v14236_v28 }
 0x277   : > { %v3716_v49 = vadd.f32 %v3627_v27, %v3471_v26  ;;  %v4117_v36 = vsel %vm3344_vm3, %v4115_v19, %v14320_v4  ;;  %v4851_v40 = vrot.slane %v4741_v16, 4  ;;  %v13538_v30 = vrot.slane %v10182_v33, 4 }
 0x278   : > { %v5836_v23 = vadd.f32 %v5804_v12, %v5676_v1  ;;  %v10193_v26 = vmul.f32 %v10083_v60, %v14236_v28  ;;  %v14321_v32 = vrot.slane %v10167_v44, 3  ;;  %v5096_v14 = vrot.slane %v4986_v35, 4 }
 0x279   : > { %v3961_v34 = vadd.f32 %v3872_v62, %v3716_v49  ;;  %v5231_v19 = vmul.f32 %v14297_v58, %v9423_v42  ;;  %v10202_v16 = vmul.f32 %v9423_v42, %v9614_v43  ;;  %v4608_v12 = vsel %vm4570_vm4, %v4606_v11, %v13539_v48 }
 0x27a   : > { %v4362_v27 = vsel %vm3344_vm3, %v4360_v52, %v14321_v32  ;;  %v5868_v1 = vmul.f32 0.7978846, %v5836_v23  ;;  %v13537_v28 = vrot.slane %v10193_v26, 4  ;;  %v5476_v35 = vmul.f32 %v9991_v3, %v9435_v9 }
 0x27b   : > { %14322 = vst [vmem:[#allocation27_spill] sm:$0xff] %v10202_v16  ;;  %v4206_v49 = vadd.f32 %v4117_v36, %v3961_v34  ;;  %v5341_v62 = vrot.slane %v5231_v19, 4  ;;  %v13536_v4 = vrot.slane %v10202_v16, 4  ;;  %v10213_v52 = vmul.f32 %v9435_v9, %v10024_v63  ;;  %v14327_v19 = vld [vmem:[#allocation57_spill] sm:$0xff]  ;;  %v14329_v16 = vld [vmem:[#allocation42_spill] sm:$0xff] }
 0x27c   : > { %6355 = vtanh.f32 %v5868_v1  ;;  %v4853_v34 = vsel %vm4570_vm4, %v4851_v40, %v13538_v30  ;;  %v421_v23 = vmul.f32 %v10118_v21, %v9961_v54  ;;  %v5098_v11 = vsel %vm4570_vm4, %v5096_v14, %v13537_v28  ;;  %v14326_v30 = vld [vmem:[#allocation54_spill] sm:$0xff] }
 0x27d   : > { %v4451_v42 = vadd.f32 %v4362_v27, %v4206_v49  ;;  %v5343_v36 = vsel %vm4570_vm4, %v5341_v62, %v13536_v4  ;;  %v5586_v32 = vrot.slane %v5476_v35, 4  ;;  %v491_v9 = vmul.f32 %v9821_v55, %v14304_v47  ;;  %v14323_v62 = vld [vmem:[#allocation51_spill] sm:$0xff]  ;;  %v14324_v35 = vld [vmem:[#allocation28_spill] sm:$0xff] }
 0x27e   : > { %v561_v40 = vmul.f32 %v10083_v60, %v9831_v18  ;;  %v631_v21 = vmul.f32 %v14298_v50, %v9614_v43  ;;  %v701_v14 = vmul.f32 %v9860_v56, %v10024_v63  ;;  %v819_v49 = vmul.f32 %v9995_v29, %v14084_v5 }
 0x27f   : > { %v4697_v27 = vadd.f32 %v4608_v12, %v4451_v42  ;;  %v523_v1 = vadd.f32 %v491_v9, %v421_v23  ;;  %v1065_v4 = vmul.f32 %v14324_v35, %v14323_v62  ;;  %v14325_v12 = vld [vmem:[#allocation53_spill] sm:$0xff]  ;;  %v1555_v48 = vmul.f32 %v14310_v24, %v14326_v30 }
 0x280   : > { %v1310_v42 = vmul.f32 %v10009_v8, %v14325_v12  ;;  %v1800_v43 = vmul.f32 %v14311_v61, %v14327_v19  ;;  %v931_v9 = vrot.slane %v819_v49, 1  ;;  %v2045_v63 = vmul.f32 %v10046_v38, %v14084_v5 }
 0x281   : > { %v4942_v28 = vadd.f32 %v4853_v34, %v4697_v27  ;;  %v593_v23 = vadd.f32 %v561_v40, %v523_v1  ;;  %v1176_v60 = vrot.slane %v1065_v4, 1  ;;  %v1666_v29 = vrot.slane %v1555_v48, 1 }
 0x282   : > { %v1421_v47 = vrot.slane %v1310_v42, 1  ;;  %v1911_v35 = vrot.slane %v1800_v43, 1  ;;  %v14328_v34 = vrot.slane %v10213_v52, 4  ;;  %v14330_v24 = vrot.slane %v14329_v16, 1 }
 0x283   : > { %v5187_v56 = vadd.f32 %v5098_v11, %v4942_v28  ;;  %v663_v8 = vadd.f32 %v631_v21, %v593_v23  ;;  %v14331_v40 = vrot.slane %v10007_v59, 1  ;;  %v14332_v49 = vrot.slane %v10015_v2, 1 }
 0x284   : > { %v5588_v27 = vsel %vm4570_vm4, %v5586_v32, %v14328_v34  ;;  %v932_v3 = vsel %vm892_vm1, %v14330_v24, %v931_v9  ;;  %v14333_v43 = vrot.slane %v10034_v41, 1  ;;  %v2157_v11 = vrot.slane %v2045_v63, 2 }
 0x285   : > { %v1177_v4 = vsel %vm892_vm1, %v14331_v40, %v1176_v60  ;;  %v5432_v1 = vadd.f32 %v5343_v36, %v5187_v56  ;;  %v1422_v28 = vsel %vm892_vm1, %v14332_v49, %v1421_v47  ;;  %v733_v32 = vadd.f32 %v701_v14, %v663_v8 }
 0x286   : > { %v1667_v48 = vsel %vm892_vm1, %v14333_v43, %v1666_v29  ;;  %v14334_v21 = vrot.slane %v10044_v20, 1  ;;  %v2291_v59 = vmul.f32 %v9879_v45, %v14323_v62  ;;  %v2536_v56 = vmul.f32 %v10073_v39, %v14325_v12  ;;  %v6356_v24 = vpop.eup %6355 }
 0x287   : > { %v5677_v2 = vadd.f32 %v5588_v27, %v5432_v1  ;;  %v2781_v47 = vmul.f32 %v9885_v22, %v14326_v30  ;;  %v3026_v29 = vmul.f32 %v9889_v15, %v14327_v19  ;;  %v3271_v63 = vmul.f32 %v9893_v13, %v14084_v5 }
 0x288   : > { %v1912_v16 = vsel %vm892_vm1, %v14334_v21, %v1911_v35  ;;  %v5932_v8 = vadd.f32 1.0, %v6356_v24  ;;  %v1020_v41 = vadd.f32 %v932_v3, %v733_v32  ;;  %v2402_v20 = vrot.slane %v2291_v59, 2  ;;  %v14338_v32 = vld [vmem:[#allocation40_spill] sm:$0xff]  ;;  %v14340_v59 = vld [vmem:[#allocation47_spill] sm:$0xff] }
 0x289   : > { %v2647_v60 = vrot.slane %v2536_v56, 2  ;;  %v5741_v36 = vmul.f32 0.044715, %v5677_v2  ;;  %v14335_v14 = vrot.slane %v10053_v7, 2  ;;  %v2892_v42 = vrot.slane %v2781_v47, 2 }
 0x28a   : > { %v3137_v23 = vrot.slane %v3026_v29, 2  ;;  %v5964_v9 = vmul.f32 %v5932_v8, %v10162_v10  ;;  %v10279_v34 = vmul.f32 0.5, %v5677_v2  ;;  %v1265_v27 = vadd.f32 %v1177_v4, %v1020_v41  ;;  %v10291_v24 = vld [vmem:[#allocation6 + $0xb] ss:$0 sm:$0xff]  ;;  %v10295_v4 = vld [vmem:[#allocation6 + $0x13] ss:$0 sm:$0xff] }
 0x28b   : > { %v2158_v35 = vsel %vm2118_vm2, %v14335_v14, %v2157_v11  ;;  %v14336_v40 = vrot.slane %v10069_v53, 2  ;;  %v5773_v49 = vmul.f32 %v5741_v36, %v5677_v2  ;;  %v14337_v3 = vrot.slane %v10087_v6, 2  ;;  %14341 = vst [vmem:[#allocation22_spill] sm:$0xff] %v10291_v24  ;;  %14342 = vst [vmem:[#allocation33_spill] sm:$0xff] %v10295_v4  ;;  %v10302_v41 = vld [vmem:[#allocation6 + $0x1b] ss:$0 sm:$0xff] }
 0x28c   : > { %v14339_v7 = vrot.slane %v14338_v32, 2  ;;  %v3383_v21 = vrot.slane %v3271_v63, 3  ;;  %v6003_v56 = vmul.f32 %v14340_v59, %v5964_v9  ;;  %v1510_v10 = vadd.f32 %v1422_v28, %v1265_v27  ;;  %14344 = vst [vmem:[#allocation24_spill] sm:$0xff] %v10302_v41 }
 0x28d   : > { %v2403_v1 = vsel %vm2118_vm2, %v14336_v40, %v2402_v20  ;;  %v2648_v43 = vsel %vm2118_vm2, %v14337_v3, %v2647_v60  ;;  %v3517_v53 = vmul.f32 %v10291_v24, %v14323_v62  ;;  %v3762_v6 = vmul.f32 %v10295_v4, %v14325_v12  ;;  %v14345_v20 = vld [vmem:[#allocation18_spill] sm:$0xff] }
 0x28e   : > { %v2893_v11 = vsel %vm2118_vm2, %v14339_v7, %v2892_v42  ;;  %v5805_v47 = vmul.f32 %v5773_v49, %v5677_v2  ;;  %v14343_v29 = vrot.slane %v10113_v0, 2  ;;  %v4007_v28 = vmul.f32 %v10302_v41, %v14326_v30 }
 0x28f   : > { %v4252_v63 = vmul.f32 %v9923_v51, %v14327_v19  ;;  %v6042_v60 = vadd.f32 %v14345_v20, %v6003_v56  ;;  %v1755_v36 = vadd.f32 %v1667_v48, %v1510_v10  ;;  %v3628_v14 = vrot.slane %v3517_v53, 3  ;;  %v14349_v10 = vld [vmem:[#allocation52_spill] sm:$0xff] }
 0x290   : > { %v3138_v8 = vsel %vm2118_vm2, %v14343_v29, %v3137_v23  ;;  %v3873_v42 = vrot.slane %v3762_v6, 3  ;;  %v5837_v9 = vadd.f32 %v5805_v47, %v5677_v2  ;;  %v4118_v27 = vrot.slane %v4007_v28, 3  ;;  %v6512_v23 = vld [vmem:[#allocation2 + $0xca] sm:$0xff]  ;;  %v14347_v29 = vld [vmem:[#allocation46_spill] sm:$0xff] }
 0x291   : > { %v4363_v40 = vrot.slane %v4252_v63, 3  ;;  %v4497_v0 = vmul.f32 %v9927_v37, %v14084_v5  ;;  %v6074_v49 = vadd.f32 %v6512_v23, %v6042_v60  ;;  %v2000_v3 = vadd.f32 %v1912_v16, %v1755_v36  ;;  %v10328_v47 = vld [vmem:[#allocation6 + $0xc] ss:$0 sm:$0xff]  ;;  %v10336_v63 = vld [vmem:[#allocation6 + $0x1c] ss:$0 sm:$0xff] }
 0x292   : > { %v14346_v32 = vrot.slane %v10122_v46, 3  ;;  %v14348_v51 = vrot.slane %v14347_v29, 3  ;;  %v5869_v56 = vmul.f32 0.7978846, %v5837_v9  ;;  %v14350_v53 = vrot.slane %v14349_v10, 3 }
 0x293   : > { %v14351_v6 = vrot.slane %v10155_v25, 3  ;;  %v4609_v16 = vrot.slane %v4497_v0, 4  ;;  %6106 = vst [vmem:[%s7803_s9 + $0x68] sm:$0xff] %v6074_v49  ;;  %v2246_v46 = vadd.f32 %v2158_v35, %v2000_v3  ;;  %v5233_v25 = vmul.f32 %v10336_v63, %v14326_v30  ;;  %v10345_v36 = vld [vmem:[#allocation6 + $0x24] ss:$0 sm:$0xff] }
 0x294   : > { %v3384_v7 = vsel %vm3344_vm3, %v14346_v32, %v3383_v21  ;;  %v3629_v48 = vsel %vm3344_vm3, %v14348_v51, %v3628_v14  ;;  %v10320_v2 = vsel %vm3344_vm3, %v14350_v53, %v3873_v42  ;;  %v4743_v21 = vmul.f32 %v10328_v47, %v14323_v62  ;;  %v10332_v51 = vld [vmem:[#allocation6 + $0x14] ss:$0 sm:$0xff]  ;;  %v14356_v53 = vld [vmem:[#allocation12_spill] sm:$0xff]  ;;  %v10404_v30 = vld [vmem:[#allocation2 + $0x120] sm:$0xff] }
 0x295   : > { %v10325_v5 = vsel %vm3344_vm3, %v14351_v6, %v4118_v27  ;;  %v4988_v28 = vmul.f32 %v10332_v51, %v14325_v12  ;;  %6357 = vtanh.f32 %v5869_v56  ;;  %v14352_v60 = vrot.slane %v10167_v44, 3  ;;  %14368 = vst [vmem:[#allocation43_spill] sm:$0xff] %v10404_v30 }
 0x296   : > { %v5478_v14 = vmul.f32 %v10345_v36, %v14327_v19  ;;  %v422_v42 = vmul.f32 %v9961_v54, %v9663_v57  ;;  %v2491_v9 = vadd.f32 %v2403_v1, %v2246_v46  ;;  %v4854_v27 = vrot.slane %v4743_v21, 4 }
 0x297   : > { %v10343_v35 = vsel %vm3344_vm3, %v14352_v60, %v4363_v40  ;;  %v5099_v0 = vrot.slane %v4988_v28, 4  ;;  %v5344_v23 = vrot.slane %v5233_v25, 4  ;;  %v14353_v49 = vrot.slane %v10176_v31, 4  ;;  %v14360_v25 = vld [vmem:[#allocation58_spill] sm:$0xff] }
 0x298   : > { %v5589_v44 = vrot.slane %v5478_v14, 4  ;;  %v492_v40 = vmul.f32 %v10071_v17, %v9821_v55  ;;  %v562_v32 = vmul.f32 %v9831_v18, %v14297_v58  ;;  %v2736_v29 = vadd.f32 %v2648_v43, %v2491_v9  ;;  %v14361_v14 = vld [vmem:[#allocation21_spill] sm:$0xff] }
 0x299   : > { %v10354_v3 = vsel %vm4570_vm4, %v14353_v49, %v4609_v16  ;;  %v14354_v56 = vrot.slane %v10182_v33, 4  ;;  %v14355_v10 = vrot.slane %v10193_v26, 4  ;;  %v632_v6 = vmul.f32 %v14356_v53, %v14298_v50  ;;  %v14357_v16 = vld [vmem:[#allocation27_spill] sm:$0xff] }
 0x29a   : > { %v14358_v46 = vrot.slane %v14357_v16, 4  ;;  %v14359_v43 = vrot.slane %v10213_v52, 4  ;;  %v524_v28 = vadd.f32 %v492_v40, %v422_v42  ;;  %v820_v26 = vmul.f32 %v14360_v25, %v9663_v57  ;;  %v14366_v40 = vld [vmem:[#allocation23_spill] sm:$0xff] }
 0x29b   : > { %v10363_v1 = vsel %vm4570_vm4, %v14354_v56, %v4854_v27  ;;  %v10368_v31 = vsel %vm4570_vm4, %v14355_v10, %v5099_v0  ;;  %v2981_v60 = vadd.f32 %v2893_v11, %v2736_v29  ;;  %v10386_v9 = vmul.f32 %v14360_v25, %v14361_v14  ;;  %v14363_v27 = vld [vmem:[#allocation28_spill] sm:$0xff] }
 0x29c   : > { %v10375_v21 = vsel %vm4570_vm4, %v14358_v46, %v5344_v23  ;;  %v10380_v33 = vsel %vm4570_vm4, %v14359_v43, %v5589_v44  ;;  %v1066_v0 = vmul.f32 %v10071_v17, %v14363_v27  ;;  %v14364_v23 = vld [vmem:[#allocation50_spill] sm:$0xff]  ;;  %v594_v52 = vadd.f32 %v562_v32, %v524_v28  ;;  %v14365_v44 = vld [vmem:[#allocation48_spill] sm:$0xff] }
 0x29d   : > { %14362 = vst [vmem:[#allocation15_spill] sm:$0xff] %v10386_v9  ;;  %v10392_v49 = vmul.f32 %v14364_v23, %v14363_v27  ;;  %v933_v56 = vrot.slane %v820_v26, 1  ;;  %v1311_v42 = vmul.f32 %v14365_v44, %v14297_v58  ;;  %v10398_v10 = vmul.f32 %v14365_v44, %v14366_v40  ;;  %v10402_v43 = vld [vmem:[#allocation2 + $0x128] sm:$0xff]  ;;  %v14370_v58 = vld [vmem:[#allocation29_spill] sm:$0xff] }
 0x29e   : > { %v3226_v11 = vadd.f32 %v3138_v8, %v2981_v60  ;;  %v13563_v29 = vrot.slane %v10386_v9, 1  ;;  %v1178_v16 = vrot.slane %v1066_v0, 1  ;;  %14367 = vst [vmem:[#allocation55_spill] sm:$0xff] %v10402_v43  ;;  %v664_v19 = vadd.f32 %v632_v6, %v594_v52  ;;  %v14369_v32 = vld [vmem:[#allocation32_spill] sm:$0xff]  ;;  %v14371_v0 = vld [vmem:[#allocation13_spill] sm:$0xff] }
 0x29f   : > { %v702_v28 = vmul.f32 %v10404_v30, %v14369_v32  ;;  %v1423_v26 = vrot.slane %v1311_v42, 1  ;;  %v1556_v27 = vmul.f32 %v14356_v53, %v14370_v58  ;;  %v10416_v46 = vmul.f32 %v14370_v58, %v14371_v0  ;;  %v6358_v6 = vpop.eup %6357 }
 0x2a0   : > { %v3472_v40 = vadd.f32 %v3384_v7, %v3226_v11  ;;  %v935_v8 = vsel %vm892_vm1, %v933_v56, %v13563_v29  ;;  %v14372_v44 = vrot.slane %v10392_v49, 1  ;;  %v1801_v7 = vmul.f32 %v10404_v30, %v14311_v61 }
 0x2a1   : > { %v734_v52 = vadd.f32 %v702_v28, %v664_v19  ;;  %v1668_v32 = vrot.slane %v1556_v27, 1  ;;  %v5933_v11 = vadd.f32 1.0, %v6358_v6  ;;  %v13569_v56 = vrot.slane %v10416_v46, 1 }
 0x2a2   : > { %v1180_v42 = vsel %vm892_vm1, %v1178_v16, %v14372_v44  ;;  %v3717_v9 = vadd.f32 %v3629_v48, %v3472_v40  ;;  %v10426_v29 = vmul.f32 %v14311_v61, %v10402_v43  ;;  %v1913_v58 = vrot.slane %v1801_v7, 1 }
 0x2a3   : > { %v1021_v60 = vadd.f32 %v935_v8, %v734_v52  ;;  %v2046_v19 = vmul.f32 %v10046_v38, %v9663_v57  ;;  %v10432_v44 = vmul.f32 %v10046_v38, %v14361_v14  ;;  %v5965_v27 = vmul.f32 %v5933_v11, %v10279_v34 }
 0x2a4   : > { %v3962_v16 = vadd.f32 %v10320_v2, %v3717_v9  ;;  %v14373_v48 = vrot.slane %v10398_v10, 1  ;;  %v13568_v40 = vrot.slane %v10426_v29, 1  ;;  %v1670_v8 = vsel %vm892_vm1, %v1668_v32, %v13569_v56 }
 0x2a5   : > { %v1266_v6 = vadd.f32 %v1180_v42, %v1021_v60  ;;  %v2159_v57 = vrot.slane %v2046_v19, 2  ;;  %v2292_v14 = vmul.f32 %v10071_v17, %v9879_v45  ;;  %v6004_v52 = vmul.f32 %v14340_v59, %v5965_v27  ;;  %v10455_v42 = vld [vmem:[#allocation2 + $0xf0] sm:$0xff]  ;;  %v10462_v19 = vld [vmem:[#allocation2 + $0xf8] sm:$0xff] }
 0x2a6   : > { %v1425_v28 = vsel %vm892_vm1, %v1423_v26, %v14373_v48  ;;  %v4207_v34 = vadd.f32 %v10325_v5, %v3962_v16  ;;  %v13566_v2 = vrot.slane %v10432_v44, 2  ;;  %v10450_v9 = vmul.f32 %v14364_v23, %v9879_v45  ;;  %14374 = vst [vmem:[#allocation19_spill] sm:$0xff] %v10455_v42  ;;  %14375 = vst [vmem:[#allocation44_spill] sm:$0xff] %v10462_v19 }
 0x2a7   : > { %v1511_v26 = vadd.f32 %v1425_v28, %v1266_v6  ;;  %v1915_v60 = vsel %vm892_vm1, %v1913_v58, %v13568_v40  ;;  %v2404_v32 = vrot.slane %v2292_v14, 2  ;;  %v2537_v7 = vmul.f32 %v10455_v42, %v10073_v39 }
 0x2a8   : > { %v6043_v59 = vadd.f32 %v14345_v20, %v6004_v52  ;;  %v4452_v5 = vadd.f32 %v10343_v35, %v4207_v34  ;;  %v13565_v11 = vrot.slane %v10450_v9, 2  ;;  %v10466_v27 = vmul.f32 %v10462_v19, %v10073_v39  ;;  %v6520_v20 = vld [vmem:[#allocation2 + $0xda] sm:$0xff] }
 0x2a9   : > { %v1756_v58 = vadd.f32 %v1670_v8, %v1511_v26  ;;  %v2649_v16 = vrot.slane %v2537_v7, 2  ;;  %v2782_v48 = vmul.f32 %v14356_v53, %v9885_v22  ;;  %v10472_v28 = vmul.f32 %v9885_v22, %v14371_v0 }
 0x2aa   : > { %v6075_v35 = vadd.f32 %v6520_v20, %v6043_v59  ;;  %v4698_v6 = vadd.f32 %v10354_v3, %v4452_v5  ;;  %v2161_v14 = vsel %vm2118_vm2, %v2159_v57, %v13566_v2  ;;  %v13567_v52 = vrot.slane %v10466_v27, 2  ;;  %v6521_v57 = vld [vmem:[#allocation2 + $0xc0] sm:$0xff]  ;;  %v10495_v20 = vld [vmem:[#allocation2 + $0xc8] sm:$0xff] }
 0x2ab   : > { %v2001_v34 = vadd.f32 %v1915_v60, %v1756_v58  ;;  %v2406_v8 = vsel %vm2118_vm2, %v2404_v32, %v13565_v11  ;;  %v2894_v26 = vrot.slane %v2782_v48, 2  ;;  %v3027_v7 = vmul.f32 %v10404_v30, %v9889_v15 }
 0x2ac   : > { %6107 = vst [vmem:[%s7803_s9 + $0x70] sm:$0xff] %v6075_v35  ;;  %v4943_v59 = vadd.f32 %v10363_v1, %v4698_v6  ;;  %v13572_v3 = vrot.slane %v10472_v28, 2  ;;  %v10489_v5 = vmul.f32 %v9889_v15, %v10402_v43  ;;  %v3272_v60 = vmul.f32 %v6521_v57, %v9893_v13 }
 0x2ad   : > { %v2247_v58 = vadd.f32 %v2161_v14, %v2001_v34  ;;  %v2651_v32 = vsel %vm2118_vm2, %v2649_v16, %v13567_v52  ;;  %v3139_v48 = vrot.slane %v3027_v7, 2  ;;  %v10499_v1 = vmul.f32 %v10495_v20, %v9893_v13 }
 0x2ae   : > { %v5188_v35 = vadd.f32 %v10368_v31, %v4943_v59  ;;  %v13570_v6 = vrot.slane %v10489_v5, 2  ;;  %v3385_v11 = vrot.slane %v3272_v60, 3  ;;  %v3518_v2 = vmul.f32 %v10291_v24, %v10071_v17 }
 0x2af   : > { %14376 = vst [vmem:[#allocation41_spill] sm:$0xff] %v10499_v1  ;;  %v2492_v14 = vadd.f32 %v2406_v8, %v2247_v58  ;;  %v13571_v34 = vrot.slane %v10499_v1, 3  ;;  %v10508_v16 = vmul.f32 %v10291_v24, %v14364_v23  ;;  %v3763_v7 = vmul.f32 %v10455_v42, %v10295_v4 }
 0x2b0   : > { %v5433_v52 = vadd.f32 %v10375_v21, %v5188_v35  ;;  %v2896_v31 = vsel %vm2118_vm2, %v2894_v26, %v13572_v3  ;;  %v3630_v59 = vrot.slane %v3518_v2, 3  ;;  %v10518_v60 = vmul.f32 %v10462_v19, %v10295_v4 }
 0x2b1   : > { %14377 = vst [vmem:[#allocation49_spill] sm:$0xff] %v10508_v16  ;;  %v2737_v8 = vadd.f32 %v2651_v32, %v2492_v14  ;;  %v3141_v58 = vsel %vm2118_vm2, %v3139_v48, %v13570_v6  ;;  %v3387_v40 = vsel %vm3344_vm3, %v3385_v11, %v13571_v34  ;;  %v13580_v21 = vrot.slane %v10508_v16, 3  ;;  %v14378_v48 = vld [vmem:[#allocation56_spill] sm:$0xff] }
 0x2b2   : > { %v5678_v35 = vadd.f32 %v10380_v33, %v5433_v52  ;;  %v3875_v56 = vrot.slane %v3763_v7, 3  ;;  %v4008_v2 = vmul.f32 %v10302_v41, %v14356_v53  ;;  %v10532_v26 = vmul.f32 %v10302_v41, %v14371_v0 }
 0x2b3   : > { %v2982_v32 = vadd.f32 %v2896_v31, %v2737_v8  ;;  %v4253_v6 = vmul.f32 %v10404_v30, %v14378_v48  ;;  %v10539_v11 = vmul.f32 %v14378_v48, %v10402_v43  ;;  %v3632_v52 = vsel %vm3344_vm3, %v3630_v59, %v13580_v21 }
 0x2b4   : > { %v10541_v34 = vmul.f32 0.5, %v5678_v35  ;;  %v5742_v33 = vmul.f32 0.044715, %v5678_v35  ;;  %v4120_v7 = vrot.slane %v4008_v2, 3  ;;  %v13581_v31 = vrot.slane %v10532_v26, 3 }
 0x2b5   : > { %v3227_v3 = vadd.f32 %v3141_v58, %v2982_v32  ;;  %v4365_v8 = vrot.slane %v4253_v6, 3  ;;  %v4498_v41 = vmul.f32 %v6521_v57, %v9927_v37  ;;  %v10551_v48 = vmul.f32 %v10495_v20, %v9927_v37 }
 0x2b6   : > { %v5774_v1 = vmul.f32 %v5742_v33, %v5678_v35  ;;  %v4744_v4 = vmul.f32 %v10328_v47, %v10071_v17  ;;  %v14379_v59 = vrot.slane %v10518_v60, 3  ;;  %v4122_v6 = vsel %vm3344_vm3, %v4120_v7, %v13581_v31 }
 0x2b7   : > { %v3473_v16 = vadd.f32 %v3387_v40, %v3227_v3  ;;  %v10563_v2 = vmul.f32 %v10328_v47, %v14364_v23  ;;  %v4611_v32 = vrot.slane %v4498_v41, 4  ;;  %v13589_v33 = vrot.slane %v10551_v48, 4 }
 0x2b8   : > { %v3877_v58 = vsel %vm3344_vm3, %v3875_v56, %v14379_v59  ;;  %v5806_v57 = vmul.f32 %v5774_v1, %v5678_v35  ;;  %v4856_v21 = vrot.slane %v4744_v4, 4  ;;  %v4989_v3 = vmul.f32 %v10455_v42, %v10332_v51 }
 0x2b9   : > { %v3718_v14 = vadd.f32 %v3632_v52, %v3473_v16  ;;  %v10571_v56 = vmul.f32 %v10462_v19, %v10332_v51  ;;  %v14380_v59 = vrot.slane %v10539_v11, 3  ;;  %v5234_v41 = vmul.f32 %v10336_v63, %v14356_v53 }
 0x2ba   : > { %v5838_v7 = vadd.f32 %v5806_v57, %v5678_v35  ;;  %v10580_v4 = vmul.f32 %v10336_v63, %v14371_v0  ;;  %v4613_v16 = vsel %vm4570_vm4, %v4611_v32, %v13589_v33  ;;  %v5101_v52 = vrot.slane %v4989_v3, 4  ;;  %v14386_v33 = vld [vmem:[#allocation57_spill] sm:$0xff] }
 0x2bb   : > { %v4367_v31 = vsel %vm3344_vm3, %v4365_v8, %v14380_v59  ;;  %v3963_v1 = vadd.f32 %v3877_v58, %v3718_v14  ;;  %v13588_v40 = vrot.slane %v10571_v56, 4  ;;  %v5346_v57 = vrot.slane %v5234_v41, 4 }
 0x2bc   : > { %v5870_v35 = vmul.f32 0.7978846, %v5838_v7  ;;  %v13587_v42 = vrot.slane %v10580_v4, 4  ;;  %v5479_v8 = vmul.f32 %v10404_v30, %v10345_v36  ;;  %v14381_v53 = vrot.slane %v10563_v2, 4  ;;  %v14387_v7 = vld [vmem:[#allocation29_spill] sm:$0xff] }
 0x2bd   : > { %v4208_v59 = vadd.f32 %v4122_v6, %v3963_v1  ;;  %v10594_v14 = vmul.f32 %v10345_v36, %v10402_v43  ;;  %v423_v58 = vmul.f32 %v10495_v20, %v9961_v54  ;;  %v5103_v32 = vsel %vm4570_vm4, %v5101_v52, %v13588_v40 }
 0x2be   : > { %v4858_v17 = vsel %vm4570_vm4, %v4856_v21, %v14381_v53  ;;  %6359 = vtanh.f32 %v5870_v35  ;;  %v5348_v6 = vsel %vm4570_vm4, %v5346_v57, %v13587_v42  ;;  %v493_v3 = vmul.f32 %v14364_v23, %v9821_v55  ;;  %v14382_v35 = vld [vmem:[#allocation28_spill] sm:$0xff] }
 0x2bf   : > { %v4453_v53 = vadd.f32 %v4367_v31, %v4208_v59  ;;  %v5591_v21 = vrot.slane %v5479_v8, 4  ;;  %v563_v41 = vmul.f32 %v10462_v19, %v9831_v18  ;;  %v633_v1 = vmul.f32 %v14298_v50, %v14371_v0  ;;  %v14383_v55 = vld [vmem:[#allocation32_spill] sm:$0xff]  ;;  %v14384_v8 = vld [vmem:[#allocation54_spill] sm:$0xff]  ;;  %v14388_v50 = vld [vmem:[#allocation59_spill] sm:$0xff] }
 0x2c0   : > { %v525_v20 = vadd.f32 %v493_v3, %v423_v58  ;;  %v822_v52 = vmul.f32 %v14360_v25, %v14323_v62  ;;  %v1068_v57 = vmul.f32 %v14382_v35, %v14325_v12  ;;  %v703_v31 = vmul.f32 %v14383_v55, %v10402_v43  ;;  %v14385_v59 = vld [vmem:[#allocation48_spill] sm:$0xff]  ;;  %v14390_v43 = vld [vmem:[#allocation15_spill] sm:$0xff] }
 0x2c1   : > { %v4699_v42 = vadd.f32 %v4613_v16, %v4453_v53  ;;  %v1313_v40 = vmul.f32 %v14385_v59, %v14384_v8  ;;  %v1558_v18 = vmul.f32 %v14387_v7, %v14386_v33  ;;  %v1803_v0 = vmul.f32 %v14311_v61, %v14388_v50 }
 0x2c2   : > { %v595_v58 = vadd.f32 %v563_v41, %v525_v20  ;;  %v936_v3 = vrot.slane %v822_v52, 1  ;;  %v1181_v19 = vrot.slane %v1068_v57, 1  ;;  %v2048_v16 = vmul.f32 %v10046_v38, %v14323_v62 }
 0x2c3   : > { %v4944_v23 = vadd.f32 %v4858_v17, %v4699_v42  ;;  %v1426_v25 = vrot.slane %v1313_v40, 1  ;;  %v1671_v30 = vrot.slane %v1558_v18, 1  ;;  %v14389_v53 = vrot.slane %v10594_v14, 4 }
 0x2c4   : > { %v665_v55 = vadd.f32 %v633_v1, %v595_v58  ;;  %v14391_v59 = vrot.slane %v14390_v43, 1  ;;  %v1916_v41 = vrot.slane %v1803_v0, 1  ;;  %v14392_v52 = vrot.slane %v10392_v49, 1 }
 0x2c5   : > { %v5593_v35 = vsel %vm4570_vm4, %v5591_v21, %v14389_v53  ;;  %v5189_v20 = vadd.f32 %v5103_v32, %v4944_v23  ;;  %v14393_v17 = vrot.slane %v10398_v10, 1  ;;  %v14394_v40 = vrot.slane %v10416_v46, 1 }
 0x2c6   : > { %v937_v7 = vsel %vm892_vm1, %v14391_v59, %v936_v3  ;;  %v1182_v61 = vsel %vm892_vm1, %v14392_v52, %v1181_v19  ;;  %v735_v21 = vadd.f32 %v703_v31, %v665_v55  ;;  %v2162_v1 = vrot.slane %v2048_v16, 2 }
 0x2c7   : > { %v1427_v42 = vsel %vm892_vm1, %v14393_v17, %v1426_v25  ;;  %v1672_v57 = vsel %vm892_vm1, %v14394_v40, %v1671_v30  ;;  %v2294_v43 = vmul.f32 %v9879_v45, %v14325_v12  ;;  %v2539_v23 = vmul.f32 %v10073_v39, %v14384_v8 }
 0x2c8   : > { %v5434_v0 = vadd.f32 %v5348_v6, %v5189_v20  ;;  %v14395_v49 = vrot.slane %v10426_v29, 1  ;;  %v2784_v25 = vmul.f32 %v9885_v22, %v14386_v33  ;;  %v3029_v10 = vmul.f32 %v9889_v15, %v14388_v50  ;;  %v6360_v30 = vpop.eup %6359 }
 0x2c9   : > { %v1022_v46 = vadd.f32 %v937_v7, %v735_v21  ;;  %v2407_v32 = vrot.slane %v2294_v43, 2  ;;  %v2652_v31 = vrot.slane %v2539_v23, 2  ;;  %v3274_v45 = vmul.f32 %v9893_v13, %v14323_v62  ;;  %v14403_v21 = vld [vmem:[#allocation24_spill] sm:$0xff] }
 0x2ca   : > { %v1917_v19 = vsel %vm892_vm1, %v14395_v49, %v1916_v41  ;;  %v5934_v59 = vadd.f32 1.0, %v6360_v30  ;;  %v5679_v18 = vadd.f32 %v5593_v35, %v5434_v0  ;;  %v2897_v6 = vrot.slane %v2784_v25, 2  ;;  %v14404_v23 = vld [vmem:[#allocation56_spill] sm:$0xff]  ;;  %v10692_v25 = vld [vmem:[%s13185_s3] ss:$0 sm:$0xff] }
 0x2cb   : > { %v3142_v58 = vrot.slane %v3029_v10, 2  ;;  %v1267_v29 = vadd.f32 %v1182_v61, %v1022_v46  ;;  %v14396_v3 = vrot.slane %v10432_v44, 2  ;;  %v14397_v22 = vrot.slane %v10450_v9, 2  ;;  %14405 = vst [vmem:[#allocation39_spill] sm:$0xff] %v10692_v25 }
 0x2cc   : > { %v14398_v53 = vrot.slane %v10466_v27, 2  ;;  %v5966_v7 = vmul.f32 %v5934_v59, %v10541_v34  ;;  %v10663_v13 = vmul.f32 0.5, %v5679_v18  ;;  %v5743_v35 = vmul.f32 0.044715, %v5679_v18  ;;  %v10678_v34 = vld [vmem:[%s13184_s2] ss:$0 sm:$0xff] }
 0x2cd   : > { %v2163_v16 = vsel %vm2118_vm2, %v14396_v3, %v2162_v1  ;;  %v2408_v15 = vsel %vm2118_vm2, %v14397_v22, %v2407_v32  ;;  %v3388_v41 = vrot.slane %v3274_v45, 3  ;;  %v1512_v20 = vadd.f32 %v1427_v42, %v1267_v29  ;;  %14401 = vst [vmem:[#allocation16_spill] sm:$0xff] %v10678_v34  ;;  %v6525_v29 = vld [vmem:[#allocation2 + $0xe2] sm:$0xff] }
 0x2ce   : > { %v2653_v55 = vsel %vm2118_vm2, %v14398_v53, %v2652_v31  ;;  %v14399_v52 = vrot.slane %v10472_v28, 2  ;;  %v14400_v61 = vrot.slane %v10489_v5, 2  ;;  %v3520_v27 = vmul.f32 %v10291_v24, %v14325_v12  ;;  %v14402_v28 = vld [vmem:[#allocation33_spill] sm:$0xff] }
 0x2cf   : > { %v6005_v17 = vmul.f32 %v10678_v34, %v5966_v7  ;;  %v5775_v42 = vmul.f32 %v5743_v35, %v5679_v18  ;;  %v3765_v40 = vmul.f32 %v14402_v28, %v14384_v8  ;;  %v4010_v5 = vmul.f32 %v14403_v21, %v14386_v33 }
 0x2d0   : > { %v2898_v44 = vsel %vm2118_vm2, %v14399_v52, %v2897_v6  ;;  %v10671_v9 = vsel %vm2118_vm2, %v14400_v61, %v3142_v58  ;;  %v1757_v1 = vadd.f32 %v1672_v57, %v1512_v20  ;;  %v3633_v43 = vrot.slane %v3520_v27, 3  ;;  %v14406_v57 = vld [vmem:[#allocation41_spill] sm:$0xff] }
 0x2d1   : > { %v4255_v0 = vmul.f32 %v14404_v23, %v14388_v50  ;;  %v4500_v49 = vmul.f32 %v9927_v37, %v14323_v62  ;;  %v6044_v10 = vadd.f32 %v10692_v25, %v6005_v17  ;;  %v5807_v30 = vmul.f32 %v5775_v42, %v5679_v18  ;;  %v14408_v6 = vld [vmem:[#allocation49_spill] sm:$0xff] }
 0x2d2   : > { %v3878_v46 = vrot.slane %v3765_v40, 3  ;;  %v4123_v32 = vrot.slane %v4010_v5, 3  ;;  %v2002_v31 = vadd.f32 %v1917_v19, %v1757_v1  ;;  %v14407_v45 = vrot.slane %v14406_v57, 3  ;;  %v10729_v5 = vld [vmem:[#allocation6 + $0x8] ss:$0 sm:$0xff]  ;;  %v14414_v1 = vld [vmem:[#allocation19_spill] sm:$0xff] }
 0x2d3   : > { %v14409_v58 = vrot.slane %v14408_v6, 3  ;;  %v4368_v62 = vrot.slane %v4255_v0, 3  ;;  %v6076_v3 = vadd.f32 %v6525_v29, %v6044_v10  ;;  %v5839_v22 = vadd.f32 %v5807_v30, %v5679_v18  ;;  %v14421_v29 = vld [vmem:[#allocation43_spill] sm:$0xff] }
 0x2d4   : > { %v3389_v59 = vsel %vm3344_vm3, %v14407_v45, %v3388_v41  ;;  %v14410_v53 = vrot.slane %v10518_v60, 3  ;;  %v4614_v35 = vrot.slane %v4500_v49, 4  ;;  %v2248_v19 = vadd.f32 %v2163_v16, %v2002_v31  ;;  %v14416_v31 = vld [vmem:[#allocation12_spill] sm:$0xff] }
 0x2d5   : > { %v10701_v37 = vsel %vm3344_vm3, %v14409_v58, %v3633_v43  ;;  %v14411_v20 = vrot.slane %v10532_v26, 3  ;;  %v14412_v52 = vrot.slane %v10539_v11, 3  ;;  %v4746_v18 = vmul.f32 %v10328_v47, %v14325_v12  ;;  %6108 = vst [vmem:[%s7803_s9 + $0x78] sm:$0xff] %v6076_v3  ;;  %v14413_v11 = vld [vmem:[#allocation34_spill] sm:$0xff] }
 0x2d6   : > { %v10706_v7 = vsel %vm3344_vm3, %v14410_v53, %v3878_v46  ;;  %v5871_v60 = vmul.f32 0.7978846, %v5839_v22  ;;  %v4991_v27 = vmul.f32 %v10332_v51, %v14384_v8  ;;  %v5236_v16 = vmul.f32 %v10336_v63, %v14386_v33  ;;  %v10761_v53 = vld [vmem:[#allocation6 + $0x20] ss:$0 sm:$0xff] }
 0x2d7   : > { %v10711_v41 = vsel %vm3344_vm3, %v14411_v20, %v4123_v32  ;;  %v10716_v61 = vsel %vm3344_vm3, %v14412_v52, %v4368_v62  ;;  %v5481_v26 = vmul.f32 %v10345_v36, %v14388_v50  ;;  %v2493_v17 = vadd.f32 %v2408_v15, %v2248_v19  ;;  %v10738_v32 = vld [vmem:[#allocation6 + $0x10] ss:$0 sm:$0xff]  ;;  %v10757_v62 = vld [vmem:[#allocation6 + $0x18] ss:$0 sm:$0xff]  ;;  %14422 = vst [vmem:[#allocation14_spill] sm:$0xff] %v10761_v53 }
 0x2d8   : > { %v4859_v42 = vrot.slane %v4746_v18, 4  ;;  %v424_v40 = vmul.f32 %v14413_v11, %v9961_v54  ;;  %v494_v43 = vmul.f32 %v10729_v5, %v14414_v1  ;;  %6361 = vtanh.f32 %v5871_v60  ;;  %14420 = vst [vmem:[#allocation45_spill] sm:$0xff] %v10757_v62  ;;  %v14424_v19 = vld [vmem:[#allocation58_spill] sm:$0xff]  ;;  %v10773_v18 = vld [vmem:[#allocation6 + $0x9] ss:$0 sm:$0xff] }
 0x2d9   : > { %v14415_v23 = vrot.slane %v10551_v48, 4  ;;  %v5104_v49 = vrot.slane %v4991_v27, 4  ;;  %v5349_v10 = vrot.slane %v5236_v16, 4  ;;  %v2738_v30 = vadd.f32 %v2653_v55, %v2493_v17  ;;  %v14425_v20 = vld [vmem:[#allocation50_spill] sm:$0xff]  ;;  %14426 = vst [vmem:[#allocation26_spill] sm:$0xff] %v10773_v18  ;;  %v14427_v60 = vld [vmem:[#allocation44_spill] sm:$0xff] }
 0x2da   : > { %v5594_v46 = vrot.slane %v5481_v26, 4  ;;  %v526_v15 = vadd.f32 %v494_v43, %v424_v40  ;;  %v564_v54 = vmul.f32 %v10738_v32, %v14416_v31  ;;  %v14417_v57 = vrot.slane %v10563_v2, 4  ;;  %v14428_v16 = vld [vmem:[#allocation48_spill] sm:$0xff]  ;;  %v14429_v43 = vld [vmem:[#allocation13_spill] sm:$0xff] }
 0x2db   : > { %v10736_v0 = vsel %vm4570_vm4, %v14415_v23, %v4614_v35  ;;  %v14418_v48 = vrot.slane %v10571_v56, 4  ;;  %v14419_v58 = vrot.slane %v10580_v4, 4  ;;  %v634_v3 = vmul.f32 %v10757_v62, %v14421_v29  ;;  %v10763_v35 = vld [vmem:[#allocation2 + $0x138] sm:$0xff] }
 0x2dc   : > { %v10745_v45 = vsel %vm4570_vm4, %v14417_v57, %v4859_v42  ;;  %v2983_v22 = vadd.f32 %v2898_v44, %v2738_v30  ;;  %v596_v2 = vadd.f32 %v564_v54, %v526_v15  ;;  %14423 = vst [vmem:[#allocation31_spill] sm:$0xff] %v10763_v35  ;;  %v704_v56 = vmul.f32 %v10763_v35, %v10761_v53  ;;  %v10795_v57 = vld [vmem:[#allocation2 + $0x140] sm:$0xff] }
 0x2dd   : > { %v10750_v6 = vsel %vm4570_vm4, %v14418_v48, %v5104_v49  ;;  %v10755_v55 = vsel %vm4570_vm4, %v14419_v58, %v5349_v10  ;;  %v823_v4 = vmul.f32 %v14413_v11, %v14424_v19  ;;  %v10771_v52 = vmul.f32 %v14425_v20, %v14424_v19  ;;  %14431 = vst [vmem:[#allocation51_spill] sm:$0xff] %v10795_v57  ;;  %v10797_v58 = vld [vmem:[#allocation6 + $0x19] ss:$0 sm:$0xff]  ;;  %v10809_v19 = vld [vmem:[#allocation6 + $0x21] ss:$0 sm:$0xff] }
 0x2de   : > { %v1069_v44 = vmul.f32 %v10773_v18, %v14414_v1  ;;  %v10779_v27 = vmul.f32 %v10773_v18, %v14427_v60  ;;  %v1314_v26 = vmul.f32 %v14428_v16, %v14416_v31  ;;  %v3228_v17 = vadd.f32 %v10671_v9, %v2983_v22  ;;  %14432 = vst [vmem:[#allocation53_spill] sm:$0xff] %v10797_v58  ;;  %v14433_v22 = vld [vmem:[#allocation55_spill] sm:$0xff] }
 0x2df   : > { %v666_v42 = vadd.f32 %v634_v3, %v596_v2  ;;  %v938_v40 = vrot.slane %v823_v4, 1  ;;  %v10786_v23 = vmul.f32 %v14428_v16, %v14429_v43  ;;  %v14430_v49 = vrot.slane %v10594_v14, 4 }
 0x2e0   : > { %v13605_v30 = vrot.slane %v10771_v52, 1  ;;  %v1183_v15 = vrot.slane %v1069_v44, 1  ;;  %v13604_v54 = vrot.slane %v10779_v27, 1  ;;  %v3474_v31 = vadd.f32 %v3389_v59, %v3228_v17 }
 0x2e1   : > { %v10791_v10 = vsel %vm4570_vm4, %v14430_v49, %v5594_v46  ;;  %v736_v9 = vadd.f32 %v704_v56, %v666_v42  ;;  %v1428_v48 = vrot.slane %v1314_v26, 1  ;;  %v1559_v3 = vmul.f32 %v10797_v58, %v14421_v29 }
 0x2e2   : > { %v940_v14 = vsel %vm892_vm1, %v938_v40, %v13605_v30  ;;  %v13601_v46 = vrot.slane %v10786_v23, 1  ;;  %v10807_v2 = vmul.f32 %v10797_v58, %v14433_v22  ;;  %v1804_v59 = vmul.f32 %v10809_v19, %v10763_v35  ;;  %v6362_v26 = vpop.eup %6361 }
 0x2e3   : > { %v3719_v56 = vadd.f32 %v10701_v37, %v3474_v31  ;;  %v1023_v4 = vadd.f32 %v940_v14, %v736_v9  ;;  %v1185_v44 = vsel %vm892_vm1, %v1183_v15, %v13604_v54  ;;  %v1673_v16 = vrot.slane %v1559_v3, 1  ;;  %v6541_v54 = vld [vmem:[#allocation2 + $0xd8] sm:$0xff] }
 0x2e4   : > { %v13599_v17 = vrot.slane %v10807_v2, 1  ;;  %v10820_v42 = vmul.f32 %v10809_v19, %v10795_v57  ;;  %v1918_v40 = vrot.slane %v1804_v59, 1  ;;  %v2049_v43 = vmul.f32 %v14413_v11, %v10046_v38  ;;  %v10836_v59 = vld [vmem:[#allocation6 + $0xa] ss:$0 sm:$0xff] }
 0x2e5   : > { %v5935_v49 = vadd.f32 1.0, %v6362_v26  ;;  %v3964_v37 = vadd.f32 %v10706_v7, %v3719_v56  ;;  %v1268_v31 = vadd.f32 %v1185_v44, %v1023_v4  ;;  %v10827_v9 = vmul.f32 %v14425_v20, %v10046_v38 }
 0x2e6   : > { %v1430_v15 = vsel %vm892_vm1, %v1428_v48, %v13601_v46  ;;  %v1675_v3 = vsel %vm892_vm1, %v1673_v16, %v13599_v17  ;;  %v13600_v14 = vrot.slane %v10820_v42, 1  ;;  %v2295_v7 = vmul.f32 %v10836_v59, %v14414_v1  ;;  %v10847_v16 = vld [vmem:[#allocation2 + $0x108] sm:$0xff] }
 0x2e7   : > { %v5967_v11 = vmul.f32 %v5935_v49, %v10663_v13  ;;  %v4209_v38 = vadd.f32 %v10711_v41, %v3964_v37  ;;  %v1513_v20 = vadd.f32 %v1430_v15, %v1268_v31  ;;  %v2164_v56 = vrot.slane %v2049_v43, 2  ;;  %14434 = vst [vmem:[#allocation42_spill] sm:$0xff] %v10847_v16  ;;  %v10857_v37 = vld [vmem:[#allocation2 + $0x110] sm:$0xff] }
 0x2e8   : > { %v13602_v4 = vrot.slane %v10827_v9, 2  ;;  %v10845_v48 = vmul.f32 %v10836_v59, %v14427_v60  ;;  %v2409_v44 = vrot.slane %v2295_v7, 2  ;;  %v2540_v26 = vmul.f32 %v10847_v16, %v10073_v39  ;;  %14435 = vst [vmem:[#allocation40_spill] sm:$0xff] %v10857_v37  ;;  %v10863_v7 = vld [vmem:[#allocation6 + $0x1a] ss:$0 sm:$0xff] }
 0x2e9   : > { %v6006_v17 = vmul.f32 %v10678_v34, %v5967_v11  ;;  %v4454_v13 = vadd.f32 %v10716_v61, %v4209_v38  ;;  %v1758_v49 = vadd.f32 %v1675_v3, %v1513_v20  ;;  %v1920_v41 = vsel %vm892_vm1, %v1918_v40, %v13600_v14  ;;  %v10880_v14 = vld [vmem:[#allocation6 + $0x22] ss:$0 sm:$0xff] }
 0x2ea   : > { %v13603_v43 = vrot.slane %v10845_v48, 2  ;;  %v10861_v31 = vmul.f32 %v10857_v37, %v10073_v39  ;;  %v2654_v15 = vrot.slane %v2540_v26, 2  ;;  %v2785_v11 = vmul.f32 %v10863_v7, %v14421_v29 }
 0x2eb   : > { %v6045_v61 = vadd.f32 %v10692_v25, %v6006_v17  ;;  %v4700_v3 = vadd.f32 %v10736_v0, %v4454_v13  ;;  %v2003_v38 = vadd.f32 %v1920_v41, %v1758_v49  ;;  %v10871_v40 = vmul.f32 %v10863_v7, %v14433_v22  ;;  %v6539_v17 = vld [vmem:[#allocation2 + $0xf2] sm:$0xff] }
 0x2ec   : > { %v2166_v39 = vsel %vm2118_vm2, %v2164_v56, %v13602_v4  ;;  %v2411_v20 = vsel %vm2118_vm2, %v2409_v44, %v13603_v43  ;;  %v13606_v26 = vrot.slane %v10861_v31, 2  ;;  %v3030_v0 = vmul.f32 %v10880_v14, %v10763_v35  ;;  %v10893_v43 = vld [vmem:[#allocation6 + $0x3] ss:$0 sm:$0xff] }
 0x2ed   : > { %v6077_v13 = vadd.f32 %v6539_v17, %v6045_v61  ;;  %v4945_v49 = vadd.f32 %v10745_v45, %v4700_v3  ;;  %v2249_v41 = vadd.f32 %v2166_v39, %v2003_v38  ;;  %v2899_v46 = vrot.slane %v2785_v11, 2  ;;  %v10898_v3 = vld [vmem:[#allocation2 + $0xe0] sm:$0xff] }
 0x2ee   : > { %v2656_v56 = vsel %vm2118_vm2, %v2654_v15, %v13606_v26  ;;  %v13610_v4 = vrot.slane %v10871_v40, 2  ;;  %v10891_v44 = vmul.f32 %v10880_v14, %v10795_v57  ;;  %v3275_v30 = vmul.f32 %v6541_v54, %v10893_v43 }
 0x2ef   : > { %6109 = vst [vmem:[%s7803_s9 + $0x80] sm:$0xff] %v6077_v13  ;;  %v5190_v45 = vadd.f32 %v10750_v6, %v4945_v49  ;;  %v2494_v61 = vadd.f32 %v2411_v20, %v2249_v41  ;;  %v3144_v11 = vrot.slane %v3030_v0, 2  ;;  %v10902_v15 = vmul.f32 %v10898_v3, %v10893_v43 }
 0x2f0   : > { %v3390_v39 = vrot.slane %v3275_v30, 3  ;;  %v3521_v17 = vmul.f32 %v14414_v1, %v10291_v24  ;;  %v10909_v26 = vmul.f32 %v14427_v60, %v10291_v24  ;;  %v3766_v13 = vmul.f32 %v10847_v16, %v14402_v28 }
 0x2f1   : > { %14436 = vst [vmem:[#allocation47_spill] sm:$0xff] %v10902_v15  ;;  %v5435_v6 = vadd.f32 %v10755_v55, %v5190_v45  ;;  %v2739_v20 = vadd.f32 %v2656_v56, %v2494_v61  ;;  %v13611_v0 = vrot.slane %v10902_v15, 3  ;;  %v2901_v49 = vsel %vm2118_vm2, %v2899_v46, %v13610_v4 }
 0x2f2   : > { %14437 = vst [vmem:[#allocation18_spill] sm:$0xff] %v10909_v26  ;;  %v3635_v30 = vrot.slane %v3521_v17, 3  ;;  %v13612_v41 = vrot.slane %v10909_v26, 3  ;;  %v10921_v38 = vmul.f32 %v10857_v37, %v14402_v28  ;;  %v14439_v56 = vrot.slane %v10891_v44, 2 }
 0x2f3   : > { %v5680_v25 = vadd.f32 %v10791_v10, %v5435_v6  ;;  %v2984_v55 = vadd.f32 %v2901_v49, %v2739_v20  ;;  %v3880_v61 = vrot.slane %v3766_v13, 3  ;;  %v3392_v24 = vsel %vm3344_vm3, %v3390_v39, %v13611_v0  ;;  %v10940_v20 = vld [vmem:[#allocation6 + $0x23] ss:$0 sm:$0xff] }
 0x2f4   : > { %14438 = vst [vmem:[#allocation46_spill] sm:$0xff] %v10921_v38  ;;  %v3146_v45 = vsel %vm2118_vm2, %v3144_v11, %v14439_v56  ;;  %v4011_v17 = vmul.f32 %v14421_v29, %v14403_v21  ;;  %v10935_v4 = vmul.f32 %v14403_v21, %v14433_v22  ;;  %v3637_v11 = vsel %vm3344_vm3, %v3635_v30, %v13612_v41  ;;  %v10954_v41 = vld [vmem:[#allocation6 + $0x4] ss:$0 sm:$0xff] }
 0x2f5   : > { %v5744_v10 = vmul.f32 0.044715, %v5680_v25  ;;  %v3229_v6 = vadd.f32 %v3146_v45, %v2984_v55  ;;  %14440 = vst [vmem:[#allocation52_spill] sm:$0xff] %v10940_v20  ;;  %v4256_v39 = vmul.f32 %v10940_v20, %v10763_v35  ;;  %v10944_v13 = vmul.f32 0.5, %v5680_v25  ;;  %14442 = vst [vmem:[#allocation27_spill] sm:$0xff] %v10954_v41 }
 0x2f6   : > { %v4125_v49 = vrot.slane %v4011_v17, 3  ;;  %v10949_v0 = vmul.f32 %v10940_v20, %v10795_v57  ;;  %v14441_v45 = vrot.slane %v10921_v38, 3  ;;  %v4501_v26 = vmul.f32 %v10954_v41, %v6541_v54 }
 0x2f7   : > { %v5776_v46 = vmul.f32 %v5744_v10, %v5680_v25  ;;  %v3475_v55 = vadd.f32 %v3392_v24, %v3229_v6  ;;  %v4370_v15 = vrot.slane %v4256_v39, 3  ;;  %v10960_v17 = vmul.f32 %v10954_v41, %v10898_v3 }
 0x2f8   : > { %v3882_v30 = vsel %vm3344_vm3, %v3880_v61, %v14441_v45  ;;  %v4747_v56 = vmul.f32 %v14414_v1, %v10328_v47  ;;  %v4616_v6 = vrot.slane %v4501_v26, 4  ;;  %v10966_v61 = vmul.f32 %v14427_v60, %v10328_v47 }
 0x2f9   : > { %v5808_v10 = vmul.f32 %v5776_v46, %v5680_v25  ;;  %v3720_v24 = vadd.f32 %v3637_v11, %v3475_v55  ;;  %v14443_v45 = vrot.slane %v10935_v4, 3  ;;  %v13622_v39 = vrot.slane %v10960_v17, 4 }
 0x2fa   : > { %v4861_v21 = vrot.slane %v4747_v56, 4  ;;  %v4992_v38 = vmul.f32 %v10847_v16, %v10332_v51  ;;  %v10977_v26 = vmul.f32 %v10857_v37, %v10332_v51  ;;  %v14444_v11 = vrot.slane %v10949_v0, 3 }
 0x2fb   : > { %v4127_v54 = vsel %vm3344_vm3, %v4125_v49, %v14443_v45  ;;  %v5840_v41 = vadd.f32 %v5808_v10, %v5680_v25  ;;  %v3965_v20 = vadd.f32 %v3882_v30, %v3720_v24  ;;  %v5237_v49 = vmul.f32 %v14421_v29, %v10336_v63 }
 0x2fc   : > { %v4372_v55 = vsel %vm3344_vm3, %v4370_v15, %v14444_v11  ;;  %v5106_v1 = vrot.slane %v4992_v38, 4  ;;  %v10986_v56 = vmul.f32 %v10336_v63, %v14433_v22  ;;  %v4618_v10 = vsel %vm4570_vm4, %v4616_v6, %v13622_v39 }
 0x2fd   : > { %v5872_v25 = vmul.f32 0.7978846, %v5840_v41  ;;  %v4210_v30 = vadd.f32 %v4127_v54, %v3965_v20  ;;  %v13625_v24 = vrot.slane %v10977_v26, 4  ;;  %v5351_v45 = vrot.slane %v5237_v49, 4  ;;  %v11002_v54 = vld [vmem:[#allocation6] ss:$0 sm:$0xff] }
 0x2fe   : > { %14445 = vst [vmem:[#allocation21_spill] sm:$0xff] %v10986_v56  ;;  %v13626_v46 = vrot.slane %v10986_v56, 4  ;;  %v5482_v15 = vmul.f32 %v10763_v35, %v10345_v36  ;;  %v10997_v38 = vmul.f32 %v10345_v36, %v10795_v57  ;;  %v14446_v41 = vrot.slane %v10966_v61, 4 }
 0x2ff   : > { %6363 = vtanh.f32 %v5872_v25  ;;  %v4455_v11 = vadd.f32 %v4372_v55, %v4210_v30  ;;  %v425_v6 = vmul.f32 %v11002_v54, %v10898_v3  ;;  %v5108_v49 = vsel %vm4570_vm4, %v5106_v1, %v13625_v24  ;;  %v11021_v24 = vld [vmem:[#allocation6 + $0x1] ss:$0 sm:$0xff] }
 0x300   : > { %v4863_v20 = vsel %vm4570_vm4, %v4861_v21, %v14446_v41  ;;  %v5353_v39 = vsel %vm4570_vm4, %v5351_v45, %v13626_v46  ;;  %v5596_v35 = vrot.slane %v5482_v15, 4  ;;  %v495_v55 = vmul.f32 %v10729_v5, %v14427_v60  ;;  %14447 = vst [vmem:[#allocation23_spill] sm:$0xff] %v11021_v24 }
 0x301   : > { %v4701_v25 = vadd.f32 %v4618_v10, %v4455_v11  ;;  %v565_v30 = vmul.f32 %v10857_v37, %v10738_v32  ;;  %v635_v3 = vmul.f32 %v10757_v62, %v14433_v22  ;;  %v705_v1 = vmul.f32 %v10761_v53, %v10795_v57  ;;  %v11027_v11 = vld [vmem:[#allocation6 + $0x11] ss:$0 sm:$0xff]  ;;  %v11035_v37 = vld [vmem:[#allocation6 + $0x2] ss:$0 sm:$0xff] }
 0x302   : > { %v527_v41 = vadd.f32 %v495_v55, %v425_v6  ;;  %v825_v45 = vmul.f32 %v11021_v24, %v14325_v12  ;;  %v1071_v10 = vmul.f32 %v10773_v18, %v14384_v8  ;;  %14448 = vst [vmem:[#allocation28_spill] sm:$0xff] %v11027_v11  ;;  %v1316_v46 = vmul.f32 %v11027_v11, %v14386_v33  ;;  %v14449_v55 = vld [vmem:[#allocation60_spill] sm:$0xff] }
 0x303   : > { %v4946_v15 = vadd.f32 %v4863_v20, %v4701_v25  ;;  %v1561_v6 = vmul.f32 %v10797_v58, %v14388_v50  ;;  %v1806_v21 = vmul.f32 %v10809_v19, %v14449_v55  ;;  %14450 = vst [vmem:[#allocation32_spill] sm:$0xff] %v11035_v37  ;;  %v2051_v18 = vmul.f32 %v11035_v37, %v14325_v12 }
 0x304   : > { %v597_v57 = vadd.f32 %v565_v30, %v527_v41  ;;  %v941_v53 = vrot.slane %v825_v45, 1  ;;  %v1186_v22 = vrot.slane %v1071_v10, 1  ;;  %v1431_v25 = vrot.slane %v1316_v46, 1 }
 0x305   : > { %v5191_v20 = vadd.f32 %v5108_v49, %v4946_v15  ;;  %v1676_v60 = vrot.slane %v1561_v6, 1  ;;  %v1921_v24 = vrot.slane %v1806_v21, 1  ;;  %v14451_v11 = vrot.slane %v10997_v38, 4 }
 0x306   : > { %v667_v58 = vadd.f32 %v635_v3, %v597_v57  ;;  %v14452_v62 = vrot.slane %v10771_v52, 1  ;;  %v14453_v41 = vrot.slane %v10779_v27, 1  ;;  %v14454_v37 = vrot.slane %v10786_v23, 1 }
 0x307   : > { %v5598_v56 = vsel %vm4570_vm4, %v5596_v35, %v14451_v11  ;;  %v5436_v10 = vadd.f32 %v5353_v39, %v5191_v20  ;;  %v14455_v49 = vrot.slane %v10807_v2, 1  ;;  %v2167_v15 = vrot.slane %v2051_v18, 2 }
 0x308   : > { %v942_v30 = vsel %vm892_vm1, %v14452_v62, %v941_v53  ;;  %v1187_v45 = vsel %vm892_vm1, %v14453_v41, %v1186_v22  ;;  %v1432_v46 = vsel %vm892_vm1, %v14454_v37, %v1431_v25  ;;  %v737_v35 = vadd.f32 %v705_v1, %v667_v58  ;;  %v11059_v53 = vld [vmem:[#allocation6 + $0x12] ss:$0 sm:$0xff] }
 0x309   : > { %v1677_v21 = vsel %vm892_vm1, %v14455_v49, %v1676_v60  ;;  %v14456_v57 = vrot.slane %v10820_v42, 1  ;;  %v2297_v62 = vmul.f32 %v10836_v59, %v14384_v8  ;;  %v2542_v27 = vmul.f32 %v11059_v53, %v14386_v33  ;;  %v6364_v23 = vpop.eup %6363 }
 0x30a   : > { %v5681_v22 = vadd.f32 %v5598_v56, %v5436_v10  ;;  %v2787_v2 = vmul.f32 %v10863_v7, %v14388_v50  ;;  %v3032_v18 = vmul.f32 %v10880_v14, %v14449_v55  ;;  %v3277_v60 = vmul.f32 %v10893_v43, %v14325_v12 }
 0x30b   : > { %v1922_v52 = vsel %vm892_vm1, %v14456_v57, %v1921_v24  ;;  %v5936_v58 = vadd.f32 1.0, %v6364_v23  ;;  %v1024_v42 = vadd.f32 %v942_v30, %v737_v35  ;;  %v2412_v37 = vrot.slane %v2297_v62, 2 }
 0x30c   : > { %v2657_v39 = vrot.slane %v2542_v27, 2  ;;  %v5745_v24 = vmul.f32 0.044715, %v5681_v22  ;;  %v14457_v3 = vrot.slane %v10827_v9, 2  ;;  %v2902_v11 = vrot.slane %v2787_v2, 2  ;;  %v14461_v27 = vld [vmem:[#allocation22_spill] sm:$0xff] }
 0x30d   : > { %v3147_v56 = vrot.slane %v3032_v18, 2  ;;  %v5968_v6 = vmul.f32 %v5936_v58, %v10944_v13  ;;  %v11073_v20 = vmul.f32 0.5, %v5681_v22  ;;  %v1269_v25 = vadd.f32 %v1187_v45, %v1024_v42  ;;  %v14463_v18 = vld [vmem:[#allocation24_spill] sm:$0xff]  ;;  %v14465_v42 = vld [vmem:[#allocation39_spill] sm:$0xff] }
 0x30e   : > { %v2168_v1 = vsel %vm2118_vm2, %v14457_v3, %v2167_v15  ;;  %v14458_v41 = vrot.slane %v10845_v48, 2  ;;  %v5777_v49 = vmul.f32 %v5745_v24, %v5681_v22  ;;  %v14459_v30 = vrot.slane %v10861_v31, 2  ;;  %v14464_v58 = vld [vmem:[#allocation52_spill] sm:$0xff] }
 0x30f   : > { %v14460_v9 = vrot.slane %v10871_v40, 2  ;;  %v3393_v57 = vrot.slane %v3277_v60, 3  ;;  %v6007_v62 = vmul.f32 %v10678_v34, %v5968_v6  ;;  %v1514_v13 = vadd.f32 %v1432_v46, %v1269_v25  ;;  %v14466_v6 = vld [vmem:[#allocation27_spill] sm:$0xff] }
 0x310   : > { %v2413_v10 = vsel %vm2118_vm2, %v14458_v41, %v2412_v37  ;;  %v2658_v35 = vsel %vm2118_vm2, %v14459_v30, %v2657_v39  ;;  %v3523_v45 = vmul.f32 %v14461_v27, %v14384_v8  ;;  %v3768_v48 = vmul.f32 %v14402_v28, %v14386_v33  ;;  %v6550_v25 = vld [vmem:[#allocation2 + $0xfa] sm:$0xff] }
 0x311   : > { %v2903_v15 = vsel %vm2118_vm2, %v14460_v9, %v2902_v11  ;;  %v5809_v23 = vmul.f32 %v5777_v49, %v5681_v22  ;;  %v14462_v2 = vrot.slane %v10891_v44, 2  ;;  %v4013_v40 = vmul.f32 %v14463_v18, %v14388_v50  ;;  %v14467_v49 = vld [vmem:[#allocation47_spill] sm:$0xff]  ;;  %v14469_v27 = vld [vmem:[#allocation18_spill] sm:$0xff] }
 0x312   : > { %v4258_v60 = vmul.f32 %v14464_v58, %v14449_v55  ;;  %v6046_v37 = vadd.f32 %v14465_v42, %v6007_v62  ;;  %v1759_v46 = vadd.f32 %v1677_v21, %v1514_v13  ;;  %v3638_v39 = vrot.slane %v3523_v45, 3  ;;  %v14471_v13 = vld [vmem:[#allocation46_spill] sm:$0xff] }
 0x313   : > { %v3148_v31 = vsel %vm2118_vm2, %v14462_v2, %v3147_v56  ;;  %v3883_v24 = vrot.slane %v3768_v48, 3  ;;  %v5841_v3 = vadd.f32 %v5809_v23, %v5681_v22  ;;  %v4128_v11 = vrot.slane %v4013_v40, 3 }
 0x314   : > { %v4373_v28 = vrot.slane %v4258_v60, 3  ;;  %v4503_v44 = vmul.f32 %v14466_v6, %v14325_v12  ;;  %v6078_v56 = vadd.f32 %v6550_v25, %v6046_v37  ;;  %v2004_v41 = vadd.f32 %v1922_v52, %v1759_v46  ;;  %v14475_v46 = vld [vmem:[#allocation19_spill] sm:$0xff] }
 0x315   : > { %v14468_v30 = vrot.slane %v14467_v49, 3  ;;  %v14470_v2 = vrot.slane %v14469_v27, 3  ;;  %v5873_v62 = vmul.f32 0.7978846, %v5841_v3  ;;  %v14472_v45 = vrot.slane %v14471_v13, 3  ;;  %v14484_v13 = vld [vmem:[#allocation23_spill] sm:$0xff] }
 0x316   : > { %v14473_v48 = vrot.slane %v10935_v4, 3  ;;  %v4619_v52 = vrot.slane %v4503_v44, 4  ;;  %6110 = vst [vmem:[%s7803_s9 + $0x88] sm:$0xff] %v6078_v56  ;;  %v2250_v23 = vadd.f32 %v2168_v1, %v2004_v41  ;;  %v4994_v18 = vmul.f32 %v10332_v51, %v14386_v33  ;;  %v14479_v56 = vld [vmem:[#allocation45_spill] sm:$0xff]  ;;  %v14480_v41 = vld [vmem:[#allocation31_spill] sm:$0xff] }
 0x317   : > { %v3394_v9 = vsel %vm3344_vm3, %v14468_v30, %v3393_v57  ;;  %v3639_v21 = vsel %vm3344_vm3, %v14470_v2, %v3638_v39  ;;  %v11108_v22 = vsel %vm3344_vm3, %v14472_v45, %v3883_v24  ;;  %v4749_v57 = vmul.f32 %v10328_v47, %v14384_v8  ;;  %v14481_v30 = vld [vmem:[#allocation21_spill] sm:$0xff] }
 0x318   : > { %v11113_v12 = vsel %vm3344_vm3, %v14473_v48, %v4128_v11  ;;  %v5239_v40 = vmul.f32 %v10336_v63, %v14388_v50  ;;  %6365 = vtanh.f32 %v5873_v62  ;;  %v14474_v60 = vrot.slane %v10949_v0, 3  ;;  %v14485_v48 = vld [vmem:[#allocation44_spill] sm:$0xff] }
 0x319   : > { %v5484_v37 = vmul.f32 %v10345_v36, %v14449_v55  ;;  %v426_v1 = vmul.f32 %v11002_v54, %v14475_v46  ;;  %v2495_v39 = vadd.f32 %v2413_v10, %v2250_v23  ;;  %v4864_v47 = vrot.slane %v4749_v57, 4  ;;  %v14486_v23 = vld [vmem:[#allocation26_spill] sm:$0xff] }
 0x31a   : > { %v11125_v4 = vsel %vm3344_vm3, %v14474_v60, %v4373_v28  ;;  %v5109_v24 = vrot.slane %v4994_v18, 4  ;;  %v5354_v3 = vrot.slane %v5239_v40, 4  ;;  %v14476_v51 = vrot.slane %v10960_v17, 4  ;;  %v14487_v18 = vld [vmem:[#allocation40_spill] sm:$0xff] }
 0x31b   : > { %v5599_v11 = vrot.slane %v5484_v37, 4  ;;  %v496_v0 = vmul.f32 %v10847_v16, %v10729_v5  ;;  %v566_v28 = vmul.f32 %v10738_v32, %v14421_v29  ;;  %v2740_v36 = vadd.f32 %v2658_v35, %v2495_v39  ;;  %v14488_v37 = vld [vmem:[#allocation28_spill] sm:$0xff]  ;;  %v14489_v39 = vld [vmem:[#allocation55_spill] sm:$0xff] }
 0x31c   : > { %v11134_v63 = vsel %vm4570_vm4, %v14476_v51, %v4619_v52  ;;  %v14477_v44 = vrot.slane %v10966_v61, 4  ;;  %v14478_v25 = vrot.slane %v10977_v26, 4  ;;  %v636_v49 = vmul.f32 %v14480_v41, %v14479_v56 }
 0x31d   : > { %v14482_v27 = vrot.slane %v14481_v30, 4  ;;  %v14483_v35 = vrot.slane %v10997_v38, 4  ;;  %v528_v62 = vadd.f32 %v496_v0, %v426_v1  ;;  %v826_v26 = vmul.f32 %v14484_v13, %v14475_v46  ;;  %v11182_v0 = vld [vmem:[#allocation2 + $0x150] sm:$0xff] }
 0x31e   : > { %v11143_v10 = vsel %vm4570_vm4, %v14477_v44, %v4864_v47  ;;  %v11148_v17 = vsel %vm4570_vm4, %v14478_v25, %v5109_v24  ;;  %v2985_v45 = vadd.f32 %v2903_v15, %v2740_v36  ;;  %v11166_v52 = vmul.f32 %v14484_v13, %v14485_v48  ;;  %v14490_v36 = vld [vmem:[#allocation14_spill] sm:$0xff]  ;;  %v14491_v25 = vld [vmem:[#allocation53_spill] sm:$0xff] }
 0x31f   : > { %v11155_v2 = vsel %vm4570_vm4, %v14482_v27, %v5354_v3  ;;  %v11160_v61 = vsel %vm4570_vm4, %v14483_v35, %v5599_v11  ;;  %v1072_v57 = vmul.f32 %v10847_v16, %v14486_v23  ;;  %v11172_v40 = vmul.f32 %v14487_v18, %v14486_v23  ;;  %v14492_v35 = vld [vmem:[#allocation51_spill] sm:$0xff] }
 0x320   : > { %v598_v38 = vadd.f32 %v566_v28, %v528_v62  ;;  %v943_v60 = vrot.slane %v826_v26, 1  ;;  %v1317_v1 = vmul.f32 %v14488_v37, %v14421_v29  ;;  %v11178_v47 = vmul.f32 %v14488_v37, %v14489_v39  ;;  %v11202_v39 = vld [vmem:[#allocation2 + $0x158] sm:$0xff] }
 0x321   : > { %v3230_v15 = vadd.f32 %v3148_v31, %v2985_v45  ;;  %v13648_v24 = vrot.slane %v11166_v52, 1  ;;  %v1188_v3 = vrot.slane %v1072_v57, 1  ;;  %v13649_v51 = vrot.slane %v11172_v40, 1  ;;  %14493 = vst [vmem:[#allocation54_spill] sm:$0xff] %v11202_v39 }
 0x322   : > { %v668_v11 = vadd.f32 %v636_v49, %v598_v38  ;;  %v706_v28 = vmul.f32 %v11182_v0, %v14490_v36  ;;  %v1433_v44 = vrot.slane %v1317_v1, 1  ;;  %v1562_v29 = vmul.f32 %v14491_v25, %v14480_v41  ;;  %v6366_v49 = vpop.eup %6365 }
 0x323   : > { %v3476_v30 = vadd.f32 %v3394_v9, %v3230_v15  ;;  %v945_v31 = vsel %vm892_vm1, %v943_v60, %v13648_v24  ;;  %v11194_v62 = vmul.f32 %v14491_v25, %v14492_v35  ;;  %v1190_v45 = vsel %vm892_vm1, %v1188_v3, %v13649_v51 }
 0x324   : > { %v738_v26 = vadd.f32 %v706_v28, %v668_v11  ;;  %v1678_v57 = vrot.slane %v1562_v29, 1  ;;  %v1807_v9 = vmul.f32 %v11182_v0, %v10809_v19  ;;  %v5937_v38 = vadd.f32 1.0, %v6366_v49  ;;  %v14494_v28 = vld [vmem:[#allocation32_spill] sm:$0xff] }
 0x325   : > { %v3721_v1 = vadd.f32 %v3639_v21, %v3476_v30  ;;  %v11206_v15 = vmul.f32 %v11202_v39, %v10809_v19  ;;  %v2052_v27 = vmul.f32 %v14494_v28, %v14475_v46  ;;  %v11212_v3 = vmul.f32 %v14494_v28, %v14485_v48 }
 0x326   : > { %v1025_v24 = vadd.f32 %v945_v31, %v738_v26  ;;  %v1923_v11 = vrot.slane %v1807_v9, 1  ;;  %v5969_v29 = vmul.f32 %v5937_v38, %v11073_v20  ;;  %v14495_v30 = vrot.slane %v11178_v47, 1 }
 0x327   : > { %v3966_v21 = vadd.f32 %v11108_v22, %v3721_v1  ;;  %v13650_v51 = vrot.slane %v11206_v15, 1  ;;  %v14496_v31 = vrot.slane %v11194_v62, 1  ;;  %v2169_v46 = vrot.slane %v2052_v27, 2  ;;  %v11235_v27 = vld [vmem:[#allocation2 + $0x120] sm:$0xff] }
 0x328   : > { %v1435_v49 = vsel %vm892_vm1, %v1433_v44, %v14495_v30  ;;  %v1270_v60 = vadd.f32 %v1190_v45, %v1025_v24  ;;  %v2298_v48 = vmul.f32 %v10847_v16, %v10836_v59  ;;  %v6008_v9 = vmul.f32 %v10678_v34, %v5969_v29  ;;  %14497 = vst [vmem:[#allocation57_spill] sm:$0xff] %v11235_v27 }
 0x329   : > { %v1680_v26 = vsel %vm892_vm1, %v1678_v57, %v14496_v31  ;;  %v4211_v20 = vadd.f32 %v11113_v12, %v3966_v21  ;;  %v13652_v22 = vrot.slane %v11212_v3, 2  ;;  %v11230_v44 = vmul.f32 %v14487_v18, %v10836_v59  ;;  %v11242_v21 = vld [vmem:[#allocation2 + $0x128] sm:$0xff] }
 0x32a   : > { %v1515_v38 = vadd.f32 %v1435_v49, %v1270_v60  ;;  %v1925_v24 = vsel %vm892_vm1, %v1923_v11, %v13650_v51  ;;  %v2414_v45 = vrot.slane %v2298_v48, 2  ;;  %v2543_v57 = vmul.f32 %v11235_v27, %v11059_v53  ;;  %14498 = vst [vmem:[#allocation29_spill] sm:$0xff] %v11242_v21  ;;  %v6555_v48 = vld [vmem:[#allocation2 + $0x10a] sm:$0xff] }
 0x32b   : > { %v6047_v1 = vadd.f32 %v14465_v42, %v6008_v9  ;;  %v4456_v12 = vadd.f32 %v11125_v4, %v4211_v20  ;;  %v11246_v60 = vmul.f32 %v11242_v21, %v11059_v53  ;;  %v2788_v49 = vmul.f32 %v10863_v7, %v14480_v41 }
 0x32c   : > { %v1760_v11 = vadd.f32 %v1680_v26, %v1515_v38  ;;  %v2659_v30 = vrot.slane %v2543_v57, 2  ;;  %v11252_v31 = vmul.f32 %v10863_v7, %v14492_v35  ;;  %v2171_v20 = vsel %vm2118_vm2, %v2169_v46, %v13652_v22  ;;  %v6556_v46 = vld [vmem:[#allocation2 + $0xf0] sm:$0xff]  ;;  %v11283_v22 = vld [vmem:[#allocation6 + $0xb] ss:$0 sm:$0xff] }
 0x32d   : > { %14499 = vst [vmem:[#allocation59_spill] sm:$0xff] %v11246_v60  ;;  %v6079_v4 = vadd.f32 %v6555_v48, %v6047_v1  ;;  %v4702_v9 = vadd.f32 %v11134_v63, %v4456_v12  ;;  %v13653_v51 = vrot.slane %v11246_v60, 2  ;;  %v14501_v26 = vrot.slane %v11230_v44, 2  ;;  %v11275_v48 = vld [vmem:[#allocation2 + $0xf8] sm:$0xff]  ;;  %14503 = vst [vmem:[#allocation56_spill] sm:$0xff] %v11283_v22 }
 0x32e   : > { %14500 = vst [vmem:[#allocation15_spill] sm:$0xff] %v11252_v31  ;;  %v2005_v29 = vadd.f32 %v1925_v24, %v1760_v11  ;;  %v2904_v57 = vrot.slane %v2788_v49, 2  ;;  %v3033_v42 = vmul.f32 %v11182_v0, %v10880_v14  ;;  %v13659_v63 = vrot.slane %v11252_v31, 2 }
 0x32f   : > { %v2416_v38 = vsel %vm2118_vm2, %v2414_v45, %v14501_v26  ;;  %6111 = vst [vmem:[%s7803_s9 + $0x90] sm:$0xff] %v6079_v4  ;;  %v4947_v1 = vadd.f32 %v11143_v10, %v4702_v9  ;;  %v11269_v12 = vmul.f32 %v11202_v39, %v10880_v14  ;;  %v3278_v24 = vmul.f32 %v6556_v46, %v10893_v43 }
 0x330   : > { %v2251_v11 = vadd.f32 %v2171_v20, %v2005_v29  ;;  %v2661_v45 = vsel %vm2118_vm2, %v2659_v30, %v13653_v51  ;;  %v3149_v49 = vrot.slane %v3033_v42, 2  ;;  %v11279_v10 = vmul.f32 %v11275_v48, %v10893_v43  ;;  %v11292_v51 = vld [vmem:[#allocation6 + $0x13] ss:$0 sm:$0xff] }
 0x331   : > { %v5192_v4 = vadd.f32 %v11148_v17, %v4947_v1  ;;  %v3395_v26 = vrot.slane %v3278_v24, 3  ;;  %v3524_v29 = vmul.f32 %v11283_v22, %v10847_v16  ;;  %v11290_v42 = vmul.f32 %v11283_v22, %v14487_v18  ;;  %14505 = vst [vmem:[#allocation49_spill] sm:$0xff] %v11292_v51 }
 0x332   : > { %14502 = vst [vmem:[#allocation33_spill] sm:$0xff] %v11279_v10  ;;  %v2496_v20 = vadd.f32 %v2416_v38, %v2251_v11  ;;  %v3769_v17 = vmul.f32 %v11292_v51, %v11235_v27  ;;  %v2906_v24 = vsel %vm2118_vm2, %v2904_v57, %v13659_v63  ;;  %v11302_v38 = vmul.f32 %v11292_v51, %v11242_v21  ;;  %v11312_v57 = vld [vmem:[#allocation6 + $0x1b] ss:$0 sm:$0xff]  ;;  %v11339_v51 = vld [vmem:[#allocation6 + $0xc] ss:$0 sm:$0xff] }
 0x333   : > { %14504 = vst [vmem:[#allocation41_spill] sm:$0xff] %v11290_v42  ;;  %v5437_v1 = vadd.f32 %v11155_v2, %v5192_v4  ;;  %v3640_v9 = vrot.slane %v3524_v29, 3  ;;  %v14506_v30 = vrot.slane %v11269_v12, 2  ;;  %v14507_v22 = vrot.slane %v11279_v10, 3  ;;  %14508 = vst [vmem:[#allocation34_spill] sm:$0xff] %v11312_v57 }
 0x334   : > { %v2741_v11 = vadd.f32 %v2661_v45, %v2496_v20  ;;  %v13667_v2 = vrot.slane %v11290_v42, 3  ;;  %v3885_v31 = vrot.slane %v3769_v17, 3  ;;  %v4014_v29 = vmul.f32 %v11312_v57, %v14480_v41 }
 0x335   : > { %v3151_v34 = vsel %vm2118_vm2, %v3149_v49, %v14506_v30  ;;  %v3397_v60 = vsel %vm3344_vm3, %v3395_v26, %v14507_v22  ;;  %v5682_v4 = vadd.f32 %v11160_v61, %v5437_v1  ;;  %v11318_v45 = vmul.f32 %v11312_v57, %v14492_v35 }
 0x336   : > { %v2986_v20 = vadd.f32 %v2906_v24, %v2741_v11  ;;  %v4259_v22 = vmul.f32 %v11182_v0, %v14464_v58  ;;  %v11325_v26 = vmul.f32 %v11202_v39, %v14464_v58  ;;  %v3642_v17 = vsel %vm3344_vm3, %v3640_v9, %v13667_v2 }
 0x337   : > { %v11327_v61 = vmul.f32 0.5, %v5682_v4  ;;  %v5746_v30 = vmul.f32 0.044715, %v5682_v4  ;;  %v4130_v1 = vrot.slane %v4014_v29, 3  ;;  %v13669_v24 = vrot.slane %v11318_v45, 3 }
 0x338   : > { %v3231_v63 = vadd.f32 %v3151_v34, %v2986_v20  ;;  %v4375_v11 = vrot.slane %v4259_v22, 3  ;;  %v4504_v57 = vmul.f32 %v6556_v46, %v14466_v6  ;;  %v11337_v58 = vmul.f32 %v11275_v48, %v14466_v6 }
 0x339   : > { %v5778_v10 = vmul.f32 %v5746_v30, %v5682_v4  ;;  %v4750_v42 = vmul.f32 %v11339_v51, %v10847_v16  ;;  %v14509_v34 = vrot.slane %v11302_v38, 3  ;;  %v4132_v20 = vsel %vm3344_vm3, %v4130_v1, %v13669_v24 }
 0x33a   : > { %v3477_v9 = vadd.f32 %v3397_v60, %v3231_v63  ;;  %v11351_v46 = vmul.f32 %v11339_v51, %v14487_v18  ;;  %v4621_v30 = vrot.slane %v4504_v57, 4  ;;  %v13681_v2 = vrot.slane %v11337_v58, 4  ;;  %v11355_v63 = vld [vmem:[#allocation6 + $0x14] ss:$0 sm:$0xff]  ;;  %v11366_v57 = vld [vmem:[#allocation6 + $0x1c] ss:$0 sm:$0xff] }
 0x33b   : > { %v3887_v29 = vsel %vm3344_vm3, %v3885_v31, %v14509_v34  ;;  %v5810_v22 = vmul.f32 %v5778_v10, %v5682_v4  ;;  %v4866_v49 = vrot.slane %v4750_v42, 4  ;;  %14510 = vst [vmem:[#allocation12_spill] sm:$0xff] %v11355_v63  ;;  %v4995_v31 = vmul.f32 %v11355_v63, %v11235_v27  ;;  %14512 = vst [vmem:[#allocation43_spill] sm:$0xff] %v11366_v57 }
 0x33c   : > { %v3722_v6 = vadd.f32 %v3642_v17, %v3477_v9  ;;  %v11361_v1 = vmul.f32 %v11355_v63, %v11242_v21  ;;  %v14511_v24 = vrot.slane %v11325_v26, 3  ;;  %v5240_v42 = vmul.f32 %v11366_v57, %v14480_v41 }
 0x33d   : > { %v5842_v34 = vadd.f32 %v5810_v22, %v5682_v4  ;;  %v11372_v17 = vmul.f32 %v11366_v57, %v14492_v35  ;;  %v4623_v60 = vsel %vm4570_vm4, %v4621_v30, %v13681_v2  ;;  %v5111_v27 = vrot.slane %v4995_v31, 4  ;;  %v14514_v2 = vld [vmem:[#allocation62_spill] sm:$0xff] }
 0x33e   : > { %v4377_v10 = vsel %vm3344_vm3, %v4375_v11, %v14511_v24  ;;  %v3967_v9 = vadd.f32 %v3887_v29, %v3722_v6  ;;  %v13680_v4 = vrot.slane %v11361_v1, 4  ;;  %v5356_v16 = vrot.slane %v5240_v42, 4  ;;  %v11379_v11 = vld [vmem:[#allocation6 + $0x24] ss:$0 sm:$0xff] }
 0x33f   : > { %v5874_v22 = vmul.f32 0.7978846, %v5842_v34  ;;  %v13679_v24 = vrot.slane %v11372_v17, 4  ;;  %v5485_v41 = vmul.f32 %v11379_v11, %v11182_v0  ;;  %v14513_v57 = vrot.slane %v11351_v46, 4 }
 0x340   : > { %v4212_v63 = vadd.f32 %v4132_v20, %v3967_v9  ;;  %v11388_v29 = vmul.f32 %v11379_v11, %v11202_v39  ;;  %v427_v30 = vmul.f32 %v11275_v48, %v11002_v54  ;;  %v5113_v31 = vsel %vm4570_vm4, %v5111_v27, %v13680_v4 }
 0x341   : > { %v4868_v6 = vsel %vm4570_vm4, %v4866_v49, %v14513_v57  ;;  %6367 = vtanh.f32 %v5874_v22  ;;  %v5358_v20 = vsel %vm4570_vm4, %v5356_v16, %v13679_v24  ;;  %v497_v34 = vmul.f32 %v14487_v18, %v10729_v5 }
 0x342   : > { %v4457_v49 = vadd.f32 %v4377_v10, %v4212_v63  ;;  %v5601_v57 = vrot.slane %v5485_v41, 4  ;;  %v567_v9 = vmul.f32 %v11242_v21, %v10738_v32  ;;  %v637_v22 = vmul.f32 %v14479_v56, %v14492_v35 }
 0x343   : > { %v529_v48 = vadd.f32 %v497_v34, %v427_v30  ;;  %v828_v27 = vmul.f32 %v14484_v13, %v14384_v8  ;;  %v1074_v16 = vmul.f32 %v14486_v23, %v14386_v33  ;;  %v707_v63 = vmul.f32 %v11202_v39, %v14490_v36 }
 0x344   : > { %v4703_v24 = vadd.f32 %v4623_v60, %v4457_v49  ;;  %v1319_v41 = vmul.f32 %v14488_v37, %v14388_v50  ;;  %v1564_v10 = vmul.f32 %v14491_v25, %v14449_v55  ;;  %v1809_v42 = vmul.f32 %v10809_v19, %v14514_v2 }
 0x345   : > { %v599_v30 = vadd.f32 %v567_v9, %v529_v48  ;;  %v946_v34 = vrot.slane %v828_v27, 1  ;;  %v1191_v4 = vrot.slane %v1074_v16, 1  ;;  %v2054_v60 = vmul.f32 %v14494_v28, %v14384_v8 }
 0x346   : > { %v4948_v35 = vadd.f32 %v4868_v6, %v4703_v24  ;;  %v1436_v21 = vrot.slane %v1319_v41, 1  ;;  %v1681_v18 = vrot.slane %v1564_v10, 1  ;;  %v14515_v49 = vrot.slane %v11388_v29, 4 }
 0x347   : > { %v669_v37 = vadd.f32 %v637_v22, %v599_v30  ;;  %v14516_v23 = vrot.slane %v11166_v52, 1  ;;  %v1926_v48 = vrot.slane %v1809_v42, 1  ;;  %v14517_v16 = vrot.slane %v11172_v40, 1 }
 0x348   : > { %v5603_v39 = vsel %vm4570_vm4, %v5601_v57, %v14515_v49  ;;  %v5193_v27 = vadd.f32 %v5113_v31, %v4948_v35  ;;  %v14518_v6 = vrot.slane %v11178_v47, 1  ;;  %v14519_v10 = vrot.slane %v11194_v62, 1 }
 0x349   : > { %v947_v9 = vsel %vm892_vm1, %v14516_v23, %v946_v34  ;;  %v1192_v24 = vsel %vm892_vm1, %v14517_v16, %v1191_v4  ;;  %v739_v57 = vadd.f32 %v707_v63, %v669_v37  ;;  %v2172_v22 = vrot.slane %v2054_v60, 2  ;;  %v14523_v16 = vld [vmem:[#allocation59_spill] sm:$0xff] }
 0x34a   : > { %v1437_v41 = vsel %vm892_vm1, %v14518_v6, %v1436_v21  ;;  %v1682_v28 = vsel %vm892_vm1, %v14519_v10, %v1681_v18  ;;  %v2300_v52 = vmul.f32 %v10836_v59, %v14386_v33  ;;  %v2545_v23 = vmul.f32 %v11059_v53, %v14388_v50 }
 0x34b   : > { %v5438_v35 = vadd.f32 %v5358_v20, %v5193_v27  ;;  %v14520_v40 = vrot.slane %v11206_v15, 1  ;;  %v2790_v47 = vmul.f32 %v10863_v7, %v14449_v55  ;;  %v3035_v62 = vmul.f32 %v10880_v14, %v14514_v2  ;;  %v6368_v18 = vpop.eup %6367 }
 0x34c   : > { %v1026_v37 = vadd.f32 %v947_v9, %v739_v57  ;;  %v2417_v21 = vrot.slane %v2300_v52, 2  ;;  %v2662_v31 = vrot.slane %v2545_v23, 2  ;;  %v3280_v42 = vmul.f32 %v10893_v43, %v14384_v8 }
 0x34d   : > { %v1927_v4 = vsel %vm892_vm1, %v14520_v40, %v1926_v48  ;;  %v5938_v63 = vadd.f32 1.0, %v6368_v18  ;;  %v5683_v30 = vadd.f32 %v5603_v39, %v5438_v35  ;;  %v2907_v20 = vrot.slane %v2790_v47, 2  ;;  %v14528_v40 = vld [vmem:[#allocation56_spill] sm:$0xff] }
 0x34e   : > { %v3152_v34 = vrot.slane %v3035_v62, 2  ;;  %v1271_v15 = vadd.f32 %v1192_v24, %v1026_v37  ;;  %v14521_v60 = vrot.slane %v11212_v3, 2  ;;  %v14522_v48 = vrot.slane %v11230_v44, 2  ;;  %v14525_v24 = vld [vmem:[#allocation15_spill] sm:$0xff]  ;;  %v14529_v62 = vld [vmem:[#allocation16_spill] sm:$0xff] }
 0x34f   : > { %v14524_v9 = vrot.slane %v14523_v16, 2  ;;  %v5970_v10 = vmul.f32 %v5938_v63, %v11327_v61  ;;  %v11457_v57 = vmul.f32 0.5, %v5683_v30  ;;  %v5747_v39 = vmul.f32 0.044715, %v5683_v30  ;;  %v14530_v61 = vld [vmem:[#allocation49_spill] sm:$0xff] }
 0x350   : > { %v2173_v49 = vsel %vm2118_vm2, %v14521_v60, %v2172_v22  ;;  %v2418_v27 = vsel %vm2118_vm2, %v14522_v48, %v2417_v21  ;;  %v3398_v52 = vrot.slane %v3280_v42, 3  ;;  %v1516_v23 = vadd.f32 %v1437_v41, %v1271_v15  ;;  %v14534_v60 = vld [vmem:[#allocation39_spill] sm:$0xff] }
 0x351   : > { %v2663_v6 = vsel %vm2118_vm2, %v14524_v9, %v2662_v31  ;;  %v14526_v35 = vrot.slane %v14525_v24, 2  ;;  %v14527_v22 = vrot.slane %v11269_v12, 2  ;;  %v3526_v47 = vmul.f32 %v14528_v40, %v14386_v33  ;;  %v14531_v31 = vld [vmem:[#allocation34_spill] sm:$0xff]  ;;  %v14533_v12 = vld [vmem:[#allocation27_spill] sm:$0xff]  ;;  %v14535_v24 = vld [vmem:[#allocation33_spill] sm:$0xff] }
 0x352   : > { %v6009_v18 = vmul.f32 %v14529_v62, %v5970_v10  ;;  %v5779_v37 = vmul.f32 %v5747_v39, %v5683_v30  ;;  %v3771_v21 = vmul.f32 %v14530_v61, %v14388_v50  ;;  %v4016_v41 = vmul.f32 %v14531_v31, %v14449_v55  ;;  %v14537_v62 = vld [vmem:[#allocation41_spill] sm:$0xff] }
 0x353   : > { %v2908_v3 = vsel %vm2118_vm2, %v14526_v35, %v2907_v20  ;;  %v3153_v44 = vsel %vm2118_vm2, %v14527_v22, %v3152_v34  ;;  %v1761_v42 = vadd.f32 %v1682_v28, %v1516_v23  ;;  %v3643_v63 = vrot.slane %v3526_v47, 3  ;;  %v14532_v20 = vld [vmem:[#allocation52_spill] sm:$0xff] }
 0x354   : > { %v4261_v15 = vmul.f32 %v14532_v20, %v14514_v2  ;;  %v4506_v34 = vmul.f32 %v14533_v12, %v14384_v8  ;;  %v6048_v48 = vadd.f32 %v14534_v60, %v6009_v18  ;;  %v5811_v16 = vmul.f32 %v5779_v37, %v5683_v30  ;;  %v6565_v20 = vld [vmem:[#allocation2 + $0x112] sm:$0xff] }
 0x355   : > { %v3888_v9 = vrot.slane %v3771_v21, 3  ;;  %v4133_v10 = vrot.slane %v4016_v41, 3  ;;  %v2006_v39 = vadd.f32 %v1927_v4, %v1761_v42  ;;  %v14536_v35 = vrot.slane %v14535_v24, 3 }
 0x356   : > { %v14538_v28 = vrot.slane %v14537_v62, 3  ;;  %v4378_v47 = vrot.slane %v4261_v15, 3  ;;  %v6080_v31 = vadd.f32 %v6565_v20, %v6048_v48  ;;  %v5843_v61 = vadd.f32 %v5811_v16, %v5683_v30  ;;  %v14545_v16 = vld [vmem:[#allocation57_spill] sm:$0xff] }
 0x357   : > { %v3399_v22 = vsel %vm3344_vm3, %v14536_v35, %v3398_v52  ;;  %v14539_v8 = vrot.slane %v11302_v38, 3  ;;  %v4624_v37 = vrot.slane %v4506_v34, 4  ;;  %v2252_v21 = vadd.f32 %v2173_v49, %v2006_v39  ;;  %v14543_v49 = vld [vmem:[#allocation43_spill] sm:$0xff] }
 0x358   : > { %v3644_v23 = vsel %vm3344_vm3, %v14538_v28, %v3643_v63  ;;  %v14540_v4 = vrot.slane %v11318_v45, 3  ;;  %v14541_v52 = vrot.slane %v11325_v26, 3  ;;  %v4752_v30 = vmul.f32 %v11339_v51, %v14386_v33  ;;  %6112 = vst [vmem:[%s7803_s9 + $0x98] sm:$0xff] %v6080_v31  ;;  %v14542_v63 = vld [vmem:[#allocation12_spill] sm:$0xff]  ;;  %v14544_v26 = vld [vmem:[#allocation42_spill] sm:$0xff] }
 0x359   : > { %v11486_v18 = vsel %vm3344_vm3, %v14539_v8, %v3888_v9  ;;  %v5875_v38 = vmul.f32 0.7978846, %v5843_v61  ;;  %v4997_v20 = vmul.f32 %v14542_v63, %v14388_v50  ;;  %v5242_v15 = vmul.f32 %v14543_v49, %v14449_v55 }
 0x35a   : > { %v11491_v41 = vsel %vm3344_vm3, %v14540_v4, %v4133_v10  ;;  %v11496_v42 = vsel %vm3344_vm3, %v14541_v52, %v4378_v47  ;;  %v5487_v45 = vmul.f32 %v11379_v11, %v14514_v2  ;;  %v2497_v34 = vadd.f32 %v2418_v27, %v2252_v21  ;;  %v14547_v27 = vld [vmem:[#allocation31_spill] sm:$0xff]  ;;  %v11535_v52 = vld [vmem:[#allocation2 + $0x168] sm:$0xff] }
 0x35b   : > { %v4869_v60 = vrot.slane %v4752_v30, 4  ;;  %v428_v48 = vmul.f32 %v11002_v54, %v14544_v26  ;;  %v498_v9 = vmul.f32 %v14545_v16, %v10729_v5  ;;  %6369 = vtanh.f32 %v5875_v38  ;;  %14551 = vst [vmem:[#allocation58_spill] sm:$0xff] %v11535_v52  ;;  %v14552_v30 = vld [vmem:[#allocation40_spill] sm:$0xff] }
 0x35c   : > { %v14546_v61 = vrot.slane %v11337_v58, 4  ;;  %v5114_v10 = vrot.slane %v4997_v20, 4  ;;  %v5359_v39 = vrot.slane %v5242_v15, 4  ;;  %v2742_v24 = vadd.f32 %v2663_v6, %v2497_v34  ;;  %v14554_v15 = vld [vmem:[#allocation29_spill] sm:$0xff] }
 0x35d   : > { %v5604_v35 = vrot.slane %v5487_v45, 4  ;;  %v530_v62 = vadd.f32 %v498_v9, %v428_v48  ;;  %v568_v28 = vmul.f32 %v14547_v27, %v10738_v32  ;;  %v14548_v47 = vrot.slane %v11351_v46, 4  ;;  %v14556_v48 = vld [vmem:[#allocation51_spill] sm:$0xff] }
 0x35e   : > { %v11514_v31 = vsel %vm4570_vm4, %v14546_v61, %v4624_v37  ;;  %v14549_v5 = vrot.slane %v11361_v1, 4  ;;  %v14550_v37 = vrot.slane %v11372_v17, 4  ;;  %v638_v6 = vmul.f32 %v11182_v0, %v14479_v56  ;;  %v14553_v17 = vld [vmem:[#allocation26_spill] sm:$0xff] }
 0x35f   : > { %v11521_v8 = vsel %vm4570_vm4, %v14548_v47, %v4869_v60  ;;  %v2987_v4 = vadd.f32 %v2908_v3, %v2742_v24  ;;  %v600_v32 = vadd.f32 %v568_v28, %v530_v62  ;;  %v708_v46 = vmul.f32 %v11535_v52, %v14490_v36  ;;  %v14555_v3 = vld [vmem:[#allocation28_spill] sm:$0xff] }
 0x360   : > { %v11526_v58 = vsel %vm4570_vm4, %v14549_v5, %v5114_v10  ;;  %v11531_v21 = vsel %vm4570_vm4, %v14550_v37, %v5359_v39  ;;  %v829_v1 = vmul.f32 %v14484_v13, %v14544_v26  ;;  %v11543_v38 = vmul.f32 %v14484_v13, %v14552_v30 }
 0x361   : > { %v1075_v20 = vmul.f32 %v14545_v16, %v14553_v17  ;;  %v11549_v56 = vmul.f32 %v14554_v15, %v14553_v17  ;;  %v1320_v45 = vmul.f32 %v14555_v3, %v14547_v27  ;;  %v3232_v34 = vadd.f32 %v3153_v44, %v2987_v4 }
 0x362   : > { %v670_v60 = vadd.f32 %v638_v6, %v600_v32  ;;  %v948_v36 = vrot.slane %v829_v1, 1  ;;  %v11555_v9 = vmul.f32 %v14555_v3, %v14556_v48  ;;  %v14557_v61 = vrot.slane %v11388_v29, 4 }
 0x363   : > { %v13702_v39 = vrot.slane %v11543_v38, 1  ;;  %v1193_v24 = vrot.slane %v1075_v20, 1  ;;  %v13700_v62 = vrot.slane %v11549_v56, 1  ;;  %v3478_v28 = vadd.f32 %v3399_v22, %v3232_v34  ;;  %v11580_v20 = vld [vmem:[#allocation2 + $0x170] sm:$0xff]  ;;  %v14560_v34 = vld [vmem:[#allocation32_spill] sm:$0xff] }
 0x364   : > { %v11560_v10 = vsel %vm4570_vm4, %v14557_v61, %v5604_v35  ;;  %v740_v47 = vadd.f32 %v708_v46, %v670_v60  ;;  %v1438_v27 = vrot.slane %v1320_v45, 1  ;;  %v1565_v44 = vmul.f32 %v11182_v0, %v14491_v25  ;;  %v14558_v35 = vld [vmem:[#allocation54_spill] sm:$0xff]  ;;  %14559 = vst [vmem:[#allocation50_spill] sm:$0xff] %v11580_v20 }
 0x365   : > { %v950_v5 = vsel %vm892_vm1, %v948_v36, %v13702_v39  ;;  %v13699_v29 = vrot.slane %v11555_v9, 1  ;;  %v11572_v37 = vmul.f32 %v14558_v35, %v14491_v25  ;;  %v1810_v6 = vmul.f32 %v11535_v52, %v10809_v19  ;;  %v6370_v1 = vpop.eup %6369 }
 0x366   : > { %v3723_v4 = vadd.f32 %v3644_v23, %v3478_v28  ;;  %v1027_v22 = vadd.f32 %v950_v5, %v740_v47  ;;  %v1195_v32 = vsel %vm892_vm1, %v1193_v24, %v13700_v62  ;;  %v1683_v46 = vrot.slane %v1565_v44, 1 }
 0x367   : > { %v13696_v17 = vrot.slane %v11572_v37, 1  ;;  %v11584_v45 = vmul.f32 %v11580_v20, %v10809_v19  ;;  %v1928_v25 = vrot.slane %v1810_v6, 1  ;;  %v2055_v60 = vmul.f32 %v14560_v34, %v14544_v26 }
 0x368   : > { %v5939_v23 = vadd.f32 1.0, %v6370_v1  ;;  %v3968_v36 = vadd.f32 %v11486_v18, %v3723_v4  ;;  %v1272_v48 = vadd.f32 %v1195_v32, %v1027_v22  ;;  %v11591_v61 = vmul.f32 %v14560_v34, %v14552_v30  ;;  %v11609_v4 = vld [vmem:[#allocation2 + $0x138] sm:$0xff] }
 0x369   : > { %v1440_v24 = vsel %vm892_vm1, %v1438_v27, %v13699_v29  ;;  %v1685_v19 = vsel %vm892_vm1, %v1683_v46, %v13696_v17  ;;  %v13694_v28 = vrot.slane %v11584_v45, 1  ;;  %v2301_v26 = vmul.f32 %v14545_v16, %v10836_v59 }
 0x36a   : > { %v5971_v18 = vmul.f32 %v5939_v23, %v11457_v57  ;;  %v4213_v47 = vadd.f32 %v11491_v41, %v3968_v36  ;;  %v1517_v44 = vadd.f32 %v1440_v24, %v1272_v48  ;;  %v2174_v30 = vrot.slane %v2055_v60, 2  ;;  %v11616_v57 = vld [vmem:[%s13184_s2] ss:$0 sm:$0xff] }
 0x36b   : > { %v13692_v5 = vrot.slane %v11591_v61, 2  ;;  %v11607_v27 = vmul.f32 %v14554_v15, %v10836_v59  ;;  %v2419_v6 = vrot.slane %v2301_v26, 2  ;;  %v2546_v22 = vmul.f32 %v11609_v4, %v11059_v53  ;;  %14561 = vst [vmem:[#allocation48_spill] sm:$0xff] %v11616_v57  ;;  %v11624_v60 = vld [vmem:[#allocation2 + $0x140] sm:$0xff] }
 0x36c   : > { %v6010_v41 = vmul.f32 %v11616_v57, %v5971_v18  ;;  %v4458_v32 = vadd.f32 %v11496_v42, %v4213_v47  ;;  %v1762_v46 = vadd.f32 %v1685_v19, %v1517_v44  ;;  %v1930_v59 = vsel %vm892_vm1, %v1928_v25, %v13694_v28  ;;  %14562 = vst [vmem:[#allocation13_spill] sm:$0xff] %v11624_v60  ;;  %v11635_v42 = vld [vmem:[%s13185_s3] ss:$0 sm:$0xff] }
 0x36d   : > { %v13691_v1 = vrot.slane %v11607_v27, 2  ;;  %v11628_v23 = vmul.f32 %v11624_v60, %v11059_v53  ;;  %v2664_v36 = vrot.slane %v2546_v22, 2  ;;  %v2791_v48 = vmul.f32 %v11182_v0, %v10863_v7  ;;  %14563 = vst [vmem:[#allocation60_spill] sm:$0xff] %v11635_v42 }
 0x36e   : > { %v6049_v24 = vadd.f32 %v11635_v42, %v6010_v41  ;;  %v4704_v25 = vadd.f32 %v11514_v31, %v4458_v32  ;;  %v2007_v19 = vadd.f32 %v1930_v59, %v1762_v46  ;;  %v11641_v26 = vmul.f32 %v14558_v35, %v10863_v7  ;;  %v6572_v31 = vld [vmem:[#allocation2 + $0x122] sm:$0xff] }
 0x36f   : > { %v2176_v18 = vsel %vm2118_vm2, %v2174_v30, %v13692_v5  ;;  %v2421_v47 = vsel %vm2118_vm2, %v2419_v6, %v13691_v1  ;;  %v13693_v44 = vrot.slane %v11628_v23, 2  ;;  %v3036_v22 = vmul.f32 %v11535_v52, %v10880_v14  ;;  %v6573_v1 = vld [vmem:[#allocation2 + $0x108] sm:$0xff] }
 0x370   : > { %v6081_v41 = vadd.f32 %v6572_v31, %v6049_v24  ;;  %v4949_v32 = vadd.f32 %v11521_v8, %v4704_v25  ;;  %v2253_v46 = vadd.f32 %v2176_v18, %v2007_v19  ;;  %v2909_v7 = vrot.slane %v2791_v48, 2  ;;  %v11664_v25 = vld [vmem:[#allocation2 + $0x110] sm:$0xff] }
 0x371   : > { %v2666_v59 = vsel %vm2118_vm2, %v2664_v36, %v13693_v44  ;;  %v13695_v30 = vrot.slane %v11641_v26, 2  ;;  %v11659_v6 = vmul.f32 %v11580_v20, %v10880_v14  ;;  %v3281_v5 = vmul.f32 %v6573_v1, %v10893_v43 }
 0x372   : > { %6113 = vst [vmem:[%s7803_s9 + $0xa0] sm:$0xff] %v6081_v41  ;;  %v5194_v24 = vadd.f32 %v11526_v58, %v4949_v32  ;;  %v2498_v31 = vadd.f32 %v2421_v47, %v2253_v46  ;;  %v3154_v8 = vrot.slane %v3036_v22, 2  ;;  %v11668_v48 = vmul.f32 %v11664_v25, %v10893_v43  ;;  %v14564_v41 = vld [vmem:[#allocation49_spill] sm:$0xff] }
 0x373   : > { %v13698_v36 = vrot.slane %v11659_v6, 2  ;;  %v3400_v19 = vrot.slane %v3281_v5, 3  ;;  %v3527_v14 = vmul.f32 %v14528_v40, %v14545_v16  ;;  %v11675_v18 = vmul.f32 %v14528_v40, %v14554_v15 }
 0x374   : > { %v5439_v58 = vadd.f32 %v11531_v21, %v5194_v24  ;;  %v2743_v47 = vadd.f32 %v2666_v59, %v2498_v31  ;;  %v13697_v22 = vrot.slane %v11668_v48, 3  ;;  %v3772_v32 = vmul.f32 %v11609_v4, %v14564_v41 }
 0x375   : > { %v2911_v43 = vsel %vm2118_vm2, %v2909_v7, %v13695_v30  ;;  %v3645_v5 = vrot.slane %v3527_v14, 3  ;;  %v13701_v46 = vrot.slane %v11675_v18, 3  ;;  %v11687_v44 = vmul.f32 %v11624_v60, %v14564_v41  ;;  %v14565_v14 = vld [vmem:[#allocation34_spill] sm:$0xff] }
 0x376   : > { %v5684_v28 = vadd.f32 %v11560_v10, %v5439_v58  ;;  %v2988_v21 = vadd.f32 %v2911_v43, %v2743_v47  ;;  %v3156_v59 = vsel %vm2118_vm2, %v3154_v8, %v13698_v36  ;;  %v3890_v24 = vrot.slane %v3772_v32, 3  ;;  %v14566_v47 = vld [vmem:[#allocation52_spill] sm:$0xff] }
 0x377   : > { %v3402_v31 = vsel %vm3344_vm3, %v3400_v19, %v13697_v22  ;;  %v13703_v7 = vrot.slane %v11687_v44, 3  ;;  %v4017_v30 = vmul.f32 %v14565_v14, %v11182_v0  ;;  %v11701_v17 = vmul.f32 %v14565_v14, %v14558_v35 }
 0x378   : > { %v5748_v10 = vmul.f32 0.044715, %v5684_v28  ;;  %v3233_v58 = vadd.f32 %v3156_v59, %v2988_v21  ;;  %v3647_v8 = vsel %vm3344_vm3, %v3645_v5, %v13701_v46  ;;  %v4262_v32 = vmul.f32 %v11535_v52, %v14566_v47 }
 0x379   : > { %v11708_v43 = vmul.f32 0.5, %v5684_v28  ;;  %v4135_v19 = vrot.slane %v4017_v30, 3  ;;  %v11713_v36 = vmul.f32 %v11580_v20, %v14566_v47  ;;  %v3892_v21 = vsel %vm3344_vm3, %v3890_v24, %v13703_v7 }
 0x37a   : > { %v5780_v29 = vmul.f32 %v5748_v10, %v5684_v28  ;;  %v3479_v62 = vadd.f32 %v3402_v31, %v3233_v58  ;;  %v4507_v5 = vmul.f32 %v6573_v1, %v14533_v12  ;;  %v4380_v59 = vrot.slane %v4262_v32, 3 }
 0x37b   : > { %v11722_v30 = vmul.f32 %v11664_v25, %v14533_v12  ;;  %v4753_v39 = vmul.f32 %v11339_v51, %v14545_v16  ;;  %v11728_v31 = vmul.f32 %v11339_v51, %v14554_v15  ;;  %v14568_v24 = vrot.slane %v11701_v17, 3 }
 0x37c   : > { %v5812_v47 = vmul.f32 %v5780_v29, %v5684_v28  ;;  %v3724_v22 = vadd.f32 %v3647_v8, %v3479_v62  ;;  %v4626_v10 = vrot.slane %v4507_v5, 4  ;;  %v4998_v12 = vmul.f32 %v11609_v4, %v14542_v63 }
 0x37d   : > { %14567 = vst [vmem:[#allocation22_spill] sm:$0xff] %v11728_v31  ;;  %v4137_v1 = vsel %vm3344_vm3, %v4135_v19, %v14568_v24  ;;  %v13705_v58 = vrot.slane %v11722_v30, 4  ;;  %v4871_v32 = vrot.slane %v4753_v39, 4  ;;  %v11739_v62 = vmul.f32 %v11624_v60, %v14542_v63 }
 0x37e   : > { %v5844_v7 = vadd.f32 %v5812_v47, %v5684_v28  ;;  %v3969_v46 = vadd.f32 %v3892_v21, %v3724_v22  ;;  %v14570_v8 = vrot.slane %v11713_v36, 3  ;;  %v5116_v16 = vrot.slane %v4998_v12, 4 }
 0x37f   : > { %14569 = vst [vmem:[#allocation24_spill] sm:$0xff] %v11739_v62  ;;  %v5243_v19 = vmul.f32 %v14543_v49, %v11182_v0  ;;  %v11748_v39 = vmul.f32 %v14543_v49, %v14558_v35  ;;  %v4628_v21 = vsel %vm4570_vm4, %v4626_v10, %v13705_v58  ;;  %v13709_v47 = vrot.slane %v11739_v62, 4 }
 0x380   : > { %v4382_v5 = vsel %vm3344_vm3, %v4380_v59, %v14570_v8  ;;  %v5876_v28 = vmul.f32 0.7978846, %v5844_v7  ;;  %v4214_v22 = vadd.f32 %v4137_v1, %v3969_v46  ;;  %v5488_v59 = vmul.f32 %v11535_v52, %v11379_v11  ;;  %v11772_v52 = vld [vmem:[#allocation6 + $0x8] ss:$0 sm:$0xff] }
 0x381   : > { %14571 = vst [vmem:[#allocation47_spill] sm:$0xff] %v11748_v39  ;;  %v5361_v24 = vrot.slane %v5243_v19, 4  ;;  %v13708_v29 = vrot.slane %v11748_v39, 4  ;;  %v11759_v12 = vmul.f32 %v11580_v20, %v11379_v11  ;;  %v14572_v46 = vrot.slane %v11728_v31, 4 }
 0x382   : > { %6371 = vtanh.f32 %v5876_v28  ;;  %v4459_v8 = vadd.f32 %v4382_v5, %v4214_v22  ;;  %v429_v10 = vmul.f32 %v11664_v25, %v11002_v54  ;;  %v5118_v1 = vsel %vm4570_vm4, %v5116_v16, %v13709_v47  ;;  %v11777_v22 = vld [vmem:[#allocation6 + $0x10] ss:$0 sm:$0xff]  ;;  %v11781_v25 = vld [vmem:[#allocation6 + $0x18] ss:$0 sm:$0xff] }
 0x383   : > { %v4873_v7 = vsel %vm4570_vm4, %v4871_v32, %v14572_v46  ;;  %v5363_v19 = vsel %vm4570_vm4, %v5361_v24, %v13708_v29  ;;  %v5606_v58 = vrot.slane %v5488_v59, 4  ;;  %v499_v5 = vmul.f32 %v11772_v52, %v14554_v15  ;;  %14573 = vst [vmem:[#allocation18_spill] sm:$0xff] %v11777_v22  ;;  %14574 = vst [vmem:[#allocation46_spill] sm:$0xff] %v11781_v25  ;;  %v11785_v59 = vld [vmem:[#allocation6 + $0x20] ss:$0 sm:$0xff] }
 0x384   : > { %v4705_v28 = vadd.f32 %v4628_v21, %v4459_v8  ;;  %v569_v54 = vmul.f32 %v11777_v22, %v11624_v60  ;;  %v639_v16 = vmul.f32 %v11781_v25, %v14558_v35  ;;  %14575 = vst [vmem:[#allocation19_spill] sm:$0xff] %v11785_v59  ;;  %v709_v46 = vmul.f32 %v11785_v59, %v11580_v20  ;;  %v11791_v8 = vld [vmem:[#allocation6 + $0x9] ss:$0 sm:$0xff]  ;;  %v11797_v60 = vld [vmem:[#allocation6 + $0x19] ss:$0 sm:$0xff]  ;;  %v14578_v20 = vld [vmem:[#allocation63_spill] sm:$0xff] }
 0x385   : > { %v531_v24 = vadd.f32 %v499_v5, %v429_v10  ;;  %v831_v21 = vmul.f32 %v14484_v13, %v14386_v33  ;;  %14576 = vst [vmem:[#allocation45_spill] sm:$0xff] %v11791_v8  ;;  %v1077_v29 = vmul.f32 %v11791_v8, %v14388_v50  ;;  %v1322_v32 = vmul.f32 %v14555_v3, %v14449_v55  ;;  %v11801_v5 = vld [vmem:[#allocation6 + $0x21] ss:$0 sm:$0xff] }
 0x386   : > { %v4950_v47 = vadd.f32 %v4873_v7, %v4705_v28  ;;  %14577 = vst [vmem:[#allocation21_spill] sm:$0xff] %v11797_v60  ;;  %v1567_v10 = vmul.f32 %v11797_v60, %v14514_v2  ;;  %v1812_v59 = vmul.f32 %v11801_v5, %v14578_v20  ;;  %v2057_v8 = vmul.f32 %v14560_v34, %v14386_v33 }
 0x387   : > { %v601_v13 = vadd.f32 %v569_v54, %v531_v24  ;;  %v951_v35 = vrot.slane %v831_v21, 1  ;;  %v1196_v15 = vrot.slane %v1077_v29, 1  ;;  %v1441_v28 = vrot.slane %v1322_v32, 1 }
 0x388   : > { %v5195_v7 = vadd.f32 %v5118_v1, %v4950_v47  ;;  %v1686_v39 = vrot.slane %v1567_v10, 1  ;;  %v1931_v3 = vrot.slane %v1812_v59, 1  ;;  %v14579_v25 = vrot.slane %v11759_v12, 4 }
 0x389   : > { %v671_v60 = vadd.f32 %v639_v16, %v601_v13  ;;  %v14580_v31 = vrot.slane %v11543_v38, 1  ;;  %v14581_v54 = vrot.slane %v11549_v56, 1  ;;  %v14582_v34 = vrot.slane %v11555_v9, 1 }
 0x38a   : > { %v5608_v62 = vsel %vm4570_vm4, %v5606_v58, %v14579_v25  ;;  %v5440_v24 = vadd.f32 %v5363_v19, %v5195_v7  ;;  %v14583_v1 = vrot.slane %v11572_v37, 1  ;;  %v2177_v59 = vrot.slane %v2057_v8, 2  ;;  %v11831_v19 = vld [vmem:[#allocation6 + $0x1a] ss:$0 sm:$0xff] }
 0x38b   : > { %v952_v22 = vsel %vm892_vm1, %v14580_v31, %v951_v35  ;;  %v1197_v29 = vsel %vm892_vm1, %v14581_v54, %v1196_v15  ;;  %v1442_v47 = vsel %vm892_vm1, %v14582_v34, %v1441_v28  ;;  %v741_v58 = vadd.f32 %v709_v46, %v671_v60  ;;  %v11825_v35 = vld [vmem:[#allocation6 + $0xa] ss:$0 sm:$0xff]  ;;  %v11835_v60 = vld [vmem:[#allocation6 + $0x22] ss:$0 sm:$0xff] }
 0x38c   : > { %v1687_v32 = vsel %vm892_vm1, %v14583_v1, %v1686_v39  ;;  %v14584_v25 = vrot.slane %v11584_v45, 1  ;;  %v2303_v15 = vmul.f32 %v11825_v35, %v14388_v50  ;;  %v2548_v56 = vmul.f32 %v11059_v53, %v14449_v55  ;;  %v6372_v9 = vpop.eup %6371  ;;  %v11839_v39 = vld [vmem:[#allocation6 + $0x3] ss:$0 sm:$0xff] }
 0x38d   : > { %v5685_v31 = vadd.f32 %v5608_v62, %v5440_v24  ;;  %v2793_v37 = vmul.f32 %v11831_v19, %v14514_v2  ;;  %v3038_v45 = vmul.f32 %v11835_v60, %v14578_v20  ;;  %v3283_v16 = vmul.f32 %v11839_v39, %v14386_v33 }
 0x38e   : > { %v1932_v38 = vsel %vm892_vm1, %v14584_v25, %v1931_v3  ;;  %v5940_v46 = vadd.f32 1.0, %v6372_v9  ;;  %v1028_v21 = vadd.f32 %v952_v22, %v741_v58  ;;  %v2422_v53 = vrot.slane %v2303_v15, 2 }
 0x38f   : > { %v2667_v8 = vrot.slane %v2548_v56, 2  ;;  %v5749_v62 = vmul.f32 0.044715, %v5685_v31  ;;  %v14585_v10 = vrot.slane %v11591_v61, 2  ;;  %v2912_v7 = vrot.slane %v2793_v37, 2 }
 0x390   : > { %v3157_v28 = vrot.slane %v3038_v45, 2  ;;  %v5972_v3 = vmul.f32 %v5940_v46, %v11708_v43  ;;  %v11847_v54 = vmul.f32 0.5, %v5685_v31  ;;  %v1273_v24 = vadd.f32 %v1197_v29, %v1028_v21  ;;  %v11868_v45 = vld [vmem:[#allocation6 + $0x23] ss:$0 sm:$0xff] }
 0x391   : > { %v2178_v13 = vsel %vm2118_vm2, %v14585_v10, %v2177_v59  ;;  %v14586_v34 = vrot.slane %v11607_v27, 2  ;;  %v5781_v25 = vmul.f32 %v5749_v62, %v5685_v31  ;;  %v14587_v22 = vrot.slane %v11628_v23, 2  ;;  %14590 = vst [vmem:[#allocation23_spill] sm:$0xff] %v11868_v45 }
 0x392   : > { %v14588_v61 = vrot.slane %v11641_v26, 2  ;;  %v3403_v15 = vrot.slane %v3283_v16, 3  ;;  %v6011_v56 = vmul.f32 %v11616_v57, %v5972_v3  ;;  %v1518_v43 = vadd.f32 %v1442_v47, %v1273_v24 }
 0x393   : > { %v2423_v1 = vsel %vm2118_vm2, %v14586_v34, %v2422_v53  ;;  %v2668_v58 = vsel %vm2118_vm2, %v14587_v22, %v2667_v8  ;;  %v3529_v29 = vmul.f32 %v14528_v40, %v14388_v50  ;;  %v3774_v27 = vmul.f32 %v14564_v41, %v14449_v55 }
 0x394   : > { %v2913_v59 = vsel %vm2118_vm2, %v14588_v61, %v2912_v7  ;;  %v5813_v9 = vmul.f32 %v5781_v25, %v5685_v31  ;;  %v14589_v37 = vrot.slane %v11659_v6, 2  ;;  %v4019_v26 = vmul.f32 %v14565_v14, %v14514_v2  ;;  %v11873_v6 = vld [vmem:[#allocation6 + $0x4] ss:$0 sm:$0xff] }
 0x395   : > { %v4264_v16 = vmul.f32 %v11868_v45, %v14578_v20  ;;  %v6050_v47 = vadd.f32 %v11635_v42, %v6011_v56  ;;  %v1763_v46 = vadd.f32 %v1687_v32, %v1518_v43  ;;  %v3648_v21 = vrot.slane %v3529_v29, 3 }
 0x396   : > { %v3158_v23 = vsel %vm2118_vm2, %v14589_v37, %v3157_v28  ;;  %v3893_v53 = vrot.slane %v3774_v27, 3  ;;  %v5845_v8 = vadd.f32 %v5813_v9, %v5685_v31  ;;  %v4138_v62 = vrot.slane %v4019_v26, 3  ;;  %v6588_v28 = vld [vmem:[#allocation2 + $0x12a] sm:$0xff]  ;;  %v11907_v9 = vld [vmem:[#allocation6] ss:$0 sm:$0xff] }
 0x397   : > { %v4383_v10 = vrot.slane %v4264_v16, 3  ;;  %v4509_v7 = vmul.f32 %v11873_v6, %v14386_v33  ;;  %v6082_v3 = vadd.f32 %v6588_v28, %v6050_v47  ;;  %v2008_v24 = vadd.f32 %v1932_v38, %v1763_v46  ;;  %v14599_v28 = vld [vmem:[#allocation22_spill] sm:$0xff] }
 0x398   : > { %v14591_v34 = vrot.slane %v11668_v48, 3  ;;  %v14592_v32 = vrot.slane %v11675_v18, 3  ;;  %v5877_v61 = vmul.f32 0.7978846, %v5845_v8  ;;  %v14593_v31 = vrot.slane %v11687_v44, 3 }
 0x399   : > { %v14594_v43 = vrot.slane %v11701_v17, 3  ;;  %v4629_v38 = vrot.slane %v4509_v7, 4  ;;  %6114 = vst [vmem:[%s7803_s9 + $0xa8] sm:$0xff] %v6082_v3  ;;  %v2254_v48 = vadd.f32 %v2178_v13, %v2008_v24  ;;  %v5000_v18 = vmul.f32 %v14542_v63, %v14449_v55  ;;  %v14596_v13 = vld [vmem:[#allocation57_spill] sm:$0xff]  ;;  %v14601_v24 = vld [vmem:[#allocation24_spill] sm:$0xff] }
 0x39a   : > { %v3404_v25 = vsel %vm3344_vm3, %v14591_v34, %v3403_v15  ;;  %v3649_v22 = vsel %vm3344_vm3, %v14592_v32, %v3648_v21  ;;  %v11886_v56 = vsel %vm3344_vm3, %v14593_v31, %v3893_v53  ;;  %v4755_v15 = vmul.f32 %v11339_v51, %v14388_v50  ;;  %v14603_v32 = vld [vmem:[#allocation58_spill] sm:$0xff] }
 0x39b   : > { %v11891_v33 = vsel %vm3344_vm3, %v14594_v43, %v4138_v62  ;;  %v5245_v44 = vmul.f32 %v14543_v49, %v14514_v2  ;;  %6373 = vtanh.f32 %v5877_v61  ;;  %v14595_v29 = vrot.slane %v11713_v36, 3  ;;  %v14598_v62 = vld [vmem:[#allocation18_spill] sm:$0xff]  ;;  %v14605_v43 = vld [vmem:[#allocation47_spill] sm:$0xff] }
 0x39c   : > { %v5490_v27 = vmul.f32 %v11379_v11, %v14578_v20  ;;  %v430_v37 = vmul.f32 %v11907_v9, %v14596_v13  ;;  %v2499_v26 = vadd.f32 %v2423_v1, %v2254_v48  ;;  %v4874_v16 = vrot.slane %v4755_v15, 4  ;;  %v14604_v61 = vld [vmem:[#allocation46_spill] sm:$0xff]  ;;  %v14618_v20 = vld [vmem:[#allocation21_spill] sm:$0xff] }
 0x39d   : > { %v11903_v17 = vsel %vm3344_vm3, %v14595_v29, %v4383_v10  ;;  %v5119_v47 = vrot.slane %v5000_v18, 4  ;;  %v5364_v46 = vrot.slane %v5245_v44, 4  ;;  %v14597_v21 = vrot.slane %v11722_v30, 4  ;;  %v11942_v44 = vld [vmem:[#allocation6 + $0x1] ss:$0 sm:$0xff] }
 0x39e   : > { %v5609_v36 = vrot.slane %v5490_v27, 4  ;;  %v500_v8 = vmul.f32 %v11772_v52, %v11609_v4  ;;  %v570_v10 = vmul.f32 %v14598_v62, %v11182_v0  ;;  %v2744_v7 = vadd.f32 %v2668_v58, %v2499_v26  ;;  %14608 = vst [vmem:[#allocation44_spill] sm:$0xff] %v11942_v44  ;;  %v14609_v26 = vld [vmem:[#allocation29_spill] sm:$0xff] }
 0x39f   : > { %v11914_v53 = vsel %vm4570_vm4, %v14597_v21, %v4629_v38  ;;  %v14600_v3 = vrot.slane %v14599_v28, 4  ;;  %v14602_v34 = vrot.slane %v14601_v24, 4  ;;  %v640_v31 = vmul.f32 %v14604_v61, %v14603_v32  ;;  %v14612_v21 = vld [vmem:[#allocation13_spill] sm:$0xff] }
 0x3a0   : > { %v14606_v38 = vrot.slane %v14605_v43, 4  ;;  %v14607_v58 = vrot.slane %v11759_v12, 4  ;;  %v532_v18 = vadd.f32 %v500_v8, %v430_v37  ;;  %v832_v29 = vmul.f32 %v11942_v44, %v14596_v13  ;;  %v11956_v37 = vld [vmem:[#allocation6 + $0x11] ss:$0 sm:$0xff] }
 0x3a1   : > { %v11923_v1 = vsel %vm4570_vm4, %v14600_v3, %v4874_v16  ;;  %v11928_v30 = vsel %vm4570_vm4, %v14602_v34, %v5119_v47  ;;  %v2989_v27 = vadd.f32 %v2913_v59, %v2744_v7  ;;  %v11948_v16 = vmul.f32 %v11942_v44, %v14609_v26  ;;  %v14611_v47 = vld [vmem:[#allocation45_spill] sm:$0xff]  ;;  %14614 = vst [vmem:[#allocation53_spill] sm:$0xff] %v11956_v37  ;;  %v14615_v3 = vld [vmem:[#allocation54_spill] sm:$0xff] }
 0x3a2   : > { %v11935_v48 = vsel %vm4570_vm4, %v14606_v38, %v5364_v46  ;;  %v11940_v15 = vsel %vm4570_vm4, %v14607_v58, %v5609_v36  ;;  %v1078_v46 = vmul.f32 %v14611_v47, %v11609_v4  ;;  %v11954_v12 = vmul.f32 %v14611_v47, %v14612_v21  ;;  %v11966_v58 = vld [vmem:[#allocation2 + $0x180] sm:$0xff] }
 0x3a3   : > { %14610 = vst [vmem:[#allocation55_spill] sm:$0xff] %v11948_v16  ;;  %v602_v36 = vadd.f32 %v570_v10, %v532_v18  ;;  %v953_v28 = vrot.slane %v832_v29, 1  ;;  %v1323_v8 = vmul.f32 %v11956_v37, %v11182_v0  ;;  %v11962_v59 = vmul.f32 %v11956_v37, %v14615_v3  ;;  %14616 = vst [vmem:[#allocation59_spill] sm:$0xff] %v11966_v58  ;;  %v14617_v10 = vld [vmem:[#allocation19_spill] sm:$0xff] }
 0x3a4   : > { %14613 = vst [vmem:[#allocation14_spill] sm:$0xff] %v11954_v12  ;;  %v3234_v7 = vadd.f32 %v3158_v23, %v2989_v27  ;;  %v13734_v24 = vrot.slane %v11948_v16, 1  ;;  %v1198_v34 = vrot.slane %v1078_v46, 1  ;;  %v13736_v43 = vrot.slane %v11954_v12, 1  ;;  %v14619_v46 = vld [vmem:[#allocation50_spill] sm:$0xff] }
 0x3a5   : > { %v672_v38 = vadd.f32 %v640_v31, %v602_v36  ;;  %v710_v18 = vmul.f32 %v11966_v58, %v14617_v10  ;;  %v1443_v29 = vrot.slane %v1323_v8, 1  ;;  %v1568_v0 = vmul.f32 %v14618_v20, %v14603_v32  ;;  %v6374_v31 = vpop.eup %6373 }
 0x3a6   : > { %v3480_v2 = vadd.f32 %v3404_v25, %v3234_v7  ;;  %v955_v23 = vsel %vm892_vm1, %v953_v28, %v13734_v24  ;;  %v11978_v3 = vmul.f32 %v14618_v20, %v14619_v46  ;;  %v1200_v8 = vsel %vm892_vm1, %v1198_v34, %v13736_v43  ;;  %v11986_v24 = vld [vmem:[#allocation2 + $0x188] sm:$0xff] }
 0x3a7   : > { %v742_v36 = vadd.f32 %v710_v18, %v672_v38  ;;  %v1688_v37 = vrot.slane %v1568_v0, 1  ;;  %v1813_v25 = vmul.f32 %v11966_v58, %v11801_v5  ;;  %v5941_v7 = vadd.f32 1.0, %v6374_v31  ;;  %14620 = vst [vmem:[#allocation15_spill] sm:$0xff] %v11986_v24  ;;  %v11992_v18 = vld [vmem:[#allocation6 + $0x2] ss:$0 sm:$0xff] }
 0x3a8   : > { %v3725_v16 = vadd.f32 %v3649_v22, %v3480_v2  ;;  %v13739_v28 = vrot.slane %v11978_v3, 1  ;;  %v11990_v27 = vmul.f32 %v11986_v24, %v11801_v5  ;;  %14621 = vst [vmem:[#allocation56_spill] sm:$0xff] %v11992_v18  ;;  %v2058_v34 = vmul.f32 %v11992_v18, %v14596_v13 }
 0x3a9   : > { %v1029_v20 = vadd.f32 %v955_v23, %v742_v36  ;;  %v1933_v38 = vrot.slane %v1813_v25, 1  ;;  %v11998_v0 = vmul.f32 %v11992_v18, %v14609_v26  ;;  %v5973_v2 = vmul.f32 %v5941_v7, %v11847_v54  ;;  %v12023_v7 = vld [vmem:[#allocation2 + $0x150] sm:$0xff] }
 0x3aa   : > { %v3970_v22 = vadd.f32 %v11886_v56, %v3725_v16  ;;  %v14622_v31 = vrot.slane %v11962_v59, 1  ;;  %v13738_v23 = vrot.slane %v11990_v27, 1  ;;  %v1690_v25 = vsel %vm892_vm1, %v1688_v37, %v13739_v28  ;;  %14623 = vst [vmem:[#allocation16_spill] sm:$0xff] %v12023_v7 }
 0x3ab   : > { %v1274_v36 = vadd.f32 %v1200_v8, %v1029_v20  ;;  %v2179_v13 = vrot.slane %v2058_v34, 2  ;;  %v2304_v26 = vmul.f32 %v11825_v35, %v11609_v4  ;;  %v6012_v12 = vmul.f32 %v11616_v57, %v5973_v2  ;;  %v12021_v8 = vld [vmem:[#allocation6 + $0x12] ss:$0 sm:$0xff] }
 0x3ac   : > { %v1445_v43 = vsel %vm892_vm1, %v1443_v29, %v14622_v31  ;;  %v4215_v54 = vadd.f32 %v11891_v33, %v3970_v22  ;;  %v13744_v56 = vrot.slane %v11998_v0, 2  ;;  %v12016_v16 = vmul.f32 %v11825_v35, %v14612_v21 }
 0x3ad   : > { %v1519_v29 = vadd.f32 %v1445_v43, %v1274_v36  ;;  %v1935_v20 = vsel %vm892_vm1, %v1933_v38, %v13738_v23  ;;  %v2424_v37 = vrot.slane %v2304_v26, 2  ;;  %v2549_v34 = vmul.f32 %v12023_v7, %v12021_v8  ;;  %v12030_v43 = vld [vmem:[#allocation2 + $0x158] sm:$0xff] }
 0x3ae   : > { %v6051_v33 = vadd.f32 %v11635_v42, %v6012_v12  ;;  %v4460_v2 = vadd.f32 %v11903_v17, %v4215_v54  ;;  %14624 = vst [vmem:[#allocation27_spill] sm:$0xff] %v12030_v43  ;;  %v12034_v38 = vmul.f32 %v12030_v43, %v12021_v8  ;;  %v2794_v26 = vmul.f32 %v11831_v19, %v14603_v32  ;;  %v6598_v12 = vld [vmem:[#allocation2 + $0x13a] sm:$0xff] }
 0x3af   : > { %v1764_v31 = vadd.f32 %v1690_v25, %v1519_v29  ;;  %v2669_v36 = vrot.slane %v2549_v34, 2  ;;  %v12040_v23 = vmul.f32 %v11831_v19, %v14619_v46  ;;  %v2181_v28 = vsel %vm2118_vm2, %v2179_v13, %v13744_v56  ;;  %v6599_v13 = vld [vmem:[#allocation2 + $0x120] sm:$0xff] }
 0x3b0   : > { %v6083_v17 = vadd.f32 %v6598_v12, %v6051_v33  ;;  %v4706_v54 = vadd.f32 %v11914_v53, %v4460_v2  ;;  %v13745_v22 = vrot.slane %v12034_v38, 2  ;;  %v14626_v25 = vrot.slane %v12016_v16, 2  ;;  %v12063_v12 = vld [vmem:[#allocation2 + $0x128] sm:$0xff] }
 0x3b1   : > { %14625 = vst [vmem:[#allocation39_spill] sm:$0xff] %v12040_v23  ;;  %v2009_v42 = vadd.f32 %v1935_v20, %v1764_v31  ;;  %v2914_v34 = vrot.slane %v2794_v26, 2  ;;  %v3039_v57 = vmul.f32 %v11966_v58, %v11835_v60  ;;  %v13749_v53 = vrot.slane %v12040_v23, 2 }
 0x3b2   : > { %v2426_v29 = vsel %vm2118_vm2, %v2424_v37, %v14626_v25  ;;  %6115 = vst [vmem:[%s7803_s9 + $0xb0] sm:$0xff] %v6083_v17  ;;  %v4951_v33 = vadd.f32 %v11923_v1, %v4706_v54  ;;  %v12057_v2 = vmul.f32 %v11986_v24, %v11835_v60  ;;  %v3284_v20 = vmul.f32 %v6599_v13, %v11839_v39 }
 0x3b3   : > { %v2255_v31 = vadd.f32 %v2181_v28, %v2009_v42  ;;  %v2671_v37 = vsel %vm2118_vm2, %v2669_v36, %v13745_v22  ;;  %v3159_v26 = vrot.slane %v3039_v57, 2  ;;  %v12067_v1 = vmul.f32 %v12063_v12, %v11839_v39 }
 0x3b4   : > { %v5196_v17 = vadd.f32 %v11928_v30, %v4951_v33  ;;  %v13748_v54 = vrot.slane %v12057_v2, 2  ;;  %v3405_v25 = vrot.slane %v3284_v20, 3  ;;  %v3530_v56 = vmul.f32 %v11609_v4, %v14528_v40 }
 0x3b5   : > { %14627 = vst [vmem:[#allocation33_spill] sm:$0xff] %v12067_v1  ;;  %v2500_v42 = vadd.f32 %v2426_v29, %v2255_v31  ;;  %v13747_v28 = vrot.slane %v12067_v1, 3  ;;  %v12076_v57 = vmul.f32 %v14612_v21, %v14528_v40  ;;  %v3775_v36 = vmul.f32 %v12023_v7, %v14564_v41 }
 0x3b6   : > { %v5441_v22 = vadd.f32 %v11935_v48, %v5196_v17  ;;  %v2916_v30 = vsel %vm2118_vm2, %v2914_v34, %v13749_v53  ;;  %v3650_v33 = vrot.slane %v3530_v56, 3  ;;  %v12086_v20 = vmul.f32 %v12030_v43, %v14564_v41 }
 0x3b7   : > { %14628 = vst [vmem:[#allocation41_spill] sm:$0xff] %v12076_v57  ;;  %v2745_v29 = vadd.f32 %v2671_v37, %v2500_v42  ;;  %v3161_v40 = vsel %vm2118_vm2, %v3159_v26, %v13748_v54  ;;  %v3407_v31 = vsel %vm3344_vm3, %v3405_v25, %v13747_v28  ;;  %v13752_v48 = vrot.slane %v12076_v57, 3 }
 0x3b8   : > { %v5686_v17 = vadd.f32 %v11940_v15, %v5441_v22  ;;  %v3895_v23 = vrot.slane %v3775_v36, 3  ;;  %v4020_v56 = vmul.f32 %v14603_v32, %v14565_v14  ;;  %v12100_v41 = vmul.f32 %v14619_v46, %v14565_v14 }
 0x3b9   : > { %v2990_v34 = vadd.f32 %v2916_v30, %v2745_v29  ;;  %v4265_v26 = vmul.f32 %v11966_v58, %v11868_v45  ;;  %v12107_v25 = vmul.f32 %v11986_v24, %v11868_v45  ;;  %v3652_v22 = vsel %vm3344_vm3, %v3650_v33, %v13752_v48 }
 0x3ba   : > { %v12109_v42 = vmul.f32 0.5, %v5686_v17  ;;  %v5750_v15 = vmul.f32 0.044715, %v5686_v17  ;;  %v4140_v36 = vrot.slane %v4020_v56, 3  ;;  %v13753_v30 = vrot.slane %v12100_v41, 3 }
 0x3bb   : > { %v3235_v14 = vadd.f32 %v3161_v40, %v2990_v34  ;;  %v4385_v29 = vrot.slane %v4265_v26, 3  ;;  %v4510_v53 = vmul.f32 %v6599_v13, %v11873_v6  ;;  %v12119_v37 = vmul.f32 %v12063_v12, %v11873_v6 }
 0x3bc   : > { %v5782_v54 = vmul.f32 %v5750_v15, %v5686_v17  ;;  %v4756_v1 = vmul.f32 %v11609_v4, %v11339_v51  ;;  %v14629_v33 = vrot.slane %v12086_v20, 3  ;;  %v4142_v56 = vsel %vm3344_vm3, %v4140_v36, %v13753_v30 }
 0x3bd   : > { %v3481_v57 = vadd.f32 %v3407_v31, %v3235_v14  ;;  %v12131_v34 = vmul.f32 %v14612_v21, %v11339_v51  ;;  %v4631_v26 = vrot.slane %v4510_v53, 4  ;;  %v13757_v15 = vrot.slane %v12119_v37, 4 }
 0x3be   : > { %v3897_v40 = vsel %vm3344_vm3, %v3895_v23, %v14629_v33  ;;  %v5814_v13 = vmul.f32 %v5782_v54, %v5686_v17  ;;  %v4876_v48 = vrot.slane %v4756_v1, 4  ;;  %v5001_v14 = vmul.f32 %v12023_v7, %v14542_v63 }
 0x3bf   : > { %v3726_v28 = vadd.f32 %v3652_v22, %v3481_v57  ;;  %v13756_v31 = vrot.slane %v12131_v34, 4  ;;  %v12139_v23 = vmul.f32 %v12030_v43, %v14542_v63  ;;  %v14630_v33 = vrot.slane %v12107_v25, 3 }
 0x3c0   : > { %v5846_v36 = vadd.f32 %v5814_v13, %v5686_v17  ;;  %v5246_v53 = vmul.f32 %v14603_v32, %v14543_v49  ;;  %v12148_v1 = vmul.f32 %v14619_v46, %v14543_v49  ;;  %v4633_v57 = vsel %vm4570_vm4, %v4631_v26, %v13757_v15 }
 0x3c1   : > { %v4387_v51 = vsel %vm3344_vm3, %v4385_v29, %v14630_v33  ;;  %v3971_v54 = vadd.f32 %v3897_v40, %v3726_v28  ;;  %v5121_v22 = vrot.slane %v5001_v14, 4  ;;  %v13755_v63 = vrot.slane %v12139_v23, 4 }
 0x3c2   : > { %v5878_v17 = vmul.f32 0.7978846, %v5846_v36  ;;  %v5366_v13 = vrot.slane %v5246_v53, 4  ;;  %v13754_v30 = vrot.slane %v12148_v1, 4  ;;  %v5491_v29 = vmul.f32 %v11966_v58, %v11379_v11 }
 0x3c3   : > { %v4216_v33 = vadd.f32 %v4142_v56, %v3971_v54  ;;  %v4878_v49 = vsel %vm4570_vm4, %v4876_v48, %v13756_v31  ;;  %v12162_v28 = vmul.f32 %v11986_v24, %v11379_v11  ;;  %v431_v40 = vmul.f32 %v12063_v12, %v11907_v9  ;;  %v14634_v31 = vld [vmem:[#allocation21_spill] sm:$0xff] }
 0x3c4   : > { %6375 = vtanh.f32 %v5878_v17  ;;  %v5123_v26 = vsel %vm4570_vm4, %v5121_v22, %v13755_v63  ;;  %v5368_v56 = vsel %vm4570_vm4, %v5366_v13, %v13754_v30  ;;  %v501_v14 = vmul.f32 %v11772_v52, %v14612_v21  ;;  %v14633_v63 = vld [vmem:[#allocation63_spill] sm:$0xff] }
 0x3c5   : > { %v4461_v48 = vadd.f32 %v4387_v51, %v4216_v33  ;;  %v5611_v36 = vrot.slane %v5491_v29, 4  ;;  %v571_v53 = vmul.f32 %v12030_v43, %v14598_v62  ;;  %v641_v54 = vmul.f32 %v14604_v61, %v14619_v46  ;;  %v14631_v29 = vld [vmem:[#allocation62_spill] sm:$0xff]  ;;  %v14632_v33 = vld [vmem:[#allocation53_spill] sm:$0xff]  ;;  %v14635_v46 = vld [vmem:[#allocation64_spill] sm:$0xff] }
 0x3c6   : > { %v533_v12 = vadd.f32 %v501_v14, %v431_v40  ;;  %v834_v22 = vmul.f32 %v11942_v44, %v14388_v50  ;;  %v1080_v17 = vmul.f32 %v14611_v47, %v14449_v55  ;;  %v711_v51 = vmul.f32 %v11986_v24, %v14617_v10  ;;  %v14637_v47 = vld [vmem:[#allocation55_spill] sm:$0xff] }
 0x3c7   : > { %v4707_v13 = vadd.f32 %v4633_v57, %v4461_v48  ;;  %v1325_v30 = vmul.f32 %v14632_v33, %v14631_v29  ;;  %v1570_v15 = vmul.f32 %v14634_v31, %v14633_v63  ;;  %v1815_v43 = vmul.f32 %v11801_v5, %v14635_v46 }
 0x3c8   : > { %v603_v40 = vadd.f32 %v571_v53, %v533_v12  ;;  %v956_v14 = vrot.slane %v834_v22, 1  ;;  %v1201_v11 = vrot.slane %v1080_v17, 1  ;;  %v2060_v57 = vmul.f32 %v11992_v18, %v14388_v50  ;;  %v14639_v17 = vld [vmem:[#allocation14_spill] sm:$0xff] }
 0x3c9   : > { %v4952_v21 = vadd.f32 %v4878_v49, %v4707_v13  ;;  %v1446_v44 = vrot.slane %v1325_v30, 1  ;;  %v1691_v58 = vrot.slane %v1570_v15, 1  ;;  %v14636_v48 = vrot.slane %v12162_v28, 4 }
 0x3ca   : > { %v673_v33 = vadd.f32 %v641_v54, %v603_v40  ;;  %v14638_v10 = vrot.slane %v14637_v47, 1  ;;  %v1936_v12 = vrot.slane %v1815_v43, 1  ;;  %v14640_v31 = vrot.slane %v14639_v17, 1 }
 0x3cb   : > { %v5613_v24 = vsel %vm4570_vm4, %v5611_v36, %v14636_v48  ;;  %v5197_v22 = vadd.f32 %v5123_v26, %v4952_v21  ;;  %v14641_v30 = vrot.slane %v11962_v59, 1  ;;  %v14642_v13 = vrot.slane %v11978_v3, 1 }
 0x3cc   : > { %v957_v53 = vsel %vm892_vm1, %v14638_v10, %v956_v14  ;;  %v1202_v49 = vsel %vm892_vm1, %v14640_v31, %v1201_v11  ;;  %v743_v36 = vadd.f32 %v711_v51, %v673_v33  ;;  %v2182_v54 = vrot.slane %v2060_v57, 2 }
 0x3cd   : > { %v1447_v15 = vsel %vm892_vm1, %v14641_v30, %v1446_v44  ;;  %v1692_v18 = vsel %vm892_vm1, %v14642_v13, %v1691_v58  ;;  %v2306_v47 = vmul.f32 %v11825_v35, %v14449_v55  ;;  %v2551_v21 = vmul.f32 %v12021_v8, %v14631_v29 }
 0x3ce   : > { %v5442_v10 = vadd.f32 %v5368_v56, %v5197_v22  ;;  %v14643_v43 = vrot.slane %v11990_v27, 1  ;;  %v2796_v44 = vmul.f32 %v11831_v19, %v14633_v63  ;;  %v3041_v59 = vmul.f32 %v11835_v60, %v14635_v46  ;;  %v6376_v58 = vpop.eup %6375 }
 0x3cf   : > { %v1030_v3 = vadd.f32 %v957_v53, %v743_v36  ;;  %v2427_v26 = vrot.slane %v2306_v47, 2  ;;  %v2672_v11 = vrot.slane %v2551_v21, 2  ;;  %v3286_v51 = vmul.f32 %v11839_v39, %v14388_v50 }
 0x3d0   : > { %v1937_v31 = vsel %vm892_vm1, %v14643_v43, %v1936_v12  ;;  %v5942_v33 = vadd.f32 1.0, %v6376_v58  ;;  %v5687_v40 = vadd.f32 %v5613_v24, %v5442_v10  ;;  %v2917_v56 = vrot.slane %v2796_v44, 2  ;;  %v12241_v10 = vld [vmem:[#allocation6 + $0xb] ss:$0 sm:$0xff]  ;;  %v12250_v58 = vld [vmem:[#allocation6 + $0x1b] ss:$0 sm:$0xff] }
 0x3d1   : > { %v3162_v14 = vrot.slane %v3041_v59, 2  ;;  %v1275_v27 = vadd.f32 %v1202_v49, %v1030_v3  ;;  %v14644_v57 = vrot.slane %v11998_v0, 2  ;;  %v14645_v12 = vrot.slane %v12016_v16, 2  ;;  %v14647_v49 = vld [vmem:[#allocation39_spill] sm:$0xff]  ;;  %14650 = vst [vmem:[#allocation12_spill] sm:$0xff] %v12241_v10  ;;  %14652 = vst [vmem:[#allocation43_spill] sm:$0xff] %v12250_v58 }
 0x3d2   : > { %v14646_v53 = vrot.slane %v12034_v38, 2  ;;  %v5974_v30 = vmul.f32 %v5942_v33, %v12109_v42  ;;  %v12231_v13 = vmul.f32 0.5, %v5687_v40  ;;  %v5751_v24 = vmul.f32 0.044715, %v5687_v40  ;;  %v14651_v42 = vld [vmem:[#allocation48_spill] sm:$0xff] }
 0x3d3   : > { %v2183_v48 = vsel %vm2118_vm2, %v14644_v57, %v2182_v54  ;;  %v2428_v22 = vsel %vm2118_vm2, %v14645_v12, %v2427_v26  ;;  %v3408_v36 = vrot.slane %v3286_v51, 3  ;;  %v1520_v47 = vadd.f32 %v1447_v15, %v1275_v27  ;;  %v12246_v59 = vld [vmem:[#allocation6 + $0x13] ss:$0 sm:$0xff]  ;;  %v14653_v33 = vld [vmem:[#allocation60_spill] sm:$0xff] }
 0x3d4   : > { %v2673_v17 = vsel %vm2118_vm2, %v14646_v53, %v2672_v11  ;;  %v14648_v21 = vrot.slane %v14647_v49, 2  ;;  %v14649_v54 = vrot.slane %v12057_v2, 2  ;;  %v3532_v38 = vmul.f32 %v12241_v10, %v14449_v55  ;;  %v14654_v53 = vld [vmem:[#allocation33_spill] sm:$0xff] }
 0x3d5   : > { %v6013_v43 = vmul.f32 %v14651_v42, %v5974_v30  ;;  %v5783_v44 = vmul.f32 %v5751_v24, %v5687_v40  ;;  %v3777_v15 = vmul.f32 %v12246_v59, %v14631_v29  ;;  %v4022_v2 = vmul.f32 %v12250_v58, %v14633_v63  ;;  %v14656_v49 = vld [vmem:[#allocation41_spill] sm:$0xff] }
 0x3d6   : > { %v2918_v0 = vsel %vm2118_vm2, %v14648_v21, %v2917_v56  ;;  %v12239_v16 = vsel %vm2118_vm2, %v14649_v54, %v3162_v14  ;;  %v1765_v3 = vadd.f32 %v1692_v18, %v1520_v47  ;;  %v3653_v26 = vrot.slane %v3532_v38, 3  ;;  %v6604_v54 = vld [vmem:[#allocation2 + $0x142] sm:$0xff] }
 0x3d7   : > { %v4267_v11 = vmul.f32 %v11868_v45, %v14635_v46  ;;  %v4512_v51 = vmul.f32 %v11873_v6, %v14388_v50  ;;  %v6052_v56 = vadd.f32 %v14653_v33, %v6013_v43  ;;  %v5815_v14 = vmul.f32 %v5783_v44, %v5687_v40 }
 0x3d8   : > { %v3898_v27 = vrot.slane %v3777_v15, 3  ;;  %v4143_v57 = vrot.slane %v4022_v2, 3  ;;  %v2010_v12 = vadd.f32 %v1937_v31, %v1765_v3  ;;  %v14655_v30 = vrot.slane %v14654_v53, 3 }
 0x3d9   : > { %v14657_v18 = vrot.slane %v14656_v49, 3  ;;  %v4388_v21 = vrot.slane %v4267_v11, 3  ;;  %v6084_v38 = vadd.f32 %v6604_v54, %v6052_v56  ;;  %v5847_v45 = vadd.f32 %v5815_v14, %v5687_v40  ;;  %v12285_v11 = vld [vmem:[#allocation6 + $0x14] ss:$0 sm:$0xff] }
 0x3da   : > { %v3409_v24 = vsel %vm3344_vm3, %v14655_v30, %v3408_v36  ;;  %v14658_v50 = vrot.slane %v12086_v20, 3  ;;  %v4634_v44 = vrot.slane %v4512_v51, 4  ;;  %v2256_v15 = vadd.f32 %v2183_v48, %v2010_v12  ;;  %v12289_v48 = vld [vmem:[#allocation6 + $0x1c] ss:$0 sm:$0xff]  ;;  %v12293_v51 = vld [vmem:[#allocation6 + $0x24] ss:$0 sm:$0xff] }
 0x3db   : > { %v3654_v47 = vsel %vm3344_vm3, %v14657_v18, %v3653_v26  ;;  %v14659_v31 = vrot.slane %v12100_v41, 3  ;;  %v14660_v36 = vrot.slane %v12107_v25, 3  ;;  %v12280_v26 = vld [vmem:[#allocation6 + $0xc] ss:$0 sm:$0xff]  ;;  %6116 = vst [vmem:[%s7803_s9 + $0xb8] sm:$0xff] %v6084_v38  ;;  %v5003_v41 = vmul.f32 %v12285_v11, %v14631_v29 }
 0x3dc   : > { %v12268_v43 = vsel %vm3344_vm3, %v14658_v50, %v3898_v27  ;;  %v4758_v20 = vmul.f32 %v12280_v26, %v14449_v55  ;;  %v5879_v40 = vmul.f32 0.7978846, %v5847_v45  ;;  %v5248_v25 = vmul.f32 %v12289_v48, %v14633_v63 }
 0x3dd   : > { %v12273_v2 = vsel %vm3344_vm3, %v14659_v31, %v4143_v57  ;;  %v12278_v3 = vsel %vm3344_vm3, %v14660_v36, %v4388_v21  ;;  %v5493_v56 = vmul.f32 %v12293_v51, %v14635_v46  ;;  %v2501_v14 = vadd.f32 %v2428_v22, %v2256_v15 }
 0x3de   : > { %v4879_v27 = vrot.slane %v4758_v20, 4  ;;  %v432_v45 = vmul.f32 %v11907_v9, %v11609_v4  ;;  %v502_v57 = vmul.f32 %v12023_v7, %v11772_v52  ;;  %6377 = vtanh.f32 %v5879_v40 }
 0x3df   : > { %v14661_v12 = vrot.slane %v12119_v37, 4  ;;  %v5124_v30 = vrot.slane %v5003_v41, 4  ;;  %v5369_v49 = vrot.slane %v5248_v25, 4  ;;  %v2746_v18 = vadd.f32 %v2673_v17, %v2501_v14  ;;  %v14665_v17 = vld [vmem:[#allocation59_spill] sm:$0xff]  ;;  %v12325_v41 = vld [vmem:[#allocation2 + $0x198] sm:$0xff]  ;;  %v14669_v14 = vld [vmem:[#allocation13_spill] sm:$0xff] }
 0x3e0   : > { %v5614_v21 = vrot.slane %v5493_v56, 4  ;;  %v534_v54 = vadd.f32 %v502_v57, %v432_v45  ;;  %v572_v22 = vmul.f32 %v14598_v62, %v14603_v32  ;;  %v14662_v38 = vrot.slane %v12131_v34, 4  ;;  %14666 = vst [vmem:[#allocation42_spill] sm:$0xff] %v12325_v41  ;;  %v14667_v34 = vld [vmem:[#allocation19_spill] sm:$0xff] }
 0x3e1   : > { %v12304_v53 = vsel %vm4570_vm4, %v14661_v12, %v4634_v44  ;;  %v14663_v15 = vrot.slane %v12139_v23, 4  ;;  %v14664_v44 = vrot.slane %v12148_v1, 4  ;;  %v642_v36 = vmul.f32 %v14665_v17, %v14604_v61  ;;  %v14668_v23 = vld [vmem:[#allocation44_spill] sm:$0xff]  ;;  %v14670_v1 = vld [vmem:[#allocation45_spill] sm:$0xff]  ;;  %v14671_v57 = vld [vmem:[#allocation27_spill] sm:$0xff] }
 0x3e2   : > { %v12311_v50 = vsel %vm4570_vm4, %v14662_v38, %v4879_v27  ;;  %v2991_v20 = vadd.f32 %v2918_v0, %v2746_v18  ;;  %v604_v40 = vadd.f32 %v572_v22, %v534_v54  ;;  %v712_v25 = vmul.f32 %v12325_v41, %v14667_v34  ;;  %v14672_v0 = vld [vmem:[#allocation53_spill] sm:$0xff]  ;;  %v14673_v22 = vld [vmem:[#allocation50_spill] sm:$0xff] }
 0x3e3   : > { %v12316_v37 = vsel %vm4570_vm4, %v14663_v15, %v5124_v30  ;;  %v12321_v31 = vsel %vm4570_vm4, %v14664_v44, %v5369_v49  ;;  %v835_v56 = vmul.f32 %v14668_v23, %v11609_v4  ;;  %v12333_v27 = vmul.f32 %v14668_v23, %v14669_v14 }
 0x3e4   : > { %v1081_v45 = vmul.f32 %v12023_v7, %v14670_v1  ;;  %v12339_v12 = vmul.f32 %v14671_v57, %v14670_v1  ;;  %v1326_v30 = vmul.f32 %v14672_v0, %v14603_v32  ;;  %v3236_v49 = vadd.f32 %v12239_v16, %v2991_v20  ;;  %v14675_v16 = vld [vmem:[#allocation21_spill] sm:$0xff] }
 0x3e5   : > { %v674_v18 = vadd.f32 %v642_v36, %v604_v40  ;;  %v958_v54 = vrot.slane %v835_v56, 1  ;;  %v12346_v38 = vmul.f32 %v14672_v0, %v14673_v22  ;;  %v14674_v15 = vrot.slane %v12162_v28, 4 }
 0x3e6   : > { %v13779_v46 = vrot.slane %v12333_v27, 1  ;;  %v1203_v63 = vrot.slane %v1081_v45, 1  ;;  %v13780_v1 = vrot.slane %v12339_v12, 1  ;;  %v3482_v29 = vadd.f32 %v3409_v24, %v3236_v49 }
 0x3e7   : > { %v12351_v44 = vsel %vm4570_vm4, %v14674_v15, %v5614_v21  ;;  %v744_v32 = vadd.f32 %v712_v25, %v674_v18  ;;  %v1448_v23 = vrot.slane %v1326_v30, 1  ;;  %v1571_v36 = vmul.f32 %v14665_v17, %v14675_v16  ;;  %v14676_v21 = vld [vmem:[#allocation15_spill] sm:$0xff] }
 0x3e8   : > { %v960_v20 = vsel %vm892_vm1, %v958_v54, %v13779_v46  ;;  %v12363_v40 = vmul.f32 %v14676_v21, %v14675_v16  ;;  %v1816_v56 = vmul.f32 %v12325_v41, %v11801_v5  ;;  %v3727_v45 = vadd.f32 %v3654_v47, %v3482_v29  ;;  %v6378_v49 = vpop.eup %6377  ;;  %v12371_v54 = vld [vmem:[#allocation2 + $0x1a0] sm:$0xff]  ;;  %v14678_v46 = vld [vmem:[#allocation56_spill] sm:$0xff] }
 0x3e9   : > { %v1031_v24 = vadd.f32 %v960_v20, %v744_v32  ;;  %v1205_v25 = vsel %vm892_vm1, %v1203_v63, %v13780_v1  ;;  %v1693_v30 = vrot.slane %v1571_v36, 1  ;;  %14677 = vst [vmem:[#allocation31_spill] sm:$0xff] %v12371_v54  ;;  %v12375_v22 = vmul.f32 %v12371_v54, %v11801_v5 }
 0x3ea   : > { %v13781_v18 = vrot.slane %v12363_v40, 1  ;;  %v1938_v15 = vrot.slane %v1816_v56, 1  ;;  %v2061_v28 = vmul.f32 %v14678_v46, %v11609_v4  ;;  %v5943_v29 = vadd.f32 1.0, %v6378_v49 }
 0x3eb   : > { %v3972_v47 = vadd.f32 %v12268_v43, %v3727_v45  ;;  %v1276_v32 = vadd.f32 %v1205_v25, %v1031_v24  ;;  %v12382_v63 = vmul.f32 %v14678_v46, %v14669_v14  ;;  %v14679_v36 = vrot.slane %v12346_v38, 1 }
 0x3ec   : > { %v1695_v1 = vsel %vm892_vm1, %v1693_v30, %v13781_v18  ;;  %v13785_v56 = vrot.slane %v12375_v22, 1  ;;  %v2307_v4 = vmul.f32 %v12023_v7, %v11825_v35  ;;  %v5975_v43 = vmul.f32 %v5943_v29, %v12231_v13 }
 0x3ed   : > { %v1450_v20 = vsel %vm892_vm1, %v1448_v23, %v14679_v36  ;;  %v4217_v45 = vadd.f32 %v12273_v2, %v3972_v47  ;;  %v2184_v14 = vrot.slane %v2061_v28, 2  ;;  %v13783_v25 = vrot.slane %v12382_v63, 2  ;;  %v12400_v36 = vld [vmem:[#allocation2 + $0x168] sm:$0xff]  ;;  %v12410_v47 = vld [vmem:[#allocation2 + $0x170] sm:$0xff] }
 0x3ee   : > { %v1521_v24 = vadd.f32 %v1450_v20, %v1276_v32  ;;  %v12398_v23 = vmul.f32 %v14671_v57, %v11825_v35  ;;  %v2429_v49 = vrot.slane %v2307_v4, 2  ;;  %v2552_v30 = vmul.f32 %v12400_v36, %v12021_v8 }
 0x3ef   : > { %v6014_v18 = vmul.f32 %v14651_v42, %v5975_v43  ;;  %v4462_v13 = vadd.f32 %v12278_v3, %v4217_v45  ;;  %v1940_v2 = vsel %vm892_vm1, %v1938_v15, %v13785_v56  ;;  %v12414_v32 = vmul.f32 %v12410_v47, %v12021_v8 }
 0x3f0   : > { %v1766_v29 = vadd.f32 %v1695_v1, %v1521_v24  ;;  %v13782_v28 = vrot.slane %v12398_v23, 2  ;;  %v2674_v20 = vrot.slane %v2552_v30, 2  ;;  %v2797_v4 = vmul.f32 %v14665_v17, %v11831_v19 }
 0x3f1   : > { %v6053_v42 = vadd.f32 %v14653_v33, %v6014_v18  ;;  %v4708_v3 = vadd.f32 %v12304_v53, %v4462_v13  ;;  %v12422_v15 = vmul.f32 %v14676_v21, %v11831_v19  ;;  %v2186_v43 = vsel %vm2118_vm2, %v2184_v14, %v13783_v25  ;;  %v6613_v53 = vld [vmem:[#allocation2 + $0x152] sm:$0xff] }
 0x3f2   : > { %v2011_v1 = vadd.f32 %v1940_v2, %v1766_v29  ;;  %v2431_v45 = vsel %vm2118_vm2, %v2429_v49, %v13782_v28  ;;  %v13784_v24 = vrot.slane %v12414_v32, 2  ;;  %v3042_v33 = vmul.f32 %v12325_v41, %v11835_v60  ;;  %v6614_v28 = vld [vmem:[#allocation2 + $0x138] sm:$0xff] }
 0x3f3   : > { %v6085_v18 = vadd.f32 %v6613_v53, %v6053_v42  ;;  %v4953_v30 = vadd.f32 %v12311_v50, %v4708_v3  ;;  %v2919_v29 = vrot.slane %v2797_v4, 2  ;;  %v13788_v14 = vrot.slane %v12422_v15, 2  ;;  %v12445_v3 = vld [vmem:[#allocation2 + $0x140] sm:$0xff] }
 0x3f4   : > { %v2257_v13 = vadd.f32 %v2186_v43, %v2011_v1  ;;  %v2676_v2 = vsel %vm2118_vm2, %v2674_v20, %v13784_v24  ;;  %v12440_v49 = vmul.f32 %v12371_v54, %v11835_v60  ;;  %v3287_v25 = vmul.f32 %v6614_v28, %v11839_v39 }
 0x3f5   : > { %6117 = vst [vmem:[%s7803_s9 + $0xc0] sm:$0xff] %v6085_v18  ;;  %v5198_v42 = vadd.f32 %v12316_v37, %v4953_v30  ;;  %v3164_v50 = vrot.slane %v3042_v33, 2  ;;  %v12449_v4 = vmul.f32 %v12445_v3, %v11839_v39  ;;  %v3533_v43 = vmul.f32 %v12241_v10, %v12023_v7 }
 0x3f6   : > { %v2502_v53 = vadd.f32 %v2431_v45, %v2257_v13  ;;  %v3410_v1 = vrot.slane %v3287_v25, 3  ;;  %v12456_v24 = vmul.f32 %v12241_v10, %v14671_v57  ;;  %v3778_v18 = vmul.f32 %v12400_v36, %v12246_v59 }
 0x3f7   : > { %14680 = vst [vmem:[#allocation40_spill] sm:$0xff] %v12449_v4  ;;  %v5443_v37 = vadd.f32 %v12321_v31, %v5198_v42  ;;  %v13789_v33 = vrot.slane %v12449_v4, 3  ;;  %v2921_v30 = vsel %vm2118_vm2, %v2919_v29, %v13788_v14  ;;  %v3655_v25 = vrot.slane %v3533_v43, 3 }
 0x3f8   : > { %14681 = vst [vmem:[#allocation26_spill] sm:$0xff] %v12456_v24  ;;  %v2747_v45 = vadd.f32 %v2676_v2, %v2502_v53  ;;  %v13791_v13 = vrot.slane %v12456_v24, 3  ;;  %v12468_v56 = vmul.f32 %v12410_v47, %v12246_v59  ;;  %v14683_v2 = vrot.slane %v12440_v49, 2 }
 0x3f9   : > { %v5688_v20 = vadd.f32 %v12351_v44, %v5443_v37  ;;  %v3900_v53 = vrot.slane %v3778_v18, 3  ;;  %v3412_v10 = vsel %vm3344_vm3, %v3410_v1, %v13789_v33  ;;  %v4023_v43 = vmul.f32 %v12250_v58, %v14665_v17 }
 0x3fa   : > { %14682 = vst [vmem:[#allocation28_spill] sm:$0xff] %v12468_v56  ;;  %v2992_v31 = vadd.f32 %v2921_v30, %v2747_v45  ;;  %v3166_v42 = vsel %vm2118_vm2, %v3164_v50, %v14683_v2  ;;  %v12482_v14 = vmul.f32 %v12250_v58, %v14676_v21  ;;  %v3657_v50 = vsel %vm3344_vm3, %v3655_v25, %v13791_v13  ;;  %v14684_v45 = vld [vmem:[#allocation23_spill] sm:$0xff] }
 0x3fb   : > { %v5752_v44 = vmul.f32 0.044715, %v5688_v20  ;;  %v4268_v18 = vmul.f32 %v12325_v41, %v14684_v45  ;;  %v12489_v30 = vmul.f32 0.5, %v5688_v20  ;;  %v4145_v1 = vrot.slane %v4023_v43, 3 }
 0x3fc   : > { %v3237_v37 = vadd.f32 %v3166_v42, %v2992_v31  ;;  %v12494_v33 = vmul.f32 %v12371_v54, %v14684_v45  ;;  %v14685_v31 = vrot.slane %v12468_v56, 3  ;;  %v4513_v25 = vmul.f32 %v6614_v28, %v11873_v6 }
 0x3fd   : > { %v5784_v29 = vmul.f32 %v5752_v44, %v5688_v20  ;;  %v4390_v13 = vrot.slane %v4268_v18, 3  ;;  %v12503_v43 = vmul.f32 %v12445_v3, %v11873_v6  ;;  %v4759_v2 = vmul.f32 %v12280_v26, %v12023_v7 }
 0x3fe   : > { %v3483_v4 = vadd.f32 %v3412_v10, %v3237_v37  ;;  %v3902_v42 = vsel %vm3344_vm3, %v3900_v53, %v14685_v31  ;;  %v4636_v44 = vrot.slane %v4513_v25, 4  ;;  %v12509_v10 = vmul.f32 %v12280_v26, %v14671_v57 }
 0x3ff   : > { %v5816_v45 = vmul.f32 %v5784_v29, %v5688_v20  ;;  %v14686_v53 = vrot.slane %v12482_v14, 3  ;;  %v13799_v37 = vrot.slane %v12503_v43, 4  ;;  %v4881_v18 = vrot.slane %v4759_v2, 4 }
 0x400   : > { %v3728_v58 = vadd.f32 %v3657_v50, %v3483_v4  ;;  %v5004_v31 = vmul.f32 %v12400_v36, %v12285_v11  ;;  %v12520_v4 = vmul.f32 %v12410_v47, %v12285_v11  ;;  %v14687_v50 = vrot.slane %v12494_v33, 3 }
 0x401   : > { %v4147_v28 = vsel %vm3344_vm3, %v4145_v1, %v14686_v53  ;;  %v5848_v24 = vadd.f32 %v5816_v45, %v5688_v20  ;;  %v5249_v1 = vmul.f32 %v12289_v48, %v14665_v17  ;;  %v12529_v2 = vmul.f32 %v12289_v48, %v14676_v21 }
 0x402   : > { %v3973_v56 = vadd.f32 %v3902_v42, %v3728_v58  ;;  %v4392_v25 = vsel %vm3344_vm3, %v4390_v13, %v14687_v50  ;;  %v5126_v7 = vrot.slane %v5004_v31, 4  ;;  %v4638_v45 = vsel %vm4570_vm4, %v4636_v44, %v13799_v37 }
 0x403   : > { %14688 = vst [vmem:[#allocation51_spill] sm:$0xff] %v12529_v2  ;;  %v5880_v20 = vmul.f32 0.7978846, %v5848_v24  ;;  %v13801_v42 = vrot.slane %v12520_v4, 4  ;;  %v5371_v53 = vrot.slane %v5249_v1, 4  ;;  %v13800_v29 = vrot.slane %v12529_v2, 4 }
 0x404   : > { %v4218_v58 = vadd.f32 %v4147_v28, %v3973_v56  ;;  %v5494_v13 = vmul.f32 %v12325_v41, %v12293_v51  ;;  %v12540_v31 = vmul.f32 %v12371_v54, %v12293_v51  ;;  %v14689_v56 = vrot.slane %v12509_v10, 4 }
 0x405   : > { %6379 = vtanh.f32 %v5880_v20  ;;  %v433_v44 = vmul.f32 %v12445_v3, %v11907_v9  ;;  %v5128_v28 = vsel %vm4570_vm4, %v5126_v7, %v13801_v42  ;;  %v5373_v1 = vsel %vm4570_vm4, %v5371_v53, %v13800_v29  ;;  %v14692_v29 = vld [vmem:[#allocation45_spill] sm:$0xff] }
 0x406   : > { %v4463_v50 = vadd.f32 %v4392_v25, %v4218_v58  ;;  %v4883_v24 = vsel %vm4570_vm4, %v4881_v18, %v14689_v56  ;;  %v5616_v37 = vrot.slane %v5494_v13, 4  ;;  %v503_v20 = vmul.f32 %v14671_v57, %v11772_v52  ;;  %v14690_v56 = vld [vmem:[#allocation44_spill] sm:$0xff]  ;;  %v14691_v13 = vld [vmem:[#allocation62_spill] sm:$0xff] }
 0x407   : > { %v573_v18 = vmul.f32 %v12410_v47, %v14598_v62  ;;  %v643_v9 = vmul.f32 %v14676_v21, %v14604_v61  ;;  %v713_v7 = vmul.f32 %v12371_v54, %v14667_v34  ;;  %v837_v53 = vmul.f32 %v14690_v56, %v14449_v55  ;;  %v14694_v58 = vld [vmem:[#allocation64_spill] sm:$0xff]  ;;  %v14695_v57 = vld [vmem:[#allocation66_spill] sm:$0xff] }
 0x408   : > { %v4709_v25 = vadd.f32 %v4638_v45, %v4463_v50  ;;  %v535_v3 = vadd.f32 %v503_v20, %v433_v44  ;;  %v1083_v42 = vmul.f32 %v14692_v29, %v14691_v13  ;;  %v14693_v45 = vld [vmem:[#allocation63_spill] sm:$0xff]  ;;  %v1573_v62 = vmul.f32 %v14675_v16, %v14694_v58 }
 0x409   : > { %v1328_v50 = vmul.f32 %v14672_v0, %v14693_v45  ;;  %v1818_v61 = vmul.f32 %v11801_v5, %v14695_v57  ;;  %v961_v20 = vrot.slane %v837_v53, 1  ;;  %v2063_v34 = vmul.f32 %v14678_v46, %v14449_v55 }
 0x40a   : > { %v4954_v52 = vadd.f32 %v4883_v24, %v4709_v25  ;;  %v605_v44 = vadd.f32 %v573_v18, %v535_v3  ;;  %v1206_v41 = vrot.slane %v1083_v42, 1  ;;  %v1696_v17 = vrot.slane %v1573_v62, 1 }
 0x40b   : > { %v1451_v21 = vrot.slane %v1328_v50, 1  ;;  %v1941_v29 = vrot.slane %v1818_v61, 1  ;;  %v14696_v24 = vrot.slane %v12540_v31, 4  ;;  %v14697_v16 = vrot.slane %v12333_v27, 1 }
 0x40c   : > { %v5199_v54 = vadd.f32 %v5128_v28, %v4954_v52  ;;  %v675_v0 = vadd.f32 %v643_v9, %v605_v44  ;;  %v14698_v5 = vrot.slane %v12339_v12, 1  ;;  %v14699_v3 = vrot.slane %v12346_v38, 1 }
 0x40d   : > { %v5618_v25 = vsel %vm4570_vm4, %v5616_v37, %v14696_v24  ;;  %v962_v2 = vsel %vm892_vm1, %v14697_v16, %v961_v20  ;;  %v14700_v53 = vrot.slane %v12363_v40, 1  ;;  %v2187_v50 = vrot.slane %v2063_v34, 2 }
 0x40e   : > { %v1207_v42 = vsel %vm892_vm1, %v14698_v5, %v1206_v41  ;;  %v5444_v18 = vadd.f32 %v5373_v1, %v5199_v54  ;;  %v1452_v28 = vsel %vm892_vm1, %v14699_v3, %v1451_v21  ;;  %v745_v37 = vadd.f32 %v713_v7, %v675_v0 }
 0x40f   : > { %v1697_v52 = vsel %vm892_vm1, %v14700_v53, %v1696_v17  ;;  %v14701_v9 = vrot.slane %v12375_v22, 1  ;;  %v2309_v12 = vmul.f32 %v11825_v35, %v14691_v13  ;;  %v2554_v41 = vmul.f32 %v12021_v8, %v14693_v45  ;;  %v6380_v54 = vpop.eup %6379 }
 0x410   : > { %v5689_v38 = vadd.f32 %v5618_v25, %v5444_v18  ;;  %v2799_v21 = vmul.f32 %v11831_v19, %v14694_v58  ;;  %v3044_v17 = vmul.f32 %v11835_v60, %v14695_v57  ;;  %v3289_v0 = vmul.f32 %v11839_v39, %v14449_v55  ;;  %v14706_v18 = vld [vmem:[#allocation12_spill] sm:$0xff] }
 0x411   : > { %v1942_v27 = vsel %vm892_vm1, %v14701_v9, %v1941_v29  ;;  %v5944_v40 = vadd.f32 1.0, %v6380_v54  ;;  %v1032_v22 = vadd.f32 %v962_v2, %v745_v37  ;;  %v2432_v1 = vrot.slane %v2309_v12, 2  ;;  %v14708_v37 = vld [vmem:[#allocation43_spill] sm:$0xff] }
 0x412   : > { %v2677_v7 = vrot.slane %v2554_v41, 2  ;;  %v5753_v62 = vmul.f32 0.044715, %v5689_v38  ;;  %v14702_v35 = vrot.slane %v12382_v63, 2  ;;  %v2922_v44 = vrot.slane %v2799_v21, 2  ;;  %v14709_v12 = vld [vmem:[#allocation23_spill] sm:$0xff] }
 0x413   : > { %v3167_v20 = vrot.slane %v3044_v17, 2  ;;  %v5976_v34 = vmul.f32 %v5944_v40, %v12489_v30  ;;  %v12606_v19 = vmul.f32 0.5, %v5689_v38  ;;  %v1277_v29 = vadd.f32 %v1207_v42, %v1032_v22  ;;  %v12620_v30 = vld [vmem:[%s13184_s2] ss:$0 sm:$0xff] }
 0x414   : > { %v2188_v61 = vsel %vm2118_vm2, %v14702_v35, %v2187_v50  ;;  %v14703_v60 = vrot.slane %v12398_v23, 2  ;;  %v5785_v24 = vmul.f32 %v5753_v62, %v5689_v38  ;;  %v14704_v2 = vrot.slane %v12414_v32, 2 }
 0x415   : > { %v14705_v63 = vrot.slane %v12422_v15, 2  ;;  %v3413_v5 = vrot.slane %v3289_v0, 3  ;;  %v6015_v42 = vmul.f32 %v12620_v30, %v5976_v34  ;;  %v1522_v23 = vadd.f32 %v1452_v28, %v1277_v29  ;;  %v12637_v28 = vld [vmem:[%s13185_s3] ss:$0 sm:$0xff]  ;;  %v14713_v29 = vld [vmem:[#allocation26_spill] sm:$0xff] }
 0x416   : > { %v2433_v39 = vsel %vm2118_vm2, %v14703_v60, %v2432_v1  ;;  %v2678_v25 = vsel %vm2118_vm2, %v14704_v2, %v2677_v7  ;;  %v3535_v3 = vmul.f32 %v14706_v18, %v14691_v13  ;;  %v3780_v32 = vmul.f32 %v12246_v59, %v14693_v45  ;;  %14710 = vst [vmem:[#allocation32_spill] sm:$0xff] %v12637_v28  ;;  %v6618_v7 = vld [vmem:[#allocation2 + $0x15a] sm:$0xff]  ;;  %v14715_v2 = vld [vmem:[#allocation28_spill] sm:$0xff] }
 0x417   : > { %v2923_v16 = vsel %vm2118_vm2, %v14705_v63, %v2922_v44  ;;  %v5817_v53 = vmul.f32 %v5785_v24, %v5689_v38  ;;  %v14707_v15 = vrot.slane %v12440_v49, 2  ;;  %v4025_v9 = vmul.f32 %v14708_v37, %v14694_v58  ;;  %v14711_v44 = vld [vmem:[#allocation40_spill] sm:$0xff] }
 0x418   : > { %v4270_v41 = vmul.f32 %v14709_v12, %v14695_v57  ;;  %v6054_v54 = vadd.f32 %v12637_v28, %v6015_v42  ;;  %v1767_v21 = vadd.f32 %v1697_v52, %v1522_v23  ;;  %v3658_v17 = vrot.slane %v3535_v3, 3 }
 0x419   : > { %v3168_v50 = vsel %vm2118_vm2, %v14707_v15, %v3167_v20  ;;  %v3903_v0 = vrot.slane %v3780_v32, 3  ;;  %v5849_v49 = vadd.f32 %v5817_v53, %v5689_v38  ;;  %v4148_v40 = vrot.slane %v4025_v9, 3 }
 0x41a   : > { %v4393_v22 = vrot.slane %v4270_v41, 3  ;;  %v4515_v1 = vmul.f32 %v11873_v6, %v14449_v55  ;;  %v6086_v62 = vadd.f32 %v6618_v7, %v6054_v54  ;;  %v2012_v35 = vadd.f32 %v1942_v27, %v1767_v21 }
 0x41b   : > { %v14712_v20 = vrot.slane %v14711_v44, 3  ;;  %v14714_v60 = vrot.slane %v14713_v29, 3  ;;  %v5881_v24 = vmul.f32 0.7978846, %v5849_v49  ;;  %v14716_v63 = vrot.slane %v14715_v2, 3  ;;  %v14727_v2 = vld [vmem:[#allocation65_spill] sm:$0xff] }
 0x41c   : > { %v14717_v42 = vrot.slane %v12482_v14, 3  ;;  %v4639_v6 = vrot.slane %v4515_v1, 4  ;;  %6118 = vst [vmem:[%s7803_s9 + $0xc8] sm:$0xff] %v6086_v62  ;;  %v2258_v27 = vadd.f32 %v2188_v61, %v2012_v35  ;;  %v5006_v23 = vmul.f32 %v12285_v11, %v14693_v45  ;;  %v14719_v61 = vld [vmem:[#allocation16_spill] sm:$0xff]  ;;  %v14723_v62 = vld [vmem:[#allocation51_spill] sm:$0xff] }
 0x41d   : > { %v3414_v34 = vsel %vm3344_vm3, %v14712_v20, %v3413_v5  ;;  %v3659_v52 = vsel %vm3344_vm3, %v14714_v60, %v3658_v17  ;;  %v12651_v38 = vsel %vm3344_vm3, %v14716_v63, %v3903_v0  ;;  %v4761_v5 = vmul.f32 %v12280_v26, %v14691_v13  ;;  %v12681_v0 = vld [vmem:[#allocation6 + $0x9] ss:$0 sm:$0xff]  ;;  %v14725_v20 = vld [vmem:[#allocation61_spill] sm:$0xff] }
 0x41e   : > { %v12656_v55 = vsel %vm3344_vm3, %v14717_v42, %v4148_v40  ;;  %v5251_v3 = vmul.f32 %v12289_v48, %v14694_v58  ;;  %6381 = vtanh.f32 %v5881_v24  ;;  %v14718_v32 = vrot.slane %v12494_v33, 3  ;;  %v14728_v63 = vld [vmem:[#allocation53_spill] sm:$0xff]  ;;  %v14729_v42 = vld [vmem:[#allocation59_spill] sm:$0xff] }
 0x41f   : > { %v12672_v53 = vmul.f32 %v12293_v51, %v14695_v57  ;;  %v838_v15 = vmul.f32 %v14719_v61, %v14690_v56  ;;  %v2503_v9 = vadd.f32 %v2433_v39, %v2258_v27  ;;  %v4884_v12 = vrot.slane %v4761_v5, 4  ;;  %v14730_v27 = vld [vmem:[#allocation15_spill] sm:$0xff] }
 0x420   : > { %v12668_v14 = vsel %vm3344_vm3, %v14718_v32, %v4393_v22  ;;  %v5129_v41 = vrot.slane %v5006_v23, 4  ;;  %v5374_v54 = vrot.slane %v5251_v3, 4  ;;  %v14720_v21 = vrot.slane %v12503_v43, 4  ;;  %v12719_v3 = vld [vmem:[#allocation6 + $0x19] ss:$0 sm:$0xff] }
 0x421   : > { %v963_v33 = vrot.slane %v838_v15, 1  ;;  %v1084_v49 = vmul.f32 %v12681_v0, %v12400_v36  ;;  %v12687_v40 = vmul.f32 %v12681_v0, %v12410_v47  ;;  %v2748_v56 = vadd.f32 %v2678_v25, %v2503_v9  ;;  %v14731_v32 = vld [vmem:[#allocation42_spill] sm:$0xff]  ;;  %v14732_v9 = vld [vmem:[#allocation31_spill] sm:$0xff] }
 0x422   : > { %v12679_v17 = vsel %vm4570_vm4, %v14720_v21, %v4639_v6  ;;  %v14721_v39 = vrot.slane %v12509_v10, 4  ;;  %v14722_v43 = vrot.slane %v12520_v4, 4  ;;  %v5619_v7 = vrot.slane %v12672_v53, 4 }
 0x423   : > { %v14724_v35 = vrot.slane %v14723_v62, 4  ;;  %v14726_v29 = vrot.slane %v14725_v20, 1  ;;  %v1208_v10 = vrot.slane %v1084_v49, 1  ;;  %v13822_v60 = vrot.slane %v12687_v40, 1 }
 0x424   : > { %v12692_v22 = vsel %vm4570_vm4, %v14721_v39, %v4884_v12  ;;  %v12697_v1 = vsel %vm4570_vm4, %v14722_v43, %v5129_v41  ;;  %v2993_v24 = vadd.f32 %v2923_v16, %v2748_v56  ;;  %v1329_v6 = vmul.f32 %v14729_v42, %v14728_v63  ;;  %v12727_v12 = vld [vmem:[#allocation2] sm:$0xff] }
 0x425   : > { %v12703_v44 = vsel %vm4570_vm4, %v14724_v35, %v5374_v54  ;;  %v965_v25 = vsel %vm892_vm1, %v963_v33, %v14726_v29  ;;  %v12714_v5 = vmul.f32 %v14730_v27, %v14728_v63  ;;  %v1210_v23 = vsel %vm892_vm1, %v1208_v10, %v13822_v60  ;;  %14733 = vst [vmem:[#allocation49_spill] sm:$0xff] %v12727_v12  ;;  %v6622_v41 = vld [vmem:[#allocation6 + $0x21] ss:$0 sm:$0xff] }
 0x426   : > { %v1033_v4 = vadd.f32 %v965_v25, %v14727_v2  ;;  %v1574_v15 = vmul.f32 %v12719_v3, %v14731_v32  ;;  %v12725_v16 = vmul.f32 %v12719_v3, %v14732_v9  ;;  %v1819_v54 = vmul.f32 %v6622_v41, %v12727_v12  ;;  %v14734_v25 = vld [vmem:[#allocation27_spill] sm:$0xff] }
 0x427   : > { %v3238_v21 = vadd.f32 %v3168_v50, %v2993_v24  ;;  %v1453_v49 = vrot.slane %v1329_v6, 1  ;;  %v13821_v56 = vrot.slane %v12714_v5, 1  ;;  %v2064_v35 = vmul.f32 %v14719_v61, %v14678_v46  ;;  %v12741_v50 = vld [vmem:[#allocation6 + $0xa] ss:$0 sm:$0xff] }
 0x428   : > { %v1278_v33 = vadd.f32 %v1210_v23, %v1033_v4  ;;  %v1698_v39 = vrot.slane %v1574_v15, 1  ;;  %v13820_v43 = vrot.slane %v12725_v16, 1  ;;  %v1943_v62 = vrot.slane %v1819_v54, 1  ;;  %v6382_v2 = vpop.eup %6381 }
 0x429   : > { %v3484_v20 = vadd.f32 %v3414_v34, %v3238_v21  ;;  %v1455_v29 = vsel %vm892_vm1, %v1453_v49, %v13821_v56  ;;  %v12739_v10 = vmul.f32 %v14734_v25, %v14678_v46  ;;  %v2310_v24 = vmul.f32 %v12741_v50, %v12400_v36  ;;  %v14735_v34 = vld [vmem:[#allocation30_spill] sm:$0xff] }
 0x42a   : > { %v1523_v4 = vadd.f32 %v1455_v29, %v1278_v33  ;;  %v1700_v63 = vsel %vm892_vm1, %v1698_v39, %v13820_v43  ;;  %v1945_v6 = vsel %vm892_vm1, %v1943_v62, %v14735_v34  ;;  %v2189_v23 = vrot.slane %v2064_v35, 2 }
 0x42b   : > { %v5945_v15 = vadd.f32 1.0, %v6382_v2  ;;  %v3729_v41 = vadd.f32 %v3659_v52, %v3484_v20  ;;  %v13817_v46 = vrot.slane %v12739_v10, 2  ;;  %v12753_v54 = vmul.f32 %v12741_v50, %v12410_v47 }
 0x42c   : > { %v1768_v21 = vadd.f32 %v1700_v63, %v1523_v4  ;;  %v2434_v49 = vrot.slane %v2310_v24, 2  ;;  %v2555_v33 = vmul.f32 %v12021_v8, %v14729_v42  ;;  %v12759_v39 = vmul.f32 %v12021_v8, %v14730_v27  ;;  %v12768_v4 = vld [vmem:[#allocation6 + $0x1a] ss:$0 sm:$0xff] }
 0x42d   : > { %v5977_v62 = vmul.f32 %v5945_v15, %v12606_v19  ;;  %v3974_v35 = vadd.f32 %v12651_v38, %v3729_v41  ;;  %v2191_v52 = vsel %vm2118_vm2, %v2189_v23, %v13817_v46  ;;  %v13812_v20 = vrot.slane %v12753_v54, 2  ;;  %v6625_v15 = vld [vmem:[#allocation6 + $0x22] ss:$0 sm:$0xff] }
 0x42e   : > { %v2013_v29 = vadd.f32 %v1945_v6, %v1768_v21  ;;  %v2679_v2 = vrot.slane %v2555_v33, 2  ;;  %v13811_v24 = vrot.slane %v12759_v39, 2  ;;  %v2800_v8 = vmul.f32 %v12768_v4, %v14731_v32  ;;  %v12790_v33 = vld [vmem:[#allocation6 + $0x3] ss:$0 sm:$0xff] }
 0x42f   : > { %v6016_v42 = vmul.f32 %v12620_v30, %v5977_v62  ;;  %v4219_v19 = vadd.f32 %v12656_v55, %v3974_v35  ;;  %v2436_v38 = vsel %vm2118_vm2, %v2434_v49, %v13812_v20  ;;  %v12779_v27 = vmul.f32 %v12768_v4, %v14732_v9  ;;  %v12812_v20 = vld [vmem:[#allocation2 + $0x180] sm:$0xff] }
 0x430   : > { %v2259_v63 = vadd.f32 %v2191_v52, %v2013_v29  ;;  %v2681_v6 = vsel %vm2118_vm2, %v2679_v2, %v13811_v24  ;;  %v2924_v23 = vrot.slane %v2800_v8, 2  ;;  %v12785_v41 = vmul.f32 %v6625_v15, %v12727_v12  ;;  %v6627_v8 = vld [vmem:[#allocation2 + $0x16a] sm:$0xff] }
 0x431   : > { %v6055_v55 = vadd.f32 %v12637_v28, %v6016_v42  ;;  %v4464_v21 = vadd.f32 %v12668_v14, %v4219_v19  ;;  %v13813_v49 = vrot.slane %v12779_v27, 2  ;;  %v3290_v62 = vmul.f32 %v12790_v33, %v14719_v61 }
 0x432   : > { %v2504_v35 = vadd.f32 %v2436_v38, %v2259_v63  ;;  %v13815_v52 = vrot.slane %v12785_v41, 2  ;;  %v12797_v29 = vmul.f32 %v12790_v33, %v14734_v25  ;;  %v3536_v2 = vmul.f32 %v12400_v36, %v14706_v18 }
 0x433   : > { %v6087_v14 = vadd.f32 %v6627_v8, %v6055_v55  ;;  %v4710_v42 = vadd.f32 %v12679_v17, %v4464_v21  ;;  %v2926_v19 = vsel %vm2118_vm2, %v2924_v23, %v13813_v49  ;;  %v3415_v15 = vrot.slane %v3290_v62, 3  ;;  %v12816_v55 = vld [vmem:[#allocation2 + $0x188] sm:$0xff] }
 0x434   : > { %v2749_v61 = vadd.f32 %v2681_v6, %v2504_v35  ;;  %v13814_v38 = vrot.slane %v12797_v29, 3  ;;  %v12808_v63 = vmul.f32 %v12410_v47, %v14706_v18  ;;  %v3660_v24 = vrot.slane %v3536_v2, 3  ;;  %14736 = vst [vmem:[#allocation34_spill] sm:$0xff] %v12816_v55 }
 0x435   : > { %6119 = vst [vmem:[%s7803_s9 + $0xd0] sm:$0xff] %v6087_v14  ;;  %v4955_v25 = vadd.f32 %v12692_v22, %v4710_v42  ;;  %v3781_v17 = vmul.f32 %v12812_v20, %v12246_v59  ;;  %v12820_v6 = vmul.f32 %v12816_v55, %v12246_v59  ;;  %v14737_v23 = vrot.slane %v12540_v31, 4 }
 0x436   : > { %v2994_v62 = vadd.f32 %v2926_v19, %v2749_v61  ;;  %v13816_v22 = vrot.slane %v12808_v63, 3  ;;  %v4026_v35 = vmul.f32 %v14731_v32, %v14708_v37  ;;  %v12834_v42 = vmul.f32 %v14732_v9, %v14708_v37  ;;  %v12841_v19 = vld [vmem:[#allocation6 + $0x23] ss:$0 sm:$0xff] }
 0x437   : > { %v5620_v21 = vsel %vm4570_vm4, %v14737_v23, %v5619_v7  ;;  %v5200_v2 = vadd.f32 %v12697_v1, %v4955_v25  ;;  %v3905_v8 = vrot.slane %v3781_v17, 3  ;;  %v13818_v14 = vrot.slane %v12820_v6, 3  ;;  %v12850_v23 = vld [vmem:[#allocation6 + $0x4] ss:$0 sm:$0xff] }
 0x438   : > { %v3239_v31 = vadd.f32 %v13815_v52, %v2994_v62  ;;  %v3417_v53 = vsel %vm3344_vm3, %v3415_v15, %v13814_v38  ;;  %v4150_v7 = vrot.slane %v4026_v35, 3  ;;  %v4271_v1 = vmul.f32 %v12841_v19, %v12727_v12  ;;  %v6632_v62 = vld [vmem:[#allocation2 + $0x150] sm:$0xff]  ;;  %v6633_v38 = vld [vmem:[#allocation2 + $0x158] sm:$0xff] }
 0x439   : > { %v5445_v61 = vadd.f32 %v12703_v44, %v5200_v2  ;;  %v3662_v25 = vsel %vm3344_vm3, %v3660_v24, %v13816_v22  ;;  %v13819_v17 = vrot.slane %v12834_v42, 3  ;;  %v4516_v49 = vmul.f32 %v6632_v62, %v12850_v23 }
 0x43a   : > { %v3485_v15 = vadd.f32 %v3417_v53, %v3239_v31  ;;  %v12853_v35 = vrot.slane %v4271_v1, 3  ;;  %v12856_v52 = vmul.f32 %v6633_v38, %v12850_v23  ;;  %v4762_v44 = vmul.f32 %v12400_v36, %v12280_v26 }
 0x43b   : > { %v5690_v2 = vadd.f32 %v5620_v21, %v5445_v61  ;;  %v3907_v24 = vsel %vm3344_vm3, %v3905_v8, %v13818_v14  ;;  %v4641_v22 = vrot.slane %v4516_v49, 4  ;;  %v12865_v46 = vmul.f32 %v12410_v47, %v12280_v26 }
 0x43c   : > { %v3730_v31 = vadd.f32 %v3662_v25, %v3485_v15  ;;  %v4152_v53 = vsel %vm3344_vm3, %v4150_v7, %v13819_v17  ;;  %v13824_v38 = vrot.slane %v12856_v52, 4  ;;  %v4886_v21 = vrot.slane %v4762_v44, 4 }
 0x43d   : > { %v12871_v1 = vmul.f32 0.5, %v5690_v2  ;;  %v5754_v62 = vmul.f32 0.044715, %v5690_v2  ;;  %v5007_v61 = vmul.f32 %v12812_v20, %v12285_v11  ;;  %v12878_v14 = vmul.f32 %v12816_v55, %v12285_v11 }
 0x43e   : > { %v3975_v8 = vadd.f32 %v3907_v24, %v3730_v31  ;;  %v5252_v25 = vmul.f32 %v14731_v32, %v12289_v48  ;;  %v4643_v15 = vsel %vm4570_vm4, %v4641_v22, %v13824_v38  ;;  %v12887_v44 = vmul.f32 %v14732_v9, %v12289_v48  ;;  %v6634_v32 = vld [vmem:[#allocation6 + $0x11] ss:$0 sm:$0xff] }
 0x43f   : > { %v5786_v7 = vmul.f32 %v5754_v62, %v5690_v2  ;;  %v5131_v17 = vrot.slane %v5007_v61, 4  ;;  %v5132_v31 = vrot.slane %v12878_v14, 4  ;;  %v5497_v56 = vmul.f32 %v12727_v12, %v12293_v51 }
 0x440   : > { %v4220_v24 = vadd.f32 %v4152_v53, %v3975_v8  ;;  %v5376_v43 = vrot.slane %v5252_v25, 4  ;;  %v1086_v62 = vmul.f32 %v12681_v0, %v14693_v45  ;;  %v1331_v22 = vmul.f32 %v6634_v32, %v14694_v58 }
 0x441   : > { %v5818_v60 = vmul.f32 %v5786_v7, %v5690_v2  ;;  %v14738_v38 = vrot.slane %v12865_v46, 4  ;;  %v12900_v8 = vrot.slane %v5497_v56, 4  ;;  %v1576_v25 = vmul.f32 %v12719_v3, %v14695_v57 }
 0x442   : > { %v4465_v61 = vadd.f32 %v12853_v35, %v4220_v24  ;;  %v5133_v49 = vsel %vm4570_vm4, %v5131_v17, %v5132_v31  ;;  %v1211_v0 = vrot.slane %v1086_v62, 1  ;;  %v1456_v12 = vrot.slane %v1331_v22, 1 }
 0x443   : > { %v4888_v53 = vsel %vm4570_vm4, %v4886_v21, %v14738_v38  ;;  %v5850_v7 = vadd.f32 %v5818_v60, %v5690_v2  ;;  %v14739_v32 = vrot.slane %v12887_v44, 4  ;;  %v1701_v55 = vrot.slane %v1576_v25, 1  ;;  %v14741_v21 = vld [vmem:[#allocation25_spill] sm:$0xff]  ;;  %v6635_v2 = vld [vmem:[#allocation6 + $0x2] ss:$0 sm:$0xff] }
 0x444   : > { %v4711_v9 = vadd.f32 %v4643_v15, %v4465_v61  ;;  %v14740_v56 = vrot.slane %v12687_v40, 1  ;;  %v14742_v3 = vrot.slane %v14741_v21, 1  ;;  %v2066_v17 = vmul.f32 %v6635_v2, %v14691_v13  ;;  %v14743_v15 = vld [vmem:[#allocation67_spill] sm:$0xff] }
 0x445   : > { %v5378_v24 = vsel %vm4570_vm4, %v5376_v43, %v14739_v32  ;;  %v5882_v28 = vmul.f32 0.7978846, %v5850_v7  ;;  %v14744_v61 = vrot.slane %v12714_v5, 1  ;;  %v2312_v40 = vmul.f32 %v12741_v50, %v14693_v45  ;;  %v6636_v7 = vld [vmem:[#allocation6 + $0x12] ss:$0 sm:$0xff] }
 0x446   : > { %v1212_v38 = vsel %vm892_vm1, %v14740_v56, %v1211_v0  ;;  %v1947_v60 = vsel %vm892_vm1, %v14735_v34, %v14742_v3  ;;  %v4956_v62 = vadd.f32 %v4888_v53, %v4711_v9  ;;  %v2192_v25 = vrot.slane %v2066_v17, 2  ;;  %v14745_v53 = vld [vmem:[#allocation35_spill] sm:$0xff] }
 0x447   : > { %v1279_v22 = vadd.f32 %v1212_v38, %v14743_v15  ;;  %v1457_v43 = vsel %vm892_vm1, %v14744_v61, %v1456_v12  ;;  %6383 = vtanh.f32 %v5882_v28  ;;  %v2557_v0 = vmul.f32 %v6636_v7, %v14694_v58  ;;  %v14752_v7 = vld [vmem:[#allocation17_spill] sm:$0xff] }
 0x448   : > { %v2802_v34 = vmul.f32 %v12768_v4, %v14695_v57  ;;  %v5201_v32 = vadd.f32 %v5133_v49, %v4956_v62  ;;  %v2437_v9 = vrot.slane %v2312_v40, 2  ;;  %v3172_v38 = vrot.slane %v14745_v53, 2 }
 0x449   : > { %v1524_v56 = vadd.f32 %v1457_v43, %v1279_v22  ;;  %v14746_v5 = vrot.slane %v12725_v16, 1  ;;  %v2682_v21 = vrot.slane %v2557_v0, 2  ;;  %v3292_v28 = vmul.f32 %v12790_v33, %v14691_v13 }
 0x44a   : > { %v2927_v3 = vrot.slane %v2802_v34, 2  ;;  %v5446_v50 = vadd.f32 %v5378_v24, %v5201_v32  ;;  %v14747_v17 = vrot.slane %v12739_v10, 2  ;;  %v14748_v49 = vrot.slane %v12753_v54, 2 }
 0x44b   : > { %v1702_v12 = vsel %vm892_vm1, %v14746_v5, %v1701_v55  ;;  %v14749_v15 = vrot.slane %v12759_v39, 2  ;;  %v14750_v55 = vrot.slane %v12785_v41, 2  ;;  %v3418_v61 = vrot.slane %v3292_v28, 3 }
 0x44c   : > { %v1769_v2 = vadd.f32 %v1702_v12, %v1524_v56  ;;  %v2193_v4 = vsel %vm2118_vm2, %v14747_v17, %v2192_v25  ;;  %v2438_v62 = vsel %vm2118_vm2, %v14748_v49, %v2437_v9  ;;  %v3538_v24 = vmul.f32 %v14706_v18, %v14693_v45 }
 0x44d   : > { %v2683_v16 = vsel %vm2118_vm2, %v14749_v15, %v2682_v21  ;;  %v3173_v22 = vsel %vm2118_vm2, %v14750_v55, %v3172_v38  ;;  %v5691_v10 = vadd.f32 %v12900_v8, %v5446_v50  ;;  %v3783_v54 = vmul.f32 %v12246_v59, %v14694_v58 }
 0x44e   : > { %v2014_v43 = vadd.f32 %v1947_v60, %v1769_v2  ;;  %v4028_v40 = vmul.f32 %v14708_v37, %v14695_v57  ;;  %v14751_v39 = vrot.slane %v12779_v27, 2  ;;  %v3663_v41 = vrot.slane %v3538_v24, 3 }
 0x44f   : > { %v4273_v0 = vmul.f32 %v12841_v19, %v14752_v7  ;;  %v4518_v34 = vmul.f32 %v12850_v23, %v14691_v13  ;;  %v5755_v32 = vmul.f32 0.044715, %v5691_v10  ;;  %v14753_v60 = vrot.slane %v12797_v29, 3 }
 0x450   : > { %v2928_v25 = vsel %vm2118_vm2, %v14751_v39, %v2927_v3  ;;  %v2260_v56 = vadd.f32 %v2193_v4, %v2014_v43  ;;  %v3908_v53 = vrot.slane %v3783_v54, 3  ;;  %v12962_v38 = vmul.f32 0.5, %v5691_v10 }
 0x451   : > { %v3419_v9 = vsel %vm3344_vm3, %v14753_v60, %v3418_v61  ;;  %v14754_v37 = vrot.slane %v12808_v63, 3  ;;  %v4153_v5 = vrot.slane %v4028_v40, 3  ;;  %v4398_v12 = vrot.slane %v4273_v0, 3  ;;  %v6384_v28 = vpop.eup %6383  ;;  %v14760_v60 = vld [vmem:[#allocation32_spill] sm:$0xff] }
 0x452   : > { %v5787_v21 = vmul.f32 %v5755_v32, %v5691_v10  ;;  %v2505_v19 = vadd.f32 %v2438_v62, %v2260_v56  ;;  %v4644_v3 = vrot.slane %v4518_v34, 4  ;;  %v4764_v13 = vmul.f32 %v12280_v26, %v14693_v45 }
 0x453   : > { %v3664_v27 = vsel %vm3344_vm3, %v14754_v37, %v3663_v41  ;;  %v14755_v29 = vrot.slane %v12820_v6, 3  ;;  %v14756_v2 = vrot.slane %v12834_v42, 3  ;;  %v4399_v63 = vsel %vm3344_vm3, %v12853_v35, %v4398_v12 }
 0x454   : > { %v5009_v4 = vmul.f32 %v12285_v11, %v14694_v58  ;;  %v5946_v49 = vadd.f32 1.0, %v6384_v28  ;;  %v5819_v62 = vmul.f32 %v5787_v21, %v5691_v10  ;;  %v2750_v15 = vadd.f32 %v2683_v16, %v2505_v19  ;;  %v14762_v21 = vld [vmem:[#allocation42_spill] sm:$0xff] }
 0x455   : > { %v3909_v50 = vsel %vm3344_vm3, %v14755_v29, %v3908_v53  ;;  %v4154_v17 = vsel %vm3344_vm3, %v14756_v2, %v4153_v5  ;;  %v4889_v55 = vrot.slane %v4764_v13, 4  ;;  %v5254_v6 = vmul.f32 %v12289_v48, %v14695_v57  ;;  %v14761_v5 = vld [vmem:[#allocation34_spill] sm:$0xff]  ;;  %v14764_v2 = vld [vmem:[#allocation68_spill] sm:$0xff] }
 0x456   : > { %v5134_v61 = vrot.slane %v5009_v4, 4  ;;  %v5499_v24 = vmul.f32 %v12293_v51, %v14752_v7  ;;  %v3293_v42 = vmul.f32 %v12790_v33, %v12400_v36  ;;  %v5978_v43 = vmul.f32 %v5946_v49, %v12871_v1  ;;  %v6637_v28 = vld [vmem:[#allocation2 + $0x172] sm:$0xff] }
 0x457   : > { %v5851_v54 = vadd.f32 %v5819_v62, %v5691_v10  ;;  %v2995_v40 = vadd.f32 %v2928_v25, %v2750_v15  ;;  %v14757_v39 = vrot.slane %v12856_v52, 4  ;;  %v14758_v16 = vrot.slane %v12865_v46, 4 }
 0x458   : > { %v12997_v48 = vsel %vm4570_vm4, %v5132_v31, %v5134_v61  ;;  %v5379_v51 = vrot.slane %v5254_v6, 4  ;;  %v13001_v1 = vmul.f32 %v12790_v33, %v12410_v47  ;;  %v6017_v10 = vmul.f32 %v12620_v30, %v5978_v43  ;;  %v14765_v61 = vld [vmem:[#allocation49_spill] sm:$0xff] }
 0x459   : > { %v4645_v41 = vsel %vm4570_vm4, %v14757_v39, %v4644_v3  ;;  %v12992_v0 = vsel %vm4570_vm4, %v14758_v16, %v4889_v55  ;;  %v5883_v52 = vmul.f32 0.7978846, %v5851_v54  ;;  %v3240_v25 = vadd.f32 %v3173_v22, %v2995_v40  ;;  %v14763_v3 = vld [vmem:[#allocation31_spill] sm:$0xff]  ;;  %v6638_v55 = vld [vmem:[#allocation6 + $0x1b] ss:$0 sm:$0xff] }
 0x45a   : > { %v3420_v34 = vrot.slane %v3293_v42, 3  ;;  %v14759_v46 = vrot.slane %v12887_v44, 4  ;;  %v5624_v56 = vrot.slane %v5499_v24, 4  ;;  %v3421_v14 = vrot.slane %v13001_v1, 3 }
 0x45b   : > { %v3539_v31 = vmul.f32 %v12812_v20, %v14706_v18  ;;  %v6056_v53 = vadd.f32 %v14760_v60, %v6017_v10  ;;  %6385 = vtanh.f32 %v5883_v52  ;;  %v3486_v37 = vadd.f32 %v3419_v9, %v3240_v25 }
 0x45c   : > { %v13007_v32 = vsel %vm4570_vm4, %v14759_v46, %v5379_v51  ;;  %v13015_v22 = vmul.f32 %v14761_v5, %v14706_v18  ;;  %v3422_v44 = vsel %vm3344_vm3, %v3420_v34, %v3421_v14  ;;  %v3784_v19 = vmul.f32 %v14762_v21, %v12246_v59  ;;  %v14766_v34 = vld [vmem:[#allocation36_spill] sm:$0xff] }
 0x45d   : > { %v3665_v12 = vrot.slane %v3539_v31, 3  ;;  %v13024_v13 = vmul.f32 %v14763_v3, %v12246_v59  ;;  %v6088_v29 = vadd.f32 %v6637_v28, %v6056_v53  ;;  %v3731_v9 = vadd.f32 %v3664_v27, %v3486_v37  ;;  %v6639_v53 = vld [vmem:[#allocation6 + $0x1c] ss:$0 sm:$0xff] }
 0x45e   : > { %v3487_v4 = vadd.f32 %v3422_v44, %v14764_v2  ;;  %v3666_v18 = vrot.slane %v13015_v22, 3  ;;  %v13030_v49 = vsel %vm4570_vm4, %v12900_v8, %v5624_v56  ;;  %v3910_v62 = vrot.slane %v3784_v19, 3 }
 0x45f   : > { %v3911_v15 = vrot.slane %v13024_v13, 3  ;;  %v13034_v6 = vmul.f32 %v6638_v55, %v14765_v61  ;;  %6120 = vst [vmem:[%s7803_s9 + $0xd8] sm:$0xff] %v6088_v29  ;;  %v3976_v59 = vadd.f32 %v3909_v50, %v3731_v9  ;;  %v4519_v27 = vmul.f32 %v12850_v23, %v12400_v36  ;;  %v6641_v29 = vld [vmem:[#allocation6 + $0x13] ss:$0 sm:$0xff] }
 0x460   : > { %v3667_v24 = vsel %vm3344_vm3, %v3665_v12, %v3666_v18  ;;  %v13042_v42 = vmul.f32 %v12850_v23, %v12410_v47  ;;  %v4765_v39 = vmul.f32 %v12812_v20, %v12280_v26  ;;  %v13051_v10 = vmul.f32 %v14761_v5, %v12280_v26  ;;  %v6640_v12 = vld [vmem:[#allocation6 + $0xb] ss:$0 sm:$0xff] }
 0x461   : > { %v3732_v43 = vadd.f32 %v3667_v24, %v3487_v4  ;;  %v3912_v54 = vsel %vm3344_vm3, %v3910_v62, %v3911_v15  ;;  %v4155_v40 = vrot.slane %v13034_v6, 3  ;;  %v4221_v16 = vadd.f32 %v4154_v17, %v3976_v59 }
 0x462   : > { %v4646_v51 = vrot.slane %v4519_v27, 4  ;;  %v4647_v50 = vrot.slane %v13042_v42, 4  ;;  %v4891_v52 = vrot.slane %v4765_v39, 4  ;;  %v5010_v47 = vmul.f32 %v14762_v21, %v12285_v11 }
 0x463   : > { %v3977_v36 = vadd.f32 %v3912_v54, %v3732_v43  ;;  %v4466_v25 = vadd.f32 %v4399_v63, %v4221_v16  ;;  %v14767_v46 = vrot.slane %v14766_v34, 3  ;;  %v4892_v20 = vrot.slane %v13051_v10, 4 }
 0x464   : > { %v13062_v17 = vmul.f32 %v14763_v3, %v12285_v11  ;;  %v5136_v26 = vrot.slane %v5010_v47, 4  ;;  %v13065_v37 = vmul.f32 %v6639_v53, %v14765_v61  ;;  %v3295_v63 = vmul.f32 %v12790_v33, %v14693_v45 }
 0x465   : > { %v4402_v56 = vsel %vm3344_vm3, %v12853_v35, %v14767_v46  ;;  %v4222_v31 = vadd.f32 %v4155_v40, %v3977_v36  ;;  %v6386_v5 = vpop.eup %6385  ;;  %v4712_v22 = vadd.f32 %v4645_v41, %v4466_v25  ;;  %v4648_v35 = vsel %vm4570_vm4, %v4646_v51, %v4647_v50  ;;  %v6643_v46 = vld [vmem:[#allocation2 + $0x182] sm:$0xff] }
 0x466   : > { %v5137_v44 = vrot.slane %v13062_v17, 4  ;;  %v3541_v11 = vmul.f32 %v6640_v12, %v14694_v58  ;;  %v5947_v21 = vadd.f32 1.0, %v6386_v5  ;;  %v4893_v3 = vsel %vm4570_vm4, %v4891_v52, %v4892_v20  ;;  %v6642_v52 = vld [vmem:[#allocation6 + $0xc] ss:$0 sm:$0xff] }
 0x467   : > { %v4467_v19 = vadd.f32 %v4402_v56, %v4222_v31  ;;  %v3423_v13 = vrot.slane %v3295_v63, 3  ;;  %v4957_v33 = vadd.f32 %v12992_v0, %v4712_v22  ;;  %v5381_v41 = vrot.slane %v13065_v37, 4  ;;  %v14768_v0 = vld [vmem:[#allocation38_spill] sm:$0xff]  ;;  %v6644_v31 = vld [vmem:[#allocation6 + $0x14] ss:$0 sm:$0xff] }
 0x468   : > { %v3668_v28 = vrot.slane %v3541_v11, 3  ;;  %v3786_v9 = vmul.f32 %v6641_v29, %v14695_v57  ;;  %v5979_v2 = vmul.f32 %v5947_v21, %v12962_v38  ;;  %v5138_v62 = vsel %vm4570_vm4, %v5136_v26, %v5137_v44  ;;  %v14769_v63 = vld [vmem:[#allocation37_spill] sm:$0xff] }
 0x469   : > { %v4713_v4 = vadd.f32 %v4648_v35, %v4467_v19  ;;  %v3424_v61 = vsel %vm3344_vm3, %v3421_v14, %v3423_v13  ;;  %v5202_v6 = vadd.f32 %v12997_v48, %v4957_v33  ;;  %v4031_v38 = vmul.f32 %v6638_v55, %v14752_v7  ;;  %v6645_v19 = vld [vmem:[#allocation6 + $0x24] ss:$0 sm:$0xff] }
 0x46a   : > { %v3488_v59 = vadd.f32 %v3424_v61, %v14768_v0  ;;  %v3913_v24 = vrot.slane %v3786_v9, 3  ;;  %v6018_v27 = vmul.f32 %v12620_v30, %v5979_v2  ;;  %v3669_v54 = vsel %vm3344_vm3, %v3666_v18, %v3668_v28 }
 0x46b   : > { %v4958_v43 = vadd.f32 %v4893_v3, %v4713_v4  ;;  %v5447_v39 = vadd.f32 %v13007_v32, %v5202_v6  ;;  %v4521_v1 = vmul.f32 %v12850_v23, %v14693_v45  ;;  %v4158_v36 = vrot.slane %v4031_v38, 3  ;;  %v14772_v3 = vld [vmem:[#allocation20_spill] sm:$0xff] }
 0x46c   : > { %v3733_v16 = vadd.f32 %v3669_v54, %v3488_v59  ;;  %v3914_v51 = vsel %vm3344_vm3, %v3911_v15, %v3913_v24  ;;  %v6057_v48 = vadd.f32 %v14760_v60, %v6018_v27  ;;  %v4767_v47 = vmul.f32 %v6642_v52, %v14694_v58  ;;  %v6646_v52 = vld [vmem:[#allocation2 + $0x18a] sm:$0xff] }
 0x46d   : > { %v5203_v14 = vadd.f32 %v5138_v62, %v4958_v43  ;;  %v5692_v18 = vadd.f32 %v13030_v49, %v5447_v39  ;;  %v4649_v55 = vrot.slane %v4521_v1, 4  ;;  %v4159_v15 = vsel %vm3344_vm3, %v4155_v40, %v4158_v36 }
 0x46e   : > { %v3978_v25 = vadd.f32 %v3914_v51, %v3733_v16  ;;  %v6089_v32 = vadd.f32 %v6643_v46, %v6057_v48  ;;  %v5012_v45 = vmul.f32 %v6644_v31, %v14695_v57  ;;  %v14770_v5 = vrot.slane %v14769_v63, 3 }
 0x46f   : > { %v5448_v56 = vadd.f32 %v5381_v41, %v5203_v14  ;;  %v5756_v23 = vmul.f32 0.044715, %v5692_v18  ;;  %v14771_v58 = vrot.slane %v14766_v34, 3  ;;  %v4894_v22 = vrot.slane %v4767_v47, 4 }
 0x470   : > { %v4223_v26 = vadd.f32 %v4159_v15, %v3978_v25  ;;  %6121 = vst [vmem:[%s7803_s9 + $0xe0] sm:$0xff] %v6089_v32  ;;  %v5257_v35 = vmul.f32 %v6639_v53, %v14752_v7  ;;  %v4650_v57 = vsel %vm4570_vm4, %v4647_v50, %v4649_v55  ;;  %v5139_v21 = vrot.slane %v5012_v45, 4  ;;  %v6647_v25 = vld [vmem:[#allocation2 + $0x19a] sm:$0xff] }
 0x471   : > { %v5693_v37 = vadd.f32 %v12900_v8, %v5448_v56  ;;  %v4404_v49 = vsel %vm3344_vm3, %v14771_v58, %v14770_v5  ;;  %v5788_v12 = vmul.f32 %v5756_v23, %v5692_v18  ;;  %v5502_v13 = vmul.f32 %v6645_v19, %v14772_v3  ;;  %v6648_v23 = vld [vmem:[#allocation2 + $0x1a2] sm:$0xff] }
 0x472   : > { %v4468_v11 = vadd.f32 %v4404_v49, %v4223_v26  ;;  %v4895_v34 = vsel %vm4570_vm4, %v4892_v20, %v4894_v22  ;;  %v5384_v9 = vrot.slane %v5257_v35, 4  ;;  %v5140_v42 = vsel %vm4570_vm4, %v5137_v44, %v5139_v21 }
 0x473   : > { %v5757_v40 = vmul.f32 0.044715, %v5693_v37  ;;  %v5820_v33 = vmul.f32 %v5788_v12, %v5692_v18  ;;  %v5629_v50 = vrot.slane %v5502_v13, 4  ;;  %v5724_v44 = vmul.f32 0.5, %v5692_v18 }
 0x474   : > { %v4714_v28 = vadd.f32 %v4650_v57, %v4468_v11  ;;  %v5385_v6 = vsel %vm4570_vm4, %v5381_v41, %v5384_v9  ;;  %v5725_v51 = vmul.f32 0.5, %v5693_v37 }
 0x475   : > { %v5789_v29 = vmul.f32 %v5757_v40, %v5693_v37  ;;  %v5852_v7 = vadd.f32 %v5820_v33, %v5692_v18  ;;  %v5630_v10 = vsel %vm4570_vm4, %v12900_v8, %v5629_v50 }
 0x476   : > { %v4959_v53 = vadd.f32 %v4895_v34, %v4714_v28 }
 0x477   : > { %v5821_v2 = vmul.f32 %v5789_v29, %v5693_v37  ;;  %v5884_v4 = vmul.f32 0.7978846, %v5852_v7 }
 0x478   : > { %v5204_v62 = vadd.f32 %v5140_v42, %v4959_v53 }
 0x479   : > { %v5853_v61 = vadd.f32 %v5821_v2, %v5693_v37  ;;  %6387 = vtanh.f32 %v5884_v4 }
 0x47a   : > { %v5449_v0 = vadd.f32 %v5385_v6, %v5204_v62 }
 0x47b   : > { %v5885_v59 = vmul.f32 0.7978846, %v5853_v61 }
 0x47c   : > { %v5694_v20 = vadd.f32 %v5630_v10, %v5449_v0 }
 0x47d   : > { %6389 = vtanh.f32 %v5885_v59 }
 0x47e   : > { %v5758_v24 = vmul.f32 0.044715, %v5694_v20  ;;  %v5726_v32 = vmul.f32 0.5, %v5694_v20 }
 0x480   : > { %v5790_v27 = vmul.f32 %v5758_v24, %v5694_v20 }
 0x482   : > { %v5822_v43 = vmul.f32 %v5790_v27, %v5694_v20 }
 0x483   : > { %v6388_v17 = vpop.eup %6387 }
 0x484   : > { %v5854_v54 = vadd.f32 %v5822_v43, %v5694_v20  ;;  %v5948_v38 = vadd.f32 1.0, %v6388_v17 }
 0x486   : > { %v5886_v39 = vmul.f32 0.7978846, %v5854_v54  ;;  %v5980_v41 = vmul.f32 %v5948_v38, %v5724_v44 }
 0x487   : > { %v6390_v16 = vpop.eup %6389 }
 0x488   : > { %v5949_v1 = vadd.f32 1.0, %v6390_v16  ;;  %6391 = vtanh.f32 %v5886_v39  ;;  %v6019_v48 = vmul.f32 %v12620_v30, %v5980_v41 }
 0x48a   : > { %v5981_v8 = vmul.f32 %v5949_v1, %v5725_v51  ;;  %v6058_v14 = vadd.f32 %v14760_v60, %v6019_v48 }
 0x48c   : > { %v6020_v36 = vmul.f32 %v12620_v30, %v5981_v8  ;;  %v6090_v47 = vadd.f32 %v6646_v52, %v6058_v14 }
 0x48e   : > { %v6059_v18 = vadd.f32 %v14760_v60, %v6020_v36  ;;  %6122 = vst [vmem:[%s7803_s9 + $0xe8] sm:$0xff] %v6090_v47 }
 0x490   : > { %v6091_v55 = vadd.f32 %v6647_v25, %v6059_v18 }
 0x492   : > { %v6392_v46 = vpop.eup %6391  ;;  %6123 = vst [vmem:[%s7803_s9 + $0xf0] sm:$0xff] %v6091_v55 }
 0x493   : > { %v5950_v56 = vadd.f32 1.0, %v6392_v46 }
 0x495   : > { %v5982_v15 = vmul.f32 %v5950_v56, %v5726_v32 }
 0x497   : > { %v6021_v31 = vmul.f32 %v12620_v30, %v5982_v15 }
 0x499   : > { %v6060_v45 = vadd.f32 %v14760_v60, %v6021_v31 }
 0x49b   : > { %v6092_v26 = vadd.f32 %v6648_v23, %v6060_v45 }
 0x49d   : > { %6124 = vst [vmem:[%s7803_s9 + $0xf8] sm:$0xff] %v6092_v26 }
 0x49e   : > { %6720 = shalt.err (!%p6717_p7)
}
 0x49f   : > { %s6721_s9 = scalar_lea.hbm %s13135_s5, 4096  ;;  %s6725_s10 = scalar_lea.hbm %s13186_s4, 8192 }
 0x4a0   : > { %p6722_p9 = scmp.ne.s32.totalorder %s13135_s5, %s6721_s9  ;;  %p6726_p5 = scmp.lt.u32.totalorder %s13135_s5, %s13186_s4 }
 0x4a1   : > { %p6727_p11 = scmp.lt.u32.totalorder %s6725_s10, %s6721_s9  ;;  %p6729_p4 = scmp.lt.u32.totalorder %s6721_s9, %s13135_s5 }
 0x4a2   : > { %p6723_p1 = pnand %p6722_p9, %p6906_p12 }
 0x4a3   : > { %p6728_p2 = por %p6727_p11, %p6726_p5 }
 0x4a4   : > { %p6724_p0 = pneg %p6723_p1 }
 0x4a5   : > { %p6730_p6 = por %p6729_p4, %p6728_p2 }
 0x4a7   : > { %p6731_p8 = pnand %p6730_p6, %p6724_p0 }
 0x4a9   : > { %6734 = shalt.err (!%p6731_p8)
}
 0x4aa   : > { %s6785_s26 = smov 128   ;;  %s6786_s8 = smov 8  }
 0x4ab   : > { %6273 = dma.vmem_to_hbm [thread:$0]  (%p6906_p12), %s13137_s25, 4096, %s13135_s5, %s6126_s29, %s6785_s26, %s6785_s26, %s6786_s8  }
 0x4ac PF: > { %s6154_s14 = sand.u32 1, %s6765_s15   ;;  %p14773_p10 = scmp.ne.s32.totalorder %s13833_s22, 0 }
 0x4ad   : > { %p14774_p13 = scmp.ge.s32.totalorder %s6777_s18, 2  ;;  %s6155_s20 = scalar_lea.sflag [#allocation5], %s6154_s14 }
 0x4af   : > { %p6284_p3 = pnand %p14774_p13, %p14773_p10 }
 0x4b1   : > { %6760 = dma.done.wait (!%p6284_p3), %s6155_s20, 4096  }
 0x4b2   : > { %6762 = vsyncadd (!%p6284_p3), %s6155_s20, 4294963200  ;;  %p18_p7 = scmp.ge.s32.totalorder %s6868_s27, 4   ;;  %s14775_s15 = smov %s6769_s16 }
 0x4b3   : > { %s14776_s16 = smov %s6773_s17  ;;  %s14777_s17 = smov %s6902_s24 }
 0x4b4   : > { %s14778_s18 = smov %s6868_s27  ;;  %20 = sbr.rel (!%p18_p7) target bundleno = 6 (0x6), region = 91 }
 0x4bb   :  { %6160 = vsyncpa [#allocation4], 1 }
 0x4bc   :  { %6162 = vsyncpa [#allocation4 + $0x1], 1 }
 0x4bd   :  { %6163 = vsyncpa [#allocation7], 1 }
 0x4be   :  { %6164 = vsyncpa [#allocation5], 1 }
 0x4bf   :  { %6166 = vsyncpa [#allocation5 + $0x1], 1 }

</bundles_post_ra>
